<compile_context>
chip_gen: v6e
topology: v6e:2x2x1
jax: 0.10.0
libtpu: 0.0.40
codegen_flags: <defaults>
</compile_context>

<pallas_src>
import numpy as np

import jax
import jax.numpy as jnp
from jax.experimental import pallas as pl
from jax.experimental.pallas import tpu as pltpu


# ---------------------------------------------------------------------------
# Kernel 1: fused conv1 + ReLU + pool + conv2 + ReLU + pool   (one image / grid step)
# ---------------------------------------------------------------------------

def conv_stages(x, conv1_w, conv1_b, conv2_w, conv2_b):
    """x: (N, C, H, W) f32 -> (N, C2o, H2*W2) pooled conv2 features (channel-major)."""
    N, C, H, W = x.shape
    C1o = conv1_w.shape[0]              # 6
    C2o = conv2_w.shape[0]              # 24
    assert conv1_w.shape[1] == C and conv2_w.shape[1] == C1o
    assert (H - 2) % 2 == 0 and (W - 2) % 2 == 0, "conv1 output must pool evenly"
    H1, W1 = (H - 2) // 2, (W - 2) // 2
    assert (H1 - 2) % 2 == 0 and (W1 - 2) % 2 == 0, "conv2 output must pool evenly"
    H2, W2 = (H1 - 2) // 2, (W1 - 2) // 2
    M = H2 * W2                          # 121

    S = H * W                            # 2500
    # lengths of the flat-grid activations at each stage (garbage past the valid
    # positions is carried along but never read by a valid output)
    L1 = S - (2 * W + 2)                 # conv1 output length     (2398)
    L2 = L1 - (W + 1)                    # pool1 output length     (2347)
    L3 = L2 - (4 * W + 4)                # conv2 output length     (2143)
    L4 = L3 - (2 * W + 2)                # pool2 output length     (2041)

    shifts1 = tuple(W * dy + dx for dy in range(3) for dx in range(3))
    shifts2 = tuple(2 * W * dy + 2 * dx for dy in range(3) for dx in range(3))
    p1off = (0, 1, W, W + 1)             # 2x2 pool taps on the dense grid
    p2off = (0, 2, 2 * W, 2 * W + 2)     # 2x2 pool taps on the stride-2 sparse grid

    # Constant 0/1 matrix gathering the H2*W2 valid pooled positions (row s = 4W*u + 4v
    # -> column u*W2 + v).  Built with numpy at trace time => baked constant, no per-call
    # cost; DMA'd once (constant block) into VMEM.
    sel_np = np.zeros((L4, M), np.float32)
    for u in range(H2):
        for v in range(W2):
            sel_np[4 * W * u + 4 * v, u * W2 + v] = 1.0
    sel = jnp.asarray(sel_np)

    # PyTorch OIHW weights -> (O, (dy, dx, c)) so rows of the in-kernel patch matrix
    # (ordered shift-major, channel-minor) line up with the weight columns.
    w1f = jnp.transpose(conv1_w, (0, 2, 3, 1)).reshape(C1o, 9 * C).astype(jnp.float32)
    w2f = jnp.transpose(conv2_w, (0, 2, 3, 1)).reshape(C2o, 9 * C1o).astype(jnp.float32)
    b1c = conv1_b.reshape(C1o, 1).astype(jnp.float32)
    b2c = conv2_b.reshape(C2o, 1).astype(jnp.float32)

    x_flat = x.reshape(N, C, S)          # contiguous (free) reshape

    def kernel(x_ref, w1_ref, b1_ref, w2_ref, b2_ref, sel_ref, o_ref):
        xf = x_ref[0]                                                    # (C, S)

        # --- conv1: one matmul against 9 lane-shifted copies of the image ---
        p1 = jnp.concatenate([xf[:, k:k + L1] for k in shifts1], axis=0)  # (9C, L1)
        a1 = jnp.dot(w1_ref[...], p1, preferred_element_type=jnp.float32)
        a1 = jnp.maximum(a1 + b1_ref[...], 0.0)                           # (C1o, L1)

        # --- pool1: max of 4 lane-shifted slices; result stays on the flat grid ---
        m1 = a1[:, p1off[0]:p1off[0] + L2]
        for off in p1off[1:]:
            m1 = jnp.maximum(m1, a1[:, off:off + L2])                      # (C1o, L2)

        # --- conv2 on the stride-2 sparse grid (shifts scaled by 2) ---
        p2 = jnp.concatenate([m1[:, k:k + L3] for k in shifts2], axis=0)   # (9*C1o, L3)
        a2 = jnp.dot(w2_ref[...], p2, preferred_element_type=jnp.float32)
        a2 = jnp.maximum(a2 + b2_ref[...], 0.0)                            # (C2o, L3)

        # --- pool2 on the sparse grid ---
        m2 = a2[:, p2off[0]:p2off[0] + L4]
        for off in p2off[1:]:
            m2 = jnp.maximum(m2, a2[:, off:off + L4])                       # (C2o, L4)

        # --- gather the (H2, W2) valid positions with one constant-matrix matmul ---
        o_ref[0] = jnp.dot(m2, sel_ref[...], preferred_element_type=jnp.float32)  # (C2o, M)

    return pl.pallas_call(
        kernel,
        out_shape=jax.ShapeDtypeStruct((N, C2o, M), jnp.float32),
        grid=(N,),
        in_specs=[
            pl.BlockSpec((1, C, S), lambda n: (n, 0, 0)),
            pl.BlockSpec((C1o, 9 * C), lambda n: (0, 0)),    # constant blocks stay resident
            pl.BlockSpec((C1o, 1), lambda n: (0, 0)),
            pl.BlockSpec((C2o, 9 * C1o), lambda n: (0, 0)),
            pl.BlockSpec((C2o, 1), lambda n: (0, 0)),
            pl.BlockSpec((L4, M), lambda n: (0, 0)),
        ],
        out_specs=pl.BlockSpec((1, C2o, M), lambda n: (n, 0, 0)),
        compiler_params=pltpu.CompilerParams(
            dimension_semantics=("parallel",)),   # shards images across v7x's 2 TCs
    )(x_flat, w1f, b1c, w2f, b2c, sel)


# ---------------------------------------------------------------------------
# Kernel 2: fused Linear -> ReLU -> Linear -> ReLU -> Linear over the whole batch
# ---------------------------------------------------------------------------

def _mlp3_kernel(x_ref, w1_ref, b1_ref, w2_ref, b2_ref, w3_ref, b3_ref, o_ref):
    h = jnp.dot(x_ref[...], w1_ref[...], preferred_element_type=jnp.float32) + b1_ref[...]
    h = jnp.maximum(h, 0.0)
    h = jnp.dot(h, w2_ref[...], preferred_element_type=jnp.float32) + b2_ref[...]
    h = jnp.maximum(h, 0.0)
    o_ref[...] = jnp.dot(h, w3_ref[...], preferred_element_type=jnp.float32) + b3_ref[...]


def mlp3(x, w1, b1, w2, b2, w3, b3):
    N, K = x.shape
    D1, D2, D3 = w1.shape[1], w2.shape[1], w3.shape[1]

    def full(shape):
        return pl.BlockSpec(shape, lambda i: (0,) * len(shape))

    return pl.pallas_call(
        _mlp3_kernel,
        out_shape=jax.ShapeDtypeStruct((N, D3), jnp.float32),
        grid=(1,),
        in_specs=[full((N, K)),
                  full((K, D1)), full((1, D1)),
                  full((D1, D2)), full((1, D2)),
                  full((D2, D3)), full((1, D3))],
        out_specs=full((N, D3)),
    )(x, w1, b1.reshape(1, D1), w2, b2.reshape(1, D2), w3, b3.reshape(1, D3))


# ---------------------------------------------------------------------------
# Encoder / AutoEncoder forward
# ---------------------------------------------------------------------------

def encode(x_nchw, params):
    """Batched encoder on NCHW f32 input (N, 3, 50, 50) -> (N, h_dim)."""
    x = x_nchw.astype(jnp.float32)
    N = x.shape[0]

    h2 = conv_stages(x, params["conv1_w"], params["conv1_b"],
                     params["conv2_w"], params["conv2_b"])        # (N, 24, 121)
    # channel-major (C, H, W) flatten == torch view(-1, 24*11*11); contiguous reshape.
    flat = h2.reshape(N, -1)                                      # (N, 2904)
    return mlp3(flat, params["l1_w"], params["l1_b"],
                params["l2_w"], params["l2_b"],
                params["l3_w"], params["l3_b"])


def autoencoder_forward(x, neighbor, distance, params):
    # Batch the three encoder passes into one encode over the concatenated batch.
    B = x.shape[0]
    h_all = encode(jnp.concatenate([x, neighbor, distance], axis=0), params)
    return h_all[:B], h_all[B:2 * B], h_all[2 * B:]


# ---------------------------------------------------------------------------
# Deterministic parameter init (shapes from the PyTorch __init__)
# ---------------------------------------------------------------------------

def init_params(key, h_dim_size=32):
    ks = jax.random.split(key, 10)

    def u(k, shape, fan_in):
        s = 1.0 / jnp.sqrt(jnp.float32(fan_in))
        return jax.random.uniform(k, shape, jnp.float32, -s, s)

    flat = 24 * 11 * 11  # 2904
    return {
        # conv weights in PyTorch OIHW layout; linear weights stored as (in, out)
        "conv1_w": u(ks[0], (6, 3, 3, 3), 3 * 3 * 3),
        "conv1_b": u(ks[1], (6,), 3 * 3 * 3),
        "conv2_w": u(ks[2], (24, 6, 3, 3), 6 * 3 * 3),
        "conv2_b": u(ks[3], (24,), 6 * 3 * 3),
        "l1_w": u(ks[4], (flat, 120), flat),
        "l1_b": u(ks[5], (120,), flat),
        "l2_w": u(ks[6], (120, 84), 120),
        "l2_b": u(ks[7], (84,), 120),
        "l3_w": u(ks[8], (84, h_dim_size), 84),
        "l3_b": u(ks[9], (h_dim_size,), 84),
    }


# ---------------------------------------------------------------------------
# Pure-JAX reference (XLA conv / reduce_window) for a correctness check
# ---------------------------------------------------------------------------

def _reference_encode(x, params):
    y = jax.lax.conv_general_dilated(x, params["conv1_w"], (1, 1), "VALID",
                                     dimension_numbers=("NCHW", "OIHW", "NCHW"))
    y = jax.nn.relu(y + params["conv1_b"].reshape(1, 6, 1, 1))
    y = jax.lax.reduce_window(y, -jnp.inf, jax.lax.max, (1, 1, 2, 2), (1, 1, 2, 2), "VALID")
    y = jax.lax.conv_general_dilated(y, params["conv2_w"], (1, 1), "VALID",
                                     dimension_numbers=("NCHW", "OIHW", "NCHW"))
    y = jax.nn.relu(y + params["conv2_b"].reshape(1, 24, 1, 1))
    y = jax.lax.reduce_window(y, -jnp.inf, jax.lax.max, (1, 1, 2, 2), (1, 1, 2, 2), "VALID")
    y = y.reshape(y.shape[0], -1)
    y = jax.nn.relu(y @ params["l1_w"] + params["l1_b"])
    y = jax.nn.relu(y @ params["l2_w"] + params["l2_b"])
    return y @ params["l3_w"] + params["l3_b"]


if __name__ == "__main__":
    key = jax.random.PRNGKey(0)
    k_p, k_x, k_n, k_d = jax.random.split(key, 4)

    params = init_params(k_p, h_dim_size=32)

    # The 24*11*11 view implies 50x50 RGB inputs; small batch of 2.
    B = 2
    x = jax.random.normal(k_x, (B, 3, 50, 50), jnp.float32)
    neighbor = jax.random.normal(k_n, (B, 3, 50, 50), jnp.float32)
    distance = jax.random.normal(k_d, (B, 3, 50, 50), jnp.float32)

    fwd = jax.jit(autoencoder_forward)
    h, h_n, h_d = fwd(x, neighbor, distance, params)
    jax.block_until_ready((h, h_n, h_d))

    assert h.shape == (B, 32) and h_n.shape == (B, 32) and h_d.shape == (B, 32)
    assert h.dtype == jnp.float32

    # numerical check against the pure-JAX reference encoder
    ref = _reference_encode(x, params)
    assert jnp.allclose(h, ref, rtol=1e-3, atol=1e-3)

    print("KERNEL_OK")
</pallas_src>

<mosaic_0001>
module attributes {stable_mosaic.version = 11 : i64} {
  func.func @kernel(%arg0: i32, %arg1: memref<1x3x2500xf32, #tpu.memory_space<vmem>>, %arg2: memref<6x27xf32, #tpu.memory_space<vmem>>, %arg3: memref<6x1xf32, #tpu.memory_space<vmem>>, %arg4: memref<24x54xf32, #tpu.memory_space<vmem>>, %arg5: memref<24x1xf32, #tpu.memory_space<vmem>>, %arg6: memref<2041x121xf32, #tpu.memory_space<vmem>>, %arg7: memref<1x24x121xf32, #tpu.memory_space<vmem>>) attributes {dimension_semantics = [#tpu.dimension_semantics<parallel>], iteration_bounds = array<i64: 6>, scalar_prefetch = 0 : i64, scratch_operands = 0 : i64, tpu.core_type = #tpu.core_type<tc>, window_params = [{transform_indices = @transform_0, window_bounds = array<i64: 1, 3, 2500>}, {pipeline_mode = #tpu.pipeline_mode<synchronous>, transform_indices = @transform_1, window_bounds = array<i64: 6, 27>}, {pipeline_mode = #tpu.pipeline_mode<synchronous>, transform_indices = @transform_2, window_bounds = array<i64: 6, 1>}, {pipeline_mode = #tpu.pipeline_mode<synchronous>, transform_indices = @transform_3, window_bounds = array<i64: 24, 54>}, {pipeline_mode = #tpu.pipeline_mode<synchronous>, transform_indices = @transform_4, window_bounds = array<i64: 24, 1>}, {pipeline_mode = #tpu.pipeline_mode<synchronous>, transform_indices = @transform_5, window_bounds = array<i64: 2041, 121>}, {transform_indices = @transform_6, window_bounds = array<i64: 1, 24, 121>}]} {
    %c0 = arith.constant 0 : index
    %c0_0 = arith.constant 0 : index
    %c0_1 = arith.constant 0 : index
    %0 = vector.load %arg1[%c0, %c0_0, %c0_1] : memref<1x3x2500xf32, #tpu.memory_space<vmem>>, vector<1x3x2500xf32>
    %1 = vector.shape_cast %0 : vector<1x3x2500xf32> to vector<3x2500xf32>
    %2 = vector.extract_strided_slice %1 {offsets = [0, 0], sizes = [3, 2398], strides = [1, 1]} : vector<3x2500xf32> to vector<3x2398xf32>
    %3 = vector.extract_strided_slice %1 {offsets = [0, 1], sizes = [3, 2398], strides = [1, 1]} : vector<3x2500xf32> to vector<3x2398xf32>
    %4 = vector.extract_strided_slice %1 {offsets = [0, 2], sizes = [3, 2398], strides = [1, 1]} : vector<3x2500xf32> to vector<3x2398xf32>
    %5 = vector.extract_strided_slice %1 {offsets = [0, 50], sizes = [3, 2398], strides = [1, 1]} : vector<3x2500xf32> to vector<3x2398xf32>
    %6 = vector.extract_strided_slice %1 {offsets = [0, 51], sizes = [3, 2398], strides = [1, 1]} : vector<3x2500xf32> to vector<3x2398xf32>
    %7 = vector.extract_strided_slice %1 {offsets = [0, 52], sizes = [3, 2398], strides = [1, 1]} : vector<3x2500xf32> to vector<3x2398xf32>
    %8 = vector.extract_strided_slice %1 {offsets = [0, 100], sizes = [3, 2398], strides = [1, 1]} : vector<3x2500xf32> to vector<3x2398xf32>
    %9 = vector.extract_strided_slice %1 {offsets = [0, 101], sizes = [3, 2398], strides = [1, 1]} : vector<3x2500xf32> to vector<3x2398xf32>
    %10 = vector.extract_strided_slice %1 {offsets = [0, 102], sizes = [3, 2398], strides = [1, 1]} : vector<3x2500xf32> to vector<3x2398xf32>
    %11 = tpu.concatenate %2, %3, %4, %5, %6, %7, %8, %9, %10 in 0 : vector<3x2398xf32>, vector<3x2398xf32>, vector<3x2398xf32>, vector<3x2398xf32>, vector<3x2398xf32>, vector<3x2398xf32>, vector<3x2398xf32>, vector<3x2398xf32>, vector<3x2398xf32> -> vector<27x2398xf32>
    %c0_2 = arith.constant 0 : index
    %c0_3 = arith.constant 0 : index
    %12 = vector.load %arg2[%c0_2, %c0_3] : memref<6x27xf32, #tpu.memory_space<vmem>>, vector<6x27xf32>
    %cst = arith.constant dense<0.000000e+00> : vector<6x2398xf32>
    %13 = tpu.matmul %12, %11, %cst {dimension_numbers = #tpu.dot_dimension_numbers<[1], [0], [0], [1], [0, 0, 1, 1], [], []>} : vector<6x27xf32>, vector<27x2398xf32>, vector<6x2398xf32> -> vector<6x2398xf32>
    %c0_4 = arith.constant 0 : index
    %c0_5 = arith.constant 0 : index
    %14 = vector.load %arg3[%c0_4, %c0_5] : memref<6x1xf32, #tpu.memory_space<vmem>>, vector<6x1xf32>
    %15 = vector.broadcast %14 : vector<6x1xf32> to vector<6x2398xf32>
    %16 = arith.addf %13, %15 : vector<6x2398xf32>
    %cst_6 = arith.constant 0.000000e+00 : f32
    %17 = vector.broadcast %cst_6 : f32 to vector<6x2398xf32>
    %18 = arith.maximumf %16, %17 : vector<6x2398xf32>
    %19 = vector.extract_strided_slice %18 {offsets = [0, 0], sizes = [6, 2347], strides = [1, 1]} : vector<6x2398xf32> to vector<6x2347xf32>
    %20 = vector.extract_strided_slice %18 {offsets = [0, 1], sizes = [6, 2347], strides = [1, 1]} : vector<6x2398xf32> to vector<6x2347xf32>
    %21 = arith.maximumf %19, %20 : vector<6x2347xf32>
    %22 = vector.extract_strided_slice %18 {offsets = [0, 50], sizes = [6, 2347], strides = [1, 1]} : vector<6x2398xf32> to vector<6x2347xf32>
    %23 = arith.maximumf %21, %22 : vector<6x2347xf32>
    %24 = vector.extract_strided_slice %18 {offsets = [0, 51], sizes = [6, 2347], strides = [1, 1]} : vector<6x2398xf32> to vector<6x2347xf32>
    %25 = arith.maximumf %23, %24 : vector<6x2347xf32>
    %26 = vector.extract_strided_slice %25 {offsets = [0, 0], sizes = [6, 2143], strides = [1, 1]} : vector<6x2347xf32> to vector<6x2143xf32>
    %27 = vector.extract_strided_slice %25 {offsets = [0, 2], sizes = [6, 2143], strides = [1, 1]} : vector<6x2347xf32> to vector<6x2143xf32>
    %28 = vector.extract_strided_slice %25 {offsets = [0, 4], sizes = [6, 2143], strides = [1, 1]} : vector<6x2347xf32> to vector<6x2143xf32>
    %29 = vector.extract_strided_slice %25 {offsets = [0, 100], sizes = [6, 2143], strides = [1, 1]} : vector<6x2347xf32> to vector<6x2143xf32>
    %30 = vector.extract_strided_slice %25 {offsets = [0, 102], sizes = [6, 2143], strides = [1, 1]} : vector<6x2347xf32> to vector<6x2143xf32>
    %31 = vector.extract_strided_slice %25 {offsets = [0, 104], sizes = [6, 2143], strides = [1, 1]} : vector<6x2347xf32> to vector<6x2143xf32>
    %32 = vector.extract_strided_slice %25 {offsets = [0, 200], sizes = [6, 2143], strides = [1, 1]} : vector<6x2347xf32> to vector<6x2143xf32>
    %33 = vector.extract_strided_slice %25 {offsets = [0, 202], sizes = [6, 2143], strides = [1, 1]} : vector<6x2347xf32> to vector<6x2143xf32>
    %34 = vector.extract_strided_slice %25 {offsets = [0, 204], sizes = [6, 2143], strides = [1, 1]} : vector<6x2347xf32> to vector<6x2143xf32>
    %35 = tpu.concatenate %26, %27, %28, %29, %30, %31, %32, %33, %34 in 0 : vector<6x2143xf32>, vector<6x2143xf32>, vector<6x2143xf32>, vector<6x2143xf32>, vector<6x2143xf32>, vector<6x2143xf32>, vector<6x2143xf32>, vector<6x2143xf32>, vector<6x2143xf32> -> vector<54x2143xf32>
    %c0_7 = arith.constant 0 : index
    %c0_8 = arith.constant 0 : index
    %36 = vector.load %arg4[%c0_7, %c0_8] : memref<24x54xf32, #tpu.memory_space<vmem>>, vector<24x54xf32>
    %cst_9 = arith.constant dense<0.000000e+00> : vector<24x2143xf32>
    %37 = tpu.matmul %36, %35, %cst_9 {dimension_numbers = #tpu.dot_dimension_numbers<[1], [0], [0], [1], [0, 0, 1, 1], [], []>} : vector<24x54xf32>, vector<54x2143xf32>, vector<24x2143xf32> -> vector<24x2143xf32>
    %c0_10 = arith.constant 0 : index
    %c0_11 = arith.constant 0 : index
    %38 = vector.load %arg5[%c0_10, %c0_11] : memref<24x1xf32, #tpu.memory_space<vmem>>, vector<24x1xf32>
    %39 = vector.broadcast %38 : vector<24x1xf32> to vector<24x2143xf32>
    %40 = arith.addf %37, %39 : vector<24x2143xf32>
    %cst_12 = arith.constant 0.000000e+00 : f32
    %41 = vector.broadcast %cst_12 : f32 to vector<24x2143xf32>
    %42 = arith.maximumf %40, %41 : vector<24x2143xf32>
    %43 = vector.extract_strided_slice %42 {offsets = [0, 0], sizes = [24, 2041], strides = [1, 1]} : vector<24x2143xf32> to vector<24x2041xf32>
    %44 = vector.extract_strided_slice %42 {offsets = [0, 2], sizes = [24, 2041], strides = [1, 1]} : vector<24x2143xf32> to vector<24x2041xf32>
    %45 = arith.maximumf %43, %44 : vector<24x2041xf32>
    %46 = vector.extract_strided_slice %42 {offsets = [0, 100], sizes = [24, 2041], strides = [1, 1]} : vector<24x2143xf32> to vector<24x2041xf32>
    %47 = arith.maximumf %45, %46 : vector<24x2041xf32>
    %48 = vector.extract_strided_slice %42 {offsets = [0, 102], sizes = [24, 2041], strides = [1, 1]} : vector<24x2143xf32> to vector<24x2041xf32>
    %49 = arith.maximumf %47, %48 : vector<24x2041xf32>
    %c0_13 = arith.constant 0 : index
    %c0_14 = arith.constant 0 : index
    %50 = vector.load %arg6[%c0_13, %c0_14] : memref<2041x121xf32, #tpu.memory_space<vmem>>, vector<2041x121xf32>
    %cst_15 = arith.constant dense<0.000000e+00> : vector<24x121xf32>
    %51 = tpu.matmul %49, %50, %cst_15 {dimension_numbers = #tpu.dot_dimension_numbers<[1], [0], [0], [1], [0, 0, 1, 1], [], []>} : vector<24x2041xf32>, vector<2041x121xf32>, vector<24x121xf32> -> vector<24x121xf32>
    %c0_16 = arith.constant 0 : index
    %c0_17 = arith.constant 0 : index
    %c0_18 = arith.constant 0 : index
    %52 = vector.load %arg7[%c0_16, %c0_17, %c0_18] : memref<1x24x121xf32, #tpu.memory_space<vmem>>, vector<1x24x121xf32>
    %53 = vector.shape_cast %52 : vector<1x24x121xf32> to vector<24x121xf32>
    %54 = vector.shape_cast %51 : vector<24x121xf32> to vector<1x24x121xf32>
    tpu.vector_store %arg7[%c0_16, %c0_17, %c0_18], %54 {strides = array<i32>} : memref<1x24x121xf32, #tpu.memory_space<vmem>>, vector<1x24x121xf32>,
    return
  }
  func.func @transform_0(%arg0: i32) -> (i32, i32, i32) {
    %c0_i32 = arith.constant 0 : i32
    %c0_i32_0 = arith.constant 0 : i32
    %c0_i32_1 = arith.constant 0 : i32
    return %arg0, %c0_i32, %c0_i32_0 : i32, i32, i32
  }
  func.func @transform_1(%arg0: i32) -> (i32, i32) {
    %c0_i32 = arith.constant 0 : i32
    %c0_i32_0 = arith.constant 0 : i32
    %c0_i32_1 = arith.constant 0 : i32
    return %c0_i32, %c0_i32_0 : i32, i32
  }
  func.func @transform_2(%arg0: i32) -> (i32, i32) {
    %c0_i32 = arith.constant 0 : i32
    %c0_i32_0 = arith.constant 0 : i32
    %c0_i32_1 = arith.constant 0 : i32
    return %c0_i32, %c0_i32_0 : i32, i32
  }
  func.func @transform_3(%arg0: i32) -> (i32, i32) {
    %c0_i32 = arith.constant 0 : i32
    %c0_i32_0 = arith.constant 0 : i32
    %c0_i32_1 = arith.constant 0 : i32
    return %c0_i32, %c0_i32_0 : i32, i32
  }
  func.func @transform_4(%arg0: i32) -> (i32, i32) {
    %c0_i32 = arith.constant 0 : i32
    %c0_i32_0 = arith.constant 0 : i32
    %c0_i32_1 = arith.constant 0 : i32
    return %c0_i32, %c0_i32_0 : i32, i32
  }
  func.func @transform_5(%arg0: i32) -> (i32, i32) {
    %c0_i32 = arith.constant 0 : i32
    %c0_i32_0 = arith.constant 0 : i32
    %c0_i32_1 = arith.constant 0 : i32
    return %c0_i32, %c0_i32_0 : i32, i32
  }
  func.func @transform_6(%arg0: i32) -> (i32, i32, i32) {
    %c0_i32 = arith.constant 0 : i32
    %c0_i32_0 = arith.constant 0 : i32
    %c0_i32_1 = arith.constant 0 : i32
    return %arg0, %c0_i32, %c0_i32_0 : i32, i32, i32
  }
}

module attributes {stable_mosaic.version = 11 : i64} {
  func.func @_mlp3_kernel(%arg0: i32, %arg1: memref<6x2904xf32, #tpu.memory_space<vmem>>, %arg2: memref<2904x120xf32, #tpu.memory_space<vmem>>, %arg3: memref<1x120xf32, #tpu.memory_space<vmem>>, %arg4: memref<120x84xf32, #tpu.memory_space<vmem>>, %arg5: memref<1x84xf32, #tpu.memory_space<vmem>>, %arg6: memref<84x32xf32, #tpu.memory_space<vmem>>, %arg7: memref<1x32xf32, #tpu.memory_space<vmem>>, %arg8: memref<6x32xf32, #tpu.memory_space<vmem>>) attributes {dimension_semantics = [#tpu.dimension_semantics<arbitrary>], iteration_bounds = array<i64: 1>, scalar_prefetch = 0 : i64, scratch_operands = 0 : i64, tpu.core_type = #tpu.core_type<tc>, window_params = [{pipeline_mode = #tpu.pipeline_mode<synchronous>, transform_indices = @transform_0, window_bounds = array<i64: 6, 2904>}, {pipeline_mode = #tpu.pipeline_mode<synchronous>, transform_indices = @transform_1, window_bounds = array<i64: 2904, 120>}, {pipeline_mode = #tpu.pipeline_mode<synchronous>, transform_indices = @transform_2, window_bounds = array<i64: 1, 120>}, {pipeline_mode = #tpu.pipeline_mode<synchronous>, transform_indices = @transform_3, window_bounds = array<i64: 120, 84>}, {pipeline_mode = #tpu.pipeline_mode<synchronous>, transform_indices = @transform_4, window_bounds = array<i64: 1, 84>}, {pipeline_mode = #tpu.pipeline_mode<synchronous>, transform_indices = @transform_5, window_bounds = array<i64: 84, 32>}, {pipeline_mode = #tpu.pipeline_mode<synchronous>, transform_indices = @transform_6, window_bounds = array<i64: 1, 32>}, {pipeline_mode = #tpu.pipeline_mode<synchronous>, transform_indices = @transform_7, window_bounds = array<i64: 6, 32>}]} {
    %c0 = arith.constant 0 : index
    %c0_0 = arith.constant 0 : index
    %0 = vector.load %arg1[%c0, %c0_0] : memref<6x2904xf32, #tpu.memory_space<vmem>>, vector<6x2904xf32>
    %c0_1 = arith.constant 0 : index
    %c0_2 = arith.constant 0 : index
    %1 = vector.load %arg2[%c0_1, %c0_2] : memref<2904x120xf32, #tpu.memory_space<vmem>>, vector<2904x120xf32>
    %cst = arith.constant dense<0.000000e+00> : vector<6x120xf32>
    %2 = tpu.matmul %0, %1, %cst {dimension_numbers = #tpu.dot_dimension_numbers<[1], [0], [0], [1], [0, 0, 1, 1], [], []>} : vector<6x2904xf32>, vector<2904x120xf32>, vector<6x120xf32> -> vector<6x120xf32>
    %c0_3 = arith.constant 0 : index
    %c0_4 = arith.constant 0 : index
    %3 = vector.load %arg3[%c0_3, %c0_4] : memref<1x120xf32, #tpu.memory_space<vmem>>, vector<1x120xf32>
    %4 = vector.broadcast %3 : vector<1x120xf32> to vector<6x120xf32>
    %5 = arith.addf %2, %4 : vector<6x120xf32>
    %cst_5 = arith.constant 0.000000e+00 : f32
    %6 = vector.broadcast %cst_5 : f32 to vector<6x120xf32>
    %7 = arith.maximumf %5, %6 : vector<6x120xf32>
    %c0_6 = arith.constant 0 : index
    %c0_7 = arith.constant 0 : index
    %8 = vector.load %arg4[%c0_6, %c0_7] : memref<120x84xf32, #tpu.memory_space<vmem>>, vector<120x84xf32>
    %cst_8 = arith.constant dense<0.000000e+00> : vector<6x84xf32>
    %9 = tpu.matmul %7, %8, %cst_8 {dimension_numbers = #tpu.dot_dimension_numbers<[1], [0], [0], [1], [0, 0, 1, 1], [], []>} : vector<6x120xf32>, vector<120x84xf32>, vector<6x84xf32> -> vector<6x84xf32>
    %c0_9 = arith.constant 0 : index
    %c0_10 = arith.constant 0 : index
    %10 = vector.load %arg5[%c0_9, %c0_10] : memref<1x84xf32, #tpu.memory_space<vmem>>, vector<1x84xf32>
    %11 = vector.broadcast %10 : vector<1x84xf32> to vector<6x84xf32>
    %12 = arith.addf %9, %11 : vector<6x84xf32>
    %cst_11 = arith.constant 0.000000e+00 : f32
    %13 = vector.broadcast %cst_11 : f32 to vector<6x84xf32>
    %14 = arith.maximumf %12, %13 : vector<6x84xf32>
    %c0_12 = arith.constant 0 : index
    %c0_13 = arith.constant 0 : index
    %15 = vector.load %arg6[%c0_12, %c0_13] : memref<84x32xf32, #tpu.memory_space<vmem>>, vector<84x32xf32>
    %cst_14 = arith.constant dense<0.000000e+00> : vector<6x32xf32>
    %16 = tpu.matmul %14, %15, %cst_14 {dimension_numbers = #tpu.dot_dimension_numbers<[1], [0], [0], [1], [0, 0, 1, 1], [], []>} : vector<6x84xf32>, vector<84x32xf32>, vector<6x32xf32> -> vector<6x32xf32>
    %c0_15 = arith.constant 0 : index
    %c0_16 = arith.constant 0 : index
    %17 = vector.load %arg7[%c0_15, %c0_16] : memref<1x32xf32, #tpu.memory_space<vmem>>, vector<1x32xf32>
    %18 = vector.broadcast %17 : vector<1x32xf32> to vector<6x32xf32>
    %19 = arith.addf %16, %18 : vector<6x32xf32>
    %c0_17 = arith.constant 0 : index
    %c0_18 = arith.constant 0 : index
    %20 = vector.load %arg8[%c0_17, %c0_18] : memref<6x32xf32, #tpu.memory_space<vmem>>, vector<6x32xf32>
    tpu.vector_store %arg8[%c0_17, %c0_18], %19 {strides = array<i32>} : memref<6x32xf32, #tpu.memory_space<vmem>>, vector<6x32xf32>,
    return
  }
  func.func @transform_0(%arg0: i32) -> (i32, i32) {
    %c0_i32 = arith.constant 0 : i32
    %c0_i32_0 = arith.constant 0 : i32
    %c0_i32_1 = arith.constant 0 : i32
    return %c0_i32, %c0_i32_0 : i32, i32
  }
  func.func @transform_1(%arg0: i32) -> (i32, i32) {
    %c0_i32 = arith.constant 0 : i32
    %c0_i32_0 = arith.constant 0 : i32
    %c0_i32_1 = arith.constant 0 : i32
    return %c0_i32, %c0_i32_0 : i32, i32
  }
  func.func @transform_2(%arg0: i32) -> (i32, i32) {
    %c0_i32 = arith.constant 0 : i32
    %c0_i32_0 = arith.constant 0 : i32
    %c0_i32_1 = arith.constant 0 : i32
    return %c0_i32, %c0_i32_0 : i32, i32
  }
  func.func @transform_3(%arg0: i32) -> (i32, i32) {
    %c0_i32 = arith.constant 0 : i32
    %c0_i32_0 = arith.constant 0 : i32
    %c0_i32_1 = arith.constant 0 : i32
    return %c0_i32, %c0_i32_0 : i32, i32
  }
  func.func @transform_4(%arg0: i32) -> (i32, i32) {
    %c0_i32 = arith.constant 0 : i32
    %c0_i32_0 = arith.constant 0 : i32
    %c0_i32_1 = arith.constant 0 : i32
    return %c0_i32, %c0_i32_0 : i32, i32
  }
  func.func @transform_5(%arg0: i32) -> (i32, i32) {
    %c0_i32 = arith.constant 0 : i32
    %c0_i32_0 = arith.constant 0 : i32
    %c0_i32_1 = arith.constant 0 : i32
    return %c0_i32, %c0_i32_0 : i32, i32
  }
  func.func @transform_6(%arg0: i32) -> (i32, i32) {
    %c0_i32 = arith.constant 0 : i32
    %c0_i32_0 = arith.constant 0 : i32
    %c0_i32_1 = arith.constant 0 : i32
    return %c0_i32, %c0_i32_0 : i32, i32
  }
  func.func @transform_7(%arg0: i32) -> (i32, i32) {
    %c0_i32 = arith.constant 0 : i32
    %c0_i32_0 = arith.constant 0 : i32
    %c0_i32_1 = arith.constant 0 : i32
    return %c0_i32, %c0_i32_0 : i32, i32
  }
}

</mosaic_0001>

<bundles_post_ra>
// kernel: autoencoder_forward.3
= control target key start
LH: loop header
LB: loop body
LE: loop exit
PB: predicated region body
PF: predicated region fallthrough
CT: control target
= control target key end

     0   :  { %vm419_vm0 = vcmask 719872   ;;  %vm1981_vm1 = vmmov 0   ;;  %vm1383_vm2 = vcmask 1043456   ;;  %vm1286_vm3 = vcmask 982016   ;;  %s3310_s1 = inlined_call_operand.vmem [shape: f32[2904,120], index: 1, kind: input, shape index: {}]   ;;  %s3311_s0 = inlined_call_operand.vmem [shape: f32[6,2904], index: 0, kind: input, shape index: {}]   ;;  %s3312_s3 = inlined_call_operand.vmem [shape: f32[120,84], index: 3, kind: input, shape index: {}]   ;;  %s3313_s5 = inlined_call_operand.vmem [shape: f32[84,32], index: 5, kind: input, shape index: {}]   ;;  %s3314_s2 = inlined_call_operand.vmem [shape: f32[1,120], index: 2, kind: input, shape index: {}]   ;;  %s3315_s4 = inlined_call_operand.vmem [shape: f32[1,84], index: 4, kind: input, shape index: {}]   ;;  %s3316_s6 = inlined_call_operand.vmem [shape: f32[1,32], index: 6, kind: input, shape index: {}]   ;;  %s3317_s7 = inlined_call_operand.vmem [shape: f32[6,32], index: 7, kind: output, shape index: {}]  }
   0x1   :  { %v80_v0 = vld [vmem:[%s3310_s1 + $0xf8] sm:$0xff]  ;;  %v79_v2 = vld [vmem:[%s3310_s1 + $0xf0] sm:$0xff]  ;;  %v78_v6 = vld [vmem:[%s3310_s1 + $0xe8] sm:$0xff]  ;;  %vm1379_vm4 = vcmask 687104   ;;  %vm1457_vm5 = vcmask 259072  }
   0x2   :  { %v64_v1 = vld [vmem:[%s3310_s1 + $0x78] sm:$0xff]  ;;  %1470 = vmatprep.subr.mxu0 %v80_v0  ;;  %v63_v4 = vld [vmem:[%s3310_s1 + $0x70] sm:$0xff]  ;;  %v62_v8 = vld [vmem:[%s3310_s1 + $0x68] sm:$0xff] }
   0x3   :  { %v112_v3 = vld [vmem:[%s3310_s1 + $0x1f8] sm:$0xff]  ;;  %1471 = vmatpush3.msra.mxu0 %v64_v1  ;;  %v111_v7 = vld [vmem:[%s3310_s1 + $0x1f0] sm:$0xff]  ;;  %v110_v10 = vld [vmem:[%s3310_s1 + $0x1e8] sm:$0xff] }
   0x4   :  { %v96_v5 = vld [vmem:[%s3310_s1 + $0x178] sm:$0xff]  ;;  %1505 = vmatprep.subr.mxu1 %v112_v3  ;;  %1472 = vmatprep.subr.mxu0 %v79_v2  ;;  %v95_v9 = vld [vmem:[%s3310_s1 + $0x170] sm:$0xff]  ;;  %v77_v11 = vld [vmem:[%s3310_s1 + $0xe0] sm:$0xff] }
   0x5   :  { %1506 = vmatpush3.msra.mxu1 %v96_v5  ;;  %1473 = vmatpush3.msra.mxu0 %v63_v4  ;;  %v94_v12 = vld [vmem:[%s3310_s1 + $0x168] sm:$0xff]  ;;  %v61_v13 = vld [vmem:[%s3310_s1 + $0x60] sm:$0xff]  ;;  %v76_v15 = vld [vmem:[%s3310_s1 + $0xd8] sm:$0xff] }
   0x6   :  { %1507 = vmatprep.subr.mxu1 %v111_v7  ;;  %1474 = vmatprep.subr.mxu0 %v78_v6  ;;  %v109_v14 = vld [vmem:[%s3310_s1 + $0x1e0] sm:$0xff]  ;;  %v60_v17 = vld [vmem:[%s3310_s1 + $0x58] sm:$0xff]  ;;  %v75_v19 = vld [vmem:[%s3310_s1 + $0xd0] sm:$0xff] }
   0x7   :  { %1508 = vmatpush3.msra.mxu1 %v95_v9  ;;  %1475 = vmatpush3.msra.mxu0 %v62_v8  ;;  %v93_v16 = vld [vmem:[%s3310_s1 + $0x160] sm:$0xff]  ;;  %v108_v18 = vld [vmem:[%s3310_s1 + $0x1d8] sm:$0xff]  ;;  %v59_v21 = vld [vmem:[%s3310_s1 + $0x50] sm:$0xff] }
   0x8   :  { %1509 = vmatprep.subr.mxu1 %v110_v10  ;;  %1476 = vmatprep.subr.mxu0 %v77_v11  ;;  %v92_v20 = vld [vmem:[%s3310_s1 + $0x158] sm:$0xff]  ;;  %v107_v22 = vld [vmem:[%s3310_s1 + $0x1d0] sm:$0xff]  ;;  %v74_v23 = vld [vmem:[%s3310_s1 + $0xc8] sm:$0xff] }
   0x9   :  { %1510 = vmatpush3.msra.mxu1 %v94_v12  ;;  %1477 = vmatpush3.msra.mxu0 %v61_v13  ;;  %v91_v24 = vld [vmem:[%s3310_s1 + $0x150] sm:$0xff]  ;;  %v58_v25 = vld [vmem:[%s3310_s1 + $0x48] sm:$0xff]  ;;  %v73_v27 = vld [vmem:[%s3310_s1 + $0xc0] sm:$0xff] }
   0xa   :  { %1511 = vmatprep.subr.mxu1 %v109_v14  ;;  %1478 = vmatprep.subr.mxu0 %v76_v15  ;;  %v106_v26 = vld [vmem:[%s3310_s1 + $0x1c8] sm:$0xff]  ;;  %v57_v29 = vld [vmem:[%s3310_s1 + $0x40] sm:$0xff]  ;;  %v72_v31 = vld [vmem:[%s3310_s1 + $0xb8] sm:$0xff] }
   0xb   :  { %1512 = vmatpush3.msra.mxu1 %v93_v16  ;;  %1479 = vmatpush3.msra.mxu0 %v60_v17  ;;  %v90_v28 = vld [vmem:[%s3310_s1 + $0x148] sm:$0xff]  ;;  %v105_v30 = vld [vmem:[%s3310_s1 + $0x1c0] sm:$0xff]  ;;  %v56_v33 = vld [vmem:[%s3310_s1 + $0x38] sm:$0xff] }
   0xc   :  { %1513 = vmatprep.subr.mxu1 %v108_v18  ;;  %1480 = vmatprep.subr.mxu0 %v75_v19  ;;  %v89_v32 = vld [vmem:[%s3310_s1 + $0x140] sm:$0xff]  ;;  %v104_v34 = vld [vmem:[%s3310_s1 + $0x1b8] sm:$0xff]  ;;  %v71_v35 = vld [vmem:[%s3310_s1 + $0xb0] sm:$0xff] }
   0xd   :  { %1514 = vmatpush3.msra.mxu1 %v92_v20  ;;  %1481 = vmatpush3.msra.mxu0 %v59_v21  ;;  %v88_v36 = vld [vmem:[%s3310_s1 + $0x138] sm:$0xff]  ;;  %v55_v37 = vld [vmem:[%s3310_s1 + $0x30] sm:$0xff]  ;;  %v70_v39 = vld [vmem:[%s3310_s1 + $0xa8] sm:$0xff] }
   0xe   :  { %1515 = vmatprep.subr.mxu1 %v107_v22  ;;  %1482 = vmatprep.subr.mxu0 %v74_v23  ;;  %v103_v38 = vld [vmem:[%s3310_s1 + $0x1b0] sm:$0xff]  ;;  %v54_v41 = vld [vmem:[%s3310_s1 + $0x28] sm:$0xff]  ;;  %v69_v43 = vld [vmem:[%s3310_s1 + $0xa0] sm:$0xff] }
   0xf   :  { %1516 = vmatpush3.msra.mxu1 %v91_v24  ;;  %1483 = vmatpush3.msra.mxu0 %v58_v25  ;;  %v87_v40 = vld [vmem:[%s3310_s1 + $0x130] sm:$0xff]  ;;  %v102_v42 = vld [vmem:[%s3310_s1 + $0x1a8] sm:$0xff]  ;;  %v53_v45 = vld [vmem:[%s3310_s1 + $0x20] sm:$0xff] }
  0x10   :  { %1517 = vmatprep.subr.mxu1 %v106_v26  ;;  %1484 = vmatprep.subr.mxu0 %v73_v27  ;;  %v86_v44 = vld [vmem:[%s3310_s1 + $0x128] sm:$0xff]  ;;  %v101_v46 = vld [vmem:[%s3310_s1 + $0x1a0] sm:$0xff]  ;;  %v68_v47 = vld [vmem:[%s3310_s1 + $0x98] sm:$0xff] }
  0x11   :  { %1518 = vmatpush3.msra.mxu1 %v90_v28  ;;  %1485 = vmatpush3.msra.mxu0 %v57_v29  ;;  %v85_v48 = vld [vmem:[%s3310_s1 + $0x120] sm:$0xff]  ;;  %v52_v49 = vld [vmem:[%s3310_s1 + $0x18] sm:$0xff]  ;;  %v67_v51 = vld [vmem:[%s3310_s1 + $0x90] sm:$0xff] }
  0x12   :  { %1519 = vmatprep.subr.mxu1 %v105_v30  ;;  %1486 = vmatprep.subr.mxu0 %v72_v31  ;;  %v100_v50 = vld [vmem:[%s3310_s1 + $0x198] sm:$0xff]  ;;  %v51_v53 = vld [vmem:[%s3310_s1 + $0x10] sm:$0xff]  ;;  %v66_v55 = vld [vmem:[%s3310_s1 + $0x88] sm:$0xff] }
  0x13   :  { %1520 = vmatpush3.msra.mxu1 %v89_v32  ;;  %1487 = vmatpush3.msra.mxu0 %v56_v33  ;;  %v84_v52 = vld [vmem:[%s3310_s1 + $0x118] sm:$0xff]  ;;  %v99_v54 = vld [vmem:[%s3310_s1 + $0x190] sm:$0xff]  ;;  %v50_v57 = vld [vmem:[%s3310_s1 + $0x8] sm:$0xff] }
  0x14   :  { %1521 = vmatprep.subr.mxu1 %v104_v34  ;;  %1488 = vmatprep.subr.mxu0 %v71_v35  ;;  %v83_v56 = vld [vmem:[%s3310_s1 + $0x110] sm:$0xff]  ;;  %v98_v58 = vld [vmem:[%s3310_s1 + $0x188] sm:$0xff]  ;;  %v65_v59 = vld [vmem:[%s3310_s1 + $0x80] sm:$0xff] }
  0x15   :  { %1522 = vmatpush3.msra.mxu1 %v88_v36  ;;  %1489 = vmatpush3.msra.mxu0 %v55_v37  ;;  %v27_v60 = vld [vmem:[%s3311_s0 + $0x8] sm:$0x3f]  ;;  %v49_v61 = vld [vmem:[%s3310_s1] sm:$0xff]  ;;  %v144_v1 = vld [vmem:[%s3310_s1 + $0x2f8] sm:$0xff] }
  0x16   :  { %1523 = vmatprep.subr.mxu1 %v103_v38  ;;  %1490 = vmatprep.subr.mxu0 %v70_v39  ;;  %v82_v62 = vld [vmem:[%s3310_s1 + $0x108] sm:$0xff]  ;;  %v26_v63 = vld [vmem:[%s3311_s0] sm:$0x3f]  ;;  %v29_v3 = vld [vmem:[%s3311_s0 + $0x18] sm:$0x3f] }
  0x17   :  { %1524 = vmatpush3.msra.mxu1 %v87_v40  ;;  %1491 = vmatpush3.msra.mxu0 %v54_v41  ;;  %v97_v0 = vld [vmem:[%s3310_s1 + $0x180] sm:$0xff]  ;;  %v128_v4 = vld [vmem:[%s3310_s1 + $0x278] sm:$0xff]  ;;  %v28_v5 = vld [vmem:[%s3311_s0 + $0x10] sm:$0x3f] }
  0x18   :  { %1525 = vmatprep.subr.mxu1 %v102_v42  ;;  %1492 = vmatprep.subr.mxu0 %v69_v43  ;;  %v81_v2 = vld [vmem:[%s3310_s1 + $0x100] sm:$0xff]  ;;  %v143_v6 = vld [vmem:[%s3310_s1 + $0x2f0] sm:$0xff]  ;;  %v176_v7 = vld [vmem:[%s3310_s1 + $0x3f8] sm:$0xff] }
  0x19   :  { %1526 = vmatpush3.msra.mxu1 %v86_v44  ;;  %1493 = vmatpush3.msra.mxu0 %v53_v45  ;;  %v127_v8 = vld [vmem:[%s3310_s1 + $0x270] sm:$0xff]  ;;  %v160_v9 = vld [vmem:[%s3310_s1 + $0x378] sm:$0xff]  ;;  %v142_v10 = vld [vmem:[%s3310_s1 + $0x2e8] sm:$0xff] }
  0x1a   :  { %1527 = vmatprep.subr.mxu1 %v101_v46  ;;  %1494 = vmatprep.subr.mxu0 %v68_v47  ;;  %v175_v11 = vld [vmem:[%s3310_s1 + $0x3f0] sm:$0xff]  ;;  %v126_v12 = vld [vmem:[%s3310_s1 + $0x268] sm:$0xff]  ;;  %v141_v14 = vld [vmem:[%s3310_s1 + $0x2e0] sm:$0xff] }
  0x1b   :  { %1528 = vmatpush3.msra.mxu1 %v85_v48  ;;  %1495 = vmatpush3.msra.mxu0 %v52_v49  ;;  %v159_v13 = vld [vmem:[%s3310_s1 + $0x370] sm:$0xff]  ;;  %v174_v15 = vld [vmem:[%s3310_s1 + $0x3e8] sm:$0xff]  ;;  %v125_v16 = vld [vmem:[%s3310_s1 + $0x260] sm:$0xff] }
  0x1c   :  { %1529 = vmatprep.subr.mxu1 %v100_v50  ;;  %1496 = vmatprep.subr.mxu0 %v67_v51  ;;  %v158_v17 = vld [vmem:[%s3310_s1 + $0x368] sm:$0xff]  ;;  %v140_v18 = vld [vmem:[%s3310_s1 + $0x2d8] sm:$0xff]  ;;  %v173_v19 = vld [vmem:[%s3310_s1 + $0x3e0] sm:$0xff] }
  0x1d   :  { %1530 = vmatpush3.msra.mxu1 %v84_v52  ;;  %1497 = vmatpush3.msra.mxu0 %v51_v53  ;;  %v124_v20 = vld [vmem:[%s3310_s1 + $0x258] sm:$0xff]  ;;  %v157_v21 = vld [vmem:[%s3310_s1 + $0x360] sm:$0xff]  ;;  %v139_v22 = vld [vmem:[%s3310_s1 + $0x2d0] sm:$0xff] }
  0x1e   :  { %1531 = vmatprep.subr.mxu1 %v99_v54  ;;  %1498 = vmatprep.subr.mxu0 %v66_v55  ;;  %v172_v23 = vld [vmem:[%s3310_s1 + $0x3d8] sm:$0xff]  ;;  %v123_v24 = vld [vmem:[%s3310_s1 + $0x250] sm:$0xff]  ;;  %v138_v26 = vld [vmem:[%s3310_s1 + $0x2c8] sm:$0xff] }
  0x1f   :  { %1532 = vmatpush3.msra.mxu1 %v83_v56  ;;  %1499 = vmatpush3.msra.mxu0 %v50_v57  ;;  %v156_v25 = vld [vmem:[%s3310_s1 + $0x358] sm:$0xff]  ;;  %v171_v27 = vld [vmem:[%s3310_s1 + $0x3d0] sm:$0xff]  ;;  %v122_v28 = vld [vmem:[%s3310_s1 + $0x248] sm:$0xff] }
  0x20   :  { %1533 = vmatprep.subr.mxu1 %v98_v58  ;;  %1500 = vmatprep.subr.mxu0 %v65_v59  ;;  %v155_v29 = vld [vmem:[%s3310_s1 + $0x350] sm:$0xff]  ;;  %v137_v30 = vld [vmem:[%s3310_s1 + $0x2c0] sm:$0xff]  ;;  %v170_v31 = vld [vmem:[%s3310_s1 + $0x3c8] sm:$0xff] }
  0x21   :  { %487 = vmatprep.mubr.f32.mxu0 %v27_v60  ;;  %1501 = vmatpush3.msra.mxu0 %v49_v61  ;;  %v121_v32 = vld [vmem:[%s3310_s1 + $0x240] sm:$0xff]  ;;  %v154_v33 = vld [vmem:[%s3310_s1 + $0x348] sm:$0xff]  ;;  %v136_v34 = vld [vmem:[%s3310_s1 + $0x2b8] sm:$0xff] }
  0x22   :  { %1534 = vmatpush3.msra.mxu1 %v82_v62  ;;  %488 = vmatmul.mubr.f32.vlgmr.msra.gmra.mxu0 %v26_v63  ;;  %v169_v35 = vld [vmem:[%s3310_s1 + $0x3c0] sm:$0xff]  ;;  %v120_v36 = vld [vmem:[%s3310_s1 + $0x238] sm:$0xff]  ;;  %v135_v38 = vld [vmem:[%s3310_s1 + $0x2b0] sm:$0xff] }
  0x23   :  { %1535 = vmatprep.subr.mxu1 %v97_v0  ;;  %1540 = vmatprep.subr.mxu0 %v144_v1  ;;  %v153_v37 = vld [vmem:[%s3310_s1 + $0x340] sm:$0xff]  ;;  %v168_v39 = vld [vmem:[%s3310_s1 + $0x3b8] sm:$0xff]  ;;  %v119_v40 = vld [vmem:[%s3310_s1 + $0x230] sm:$0xff] }
  0x24   :  { %1536 = vmatpush3.msra.mxu1 %v81_v2  ;;  %557 = vmatprep.mubr.f32.mxu1 %v29_v3  ;;  %v152_v41 = vld [vmem:[%s3310_s1 + $0x338] sm:$0xff]  ;;  %v134_v42 = vld [vmem:[%s3310_s1 + $0x2a8] sm:$0xff]  ;;  %v167_v43 = vld [vmem:[%s3310_s1 + $0x3b0] sm:$0xff] }
  0x25   :  { %1541 = vmatpush3.msra.mxu0 %v128_v4  ;;  %558 = vmatmul.mubr.f32.vlgmr.msra.gmra.mxu1 %v28_v5  ;;  %v118_v44 = vld [vmem:[%s3310_s1 + $0x228] sm:$0xff]  ;;  %v151_v45 = vld [vmem:[%s3310_s1 + $0x330] sm:$0xff]  ;;  %v133_v46 = vld [vmem:[%s3310_s1 + $0x2a0] sm:$0xff] }
  0x26   :  { %1542 = vmatprep.subr.mxu0 %v143_v6  ;;  %1575 = vmatprep.subr.mxu1 %v176_v7  ;;  %v166_v47 = vld [vmem:[%s3310_s1 + $0x3a8] sm:$0xff]  ;;  %v117_v48 = vld [vmem:[%s3310_s1 + $0x220] sm:$0xff]  ;;  %v132_v50 = vld [vmem:[%s3310_s1 + $0x298] sm:$0xff] }
  0x27   :  { %1543 = vmatpush3.msra.mxu0 %v127_v8  ;;  %1576 = vmatpush3.msra.mxu1 %v160_v9  ;;  %v150_v49 = vld [vmem:[%s3310_s1 + $0x328] sm:$0xff]  ;;  %v165_v51 = vld [vmem:[%s3310_s1 + $0x3a0] sm:$0xff]  ;;  %v116_v52 = vld [vmem:[%s3310_s1 + $0x218] sm:$0xff] }
  0x28   :  { %1544 = vmatprep.subr.mxu0 %v142_v10  ;;  %1577 = vmatprep.subr.mxu1 %v175_v11  ;;  %v149_v53 = vld [vmem:[%s3310_s1 + $0x320] sm:$0xff]  ;;  %v131_v54 = vld [vmem:[%s3310_s1 + $0x290] sm:$0xff]  ;;  %v164_v55 = vld [vmem:[%s3310_s1 + $0x398] sm:$0xff] }
  0x29   :  { %1545 = vmatpush3.msra.mxu0 %v126_v12  ;;  %1578 = vmatpush3.msra.mxu1 %v159_v13  ;;  %v115_v56 = vld [vmem:[%s3310_s1 + $0x210] sm:$0xff]  ;;  %v148_v57 = vld [vmem:[%s3310_s1 + $0x318] sm:$0xff]  ;;  %v130_v58 = vld [vmem:[%s3310_s1 + $0x288] sm:$0xff] }
  0x2a   :  { %1546 = vmatprep.subr.mxu0 %v141_v14  ;;  %1579 = vmatprep.subr.mxu1 %v174_v15  ;;  %v163_v59 = vld [vmem:[%s3310_s1 + $0x390] sm:$0xff]  ;;  %v114_v60 = vld [vmem:[%s3310_s1 + $0x208] sm:$0xff]  ;;  %v129_v62 = vld [vmem:[%s3310_s1 + $0x280] sm:$0xff] }
  0x2b   :  { %1547 = vmatpush3.msra.mxu0 %v125_v16  ;;  %1580 = vmatpush3.msra.mxu1 %v158_v17  ;;  %v147_v61 = vld [vmem:[%s3310_s1 + $0x310] sm:$0xff]  ;;  %v162_v63 = vld [vmem:[%s3310_s1 + $0x388] sm:$0xff]  ;;  %v113_v0 = vld [vmem:[%s3310_s1 + $0x200] sm:$0xff] }
  0x2c   :  { %1548 = vmatprep.subr.mxu0 %v140_v18  ;;  %1581 = vmatprep.subr.mxu1 %v173_v19  ;;  %v31_v1 = vld [vmem:[%s3311_s0 + $0x28] sm:$0x3f]  ;;  %v30_v3 = vld [vmem:[%s3311_s0 + $0x20] sm:$0x3f]  ;;  %v208_v5 = vld [vmem:[%s3310_s1 + $0x4f8] sm:$0xff] }
  0x2d   :  { %1549 = vmatpush3.msra.mxu0 %v124_v20  ;;  %1582 = vmatpush3.msra.mxu1 %v157_v21  ;;  %v146_v2 = vld [vmem:[%s3310_s1 + $0x308] sm:$0xff]  ;;  %v161_v4 = vld [vmem:[%s3310_s1 + $0x380] sm:$0xff]  ;;  %v33_v7 = vld [vmem:[%s3311_s0 + $0x38] sm:$0x3f] }
  0x2e   :  { %1550 = vmatprep.subr.mxu0 %v139_v22  ;;  %1583 = vmatprep.subr.mxu1 %v172_v23  ;;  %v145_v6 = vld [vmem:[%s3310_s1 + $0x300] sm:$0xff]  ;;  %v192_v8 = vld [vmem:[%s3310_s1 + $0x478] sm:$0xff]  ;;  %v32_v9 = vld [vmem:[%s3311_s0 + $0x30] sm:$0x3f] }
  0x2f   :  { %1551 = vmatpush3.msra.mxu0 %v123_v24  ;;  %1584 = vmatpush3.msra.mxu1 %v156_v25  ;;  %v207_v10 = vld [vmem:[%s3310_s1 + $0x4f0] sm:$0xff]  ;;  %v240_v11 = vld [vmem:[%s3310_s1 + $0x5f8] sm:$0xff]  ;;  %v206_v14 = vld [vmem:[%s3310_s1 + $0x4e8] sm:$0xff] }
  0x30   :  { %1552 = vmatprep.subr.mxu0 %v138_v26  ;;  %1585 = vmatprep.subr.mxu1 %v171_v27  ;;  %v191_v12 = vld [vmem:[%s3310_s1 + $0x470] sm:$0xff]  ;;  %v224_v13 = vld [vmem:[%s3310_s1 + $0x578] sm:$0xff]  ;;  %v190_v16 = vld [vmem:[%s3310_s1 + $0x468] sm:$0xff] }
  0x31   :  { %1553 = vmatpush3.msra.mxu0 %v122_v28  ;;  %1586 = vmatpush3.msra.mxu1 %v155_v29  ;;  %v239_v15 = vld [vmem:[%s3310_s1 + $0x5f0] sm:$0xff]  ;;  %v205_v18 = vld [vmem:[%s3310_s1 + $0x4e0] sm:$0xff]  ;;  %v238_v19 = vld [vmem:[%s3310_s1 + $0x5e8] sm:$0xff] }
  0x32   :  { %1554 = vmatprep.subr.mxu0 %v137_v30  ;;  %1587 = vmatprep.subr.mxu1 %v170_v31  ;;  %v223_v17 = vld [vmem:[%s3310_s1 + $0x570] sm:$0xff]  ;;  %v189_v20 = vld [vmem:[%s3310_s1 + $0x460] sm:$0xff]  ;;  %v222_v21 = vld [vmem:[%s3310_s1 + $0x568] sm:$0xff] }
  0x33   :  { %1555 = vmatpush3.msra.mxu0 %v121_v32  ;;  %1588 = vmatpush3.msra.mxu1 %v154_v33  ;;  %v204_v22 = vld [vmem:[%s3310_s1 + $0x4d8] sm:$0xff]  ;;  %v237_v23 = vld [vmem:[%s3310_s1 + $0x5e0] sm:$0xff]  ;;  %v203_v26 = vld [vmem:[%s3310_s1 + $0x4d0] sm:$0xff] }
  0x34   :  { %1556 = vmatprep.subr.mxu0 %v136_v34  ;;  %1589 = vmatprep.subr.mxu1 %v169_v35  ;;  %v188_v24 = vld [vmem:[%s3310_s1 + $0x458] sm:$0xff]  ;;  %v221_v25 = vld [vmem:[%s3310_s1 + $0x560] sm:$0xff]  ;;  %v187_v28 = vld [vmem:[%s3310_s1 + $0x450] sm:$0xff] }
  0x35   :  { %1557 = vmatpush3.msra.mxu0 %v120_v36  ;;  %1590 = vmatpush3.msra.mxu1 %v153_v37  ;;  %v236_v27 = vld [vmem:[%s3310_s1 + $0x5d8] sm:$0xff]  ;;  %v202_v30 = vld [vmem:[%s3310_s1 + $0x4c8] sm:$0xff]  ;;  %v235_v31 = vld [vmem:[%s3310_s1 + $0x5d0] sm:$0xff] }
  0x36   :  { %1558 = vmatprep.subr.mxu0 %v135_v38  ;;  %1591 = vmatprep.subr.mxu1 %v168_v39  ;;  %v220_v29 = vld [vmem:[%s3310_s1 + $0x558] sm:$0xff]  ;;  %v186_v32 = vld [vmem:[%s3310_s1 + $0x448] sm:$0xff]  ;;  %v219_v33 = vld [vmem:[%s3310_s1 + $0x550] sm:$0xff] }
  0x37   :  { %1559 = vmatpush3.msra.mxu0 %v119_v40  ;;  %1592 = vmatpush3.msra.mxu1 %v152_v41  ;;  %v201_v34 = vld [vmem:[%s3310_s1 + $0x4c0] sm:$0xff]  ;;  %v234_v35 = vld [vmem:[%s3310_s1 + $0x5c8] sm:$0xff]  ;;  %v200_v38 = vld [vmem:[%s3310_s1 + $0x4b8] sm:$0xff] }
  0x38   :  { %1560 = vmatprep.subr.mxu0 %v134_v42  ;;  %1593 = vmatprep.subr.mxu1 %v167_v43  ;;  %v185_v36 = vld [vmem:[%s3310_s1 + $0x440] sm:$0xff]  ;;  %v218_v37 = vld [vmem:[%s3310_s1 + $0x548] sm:$0xff]  ;;  %v184_v40 = vld [vmem:[%s3310_s1 + $0x438] sm:$0xff] }
  0x39   :  { %1561 = vmatpush3.msra.mxu0 %v118_v44  ;;  %1594 = vmatpush3.msra.mxu1 %v151_v45  ;;  %v233_v39 = vld [vmem:[%s3310_s1 + $0x5c0] sm:$0xff]  ;;  %v199_v42 = vld [vmem:[%s3310_s1 + $0x4b0] sm:$0xff]  ;;  %v232_v43 = vld [vmem:[%s3310_s1 + $0x5b8] sm:$0xff] }
  0x3a   :  { %1562 = vmatprep.subr.mxu0 %v133_v46  ;;  %1595 = vmatprep.subr.mxu1 %v166_v47  ;;  %v217_v41 = vld [vmem:[%s3310_s1 + $0x540] sm:$0xff]  ;;  %v183_v44 = vld [vmem:[%s3310_s1 + $0x430] sm:$0xff]  ;;  %v216_v45 = vld [vmem:[%s3310_s1 + $0x538] sm:$0xff] }
  0x3b   :  { %1563 = vmatpush3.msra.mxu0 %v117_v48  ;;  %1596 = vmatpush3.msra.mxu1 %v150_v49  ;;  %v198_v46 = vld [vmem:[%s3310_s1 + $0x4a8] sm:$0xff]  ;;  %v231_v47 = vld [vmem:[%s3310_s1 + $0x5b0] sm:$0xff] }
  0x3c   :  { %1564 = vmatprep.subr.mxu0 %v132_v50  ;;  %1597 = vmatprep.subr.mxu1 %v165_v51  ;;  %v182_v48 = vld [vmem:[%s3310_s1 + $0x428] sm:$0xff]  ;;  %v215_v49 = vld [vmem:[%s3310_s1 + $0x530] sm:$0xff]  ;;  %v197_v50 = vld [vmem:[%s3310_s1 + $0x4a0] sm:$0xff] }
  0x3d   :  { %1565 = vmatpush3.msra.mxu0 %v116_v52  ;;  %1598 = vmatpush3.msra.mxu1 %v149_v53  ;;  %v230_v51 = vld [vmem:[%s3310_s1 + $0x5a8] sm:$0xff]  ;;  %v181_v52 = vld [vmem:[%s3310_s1 + $0x420] sm:$0xff] }
  0x3e   :  { %1566 = vmatprep.subr.mxu0 %v131_v54  ;;  %1599 = vmatprep.subr.mxu1 %v164_v55  ;;  %v214_v53 = vld [vmem:[%s3310_s1 + $0x528] sm:$0xff]  ;;  %v196_v54 = vld [vmem:[%s3310_s1 + $0x498] sm:$0xff]  ;;  %v229_v55 = vld [vmem:[%s3310_s1 + $0x5a0] sm:$0xff] }
  0x3f   :  { %1567 = vmatpush3.msra.mxu0 %v115_v56  ;;  %1600 = vmatpush3.msra.mxu1 %v148_v57  ;;  %v180_v56 = vld [vmem:[%s3310_s1 + $0x418] sm:$0xff]  ;;  %v213_v57 = vld [vmem:[%s3310_s1 + $0x520] sm:$0xff] }
  0x40   :  { %1568 = vmatprep.subr.mxu0 %v130_v58  ;;  %1601 = vmatprep.subr.mxu1 %v163_v59  ;;  %v195_v58 = vld [vmem:[%s3310_s1 + $0x490] sm:$0xff]  ;;  %v228_v59 = vld [vmem:[%s3310_s1 + $0x598] sm:$0xff] }
  0x41   :  { %1569 = vmatpush3.msra.mxu0 %v114_v60  ;;  %1602 = vmatpush3.msra.mxu1 %v147_v61  ;;  %v179_v60 = vld [vmem:[%s3310_s1 + $0x410] sm:$0xff]  ;;  %v212_v61 = vld [vmem:[%s3310_s1 + $0x518] sm:$0xff] }
  0x42   :  { %1570 = vmatprep.subr.mxu0 %v129_v62  ;;  %1603 = vmatprep.subr.mxu1 %v162_v63  ;;  %v194_v62 = vld [vmem:[%s3310_s1 + $0x488] sm:$0xff]  ;;  %v227_v63 = vld [vmem:[%s3310_s1 + $0x590] sm:$0xff] }
  0x43   :  { %1571 = vmatpush3.msra.mxu0 %v113_v0  ;;  %627 = vmatprep.mubr.f32.mxu0 %v31_v1  ;;  %v178_v0 = vld [vmem:[%s3310_s1 + $0x408] sm:$0xff]  ;;  %v211_v1 = vld [vmem:[%s3310_s1 + $0x510] sm:$0xff] }
  0x44   :  { %1604 = vmatpush3.msra.mxu1 %v146_v2  ;;  %628 = vmatmul.mubr.f32.vlgmr.msra.gmra.mxu0 %v30_v3  ;;  %v193_v2 = vld [vmem:[%s3310_s1 + $0x480] sm:$0xff]  ;;  %v226_v3 = vld [vmem:[%s3310_s1 + $0x588] sm:$0xff] }
  0x45   :  { %1605 = vmatprep.subr.mxu1 %v161_v4  ;;  %1610 = vmatprep.subr.mxu0 %v208_v5  ;;  %v177_v4 = vld [vmem:[%s3310_s1 + $0x400] sm:$0xff]  ;;  %v35_v5 = vld [vmem:[%s3311_s0 + $0x48] sm:$0x3f] }
  0x46   :  { %1606 = vmatpush3.msra.mxu1 %v145_v6  ;;  %697 = vmatprep.mubr.f32.mxu1 %v33_v7  ;;  %v210_v6 = vld [vmem:[%s3310_s1 + $0x508] sm:$0xff]  ;;  %v34_v7 = vld [vmem:[%s3311_s0 + $0x40] sm:$0x3f] }
  0x47   :  { %1611 = vmatpush3.msra.mxu0 %v192_v8  ;;  %698 = vmatmul.mubr.f32.vlgmr.msra.gmra.mxu1 %v32_v9  ;;  %v225_v8 = vld [vmem:[%s3310_s1 + $0x580] sm:$0xff]  ;;  %v272_v9 = vld [vmem:[%s3310_s1 + $0x6f8] sm:$0xff] }
  0x48   :  { %1612 = vmatprep.subr.mxu0 %v207_v10  ;;  %1645 = vmatprep.subr.mxu1 %v240_v11  ;;  %v209_v10 = vld [vmem:[%s3310_s1 + $0x500] sm:$0xff]  ;;  %v37_v11 = vld [vmem:[%s3311_s0 + $0x58] sm:$0x3f] }
  0x49   :  { %1613 = vmatpush3.msra.mxu0 %v191_v12  ;;  %1646 = vmatpush3.msra.mxu1 %v224_v13  ;;  %v256_v12 = vld [vmem:[%s3310_s1 + $0x678] sm:$0xff]  ;;  %v36_v13 = vld [vmem:[%s3311_s0 + $0x50] sm:$0x3f] }
  0x4a   :  { %1614 = vmatprep.subr.mxu0 %v206_v14  ;;  %1647 = vmatprep.subr.mxu1 %v239_v15  ;;  %v271_v14 = vld [vmem:[%s3310_s1 + $0x6f0] sm:$0xff]  ;;  %v304_v15 = vld [vmem:[%s3310_s1 + $0x7f8] sm:$0xff] }
  0x4b   :  { %1615 = vmatpush3.msra.mxu0 %v190_v16  ;;  %1648 = vmatpush3.msra.mxu1 %v223_v17  ;;  %v255_v16 = vld [vmem:[%s3310_s1 + $0x670] sm:$0xff]  ;;  %v288_v17 = vld [vmem:[%s3310_s1 + $0x778] sm:$0xff] }
  0x4c   :  { %1616 = vmatprep.subr.mxu0 %v205_v18  ;;  %1649 = vmatprep.subr.mxu1 %v238_v19  ;;  %v270_v18 = vld [vmem:[%s3310_s1 + $0x6e8] sm:$0xff]  ;;  %v303_v19 = vld [vmem:[%s3310_s1 + $0x7f0] sm:$0xff] }
  0x4d   :  { %1617 = vmatpush3.msra.mxu0 %v189_v20  ;;  %1650 = vmatpush3.msra.mxu1 %v222_v21  ;;  %v254_v20 = vld [vmem:[%s3310_s1 + $0x668] sm:$0xff]  ;;  %v287_v21 = vld [vmem:[%s3310_s1 + $0x770] sm:$0xff] }
  0x4e   :  { %1618 = vmatprep.subr.mxu0 %v204_v22  ;;  %1651 = vmatprep.subr.mxu1 %v237_v23  ;;  %v269_v22 = vld [vmem:[%s3310_s1 + $0x6e0] sm:$0xff]  ;;  %v302_v23 = vld [vmem:[%s3310_s1 + $0x7e8] sm:$0xff] }
  0x4f   :  { %1619 = vmatpush3.msra.mxu0 %v188_v24  ;;  %1652 = vmatpush3.msra.mxu1 %v221_v25  ;;  %v253_v24 = vld [vmem:[%s3310_s1 + $0x660] sm:$0xff]  ;;  %v286_v25 = vld [vmem:[%s3310_s1 + $0x768] sm:$0xff] }
  0x50   :  { %1620 = vmatprep.subr.mxu0 %v203_v26  ;;  %1653 = vmatprep.subr.mxu1 %v236_v27  ;;  %v268_v26 = vld [vmem:[%s3310_s1 + $0x6d8] sm:$0xff]  ;;  %v301_v27 = vld [vmem:[%s3310_s1 + $0x7e0] sm:$0xff] }
  0x51   :  { %1621 = vmatpush3.msra.mxu0 %v187_v28  ;;  %1654 = vmatpush3.msra.mxu1 %v220_v29  ;;  %v252_v28 = vld [vmem:[%s3310_s1 + $0x658] sm:$0xff]  ;;  %v285_v29 = vld [vmem:[%s3310_s1 + $0x760] sm:$0xff] }
  0x52   :  { %1622 = vmatprep.subr.mxu0 %v202_v30  ;;  %1655 = vmatprep.subr.mxu1 %v235_v31  ;;  %v267_v30 = vld [vmem:[%s3310_s1 + $0x6d0] sm:$0xff]  ;;  %v300_v31 = vld [vmem:[%s3310_s1 + $0x7d8] sm:$0xff] }
  0x53   :  { %1623 = vmatpush3.msra.mxu0 %v186_v32  ;;  %1656 = vmatpush3.msra.mxu1 %v219_v33  ;;  %v251_v32 = vld [vmem:[%s3310_s1 + $0x650] sm:$0xff]  ;;  %v284_v33 = vld [vmem:[%s3310_s1 + $0x758] sm:$0xff] }
  0x54   :  { %1624 = vmatprep.subr.mxu0 %v201_v34  ;;  %1657 = vmatprep.subr.mxu1 %v234_v35  ;;  %v266_v34 = vld [vmem:[%s3310_s1 + $0x6c8] sm:$0xff]  ;;  %v299_v35 = vld [vmem:[%s3310_s1 + $0x7d0] sm:$0xff] }
  0x55   :  { %1625 = vmatpush3.msra.mxu0 %v185_v36  ;;  %1658 = vmatpush3.msra.mxu1 %v218_v37  ;;  %v250_v36 = vld [vmem:[%s3310_s1 + $0x648] sm:$0xff]  ;;  %v283_v37 = vld [vmem:[%s3310_s1 + $0x750] sm:$0xff] }
  0x56   :  { %1626 = vmatprep.subr.mxu0 %v200_v38  ;;  %1659 = vmatprep.subr.mxu1 %v233_v39  ;;  %v265_v38 = vld [vmem:[%s3310_s1 + $0x6c0] sm:$0xff]  ;;  %v298_v39 = vld [vmem:[%s3310_s1 + $0x7c8] sm:$0xff] }
  0x57   :  { %1627 = vmatpush3.msra.mxu0 %v184_v40  ;;  %1660 = vmatpush3.msra.mxu1 %v217_v41  ;;  %v249_v40 = vld [vmem:[%s3310_s1 + $0x640] sm:$0xff]  ;;  %v282_v41 = vld [vmem:[%s3310_s1 + $0x748] sm:$0xff] }
  0x58   :  { %1628 = vmatprep.subr.mxu0 %v199_v42  ;;  %1661 = vmatprep.subr.mxu1 %v232_v43  ;;  %v264_v42 = vld [vmem:[%s3310_s1 + $0x6b8] sm:$0xff]  ;;  %v297_v43 = vld [vmem:[%s3310_s1 + $0x7c0] sm:$0xff] }
  0x59   :  { %1629 = vmatpush3.msra.mxu0 %v183_v44  ;;  %1662 = vmatpush3.msra.mxu1 %v216_v45  ;;  %v248_v44 = vld [vmem:[%s3310_s1 + $0x638] sm:$0xff]  ;;  %v281_v45 = vld [vmem:[%s3310_s1 + $0x740] sm:$0xff] }
  0x5a   :  { %1630 = vmatprep.subr.mxu0 %v198_v46  ;;  %1663 = vmatprep.subr.mxu1 %v231_v47  ;;  %v263_v46 = vld [vmem:[%s3310_s1 + $0x6b0] sm:$0xff]  ;;  %v296_v47 = vld [vmem:[%s3310_s1 + $0x7b8] sm:$0xff] }
  0x5b   :  { %1631 = vmatpush3.msra.mxu0 %v182_v48  ;;  %1664 = vmatpush3.msra.mxu1 %v215_v49  ;;  %v247_v48 = vld [vmem:[%s3310_s1 + $0x630] sm:$0xff]  ;;  %v280_v49 = vld [vmem:[%s3310_s1 + $0x738] sm:$0xff] }
  0x5c   :  { %1632 = vmatprep.subr.mxu0 %v197_v50  ;;  %1665 = vmatprep.subr.mxu1 %v230_v51  ;;  %v262_v50 = vld [vmem:[%s3310_s1 + $0x6a8] sm:$0xff]  ;;  %v295_v51 = vld [vmem:[%s3310_s1 + $0x7b0] sm:$0xff] }
  0x5d   :  { %1633 = vmatpush3.msra.mxu0 %v181_v52  ;;  %1666 = vmatpush3.msra.mxu1 %v214_v53  ;;  %v246_v52 = vld [vmem:[%s3310_s1 + $0x628] sm:$0xff]  ;;  %v279_v53 = vld [vmem:[%s3310_s1 + $0x730] sm:$0xff] }
  0x5e   :  { %1634 = vmatprep.subr.mxu0 %v196_v54  ;;  %1667 = vmatprep.subr.mxu1 %v229_v55  ;;  %v261_v54 = vld [vmem:[%s3310_s1 + $0x6a0] sm:$0xff]  ;;  %v294_v55 = vld [vmem:[%s3310_s1 + $0x7a8] sm:$0xff] }
  0x5f   :  { %1635 = vmatpush3.msra.mxu0 %v180_v56  ;;  %1668 = vmatpush3.msra.mxu1 %v213_v57  ;;  %v245_v56 = vld [vmem:[%s3310_s1 + $0x620] sm:$0xff]  ;;  %v278_v57 = vld [vmem:[%s3310_s1 + $0x728] sm:$0xff] }
  0x60   :  { %1636 = vmatprep.subr.mxu0 %v195_v58  ;;  %1669 = vmatprep.subr.mxu1 %v228_v59  ;;  %v260_v58 = vld [vmem:[%s3310_s1 + $0x698] sm:$0xff]  ;;  %v293_v59 = vld [vmem:[%s3310_s1 + $0x7a0] sm:$0xff] }
  0x61   :  { %1637 = vmatpush3.msra.mxu0 %v179_v60  ;;  %1670 = vmatpush3.msra.mxu1 %v212_v61  ;;  %v244_v60 = vld [vmem:[%s3310_s1 + $0x618] sm:$0xff]  ;;  %v277_v61 = vld [vmem:[%s3310_s1 + $0x720] sm:$0xff] }
  0x62   :  { %1638 = vmatprep.subr.mxu0 %v194_v62  ;;  %1671 = vmatprep.subr.mxu1 %v227_v63  ;;  %v259_v62 = vld [vmem:[%s3310_s1 + $0x690] sm:$0xff]  ;;  %v292_v63 = vld [vmem:[%s3310_s1 + $0x798] sm:$0xff] }
  0x63   :  { %1639 = vmatpush3.msra.mxu0 %v178_v0  ;;  %1672 = vmatpush3.msra.mxu1 %v211_v1  ;;  %v243_v0 = vld [vmem:[%s3310_s1 + $0x610] sm:$0xff]  ;;  %v276_v1 = vld [vmem:[%s3310_s1 + $0x718] sm:$0xff] }
  0x64   :  { %1640 = vmatprep.subr.mxu0 %v193_v2  ;;  %1673 = vmatprep.subr.mxu1 %v226_v3  ;;  %v258_v2 = vld [vmem:[%s3310_s1 + $0x688] sm:$0xff]  ;;  %v291_v3 = vld [vmem:[%s3310_s1 + $0x790] sm:$0xff] }
  0x65   :  { %1641 = vmatpush3.msra.mxu0 %v177_v4  ;;  %767 = vmatprep.mubr.f32.mxu0 %v35_v5  ;;  %v242_v4 = vld [vmem:[%s3310_s1 + $0x608] sm:$0xff]  ;;  %v275_v5 = vld [vmem:[%s3310_s1 + $0x710] sm:$0xff] }
  0x66   :  { %1674 = vmatpush3.msra.mxu1 %v210_v6  ;;  %768 = vmatmul.mubr.f32.vlgmr.msra.gmra.mxu0 %v34_v7  ;;  %v257_v6 = vld [vmem:[%s3310_s1 + $0x680] sm:$0xff]  ;;  %v290_v7 = vld [vmem:[%s3310_s1 + $0x788] sm:$0xff] }
  0x67   :  { %1675 = vmatprep.subr.mxu1 %v225_v8  ;;  %1680 = vmatprep.subr.mxu0 %v272_v9  ;;  %v241_v8 = vld [vmem:[%s3310_s1 + $0x600] sm:$0xff]  ;;  %v39_v9 = vld [vmem:[%s3311_s0 + $0x68] sm:$0x3f] }
  0x68   :  { %1676 = vmatpush3.msra.mxu1 %v209_v10  ;;  %837 = vmatprep.mubr.f32.mxu1 %v37_v11  ;;  %v274_v10 = vld [vmem:[%s3310_s1 + $0x708] sm:$0xff]  ;;  %v38_v11 = vld [vmem:[%s3311_s0 + $0x60] sm:$0x3f] }
  0x69   :  { %1681 = vmatpush3.msra.mxu0 %v256_v12  ;;  %838 = vmatmul.mubr.f32.vlgmr.msra.gmra.mxu1 %v36_v13  ;;  %v289_v12 = vld [vmem:[%s3310_s1 + $0x780] sm:$0xff]  ;;  %v336_v13 = vld [vmem:[%s3310_s1 + $0x8f8] sm:$0xff] }
  0x6a   :  { %1682 = vmatprep.subr.mxu0 %v271_v14  ;;  %1715 = vmatprep.subr.mxu1 %v304_v15  ;;  %v273_v14 = vld [vmem:[%s3310_s1 + $0x700] sm:$0xff]  ;;  %v41_v15 = vld [vmem:[%s3311_s0 + $0x78] sm:$0x3f] }
  0x6b   :  { %1683 = vmatpush3.msra.mxu0 %v255_v16  ;;  %1716 = vmatpush3.msra.mxu1 %v288_v17  ;;  %v320_v16 = vld [vmem:[%s3310_s1 + $0x878] sm:$0xff]  ;;  %v40_v17 = vld [vmem:[%s3311_s0 + $0x70] sm:$0x3f] }
  0x6c   :  { %1684 = vmatprep.subr.mxu0 %v270_v18  ;;  %1717 = vmatprep.subr.mxu1 %v303_v19  ;;  %v335_v18 = vld [vmem:[%s3310_s1 + $0x8f0] sm:$0xff]  ;;  %v368_v19 = vld [vmem:[%s3310_s1 + $0x9f8] sm:$0xff] }
  0x6d   :  { %1685 = vmatpush3.msra.mxu0 %v254_v20  ;;  %1718 = vmatpush3.msra.mxu1 %v287_v21  ;;  %v319_v20 = vld [vmem:[%s3310_s1 + $0x870] sm:$0xff]  ;;  %v352_v21 = vld [vmem:[%s3310_s1 + $0x978] sm:$0xff] }
  0x6e   :  { %1686 = vmatprep.subr.mxu0 %v269_v22  ;;  %1719 = vmatprep.subr.mxu1 %v302_v23  ;;  %v334_v22 = vld [vmem:[%s3310_s1 + $0x8e8] sm:$0xff]  ;;  %v367_v23 = vld [vmem:[%s3310_s1 + $0x9f0] sm:$0xff] }
  0x6f   :  { %1687 = vmatpush3.msra.mxu0 %v253_v24  ;;  %1720 = vmatpush3.msra.mxu1 %v286_v25  ;;  %v318_v24 = vld [vmem:[%s3310_s1 + $0x868] sm:$0xff]  ;;  %v351_v25 = vld [vmem:[%s3310_s1 + $0x970] sm:$0xff] }
  0x70   :  { %1688 = vmatprep.subr.mxu0 %v268_v26  ;;  %1721 = vmatprep.subr.mxu1 %v301_v27  ;;  %v333_v26 = vld [vmem:[%s3310_s1 + $0x8e0] sm:$0xff]  ;;  %v366_v27 = vld [vmem:[%s3310_s1 + $0x9e8] sm:$0xff] }
  0x71   :  { %1689 = vmatpush3.msra.mxu0 %v252_v28  ;;  %1722 = vmatpush3.msra.mxu1 %v285_v29  ;;  %v317_v28 = vld [vmem:[%s3310_s1 + $0x860] sm:$0xff]  ;;  %v350_v29 = vld [vmem:[%s3310_s1 + $0x968] sm:$0xff] }
  0x72   :  { %1690 = vmatprep.subr.mxu0 %v267_v30  ;;  %1723 = vmatprep.subr.mxu1 %v300_v31  ;;  %v332_v30 = vld [vmem:[%s3310_s1 + $0x8d8] sm:$0xff]  ;;  %v365_v31 = vld [vmem:[%s3310_s1 + $0x9e0] sm:$0xff] }
  0x73   :  { %1691 = vmatpush3.msra.mxu0 %v251_v32  ;;  %1724 = vmatpush3.msra.mxu1 %v284_v33  ;;  %v316_v32 = vld [vmem:[%s3310_s1 + $0x858] sm:$0xff]  ;;  %v349_v33 = vld [vmem:[%s3310_s1 + $0x960] sm:$0xff] }
  0x74   :  { %1692 = vmatprep.subr.mxu0 %v266_v34  ;;  %1725 = vmatprep.subr.mxu1 %v299_v35  ;;  %v331_v34 = vld [vmem:[%s3310_s1 + $0x8d0] sm:$0xff]  ;;  %v364_v35 = vld [vmem:[%s3310_s1 + $0x9d8] sm:$0xff] }
  0x75   :  { %1693 = vmatpush3.msra.mxu0 %v250_v36  ;;  %1726 = vmatpush3.msra.mxu1 %v283_v37  ;;  %v315_v36 = vld [vmem:[%s3310_s1 + $0x850] sm:$0xff]  ;;  %v348_v37 = vld [vmem:[%s3310_s1 + $0x958] sm:$0xff] }
  0x76   :  { %1694 = vmatprep.subr.mxu0 %v265_v38  ;;  %1727 = vmatprep.subr.mxu1 %v298_v39  ;;  %v330_v38 = vld [vmem:[%s3310_s1 + $0x8c8] sm:$0xff]  ;;  %v363_v39 = vld [vmem:[%s3310_s1 + $0x9d0] sm:$0xff] }
  0x77   :  { %1695 = vmatpush3.msra.mxu0 %v249_v40  ;;  %1728 = vmatpush3.msra.mxu1 %v282_v41  ;;  %v314_v40 = vld [vmem:[%s3310_s1 + $0x848] sm:$0xff]  ;;  %v347_v41 = vld [vmem:[%s3310_s1 + $0x950] sm:$0xff] }
  0x78   :  { %1696 = vmatprep.subr.mxu0 %v264_v42  ;;  %1729 = vmatprep.subr.mxu1 %v297_v43  ;;  %v329_v42 = vld [vmem:[%s3310_s1 + $0x8c0] sm:$0xff]  ;;  %v362_v43 = vld [vmem:[%s3310_s1 + $0x9c8] sm:$0xff] }
  0x79   :  { %1697 = vmatpush3.msra.mxu0 %v248_v44  ;;  %1730 = vmatpush3.msra.mxu1 %v281_v45  ;;  %v313_v44 = vld [vmem:[%s3310_s1 + $0x840] sm:$0xff]  ;;  %v346_v45 = vld [vmem:[%s3310_s1 + $0x948] sm:$0xff] }
  0x7a   :  { %1698 = vmatprep.subr.mxu0 %v263_v46  ;;  %1731 = vmatprep.subr.mxu1 %v296_v47  ;;  %v328_v46 = vld [vmem:[%s3310_s1 + $0x8b8] sm:$0xff]  ;;  %v361_v47 = vld [vmem:[%s3310_s1 + $0x9c0] sm:$0xff] }
  0x7b   :  { %1699 = vmatpush3.msra.mxu0 %v247_v48  ;;  %1732 = vmatpush3.msra.mxu1 %v280_v49  ;;  %v312_v48 = vld [vmem:[%s3310_s1 + $0x838] sm:$0xff]  ;;  %v345_v49 = vld [vmem:[%s3310_s1 + $0x940] sm:$0xff] }
  0x7c   :  { %1700 = vmatprep.subr.mxu0 %v262_v50  ;;  %1733 = vmatprep.subr.mxu1 %v295_v51  ;;  %v327_v50 = vld [vmem:[%s3310_s1 + $0x8b0] sm:$0xff]  ;;  %v360_v51 = vld [vmem:[%s3310_s1 + $0x9b8] sm:$0xff] }
  0x7d   :  { %1701 = vmatpush3.msra.mxu0 %v246_v52  ;;  %1734 = vmatpush3.msra.mxu1 %v279_v53  ;;  %v311_v52 = vld [vmem:[%s3310_s1 + $0x830] sm:$0xff]  ;;  %v344_v53 = vld [vmem:[%s3310_s1 + $0x938] sm:$0xff] }
  0x7e   :  { %1702 = vmatprep.subr.mxu0 %v261_v54  ;;  %1735 = vmatprep.subr.mxu1 %v294_v55  ;;  %v326_v54 = vld [vmem:[%s3310_s1 + $0x8a8] sm:$0xff]  ;;  %v359_v55 = vld [vmem:[%s3310_s1 + $0x9b0] sm:$0xff] }
  0x7f   :  { %1703 = vmatpush3.msra.mxu0 %v245_v56  ;;  %1736 = vmatpush3.msra.mxu1 %v278_v57  ;;  %v310_v56 = vld [vmem:[%s3310_s1 + $0x828] sm:$0xff]  ;;  %v343_v57 = vld [vmem:[%s3310_s1 + $0x930] sm:$0xff] }
  0x80   :  { %1704 = vmatprep.subr.mxu0 %v260_v58  ;;  %1737 = vmatprep.subr.mxu1 %v293_v59  ;;  %v325_v58 = vld [vmem:[%s3310_s1 + $0x8a0] sm:$0xff]  ;;  %v358_v59 = vld [vmem:[%s3310_s1 + $0x9a8] sm:$0xff] }
  0x81   :  { %1705 = vmatpush3.msra.mxu0 %v244_v60  ;;  %1738 = vmatpush3.msra.mxu1 %v277_v61  ;;  %v309_v60 = vld [vmem:[%s3310_s1 + $0x820] sm:$0xff]  ;;  %v342_v61 = vld [vmem:[%s3310_s1 + $0x928] sm:$0xff] }
  0x82   :  { %1706 = vmatprep.subr.mxu0 %v259_v62  ;;  %1739 = vmatprep.subr.mxu1 %v292_v63  ;;  %v324_v62 = vld [vmem:[%s3310_s1 + $0x898] sm:$0xff]  ;;  %v357_v63 = vld [vmem:[%s3310_s1 + $0x9a0] sm:$0xff] }
  0x83   :  { %1707 = vmatpush3.msra.mxu0 %v243_v0  ;;  %1740 = vmatpush3.msra.mxu1 %v276_v1  ;;  %v308_v0 = vld [vmem:[%s3310_s1 + $0x818] sm:$0xff]  ;;  %v341_v1 = vld [vmem:[%s3310_s1 + $0x920] sm:$0xff] }
  0x84   :  { %1708 = vmatprep.subr.mxu0 %v258_v2  ;;  %1741 = vmatprep.subr.mxu1 %v291_v3  ;;  %v323_v2 = vld [vmem:[%s3310_s1 + $0x890] sm:$0xff]  ;;  %v356_v3 = vld [vmem:[%s3310_s1 + $0x998] sm:$0xff] }
  0x85   :  { %1709 = vmatpush3.msra.mxu0 %v242_v4  ;;  %1742 = vmatpush3.msra.mxu1 %v275_v5  ;;  %v307_v4 = vld [vmem:[%s3310_s1 + $0x810] sm:$0xff]  ;;  %v340_v5 = vld [vmem:[%s3310_s1 + $0x918] sm:$0xff] }
  0x86   :  { %1710 = vmatprep.subr.mxu0 %v257_v6  ;;  %1743 = vmatprep.subr.mxu1 %v290_v7  ;;  %v322_v6 = vld [vmem:[%s3310_s1 + $0x888] sm:$0xff]  ;;  %v355_v7 = vld [vmem:[%s3310_s1 + $0x990] sm:$0xff] }
  0x87   :  { %1711 = vmatpush3.msra.mxu0 %v241_v8  ;;  %907 = vmatprep.mubr.f32.mxu0 %v39_v9  ;;  %v306_v8 = vld [vmem:[%s3310_s1 + $0x808] sm:$0xff]  ;;  %v339_v9 = vld [vmem:[%s3310_s1 + $0x910] sm:$0xff] }
  0x88   :  { %1744 = vmatpush3.msra.mxu1 %v274_v10  ;;  %908 = vmatmul.mubr.f32.vlgmr.msra.gmra.mxu0 %v38_v11  ;;  %v321_v10 = vld [vmem:[%s3310_s1 + $0x880] sm:$0xff]  ;;  %v354_v11 = vld [vmem:[%s3310_s1 + $0x988] sm:$0xff] }
  0x89   :  { %1745 = vmatprep.subr.mxu1 %v289_v12  ;;  %1750 = vmatprep.subr.mxu0 %v336_v13  ;;  %v305_v12 = vld [vmem:[%s3310_s1 + $0x800] sm:$0xff]  ;;  %v43_v13 = vld [vmem:[%s3311_s0 + $0x88] sm:$0x3f] }
  0x8a   :  { %1746 = vmatpush3.msra.mxu1 %v273_v14  ;;  %977 = vmatprep.mubr.f32.mxu1 %v41_v15  ;;  %v338_v14 = vld [vmem:[%s3310_s1 + $0x908] sm:$0xff]  ;;  %v42_v15 = vld [vmem:[%s3311_s0 + $0x80] sm:$0x3f] }
  0x8b   :  { %1751 = vmatpush3.msra.mxu0 %v320_v16  ;;  %978 = vmatmul.mubr.f32.vlgmr.msra.gmra.mxu1 %v40_v17  ;;  %v353_v16 = vld [vmem:[%s3310_s1 + $0x980] sm:$0xff]  ;;  %v400_v17 = vld [vmem:[%s3310_s1 + $0xaf8] sm:$0xff] }
  0x8c   :  { %1752 = vmatprep.subr.mxu0 %v335_v18  ;;  %1785 = vmatprep.subr.mxu1 %v368_v19  ;;  %v337_v18 = vld [vmem:[%s3310_s1 + $0x900] sm:$0xff]  ;;  %v45_v19 = vld [vmem:[%s3311_s0 + $0x98] sm:$0x3f] }
  0x8d   :  { %1753 = vmatpush3.msra.mxu0 %v319_v20  ;;  %1786 = vmatpush3.msra.mxu1 %v352_v21  ;;  %v384_v20 = vld [vmem:[%s3310_s1 + $0xa78] sm:$0xff]  ;;  %v44_v21 = vld [vmem:[%s3311_s0 + $0x90] sm:$0x3f] }
  0x8e   :  { %1754 = vmatprep.subr.mxu0 %v334_v22  ;;  %1787 = vmatprep.subr.mxu1 %v367_v23  ;;  %v399_v22 = vld [vmem:[%s3310_s1 + $0xaf0] sm:$0xff] }
  0x8f   :  { %1755 = vmatpush3.msra.mxu0 %v318_v24  ;;  %1788 = vmatpush3.msra.mxu1 %v351_v25  ;;  %v383_v23 = vld [vmem:[%s3310_s1 + $0xa70] sm:$0xff]  ;;  %v398_v24 = vld [vmem:[%s3310_s1 + $0xae8] sm:$0xff] }
  0x90   :  { %1756 = vmatprep.subr.mxu0 %v333_v26  ;;  %1789 = vmatprep.subr.mxu1 %v366_v27  ;;  %v411_v25 = vld [vmem:[%s3310_s1 + $0xb50] sm:$0xff]  ;;  %v382_v26 = vld [vmem:[%s3310_s1 + $0xa68] sm:$0xff]  ;;  %v397_v27 = vld [vmem:[%s3310_s1 + $0xae0] sm:$0xff] }
  0x91   :  { %1757 = vmatpush3.msra.mxu0 %v317_v28  ;;  %1790 = vmatpush3.msra.mxu1 %v350_v29  ;;  %v1980_v28 = vmov 0.0   ;;  %v410_v29 = vld [vmem:[%s3310_s1 + $0xb48] sm:$0xff] }
  0x92   :  { %1758 = vmatprep.subr.mxu0 %v332_v30  ;;  %1791 = vmatprep.subr.mxu1 %v365_v31  ;;  %v381_v30 = vld [vmem:[%s3310_s1 + $0xa60] sm:$0xff]  ;;  %v396_v31 = vld [vmem:[%s3310_s1 + $0xad8] sm:$0xff] }
  0x93   :  { %1759 = vmatpush3.msra.mxu0 %v316_v32  ;;  %1792 = vmatpush3.msra.mxu1 %v349_v33  ;;  %v409_v32 = vld [vmem:[%s3310_s1 + $0xb40] sm:$0xff]  ;;  %v380_v33 = vld [vmem:[%s3310_s1 + $0xa58] sm:$0xff] }
  0x94   :  { %1760 = vmatprep.subr.mxu0 %v331_v34  ;;  %1793 = vmatprep.subr.mxu1 %v364_v35  ;;  %v395_v34 = vld [vmem:[%s3310_s1 + $0xad0] sm:$0xff]  ;;  %v408_v35 = vld [vmem:[%s3310_s1 + $0xb38] sm:$0xff] }
  0x95   :  { %1761 = vmatpush3.msra.mxu0 %v315_v36  ;;  %1794 = vmatpush3.msra.mxu1 %v348_v37  ;;  %v379_v36 = vld [vmem:[%s3310_s1 + $0xa50] sm:$0xff]  ;;  %v394_v37 = vld [vmem:[%s3310_s1 + $0xac8] sm:$0xff] }
  0x96   :  { %1762 = vmatprep.subr.mxu0 %v330_v38  ;;  %1795 = vmatprep.subr.mxu1 %v363_v39  ;;  %v407_v38 = vld [vmem:[%s3310_s1 + $0xb30] sm:$0xff]  ;;  %v378_v39 = vld [vmem:[%s3310_s1 + $0xa48] sm:$0xff] }
  0x97   :  { %1763 = vmatpush3.msra.mxu0 %v314_v40  ;;  %1796 = vmatpush3.msra.mxu1 %v347_v41  ;;  %v393_v40 = vld [vmem:[%s3310_s1 + $0xac0] sm:$0xff]  ;;  %v406_v41 = vld [vmem:[%s3310_s1 + $0xb28] sm:$0xff] }
  0x98   :  { %1764 = vmatprep.subr.mxu0 %v329_v42  ;;  %1797 = vmatprep.subr.mxu1 %v362_v43  ;;  %v377_v42 = vld [vmem:[%s3310_s1 + $0xa40] sm:$0xff]  ;;  %v392_v43 = vld [vmem:[%s3310_s1 + $0xab8] sm:$0xff] }
  0x99   :  { %1765 = vmatpush3.msra.mxu0 %v313_v44  ;;  %1798 = vmatpush3.msra.mxu1 %v346_v45  ;;  %v405_v44 = vld [vmem:[%s3310_s1 + $0xb20] sm:$0xff]  ;;  %v376_v45 = vld [vmem:[%s3310_s1 + $0xa38] sm:$0xff] }
  0x9a   :  { %1766 = vmatprep.subr.mxu0 %v328_v46  ;;  %1799 = vmatprep.subr.mxu1 %v361_v47  ;;  %v391_v46 = vld [vmem:[%s3310_s1 + $0xab0] sm:$0xff]  ;;  %v404_v47 = vld [vmem:[%s3310_s1 + $0xb18] sm:$0xff] }
  0x9b   :  { %1767 = vmatpush3.msra.mxu0 %v312_v48  ;;  %1800 = vmatpush3.msra.mxu1 %v345_v49  ;;  %v375_v48 = vld [vmem:[%s3310_s1 + $0xa30] sm:$0xff]  ;;  %v390_v49 = vld [vmem:[%s3310_s1 + $0xaa8] sm:$0xff] }
  0x9c   :  { %1768 = vmatprep.subr.mxu0 %v327_v50  ;;  %1801 = vmatprep.subr.mxu1 %v360_v51  ;;  %v47_v50 = vld [vmem:[%s3311_s0 + $0xa8] sm:$0x3f] }
  0x9d   :  { %1769 = vmatpush3.msra.mxu0 %v311_v52  ;;  %1802 = vmatpush3.msra.mxu1 %v344_v53  ;;  %v374_v51 = vld [vmem:[%s3310_s1 + $0xa28] sm:$0xff]  ;;  %v403_v52 = vld [vmem:[%s3310_s1 + $0xb10] sm:$0xff]  ;;  %v389_v53 = vld [vmem:[%s3310_s1 + $0xaa0] sm:$0xff] }
  0x9e   :  { %1770 = vmatprep.subr.mxu0 %v326_v54  ;;  %1803 = vmatprep.subr.mxu1 %v359_v55  ;;  %v373_v54 = vld [vmem:[%s3310_s1 + $0xa20] sm:$0xff]  ;;  %v402_v55 = vld [vmem:[%s3310_s1 + $0xb08] sm:$0xff] }
  0x9f   :  { %1771 = vmatpush3.msra.mxu0 %v310_v56  ;;  %1804 = vmatpush3.msra.mxu1 %v343_v57  ;;  %v388_v56 = vld [vmem:[%s3310_s1 + $0xa98] sm:$0xff] }
  0xa0   :  { %1772 = vmatprep.subr.mxu0 %v325_v58  ;;  %1805 = vmatprep.subr.mxu1 %v358_v59  ;;  %v372_v57 = vld [vmem:[%s3310_s1 + $0xa18] sm:$0xff]  ;;  %v401_v58 = vld [vmem:[%s3310_s1 + $0xb00] sm:$0xff]  ;;  %v387_v59 = vld [vmem:[%s3310_s1 + $0xa90] sm:$0xff] }
  0xa1   :  { %1773 = vmatpush3.msra.mxu0 %v309_v60  ;;  %1806 = vmatpush3.msra.mxu1 %v342_v61  ;;  %v371_v60 = vld [vmem:[%s3310_s1 + $0xa10] sm:$0xff] }
  0xa2   :  { %1774 = vmatprep.subr.mxu0 %v324_v62  ;;  %1807 = vmatprep.subr.mxu1 %v357_v63  ;;  %v48_v61 = vld [vmem:[%s3311_s0 + $0xb0] sm:$0x3f]  ;;  %v386_v62 = vld [vmem:[%s3310_s1 + $0xa88] sm:$0xff] }
  0xa3   :  { %1775 = vmatpush3.msra.mxu0 %v308_v0  ;;  %1808 = vmatpush3.msra.mxu1 %v341_v1  ;;  %v370_v63 = vld [vmem:[%s3310_s1 + $0xa08] sm:$0xff]  ;;  %v385_v0 = vld [vmem:[%s3310_s1 + $0xa80] sm:$0xff] }
  0xa4   :  { %1776 = vmatprep.subr.mxu0 %v323_v2  ;;  %1809 = vmatprep.subr.mxu1 %v356_v3  ;;  %v369_v1 = vld [vmem:[%s3310_s1 + $0xa00] sm:$0xff]  ;;  %v1278_v3 = vld [vmem:[%s3312_s3 + $0x70] sm:$0xff] }
  0xa5   :  { %1777 = vmatpush3.msra.mxu0 %v307_v4  ;;  %1810 = vmatpush3.msra.mxu1 %v340_v5  ;;  %v46_v2 = vld [vmem:[%s3311_s0 + $0xa0] sm:$0x3f]  ;;  %v1277_v4 = vld [vmem:[%s3312_s3 + $0x68] sm:$0xff] }
  0xa6   :  { %1778 = vmatprep.subr.mxu0 %v322_v6  ;;  %1811 = vmatprep.subr.mxu1 %v355_v7  ;;  %v1276_v5 = vld [vmem:[%s3312_s3 + $0x60] sm:$0xff]  ;;  %v1275_v6 = vld [vmem:[%s3312_s3 + $0x58] sm:$0xff]  ;;  %v1274_v7 = vld [vmem:[%s3312_s3 + $0x50] sm:$0xff] }
  0xa7   :  { %1779 = vmatpush3.msra.mxu0 %v306_v8  ;;  %1812 = vmatpush3.msra.mxu1 %v339_v9  ;;  %v1273_v8 = vld [vmem:[%s3312_s3 + $0x48] sm:$0xff]  ;;  %v1272_v9 = vld [vmem:[%s3312_s3 + $0x40] sm:$0xff] }
  0xa8   :  { %1780 = vmatprep.subr.mxu0 %v321_v10  ;;  %1813 = vmatprep.subr.mxu1 %v354_v11  ;;  %v1271_v10 = vld [vmem:[%s3312_s3 + $0x38] sm:$0xff]  ;;  %v1270_v11 = vld [vmem:[%s3312_s3 + $0x30] sm:$0xff] }
  0xa9   :  { %1781 = vmatpush3.msra.mxu0 %v305_v12  ;;  %1047 = vmatprep.mubr.f32.mxu0 %v43_v13  ;;  %v1269_v12 = vld [vmem:[%s3312_s3 + $0x28] sm:$0xff]  ;;  %v1268_v13 = vld [vmem:[%s3312_s3 + $0x20] sm:$0xff] }
  0xaa   :  { %1814 = vmatpush3.msra.mxu1 %v338_v14  ;;  %1048 = vmatmul.mubr.f32.vlgmr.msra.gmra.mxu0 %v42_v15  ;;  %v1267_v14 = vld [vmem:[%s3312_s3 + $0x18] sm:$0xff]  ;;  %v1266_v15 = vld [vmem:[%s3312_s3 + $0x10] sm:$0xff] }
  0xab   :  { %1815 = vmatprep.subr.mxu1 %v353_v16  ;;  %1820 = vmatprep.subr.mxu0 %v400_v17  ;;  %v1265_v16 = vld [vmem:[%s3312_s3 + $0x8] sm:$0xff]  ;;  %v1264_v17 = vld [vmem:[%s3312_s3] sm:$0xff] }
  0xac   :  { %1816 = vmatpush3.msra.mxu1 %v337_v18  ;;  %1117 = vmatprep.mubr.f32.mxu1 %v45_v19  ;;  %v1371_v18 = vld [vmem:[%s3313_s5 + $0x50] sm:$0xf]  ;;  %v1370_v19 = vld [vmem:[%s3313_s5 + $0x48] sm:$0xff] }
  0xad   :  { %1821 = vmatpush3.msra.mxu0 %v384_v20  ;;  %1118 = vmatmul.mubr.f32.vlgmr.msra.gmra.mxu1 %v44_v21  ;;  %v1369_v20 = vld [vmem:[%s3313_s5 + $0x40] sm:$0xff]  ;;  %v1368_v21 = vld [vmem:[%s3313_s5 + $0x38] sm:$0xff] }
  0xae   :  { %1822 = vmatprep.subr.mxu0 %v399_v22  ;;  %1895 = vmatprep.subr.mxu1 %v1980_v28  ;;  %v1367_v22 = vld [vmem:[%s3313_s5 + $0x30] sm:$0xff] }
  0xaf   :  { %1823 = vmatpush3.msra.mxu0 %v383_v23  ;;  %1896 = vmatpush3.msra.mxu1 %v411_v25  ;;  %v1366_v23 = vld [vmem:[%s3313_s5 + $0x28] sm:$0xff]  ;;  %v1364_v25 = vld [vmem:[%s3313_s5 + $0x18] sm:$0xff] }
  0xb0   :  { %1824 = vmatprep.subr.mxu0 %v398_v24  ;;  %1897 = vmatprep.subr.mxu1 %v1980_v28  ;;  %v1365_v24 = vld [vmem:[%s3313_s5 + $0x20] sm:$0xff] }
  0xb1   :  { %1825 = vmatpush3.msra.mxu0 %v382_v26  ;;  %1898 = vmatpush3.msra.mxu1 %v410_v29 }
  0xb2   :  { %1826 = vmatprep.subr.mxu0 %v397_v27  ;;  %1899 = vmatprep.subr.mxu1 %v1980_v28 }
  0xb3   :  { %1827 = vmatpush3.msra.mxu0 %v381_v30  ;;  %1900 = vmatpush3.msra.mxu1 %v409_v32 }
  0xb4   :  { %1828 = vmatprep.subr.mxu0 %v396_v31  ;;  %1901 = vmatprep.subr.mxu1 %v1980_v28 }
  0xb5   :  { %1829 = vmatpush3.msra.mxu0 %v380_v33  ;;  %1902 = vmatpush3.msra.mxu1 %v408_v35 }
  0xb6   :  { %1830 = vmatprep.subr.mxu0 %v395_v34  ;;  %1903 = vmatprep.subr.mxu1 %v1980_v28  ;;  %v1463_v34 = vld [vmem:[%s3314_s2] ss:$0 sm:$0xff] }
  0xb7   :  { %1831 = vmatpush3.msra.mxu0 %v379_v36  ;;  %1904 = vmatpush3.msra.mxu1 %v407_v38 }
  0xb8   :  { %1832 = vmatprep.subr.mxu0 %v394_v37  ;;  %1905 = vmatprep.subr.mxu1 %v1980_v28 }
  0xb9   :  { %1833 = vmatpush3.msra.mxu0 %v378_v39  ;;  %1906 = vmatpush3.msra.mxu1 %v406_v41 }
  0xba   :  { %1834 = vmatprep.subr.mxu0 %v393_v40  ;;  %1907 = vmatprep.subr.mxu1 %v1980_v28 }
  0xbb   :  { %1835 = vmatpush3.msra.mxu0 %v377_v42  ;;  %1908 = vmatpush3.msra.mxu1 %v405_v44 }
  0xbc   :  { %1836 = vmatprep.subr.mxu0 %v392_v43  ;;  %1909 = vmatprep.subr.mxu1 %v1980_v28 }
  0xbd   :  { %1837 = vmatpush3.msra.mxu0 %v376_v45  ;;  %1910 = vmatpush3.msra.mxu1 %v404_v47 }
  0xbe   :  { %1838 = vmatprep.subr.mxu0 %v391_v46  ;;  %1911 = vmatprep.subr.mxu1 %v1980_v28 }
  0xbf   :  { %1839 = vmatpush3.msra.mxu0 %v375_v48  ;;  %1187 = vmatprep.mubr.f32.mxu0 %v47_v50 }
  0xc0   :  { %1840 = vmatprep.subr.mxu0 %v390_v49  ;;  %1912 = vmatpush3.msra.mxu1 %v403_v52 }
  0xc1   :  { %1841 = vmatpush3.msra.mxu0 %v374_v51  ;;  %1913 = vmatprep.subr.mxu1 %v1980_v28 }
  0xc2   :  { %1842 = vmatprep.subr.mxu0 %v389_v53  ;;  %1914 = vmatpush3.msra.mxu1 %v402_v55 }
  0xc3   :  { %1843 = vmatpush3.msra.mxu0 %v373_v54  ;;  %1915 = vmatprep.subr.mxu1 %v1980_v28 }
  0xc4   :  { %1844 = vmatprep.subr.mxu0 %v388_v56  ;;  %1916 = vmatpush3.msra.mxu1 %v401_v58 }
  0xc5   :  { %1845 = vmatpush3.msra.mxu0 %v372_v57  ;;  %1917 = vmatprep.mubr.msk.f32.mxu1 %vm1981_vm1, %v1980_v28 }
  0xc6   :  { %1846 = vmatprep.subr.mxu0 %v387_v59  ;;  %1918 = vmatmul.mubr.msk.f32.vlgmr.msra.gmra.mxu1 %vm419_vm0, %v48_v61 }
  0xc7   :  { %1847 = vmatpush3.msra.mxu0 %v371_v60  ;;  %1920 = vmatprep.subr.mxu1 %v1980_v28 }
  0xc8   :  { %1848 = vmatprep.subr.mxu0 %v386_v62  ;;  %1950 = vmatprep.mubr.msk.f32.mxu1 %vm1981_vm1, %v1980_v28 }
  0xc9   :  { %1849 = vmatpush3.msra.mxu0 %v370_v63  ;;  %1921 = vmatpush3.msra.mxu1 %v1278_v3 }
  0xca   :  { %1850 = vmatprep.subr.mxu0 %v385_v0  ;;  %1922 = vmatprep.subr.mxu1 %v1980_v28 }
  0xcb   :  { %1851 = vmatpush3.msra.mxu0 %v369_v1  ;;  %1923 = vmatpush3.msra.mxu1 %v1277_v4 }
  0xcc   :  { %1188 = vmatmul.mubr.f32.vlgmr.msra.gmra.mxu0 %v46_v2  ;;  %1953 = vmatprep.subr.mxu0 %v1980_v28 }
  0xcd   :  { %1975 = vmatprep.mubr.msk.f32.mxu0 %vm1981_vm1, %v1980_v28  ;;  %1924 = vmatprep.subr.mxu1 %v1980_v28 }
  0xce   :  { %1925 = vmatpush3.msra.mxu1 %v1276_v5  ;;  %1954 = vmatpush3.msk.msra.mxu0 %vm1383_vm2, %v1371_v18 }
  0xcf   :  { %1926 = vmatprep.subr.mxu1 %v1980_v28  ;;  %1955 = vmatprep.subr.mxu0 %v1980_v28 }
  0xd0   :  { %1927 = vmatpush3.msra.mxu1 %v1275_v6  ;;  %1956 = vmatpush3.msra.mxu0 %v1370_v19 }
  0xd1   :  { %1928 = vmatprep.subr.mxu1 %v1980_v28  ;;  %1957 = vmatprep.subr.mxu0 %v1980_v28 }
  0xd2   :  { %1929 = vmatpush3.msra.mxu1 %v1274_v7  ;;  %1958 = vmatpush3.msra.mxu0 %v1369_v20  ;;  %v1467_v20 = vld [vmem:[%s3316_s6] ss:$0 sm:$0xff] }
  0xd3   :  { %1930 = vmatprep.subr.mxu1 %v1980_v28  ;;  %1959 = vmatprep.subr.mxu0 %v1980_v28 }
  0xd4   :  { %1931 = vmatpush3.msra.mxu1 %v1273_v8  ;;  %1960 = vmatpush3.msra.mxu0 %v1368_v21 }
  0xd5   :  { %1932 = vmatprep.subr.mxu1 %v1980_v28  ;;  %1961 = vmatprep.subr.mxu0 %v1980_v28 }
  0xd6   :  { %1933 = vmatpush3.msra.mxu1 %v1272_v9  ;;  %1962 = vmatpush3.msra.mxu0 %v1367_v22 }
  0xd7   :  { %1934 = vmatprep.subr.mxu1 %v1980_v28  ;;  %1963 = vmatprep.subr.mxu0 %v1980_v28 }
  0xd8   :  { %1935 = vmatpush3.msra.mxu1 %v1271_v10  ;;  %1964 = vmatpush3.msra.mxu0 %v1366_v23 }
  0xd9   :  { %1936 = vmatprep.subr.mxu1 %v1980_v28  ;;  %1965 = vmatprep.subr.mxu0 %v1980_v28 }
  0xda   :  { %1937 = vmatpush3.msra.mxu1 %v1270_v11  ;;  %1966 = vmatpush3.msra.mxu0 %v1365_v24 }
  0xdb   :  { %1938 = vmatprep.subr.mxu1 %v1980_v28  ;;  %1967 = vmatprep.subr.mxu0 %v1980_v28 }
  0xdc   :  { %1939 = vmatpush3.msra.mxu1 %v1269_v12  ;;  %1968 = vmatpush3.msra.mxu0 %v1364_v25  ;;  %v1363_v12 = vld [vmem:[%s3313_s5 + $0x10] sm:$0xff] }
  0xdd   :  { %1940 = vmatprep.subr.mxu1 %v1980_v28  ;;  %1969 = vmatprep.subr.mxu0 %v1980_v28 }
  0xde   :  { %1941 = vmatpush3.msra.mxu1 %v1268_v13  ;;  %1970 = vmatpush3.msra.mxu0 %v1363_v12  ;;  %v1362_v13 = vld [vmem:[%s3313_s5 + $0x8] sm:$0xff] }
  0xdf   :  { %1942 = vmatprep.subr.mxu1 %v1980_v28  ;;  %1971 = vmatprep.subr.mxu0 %v1980_v28 }
  0xe0   :  { %1943 = vmatpush3.msra.mxu1 %v1267_v14  ;;  %1972 = vmatpush3.msra.mxu0 %v1362_v13  ;;  %v1361_v14 = vld [vmem:[%s3313_s5] sm:$0xff] }
  0xe1   :  { %1944 = vmatprep.subr.mxu1 %v1980_v28  ;;  %1973 = vmatprep.subr.mxu0 %v1980_v28 }
  0xe2   :  { %1945 = vmatpush3.msra.mxu1 %v1266_v15  ;;  %v1502_v26 = vpop.f32.mrf.mxu0  ;;  %1974 = vmatpush3.msra.mxu0 %v1361_v14  ;;  %v1465_v15 = vld [vmem:[%s3315_s4] ss:$0 sm:$0xff] }
  0xe3   :  { %1946 = vmatprep.subr.mxu1 %v1980_v28 }
  0xe4   :  { %1947 = vmatpush3.msra.mxu1 %v1265_v16  ;;  %v1503_v29 = vpop.f32.mrf.mxu0 }
  0xe5   :  { %1948 = vmatprep.subr.mxu1 %v1980_v28  ;;  %v1537_v27 = vpop.f32.mrf.mxu1  ;;  %v1504_v32 = vadd.f32 %v1503_v29, %v1502_v26 }
  0xe6   :  { %1949 = vmatpush3.msra.mxu1 %v1264_v17 }
  0xe7   :  { %v1538_v30 = vpop.f32.mrf.mxu1  ;;  %v490_v36 = vadd.f32 %v1504_v32, %v1463_v34 }
  0xe8   :  { %v1539_v37 = vadd.f32 %v1538_v30, %v1537_v27 }
  0xea   :  { %v560_v42 = vadd.f32 %v1539_v37, %v490_v36 }
 0x104   :  { %v1572_v31 = vpop.f32.mrf.mxu0 }
 0x106   :  { %v1573_v35 = vpop.f32.mrf.mxu0 }
 0x107   :  { %v1607_v33 = vpop.f32.mrf.mxu1  ;;  %v1574_v40 = vadd.f32 %v1573_v35, %v1572_v31 }
 0x109   :  { %v1608_v38 = vpop.f32.mrf.mxu1  ;;  %v630_v44 = vadd.f32 %v1574_v40, %v560_v42 }
 0x10a   :  { %v1609_v45 = vadd.f32 %v1608_v38, %v1607_v33 }
 0x10c   :  { %v700_v50 = vadd.f32 %v1609_v45, %v630_v44 }
 0x126   :  { %v1642_v39 = vpop.f32.mrf.mxu0 }
 0x128   :  { %v1643_v43 = vpop.f32.mrf.mxu0 }
 0x129   :  { %v1677_v41 = vpop.f32.mrf.mxu1  ;;  %v1644_v48 = vadd.f32 %v1643_v43, %v1642_v39 }
 0x12b   :  { %v1678_v46 = vpop.f32.mrf.mxu1  ;;  %v770_v52 = vadd.f32 %v1644_v48, %v700_v50 }
 0x12c   :  { %v1679_v53 = vadd.f32 %v1678_v46, %v1677_v41 }
 0x12e   :  { %v840_v58 = vadd.f32 %v1679_v53, %v770_v52 }
 0x148   :  { %v1712_v47 = vpop.f32.mrf.mxu0 }
 0x14a   :  { %v1713_v51 = vpop.f32.mrf.mxu0 }
 0x14b   :  { %v1747_v49 = vpop.f32.mrf.mxu1  ;;  %v1714_v56 = vadd.f32 %v1713_v51, %v1712_v47 }
 0x14d   :  { %v1748_v54 = vpop.f32.mrf.mxu1  ;;  %v910_v60 = vadd.f32 %v1714_v56, %v840_v58 }
 0x14e   :  { %v1749_v61 = vadd.f32 %v1748_v54, %v1747_v49 }
 0x150   :  { %v980_v1 = vadd.f32 %v1749_v61, %v910_v60 }
 0x16a   :  { %v1782_v55 = vpop.f32.mrf.mxu0 }
 0x16c   :  { %v1783_v59 = vpop.f32.mrf.mxu0 }
 0x16d   :  { %v1817_v57 = vpop.f32.mrf.mxu1  ;;  %v1784_v63 = vadd.f32 %v1783_v59, %v1782_v55 }
 0x16f   :  { %v1818_v62 = vpop.f32.mrf.mxu1  ;;  %v1050_v3 = vadd.f32 %v1784_v63, %v980_v1 }
 0x170   :  { %v1819_v4 = vadd.f32 %v1818_v62, %v1817_v57 }
 0x172   :  { %v1120_v7 = vadd.f32 %v1819_v4, %v1050_v3 }
 0x186   :  { %v1259_v0 = vpop.f32.mrf.mxu1 }
 0x188   :  { %v1919_v2 = vpop.f32.mrf.mxu1 }
 0x18c   :  { %v1852_v5 = vpop.f32.mrf.mxu0 }
 0x18e   :  { %v1853_v6 = vpop.f32.mrf.mxu0 }
 0x18f   :  { %v1854_v8 = vadd.f32 %v1853_v6, %v1852_v5 }
 0x191   :  { %v1190_v9 = vadd.f32 %v1854_v8, %v1120_v7 }
 0x193   :  { %v1260_v10 = vadd.f32 %v1259_v0, %v1190_v9 }
 0x195   :  { %v1263_v11 = vmax.f32 %v1260_v10, 0.0 }
 0x197   :  { %1951 = vmatmul.mubr.msk.f32.vlgmr.msra.gmra.mxu1 %vm1286_vm3, %v1263_v11 }
 0x257   :  { %v1356_v16 = vpop.f32.mrf.mxu1 }
 0x258   :  { %v1357_v17 = vadd.f32 %v1465_v15, %v1356_v16 }
 0x259   :  { %v1952_v18 = vpop.f32.mrf.mxu1 }
 0x25a   :  { %v1360_v19 = vmax.f32 %v1357_v17, 0.0 }
 0x25c   :  { %1976 = vmatmul.mubr.msk.f32.vlgmr.msra.gmra.mxu0 %vm1379_vm4, %v1360_v19 }
 0x31c   :  { %v1453_v28 = vpop.f32.mrf.mxu0 }
 0x31d   :  { %v1454_v21 = vadd.f32 %v1467_v20, %v1453_v28 }
 0x31e   :  { %v1977_v22 = vpop.f32.mrf.mxu0 }
 0x31f   :  { %1458 = vst.msk [vmem:[%s3317_s7] sm:$0x3f] %vm1457_vm5, %v1454_v21 }

// kernel: autoencoder_forward.2
= control target key start
LH: loop header
LB: loop body
LE: loop exit
PB: predicated region body
PF: predicated region fallthrough
CT: control target
= control target key end

     0   :  { %s6479_s21 = smov 0   ;;  %s10898_s0 = inlined_call_operand.vmem [shape: f32[6,3,2500], index: 0, kind: input, shape index: {}]   ;;  %s10899_s1 = inlined_call_operand.vmem [shape: f32[6,27], index: 1, kind: input, shape index: {}]   ;;  %s10900_s2 = inlined_call_operand.vmem [shape: f32[6,1], index: 2, kind: input, shape index: {}]   ;;  %s10901_s3 = inlined_call_operand.vmem [shape: f32[24,54], index: 3, kind: input, shape index: {}]   ;;  %s10902_s4 = inlined_call_operand.vmem [shape: f32[24,1], index: 4, kind: input, shape index: {}]   ;;  %s10903_s5 = inlined_call_operand.vmem [shape: f32[2041,121], index: 5, kind: input, shape index: {}]   ;;  %s10904_s6 = inlined_call_operand.vmem [shape: f32[6,24,121], index: 6, kind: output, shape index: {}]  }
   0x1 LB: > { %s5568_s22 = sadd.s32 4294967295, %s6426_s21   ;;  %p5572_p0 = scmp.ge.s32.totalorder %s6426_s21, 1  ;;  %s6426_s21 = sphi %s6479_s21, %s16_s21  }
   0x2   : > { %p212_p1 = scmp.lt.s32.totalorder %s6426_s21, 7 }
   0x4   : > { %p213_p2 = pnand %p5572_p0, %p212_p1 }
   0x6   : > { %216 = sbr.rel (%p213_p2) target bundleno = 1640 (0x668), region = 44 }
   0xb   : > { %p242_p3 = scmp.lt.s32.totalorder %s5568_s22, 5  ;;  %s6428_s27 = smov 127   ;;  %v10905_v57 = vmov 0.0   ;;  %vm1006_vm0 = vcmask 211968   ;;  %vm1026_vm1 = vcmask 1042432   ;;  %vm828_vm2 = vcmask 228352  }
   0xc   : > { %s6429_s28 = smov 76   ;;  %s6430_s29 = smov 28   ;;  %1278 = vmatprep.mubr.f32.mxu1 %v10905_v57  ;;  %1420 = vmatprep.mubr.f32.mxu0 %v10905_v57  ;;  %vm729_vm3 = vcmask 621568   ;;  %vm1126_vm4 = vcmask 1041408   ;;  %vm927_vm5 = vcmask 220160   ;;  %vm1146_vm6 = vcmask 1044480  }
   0xd   : > { %s11105_s22 = smov (!%p242_p3, %s5568_s22), 5  ;;  %s6431_s30 = smov 26   ;;  %vm541_vm7 = vcmask 637952   ;;  %vm442_vm8 = vcmask 1031168   ;;  %vm630_vm9 = vcmask 629760   ;;  %vm1066_vm10 = vcmask 1040384  }
   0xe   : > { %s6031_s23 = smul.u32 80, %s11105_s22  ;;  %s6432_s7 = smov 126   ;;  %vm1086_vm11 = vcmask 1043456   ;;  %vm347_vm12 = vcmask 1039360   ;;  %vm1106_vm13 = vcmask 1046528   ;;  %vm1046_vm14 = vcmask 1045504  }
   0xf   : > { %s6433_s8 = smov 78   ;;  %s6434_s9 = smov 27   ;;  %vm6438_vm15 = vmmov 0  }
  0x10   : > { %s6493_s26 = scalar_lea.vmem %s10898_s0, %s6031_s23  ;;  %s6435_s10 = smov 77  }
  0x11   : > { %v6496_v0 = vld [vmem:[%s6493_s26 + $0x8] sm:$0x77]  ;;  %v6499_v1 = vld [vmem:[%s6493_s26] sm:$0x77]  ;;  %v6502_v2 = vld [vmem:[%s6493_s26 + $0x10] sm:$0x77] }
  0x12   : > { %v292_v3 = vrot.slane %v6496_v0, 5  ;;  %v290_v4 = vrot.slane %v6499_v1, 5  ;;  %v6508_v5 = vcombine.high %v6496_v0, %v6496_v0  ;;  %v294_v7 = vrot.slane %v6502_v2, 5  ;;  %v6519_v9 = vld [vmem:[%s6493_s26 + $0x18] sm:$0x77]  ;;  %s6439_s17 = smov 52  }
  0x13   : > { %v6516_v8 = vcombine.high %v6502_v2, %v6502_v2  ;;  %v296_v11 = vrot.slane %v6519_v9, 5  ;;  %v6527_v12 = vcombine.high %v6519_v9, %v6519_v9  ;;  %v6531_v13 = vcombine.high %v6499_v1, %v6499_v1  ;;  %v6534_v14 = vld [vmem:[%s6493_s26 + $0x20] sm:$0x77]  ;;  %v6545_v18 = vld [vmem:[%s6493_s26 + $0x28] sm:$0x77]  ;;  %s6440_s18 = smov 56  }
  0x14   : > { %313 = vrot.lane.b32.xlu1 %v292_v3, %s6428_s27  ;;  %309 = vrot.lane.b32.xlu0 %v290_v4, %s6428_s27  ;;  %v293_v6 = vrot.slane %v6508_v5, 5  ;;  %v6542_v17 = vcombine.high %v6534_v14, %v6534_v14  ;;  %v298_v20 = vrot.slane %v6534_v14, 5  ;;  %v6553_v21 = vcombine.high %v6545_v18, %v6545_v18  ;;  %v6556_v22 = vld [vmem:[%s6493_s26 + $0x30] sm:$0x77]  ;;  %v6567_v26 = vld [vmem:[%s6493_s26 + $0x38] sm:$0x77] }
  0x15   : > { %v295_v10 = vrot.slane %v6516_v8, 5  ;;  %v297_v15 = vrot.slane %v6527_v12, 5  ;;  %v291_v16 = vrot.slane %v6531_v13, 5  ;;  %v300_v24 = vrot.slane %v6545_v18, 5  ;;  %v6578_v30 = vld [vmem:[%s6493_s26 + $0x40] sm:$0x77] }
  0x16   : > { %v299_v19 = vrot.slane %v6542_v17, 5  ;;  %v301_v23 = vrot.slane %v6553_v21, 5  ;;  %v6564_v25 = vcombine.high %v6556_v22, %v6556_v22  ;;  %v302_v28 = vrot.slane %v6556_v22, 5  ;;  %v6593_v36 = vld [vmem:[%s6493_s26 + $0x48] sm:$0x77]  ;;  %s6441_s19 = smov 54  }
  0x17   : > { %v6575_v29 = vcombine.high %v6567_v26, %v6567_v26  ;;  %v304_v32 = vrot.slane %v6567_v26, 5  ;;  %v6586_v33 = vcombine.high %v6578_v30, %v6578_v30  ;;  %v306_v35 = vrot.slane %v6578_v30, 5  ;;  %s6442_s20 = smov 24   ;;  %s6443_s23 = smov 124  }
  0x18   : > { %315 = vrot.lane.b32.xlu1 %v293_v6, %s6428_s27  ;;  %317 = vrot.lane.b32.xlu0 %v294_v7, %s6428_s27  ;;  %v303_v27 = vrot.slane %v6564_v25, 5  ;;  %v670_v37 = vrot.slane %v6531_v13, 1  ;;  %v308_v38 = vrot.slane %v6593_v36, 5  ;;  %v769_v39 = vrot.slane %v6531_v13, 6  ;;  %s6032_s12 = smul.u32 24, %s11105_s22 }
  0x19   : > { %v305_v31 = vrot.slane %v6575_v29, 5  ;;  %v307_v34 = vrot.slane %v6586_v33, 5  ;;  %v671_v40 = vrot.slane %v6496_v0, 1  ;;  %v770_v41 = vrot.slane %v6496_v0, 6 }
  0x1a   : > { %v386_v42 = vrot.slane %v6531_v13, 2  ;;  %v482_v43 = vrot.slane %v6531_v13, 7  ;;  %v387_v44 = vrot.slane %v6496_v0, 2  ;;  %v669_v45 = vrot.slane %v6499_v1, 1 }
  0x1b   : > { %v483_v46 = vrot.slane %v6496_v0, 7  ;;  %v868_v47 = vrot.slane %v6531_v13, 3  ;;  %v768_v48 = vrot.slane %v6499_v1, 6  ;;  %v869_v49 = vrot.slane %v6496_v0, 3 }
  0x1c   : > { %319 = vrot.lane.b32.xlu1 %v295_v10, %s6428_s27  ;;  %321 = vrot.lane.b32.xlu0 %v296_v11, %s6428_s27  ;;  %v481_v50 = vrot.slane %v6499_v1, 7  ;;  %v385_v51 = vrot.slane %v6499_v1, 2  ;;  %v581_v52 = vcombine.low %v6496_v0, %v6496_v0  ;;  %v580_v53 = vcombine.low %v6499_v1, %v6499_v1 }
  0x1d   : > { %v867_v54 = vrot.slane %v6499_v1, 3  ;;  %v673_v55 = vrot.slane %v6502_v2, 1  ;;  %v672_v56 = vrot.slane %v6508_v5, 1  ;;  %v772_v58 = vrot.slane %v6502_v2, 6 }
  0x1e   : > { %v771_v59 = vrot.slane %v6508_v5, 6  ;;  %v389_v60 = vrot.slane %v6502_v2, 2  ;;  %v388_v61 = vrot.slane %v6508_v5, 2  ;;  %v485_v62 = vrot.slane %v6502_v2, 7 }
  0x1f   : > { %v484_v63 = vrot.slane %v6508_v5, 7  ;;  %v871_v3 = vrot.slane %v6502_v2, 3  ;;  %v870_v4 = vrot.slane %v6508_v5, 3  ;;  %v582_v6 = vcombine.low %v6502_v2, %v6502_v2 }
  0x20   : > { %323 = vrot.lane.b32.xlu1 %v297_v15, %s6428_s27  ;;  %311 = vrot.lane.b32.xlu0 %v291_v16, %s6428_s27  ;;  %v675_v7 = vrot.slane %v6519_v9, 1  ;;  %v674_v10 = vrot.slane %v6516_v8, 1  ;;  %v774_v11 = vrot.slane %v6519_v9, 6  ;;  %v773_v15 = vrot.slane %v6516_v8, 6 }
  0x24   : > { %327 = vrot.lane.b32.xlu1 %v299_v19, %s6428_s27  ;;  %325 = vrot.lane.b32.xlu0 %v298_v20, %s6428_s27  ;;  %v391_v20 = vrot.slane %v6519_v9, 2 }
  0x28   : > { %331 = vrot.lane.b32.xlu1 %v301_v23, %s6428_s27  ;;  %329 = vrot.lane.b32.xlu0 %v300_v24, %s6428_s27  ;;  %v390_v23 = vrot.slane %v6516_v8, 2 }
  0x2c   : > { %335 = vrot.lane.b32.xlu1 %v303_v27, %s6428_s27  ;;  %333 = vrot.lane.b32.xlu0 %v302_v28, %s6428_s27  ;;  %v487_v28 = vrot.slane %v6519_v9, 7 }
  0x30   : > { %339 = vrot.lane.b32.xlu1 %v305_v31, %s6428_s27  ;;  %337 = vrot.lane.b32.xlu0 %v304_v32, %s6428_s27  ;;  %v486_v31 = vrot.slane %v6516_v8, 7 }
  0x34   : > { %343 = vrot.lane.b32.xlu1 %v307_v34, %s6428_s27  ;;  %341 = vrot.lane.b32.xlu0 %v306_v35, %s6428_s27  ;;  %v873_v35 = vrot.slane %v6519_v9, 3 }
  0x38   : > { %691 = vrot.lane.b32.xlu1 %v670_v37, %s6429_s28  ;;  %345 = vrot.lane.b32.xlu0 %v308_v38, %s6428_s27  ;;  %v872_v37 = vrot.slane %v6516_v8, 3 }
  0x3c   : > { %790 = vrot.lane.b32.xlu1 %v769_v39, %s6430_s29  ;;  %693 = vrot.lane.b32.xlu0 %v671_v40, %s6429_s28  ;;  %v583_v40 = vcombine.low %v6519_v9, %v6519_v9 }
  0x40   : > { %968 = vrot.lane.b32.xlu1 %v6531_v13, %s6431_s30  ;;  %792 = vrot.lane.b32.xlu0 %v770_v41, %s6430_s29 }
  0x44   : > { %406 = vrot.lane.b32.xlu1 %v386_v42, %s6432_s7  ;;  %970 = vrot.lane.b32.xlu0 %v6496_v0, %s6431_s30 }
  0x48   : > { %503 = vrot.lane.b32.xlu1 %v482_v43, %s6433_s8  ;;  %408 = vrot.lane.b32.xlu0 %v387_v44, %s6432_s7  ;;  %v677_v43 = vrot.slane %v6534_v14, 1  ;;  %v676_v44 = vrot.slane %v6527_v12, 1 }
  0x4c   : > { %689 = vrot.lane.b32.xlu1 %v669_v45, %s6429_s28  ;;  %505 = vrot.lane.b32.xlu0 %v483_v46, %s6433_s8 }
  0x50   : > { %889 = vrot.lane.b32.xlu1 %v868_v47, %s6434_s9  ;;  %788 = vrot.lane.b32.xlu0 %v768_v48, %s6430_s29  ;;  %v776_v47 = vrot.slane %v6534_v14, 6  ;;  %v775_v48 = vrot.slane %v6527_v12, 6 }
  0x54   : > { %966 = vrot.lane.b32.xlu1 %v6499_v1, %s6431_s30  ;;  %891 = vrot.lane.b32.xlu0 %v869_v49, %s6434_s9 }
  0x58   : > { %501 = vrot.lane.b32.xlu1 %v481_v50, %s6433_s8  ;;  %404 = vrot.lane.b32.xlu0 %v385_v51, %s6432_s7 }
  0x5c   : > { %594 = vrot.lane.b32.xlu1 %v581_v52, %s6435_s10  ;;  %592 = vrot.lane.b32.xlu0 %v6499_v1, %s6435_s10 }
  0x60   : > { %590 = vrot.lane.b32.xlu1 %v580_v53, %s6435_s10  ;;  %887 = vrot.lane.b32.xlu0 %v867_v54, %s6434_s9  ;;  %v393_v53 = vrot.slane %v6534_v14, 2  ;;  %v392_v54 = vrot.slane %v6527_v12, 2 }
  0x64   : > { %697 = vrot.lane.b32.xlu1 %v673_v55, %s6429_s28  ;;  %695 = vrot.lane.b32.xlu0 %v672_v56, %s6429_s28 }
  0x68   : > { %796 = vrot.lane.b32.xlu1 %v772_v58, %s6430_s29  ;;  %794 = vrot.lane.b32.xlu0 %v771_v59, %s6430_s29  ;;  %v489_v58 = vrot.slane %v6534_v14, 7  ;;  %v488_v59 = vrot.slane %v6527_v12, 7 }
  0x6c   : > { %974 = vrot.lane.b32.xlu1 %v6502_v2, %s6431_s30  ;;  %972 = vrot.lane.b32.xlu0 %v6508_v5, %s6431_s30 }
  0x70   : > { %412 = vrot.lane.b32.xlu1 %v389_v60, %s6432_s7  ;;  %410 = vrot.lane.b32.xlu0 %v388_v61, %s6432_s7 }
  0x74   : > { %509 = vrot.lane.b32.xlu1 %v485_v62, %s6433_s8  ;;  %507 = vrot.lane.b32.xlu0 %v484_v63, %s6433_s8  ;;  %v875_v62 = vrot.slane %v6534_v14, 3  ;;  %v874_v63 = vrot.slane %v6527_v12, 3 }
  0x78   : > { %895 = vrot.lane.b32.xlu1 %v871_v3, %s6434_s9  ;;  %893 = vrot.lane.b32.xlu0 %v870_v4, %s6434_s9 }
  0x7c   : > { %598 = vrot.lane.b32.xlu1 %v582_v6, %s6435_s10  ;;  %596 = vrot.lane.b32.xlu0 %v6496_v0, %s6435_s10  ;;  %v584_v6 = vcombine.low %v6534_v14, %v6534_v14 }
  0x80   : > { %701 = vrot.lane.b32.xlu1 %v675_v7, %s6429_s28  ;;  %699 = vrot.lane.b32.xlu0 %v674_v10, %s6429_s28 }
  0x84   : > { %800 = vrot.lane.b32.xlu1 %v774_v11, %s6430_s29  ;;  %798 = vrot.lane.b32.xlu0 %v773_v15, %s6430_s29  ;;  %v679_v11 = vrot.slane %v6545_v18, 1  ;;  %v678_v15 = vrot.slane %v6542_v17, 1 }
  0x86   : > { %v6682_v16 = vpop.permute.xlu1 %313  ;;  %v6684_v19 = vpop.permute.xlu0 %309 }
  0x88   : > { %978 = vrot.lane.b32.xlu1 %v6519_v9, %s6431_s30  ;;  %976 = vrot.lane.b32.xlu0 %v6516_v8, %s6431_s30 }
  0x8a   : > { %v6692_v24 = vpop.permute.xlu1 %315  ;;  %v6694_v27 = vpop.permute.xlu0 %317 }
  0x8c   : > { %416 = vrot.lane.b32.xlu1 %v391_v20, %s6432_s7  ;;  %414 = vrot.lane.b32.xlu0 %v390_v23, %s6432_s7 }
  0x8e   : > { %v6700_v32 = vpop.permute.xlu1 %319  ;;  %v6702_v34 = vpop.permute.xlu0 %321 }
  0x90   : > { %513 = vrot.lane.b32.xlu1 %v487_v28, %s6433_s8  ;;  %511 = vrot.lane.b32.xlu0 %v486_v31, %s6433_s8  ;;  %v778_v31 = vrot.slane %v6545_v18, 6 }
  0x92   : > { %v6708_v38 = vpop.permute.xlu1 %323  ;;  %v6710_v39 = vpop.permute.xlu0 %311 }
  0x94   : > { %899 = vrot.lane.b32.xlu1 %v873_v35, %s6434_s9  ;;  %897 = vrot.lane.b32.xlu0 %v872_v37, %s6434_s9 }
  0x96   : > { %v6716_v41 = vpop.permute.xlu1 %327  ;;  %v6718_v42 = vpop.permute.xlu0 %325 }
  0x98   : > { %602 = vrot.lane.b32.xlu1 %v583_v40, %s6435_s10  ;;  %600 = vrot.lane.b32.xlu0 %v6502_v2, %s6435_s10 }
  0x9a   : > { %v6725_v45 = vpop.permute.xlu1 %331  ;;  %v6727_v46 = vpop.permute.xlu0 %329 }
  0x9c   : > { %705 = vrot.lane.b32.xlu1 %v677_v43, %s6429_s28  ;;  %703 = vrot.lane.b32.xlu0 %v676_v44, %s6429_s28  ;;  %v395_v44 = vrot.slane %v6545_v18, 2 }
  0x9e   : > { %v6733_v49 = vpop.permute.xlu1 %335  ;;  %v6735_v50 = vpop.permute.xlu0 %333 }
  0xa0   : > { %804 = vrot.lane.b32.xlu1 %v776_v47, %s6430_s29  ;;  %802 = vrot.lane.b32.xlu0 %v775_v48, %s6430_s29  ;;  %v394_v47 = vrot.slane %v6542_v17, 2 }
  0xa2   : > { %v6739_v51 = vpop.permute.xlu1 %339  ;;  %v6741_v52 = vpop.permute.xlu0 %337 }
  0xa3   : > { %10986 = vst [vmem:[#allocation2_spill] sm:$0xff] %v6739_v51 }
  0xa4   : > { %982 = vrot.lane.b32.xlu1 %v6534_v14, %s6431_s30  ;;  %980 = vrot.lane.b32.xlu0 %v6527_v12, %s6431_s30 }
  0xa6   : > { %v6749_v55 = vpop.permute.xlu1 %343  ;;  %v6751_v56 = vpop.permute.xlu0 %341 }
  0xa7   : > { %10987 = vst [vmem:[#allocation3_spill] sm:$0xff] %v6749_v55 }
  0xa8   : > { %420 = vrot.lane.b32.xlu1 %v393_v53, %s6432_s7  ;;  %418 = vrot.lane.b32.xlu0 %v392_v54, %s6432_s7 }
  0xaa   : > { %v6757_v60 = vpop.permute.xlu1 %691  ;;  %v6759_v61 = vpop.permute.xlu0 %345 }
  0xab   : > { %10988 = vst [vmem:[#allocation4_spill] sm:$0xff] %v6759_v61 }
  0xac   : > { %517 = vrot.lane.b32.xlu1 %v489_v58, %s6433_s8  ;;  %515 = vrot.lane.b32.xlu0 %v488_v59, %s6433_s8  ;;  %v491_v58 = vrot.slane %v6545_v18, 7  ;;  %v490_v59 = vrot.slane %v6542_v17, 7 }
  0xae   : > { %v6765_v3 = vpop.permute.xlu1 %790  ;;  %v6767_v4 = vpop.permute.xlu0 %693 }
  0xb0   : > { %903 = vrot.lane.b32.xlu1 %v875_v62, %s6434_s9  ;;  %901 = vrot.lane.b32.xlu0 %v874_v63, %s6434_s9  ;;  %v731_v62 = vsel %vm729_vm3, %v6757_v60, %v6767_v4 }
  0xb2   : > { %v969_v7 = vpop.permute.xlu1 %968  ;;  %v6773_v10 = vpop.permute.xlu0 %792 }
  0xb3   : > { %v830_v54 = vsel %vm828_vm2, %v6765_v3, %v6773_v10 }
  0xb4   : > { %606 = vrot.lane.b32.xlu1 %v584_v6, %s6435_s10  ;;  %604 = vrot.lane.b32.xlu0 %v6519_v9, %s6435_s10  ;;  %v777_v9 = vrot.slane %v6542_v17, 6 }
  0xb6   : > { %v6780_v20 = vpop.permute.xlu1 %406  ;;  %v6782_v23 = vpop.permute.xlu0 %970 }
  0xb7   : > { %v1008_v28 = vsel %vm1006_vm0, %v969_v7, %v6782_v23 }
  0xb8   : > { %709 = vrot.lane.b32.xlu1 %v679_v11, %s6429_s28  ;;  %707 = vrot.lane.b32.xlu0 %v678_v15, %s6429_s28 }
  0xb9   : > { %5575 = vmatprep.subr.msk.mxu1 %vm1026_vm1, %v1008_v28  ;;  %v1128_v28 = vsel %vm1126_vm4, %v731_v62, %v830_v54 }
  0xba   : > { %v504_v35 = vpop.permute.xlu1 %503  ;;  %v6791_v37 = vpop.permute.xlu0 %408 }
  0xbc   : > { %808 = vrot.lane.b32.xlu1 %v778_v31, %s6430_s29  ;;  %806 = vrot.lane.b32.xlu0 %v777_v9, %s6430_s29  ;;  %v877_v9 = vrot.slane %v6545_v18, 3 }
  0xbe   : > { %v690_v40 = vpop.permute.xlu1 %689  ;;  %v6795_v43 = vpop.permute.xlu0 %505 }
  0xbf   : > { %v543_v54 = vsel %vm541_vm7, %v504_v35, %v6795_v43  ;;  %v730_v61 = vsel %vm729_vm3, %v690_v40, %v6757_v60  ;;  %v349_v60 = vsel %vm347_vm12, %v6710_v39, %v6682_v16 }
  0xc0   : > { %986 = vrot.lane.b32.xlu1 %v6545_v18, %s6431_s30  ;;  %984 = vrot.lane.b32.xlu0 %v6542_v17, %s6431_s30 }
  0xc2   : > { %v890_v48 = vpop.permute.xlu1 %889  ;;  %v789_v53 = vpop.permute.xlu0 %788 }
  0xc4   : > { %424 = vrot.lane.b32.xlu1 %v395_v44, %s6432_s7  ;;  %422 = vrot.lane.b32.xlu0 %v394_v47, %s6432_s7  ;;  %v876_v44 = vrot.slane %v6542_v17, 3 }
  0xc6   : > { %v967_v63 = vpop.permute.xlu1 %966  ;;  %v6813_v6 = vpop.permute.xlu0 %891 }
  0xc7   : > { %v929_v11 = vsel %vm927_vm5, %v890_v48, %v6813_v6  ;;  %v1007_v15 = vsel %vm1006_vm0, %v967_v63, %v969_v7  ;;  %v585_v7 = vcombine.low %v6545_v18, %v6545_v18  ;;  %v444_v63 = vsel %vm442_vm8, %v6780_v20, %v6791_v37 }
  0xc8   : > { %521 = vrot.lane.b32.xlu1 %v491_v58, %s6433_s8  ;;  %519 = vrot.lane.b32.xlu0 %v490_v59, %s6433_s8  ;;  %v1148_v31 = vsel %vm1146_vm6, %v1128_v28, %v929_v11  ;;  %v829_v28 = vsel %vm828_vm2, %v789_v53, %v6765_v3  ;;  %v1068_v55 = vsel %vm1066_vm10, %v444_v63, %v543_v54  ;;  %v779_v54 = vrot.slane %v6553_v21, 6 }
  0xc9   : > { %5576 = vmatpush1.msk.msra.mxu1 %vm1026_vm1, %v1007_v15  ;;  %v681_v15 = vrot.slane %v6556_v22, 1 }
  0xca   : > { %1240 = vmatprep.subr.mxu1 %v1148_v31  ;;  %v502_v47 = vpop.permute.xlu1 %501  ;;  %v405_v57 = vpop.permute.xlu0 %404 }
  0xcb   : > { %v542_v31 = vsel %vm541_vm7, %v502_v47, %v504_v35 }
  0xcc   : > { %907 = vrot.lane.b32.xlu1 %v877_v9, %s6434_s9  ;;  %905 = vrot.lane.b32.xlu0 %v876_v44, %s6434_s9  ;;  %v443_v9 = vsel %vm442_vm8, %v405_v57, %v6780_v20  ;;  %v680_v44 = vrot.slane %v6553_v21, 1  ;;  %v780_v57 = vrot.slane %v6556_v22, 6  ;;  %v6437_v20 = vmov 0  }
  0xcd   : > { %6057 = vset.pattern.permute.xlu0 %v6437_v20  ;;  %6058 = vset.pattern.permute.xlu1 %v6437_v20  ;;  %v493_v20 = vrot.slane %v6556_v22, 7 }
  0xce   : > { %v6831_v58 = vpop.permute.xlu1 %594  ;;  %v593_v59 = vpop.permute.xlu0 %592 }
  0xcf   : > { %v632_v11 = vsel %vm630_vm9, %v593_v59, %v6831_v58 }
  0xd0   : > { %610 = vrot.lane.b32.xlu1 %v585_v7, %s6435_s10  ;;  %608 = vrot.lane.b32.xlu0 %v6534_v14, %s6435_s10  ;;  %v1088_v35 = vsel %vm1086_vm11, %v1068_v55, %v632_v11  ;;  %v1067_v14 = vsel %vm1066_vm10, %v443_v9, %v542_v31  ;;  %v1127_v7 = vsel %vm1126_vm4, %v730_v61, %v829_v28 }
  0xd1   : > { %v1028_v28 = vsel %vm1026_vm1, %v6531_v13, %v349_v60 }
  0xd2   : > { %v591_v51 = vpop.permute.xlu1 %590  ;;  %v888_v3 = vpop.permute.xlu0 %887 }
  0xd3   : > { %v631_v53 = vsel %vm630_vm9, %v591_v51, %v593_v59  ;;  %v928_v47 = vsel %vm927_vm5, %v888_v3, %v890_v48  ;;  %v348_v51 = vsel %vm347_vm12, %v6684_v19, %v6710_v39  ;;  %v1108_v48 = vsel %vm1106_vm13, %v1088_v35, %v731_v62 }
  0xd4   : > { %713 = vrot.lane.b32.xlu1 %v681_v15, %s6429_s28  ;;  %711 = vrot.lane.b32.xlu0 %v680_v44, %s6429_s28  ;;  %v1147_v55 = vsel %vm1146_vm6, %v1127_v7, %v928_v47  ;;  %v1087_v40 = vsel %vm1086_vm11, %v1067_v14, %v631_v53  ;;  %v1048_v19 = vsel %vm1046_vm14, %v1028_v28, %v444_v63  ;;  %v396_v63 = vrot.slane %v6553_v21, 2 }
  0xd5   : > { %1241 = vmatpush1.msra.mxu1 %v1147_v55  ;;  %v1107_v59 = vsel %vm1106_vm13, %v1087_v40, %v730_v61  ;;  %v1027_v39 = vsel %vm1026_vm1, %v6499_v1, %v348_v51  ;;  %v6882_v61 = vld [vmem:[%s10899_s1] sm:$0x3f]  ;;  %v397_v1 = vrot.slane %v6556_v22, 2  ;;  %v10989_v44 = vmov 0.0  }
  0xd6   : > { %v6870_v11 = vpop.permute.xlu1 %697  ;;  %1242 = vmatprep.subr.mxu1 %v1108_v48  ;;  %v696_v15 = vpop.permute.xlu0 %695  ;;  %v1047_v62 = vsel %vm1046_vm14, %v1027_v39, %v443_v9  ;;  %v492_v14 = vrot.slane %v6553_v21, 7  ;;  %v878_v7 = vrot.slane %v6553_v21, 3  ;;  %v586_v51 = vcombine.low %v6556_v22, %v6556_v22 }
  0xd7   : > { %1243 = vmatpush1.msra.mxu1 %v1107_v59  ;;  %v733_v48 = vsel %vm729_vm3, %v696_v15, %v6870_v11  ;;  %v732_v59 = vsel %vm729_vm3, %v6767_v4, %v696_v15 }
  0xd8   : > { %812 = vrot.lane.b32.xlu1 %v780_v57, %s6430_s29  ;;  %810 = vrot.lane.b32.xlu0 %v779_v54, %s6430_s29 }
  0xd9   : > { %1244 = vmatprep.subr.mxu1 %v1048_v19 }
  0xda   : > { %1245 = vmatpush1.msra.mxu1 %v1047_v62  ;;  %v6885_v31 = vpop.permute.xlu1 %796  ;;  %v795_v13 = vpop.permute.xlu0 %794 }
  0xdb   : > { %5577 = vmatmul.mubr.msk.f32.vlgmr.msra.gmra.mxu1 %vm927_vm5, %v6882_v61  ;;  %v832_v40 = vsel %vm828_vm2, %v795_v13, %v6885_v31  ;;  %v831_v54 = vsel %vm828_vm2, %v6773_v10, %v795_v13  ;;  %v683_v10 = vrot.slane %v6567_v26, 1 }
  0xdc   : > { %990 = vrot.lane.b32.xlu1 %v6556_v22, %s6431_s30  ;;  %988 = vrot.lane.b32.xlu0 %v6553_v21, %s6431_s30  ;;  %v1130_v39 = vsel %vm1126_vm4, %v733_v48, %v832_v40 }
  0xdd   : > { %1349 = vmatprep.mubr.f32.mxu1 %v10989_v44 }
  0xde   : > { %v6896_v9 = vpop.permute.xlu1 %974  ;;  %v973_v3 = vpop.permute.xlu0 %972 }
  0xdf   : > { %v1009_v35 = vsel %vm1006_vm0, %v6782_v23, %v973_v3  ;;  %v1010_v57 = vsel %vm1006_vm0, %v973_v3, %v6896_v9  ;;  %v879_v23 = vrot.slane %v6556_v22, 3  ;;  %v682_v3 = vrot.slane %v6564_v25, 1 }
  0xe0   : > { %428 = vrot.lane.b32.xlu1 %v397_v1, %s6432_s7  ;;  %426 = vrot.lane.b32.xlu0 %v396_v63, %s6432_s7  ;;  %v1129_v63 = vsel %vm1126_vm4, %v732_v59, %v831_v54  ;;  %v781_v54 = vrot.slane %v6564_v25, 6 }
  0xe1   : > { %5578 = vmatprep.subr.msk.mxu1 %vm1026_vm1, %v1010_v57 }
  0xe2   : > { %5579 = vmatpush1.msk.msra.mxu1 %vm1026_vm1, %v1009_v35  ;;  %v6908_v53 = vpop.permute.xlu1 %412  ;;  %v411_v47 = vpop.permute.xlu0 %410 }
  0xe3   : > { %v446_v35 = vsel %vm442_vm8, %v411_v47, %v6908_v53 }
  0xe4   : > { %525 = vrot.lane.b32.xlu1 %v493_v20, %s6433_s8  ;;  %523 = vrot.lane.b32.xlu0 %v492_v14, %s6433_s8  ;;  %v782_v14 = vrot.slane %v6567_v26, 6 }
  0xe6   : > { %v6914_v60 = vpop.permute.xlu1 %509  ;;  %v508_v55 = vpop.permute.xlu0 %507 }
  0xe7   : > { %v544_v62 = vsel %vm541_vm7, %v6795_v43, %v508_v55  ;;  %v545_v4 = vsel %vm541_vm7, %v508_v55, %v6914_v60 }
  0xe8   : > { %911 = vrot.lane.b32.xlu1 %v879_v23, %s6434_s9  ;;  %909 = vrot.lane.b32.xlu0 %v878_v7, %s6434_s9  ;;  %v1070_v23 = vsel %vm1066_vm10, %v446_v35, %v545_v4 }
  0xea   : > { %v6928_v28 = vpop.permute.xlu1 %895  ;;  %v894_v19 = vpop.permute.xlu0 %893 }
  0xeb   : > { %v930_v13 = vsel %vm927_vm5, %v6813_v6, %v894_v19  ;;  %v931_v1 = vsel %vm927_vm5, %v894_v19, %v6928_v28  ;;  %v445_v6 = vsel %vm442_vm8, %v6791_v37, %v411_v47  ;;  %v351_v37 = vsel %vm347_vm12, %v6692_v24, %v6694_v27 }
  0xec   : > { %614 = vrot.lane.b32.xlu1 %v586_v51, %s6435_s10  ;;  %612 = vrot.lane.b32.xlu0 %v6545_v18, %s6435_s10  ;;  %v1150_v15 = vsel %vm1146_vm6, %v1130_v39, %v931_v1  ;;  %v1149_v43 = vsel %vm1146_vm6, %v1129_v63, %v930_v13  ;;  %v1069_v18 = vsel %vm1066_vm10, %v445_v6, %v544_v62 }
  0xed   : > { %1311 = vmatprep.subr.mxu1 %v1150_v15  ;;  %v1030_v62 = vsel %vm1026_vm1, %v6508_v5, %v351_v37  ;;  %v399_v5 = vrot.slane %v6567_v26, 2 }
  0xee   : > { %v6951_v57 = vpop.permute.xlu1 %598  ;;  %1312 = vmatpush1.msra.mxu1 %v1149_v43  ;;  %v597_v20 = vpop.permute.xlu0 %596  ;;  %v1050_v13 = vsel %vm1046_vm14, %v1030_v62, %v446_v35  ;;  %v495_v43 = vrot.slane %v6567_v26, 7 }
  0xef   : > { %v633_v7 = vsel %vm630_vm9, %v6831_v58, %v597_v20  ;;  %v634_v55 = vsel %vm630_vm9, %v597_v20, %v6951_v57  ;;  %v350_v58 = vsel %vm347_vm12, %v6682_v16, %v6692_v24  ;;  %v880_v20 = vrot.slane %v6564_v25, 3 }
  0xf0   : > { %717 = vrot.lane.b32.xlu1 %v683_v10, %s6429_s28  ;;  %715 = vrot.lane.b32.xlu0 %v682_v3, %s6429_s28  ;;  %v1090_v47 = vsel %vm1086_vm11, %v1070_v23, %v634_v55  ;;  %v1089_v40 = vsel %vm1086_vm11, %v1069_v18, %v633_v7  ;;  %v1029_v16 = vsel %vm1026_vm1, %v6496_v0, %v350_v58  ;;  %v398_v0 = vrot.slane %v6564_v25, 2 }
  0xf1   : > { %v1110_v51 = vsel %vm1106_vm13, %v1090_v47, %v733_v48  ;;  %v1109_v19 = vsel %vm1106_vm13, %v1089_v40, %v732_v59  ;;  %v1049_v24 = vsel %vm1046_vm14, %v1029_v16, %v445_v6  ;;  %v494_v3 = vrot.slane %v6564_v25, 7 }
  0xf2   : > { %v6973_v39 = vpop.permute.xlu1 %701  ;;  %1313 = vmatprep.subr.mxu1 %v1110_v51  ;;  %v700_v10 = vpop.permute.xlu0 %699  ;;  %v587_v55 = vcombine.low %v6567_v26, %v6567_v26  ;;  %v684_v16 = vrot.slane %v6575_v29, 1 }
  0xf3   : > { %1314 = vmatpush1.msra.mxu1 %v1109_v19  ;;  %v735_v37 = vsel %vm729_vm3, %v700_v10, %v6973_v39  ;;  %v734_v47 = vsel %vm729_vm3, %v6870_v11, %v700_v10 }
  0xf4   : > { %816 = vrot.lane.b32.xlu1 %v782_v14, %s6430_s29  ;;  %814 = vrot.lane.b32.xlu0 %v781_v54, %s6430_s29 }
  0xf5   : > { %1315 = vmatprep.subr.mxu1 %v1050_v13 }
  0xf6   : > { %1316 = vmatpush1.msra.mxu1 %v1049_v24  ;;  %v6983_v48 = vpop.permute.xlu1 %800  ;;  %v799_v59 = vpop.permute.xlu0 %798 }
  0xf7   : > { %5580 = vmatmul.mubr.msk.f32.vlgmr.msra.gmra.mxu1 %vm927_vm5, %v6882_v61  ;;  %v834_v23 = vsel %vm828_vm2, %v799_v59, %v6983_v48  ;;  %v833_v7 = vsel %vm828_vm2, %v6885_v31, %v799_v59  ;;  %v685_v31 = vrot.slane %v6578_v30, 1 }
  0xf8   : > { %994 = vrot.lane.b32.xlu1 %v6567_v26, %s6431_s30  ;;  %992 = vrot.lane.b32.xlu0 %v6564_v25, %s6431_s30  ;;  %v1132_v58 = vsel %vm1126_vm4, %v735_v37, %v834_v23  ;;  %v1131_v13 = vsel %vm1126_vm4, %v734_v47, %v833_v7 }
  0xf9   : > { %1491 = vmatprep.mubr.f32.mxu1 %v10989_v44 }
  0xfa   : > { %v6994_v1 = vpop.permute.xlu1 %978  ;;  %v977_v63 = vpop.permute.xlu0 %976 }
  0xfb   : > { %v1012_v4 = vsel %vm1006_vm0, %v977_v63, %v6994_v1  ;;  %v1011_v15 = vsel %vm1006_vm0, %v6896_v9, %v977_v63  ;;  %v881_v9 = vrot.slane %v6567_v26, 3 }
  0xfc   : > { %432 = vrot.lane.b32.xlu1 %v399_v5, %s6432_s7  ;;  %430 = vrot.lane.b32.xlu0 %v398_v0, %s6432_s7 }
  0xfd   : > { %5581 = vmatprep.subr.msk.mxu0 %vm1026_vm1, %v1012_v4 }
  0xfe   : > { %5582 = vmatpush1.msk.msra.mxu0 %vm1026_vm1, %v1011_v15  ;;  %v7006_v6 = vpop.permute.xlu1 %416  ;;  %v415_v35 = vpop.permute.xlu0 %414 }
  0xff   : > { %v447_v24 = vsel %vm442_vm8, %v6908_v53, %v415_v35  ;;  %v448_v59 = vsel %vm442_vm8, %v415_v35, %v7006_v6  ;;  %v783_v35 = vrot.slane %v6575_v29, 6 }
 0x100   : > { %529 = vrot.lane.b32.xlu1 %v495_v43, %s6433_s8  ;;  %527 = vrot.lane.b32.xlu0 %v494_v3, %s6433_s8  ;;  %v784_v3 = vrot.slane %v6578_v30, 6 }
 0x102   : > { %v7012_v14 = vpop.permute.xlu1 %513  ;;  %v512_v18 = vpop.permute.xlu0 %511 }
 0x103   : > { %v546_v51 = vsel %vm541_vm7, %v6914_v60, %v512_v18  ;;  %v547_v11 = vsel %vm541_vm7, %v512_v18, %v7012_v14 }
 0x104   : > { %915 = vrot.lane.b32.xlu1 %v881_v9, %s6434_s9  ;;  %913 = vrot.lane.b32.xlu0 %v880_v20, %s6434_s9  ;;  %v1071_v0 = vsel %vm1066_vm10, %v447_v24, %v546_v51  ;;  %v1072_v63 = vsel %vm1066_vm10, %v448_v59, %v547_v11  ;;  %v352_v9 = vsel %vm347_vm12, %v6694_v27, %v6700_v32 }
 0x105   : > { %v1031_v27 = vsel %vm1026_vm1, %v6502_v2, %v352_v9  ;;  %v400_v2 = vrot.slane %v6575_v29, 2  ;;  %v686_v9 = vrot.slane %v6586_v33, 1 }
 0x106   : > { %v7026_v40 = vpop.permute.xlu1 %899  ;;  %v898_v54 = vpop.permute.xlu0 %897 }
 0x107   : > { %v932_v19 = vsel %vm927_vm5, %v6928_v28, %v898_v54  ;;  %v933_v62 = vsel %vm927_vm5, %v898_v54, %v7026_v40  ;;  %v353_v28 = vsel %vm347_vm12, %v6700_v32, %v6702_v34  ;;  %v1051_v32 = vsel %vm1046_vm14, %v1031_v27, %v447_v24 }
 0x108   : > { %618 = vrot.lane.b32.xlu1 %v587_v55, %s6435_s10  ;;  %616 = vrot.lane.b32.xlu0 %v6556_v22, %s6435_s10  ;;  %v1152_v10 = vsel %vm1146_vm6, %v1132_v58, %v933_v62  ;;  %v1151_v60 = vsel %vm1146_vm6, %v1131_v13, %v932_v19  ;;  %v1032_v7 = vsel %vm1026_vm1, %v6516_v8, %v353_v28  ;;  %v401_v8 = vrot.slane %v6578_v30, 2 }
 0x109   : > { %1382 = vmatprep.subr.mxu0 %v1152_v10  ;;  %v1052_v55 = vsel %vm1046_vm14, %v1032_v7, %v448_v59  ;;  %v497_v19 = vrot.slane %v6578_v30, 7  ;;  %v496_v62 = vrot.slane %v6575_v29, 7  ;;  %v882_v10 = vrot.slane %v6575_v29, 3 }
 0x10a   : > { %v7052_v5 = vpop.permute.xlu1 %602  ;;  %1383 = vmatpush1.msra.mxu0 %v1151_v60  ;;  %v601_v22 = vpop.permute.xlu0 %600  ;;  %v588_v59 = vcombine.low %v6578_v30, %v6578_v30 }
 0x10b   : > { %v635_v4 = vsel %vm630_vm9, %v6951_v57, %v601_v22  ;;  %v636_v15 = vsel %vm630_vm9, %v601_v22, %v7052_v5 }
 0x10c   : > { %721 = vrot.lane.b32.xlu1 %v685_v31, %s6429_s28  ;;  %719 = vrot.lane.b32.xlu0 %v684_v16, %s6429_s28  ;;  %v1092_v53 = vsel %vm1086_vm11, %v1072_v63, %v636_v15  ;;  %v1091_v43 = vsel %vm1086_vm11, %v1071_v0, %v635_v4 }
 0x10d   : > { %v1112_v57 = vsel %vm1106_vm13, %v1092_v53, %v735_v37  ;;  %v1111_v20 = vsel %vm1106_vm13, %v1091_v43, %v734_v47 }
 0x10e   : > { %v7071_v18 = vpop.permute.xlu1 %705  ;;  %1384 = vmatprep.subr.mxu0 %v1112_v57  ;;  %v704_v23 = vpop.permute.xlu0 %703 }
 0x10f   : > { %1385 = vmatpush1.msra.mxu0 %v1111_v20  ;;  %v737_v22 = vsel %vm729_vm3, %v704_v23, %v7071_v18  ;;  %v736_v0 = vsel %vm729_vm3, %v6973_v39, %v704_v23 }
 0x110   : > { %820 = vrot.lane.b32.xlu1 %v784_v3, %s6430_s29  ;;  %818 = vrot.lane.b32.xlu0 %v783_v35, %s6430_s29 }
 0x111   : > { %1386 = vmatprep.subr.mxu0 %v1052_v55 }
 0x112   : > { %1387 = vmatpush1.msra.mxu0 %v1051_v32  ;;  %v7081_v37 = vpop.permute.xlu1 %804  ;;  %v803_v47 = vpop.permute.xlu0 %802 }
 0x113   : > { %5583 = vmatmul.mubr.msk.f32.vlgmr.msra.gmra.mxu0 %vm927_vm5, %v6882_v61  ;;  %v836_v28 = vsel %vm828_vm2, %v803_v47, %v7081_v37  ;;  %v835_v24 = vsel %vm828_vm2, %v6983_v48, %v803_v47  ;;  %v687_v48 = vrot.slane %v6593_v36, 1 }
 0x114   : > { %998 = vrot.lane.b32.xlu1 %v6578_v30, %s6431_s30  ;;  %996 = vrot.lane.b32.xlu0 %v6575_v29, %s6431_s30  ;;  %v1134_v15 = vsel %vm1126_vm4, %v737_v22, %v836_v28  ;;  %v1133_v3 = vsel %vm1126_vm4, %v736_v0, %v835_v24  ;;  %v402_v28 = vrot.slane %v6586_v33, 2 }
 0x115   : > { %1562 = vmatprep.mubr.f32.mxu0 %v10989_v44 }
 0x116   : > { %v7092_v54 = vpop.permute.xlu1 %982  ;;  %v981_v58 = vpop.permute.xlu0 %980 }
 0x117   : > { %v1013_v31 = vsel %vm1006_vm0, %v6994_v1, %v981_v58  ;;  %v1014_v51 = vsel %vm1006_vm0, %v981_v58, %v7092_v54  ;;  %v883_v1 = vrot.slane %v6578_v30, 3 }
 0x118   : > { %436 = vrot.lane.b32.xlu1 %v401_v8, %s6432_s7  ;;  %434 = vrot.lane.b32.xlu0 %v400_v2, %s6432_s7  ;;  %v786_v8 = vrot.slane %v6593_v36, 6  ;;  %v785_v2 = vrot.slane %v6586_v33, 6 }
 0x119   : > { %5584 = vmatprep.subr.msk.mxu1 %vm1026_vm1, %v1014_v51 }
 0x11a   : > { %5585 = vmatpush1.msk.msra.mxu1 %vm1026_vm1, %v1013_v31  ;;  %v7104_v13 = vpop.permute.xlu1 %420  ;;  %v419_v11 = vpop.permute.xlu0 %418 }
 0x11b   : > { %v449_v57 = vsel %vm442_vm8, %v7006_v6, %v419_v11  ;;  %v450_v20 = vsel %vm442_vm8, %v419_v11, %v7104_v13 }
 0x11c   : > { %533 = vrot.lane.b32.xlu1 %v497_v19, %s6433_s8  ;;  %531 = vrot.lane.b32.xlu0 %v496_v62, %s6433_s8 }
 0x11e   : > { %v7110_v60 = vpop.permute.xlu1 %517  ;;  %v516_v16 = vpop.permute.xlu0 %515 }
 0x11f   : > { %v548_v53 = vsel %vm541_vm7, %v7012_v14, %v516_v16  ;;  %v549_v39 = vsel %vm541_vm7, %v516_v16, %v7110_v60 }
 0x120   : > { %919 = vrot.lane.b32.xlu1 %v883_v1, %s6434_s9  ;;  %917 = vrot.lane.b32.xlu0 %v882_v10, %s6434_s9  ;;  %v1073_v7 = vsel %vm1066_vm10, %v449_v57, %v548_v53  ;;  %v1074_v55 = vsel %vm1066_vm10, %v450_v20, %v549_v39  ;;  %v6409_v1 = vld [vmem:[%s6493_s26 + $0x18] sm:$0x77] }
 0x122   : > { %v7124_v63 = vpop.permute.xlu1 %903  ;;  %v902_v4 = vpop.permute.xlu0 %901 }
 0x123   : > { %v934_v43 = vsel %vm927_vm5, %v7026_v40, %v902_v4  ;;  %v935_v30 = vsel %vm927_vm5, %v902_v4, %v7124_v63  ;;  %v355_v40 = vsel %vm347_vm12, %v6708_v38, %v6718_v42  ;;  %v499_v4 = vrot.slane %v6593_v36, 7 }
 0x124   : > { %622 = vrot.lane.b32.xlu1 %v588_v59, %s6435_s10  ;;  %620 = vrot.lane.b32.xlu0 %v6567_v26, %s6435_s10  ;;  %v1154_v35 = vsel %vm1146_vm6, %v1134_v15, %v935_v30  ;;  %v1153_v14 = vsel %vm1146_vm6, %v1133_v3, %v934_v43  ;;  %v1034_v62 = vsel %vm1026_vm1, %v6527_v12, %v355_v40  ;;  %v403_v12 = vrot.slane %v6593_v36, 2 }
 0x125   : > { %1453 = vmatprep.subr.mxu1 %v1154_v35  ;;  %v1054_v11 = vsel %vm1046_vm14, %v1034_v62, %v450_v20  ;;  %v498_v15 = vrot.slane %v6586_v33, 7  ;;  %v884_v30 = vrot.slane %v6586_v33, 3 }
 0x126   : > { %v7150_v23 = vpop.permute.xlu1 %606  ;;  %1454 = vmatpush1.msra.mxu1 %v1153_v14  ;;  %v605_v26 = vpop.permute.xlu0 %604 }
 0x127   : > { %v637_v27 = vsel %vm630_vm9, %v7052_v5, %v605_v26  ;;  %v638_v32 = vsel %vm630_vm9, %v605_v26, %v7150_v23  ;;  %v354_v5 = vsel %vm347_vm12, %v6702_v34, %v6708_v38 }
 0x128   : > { %725 = vrot.lane.b32.xlu1 %v687_v48, %s6429_s28  ;;  %723 = vrot.lane.b32.xlu0 %v686_v9, %s6429_s28  ;;  %v1094_v6 = vsel %vm1086_vm11, %v1074_v55, %v638_v32  ;;  %v1093_v47 = vsel %vm1086_vm11, %v1073_v7, %v637_v27  ;;  %v1033_v34 = vsel %vm1026_vm1, %v6409_v1, %v354_v5 }
 0x129   : > { %v1114_v58 = vsel %vm1106_vm13, %v1094_v6, %v737_v22  ;;  %v1113_v31 = vsel %vm1106_vm13, %v1093_v47, %v736_v0  ;;  %v1053_v38 = vsel %vm1046_vm14, %v1033_v34, %v449_v57  ;;  %v7241_v47 = vld [vmem:[%s6493_s26 + $0x40] sm:$0x77] }
 0x12a   : > { %v7169_v51 = vpop.permute.xlu1 %709  ;;  %1455 = vmatprep.subr.mxu1 %v1114_v58  ;;  %v708_v19 = vpop.permute.xlu0 %707 }
 0x12b   : > { %1456 = vmatpush1.msra.mxu1 %v1113_v31  ;;  %v739_v40 = vsel %vm729_vm3, %v708_v19, %v7169_v51  ;;  %v738_v57 = vsel %vm729_vm3, %v7071_v18, %v708_v19 }
 0x12c   : > { %824 = vrot.lane.b32.xlu1 %v786_v8, %s6430_s29  ;;  %822 = vrot.lane.b32.xlu0 %v785_v2, %s6430_s29 }
 0x12d   : > { %1457 = vmatprep.subr.mxu1 %v1054_v11 }
 0x12e   : > { %1458 = vmatpush1.msra.mxu1 %v1053_v38  ;;  %v7179_v10 = vpop.permute.xlu1 %808  ;;  %v807_v16 = vpop.permute.xlu0 %806 }
 0x12f   : > { %5586 = vmatmul.mubr.msk.f32.vlgmr.msra.gmra.mxu1 %vm927_vm5, %v6882_v61  ;;  %v838_v35 = vsel %vm828_vm2, %v807_v16, %v7179_v10  ;;  %v837_v14 = vsel %vm828_vm2, %v7081_v37, %v807_v16 }
 0x130   : > { %1002 = vrot.lane.b32.xlu1 %v6593_v36, %s6431_s30  ;;  %1000 = vrot.lane.b32.xlu0 %v6586_v33, %s6431_s30  ;;  %v1136_v7 = vsel %vm1126_vm4, %v739_v40, %v838_v35  ;;  %v1135_v6 = vsel %vm1126_vm4, %v738_v57, %v837_v14 }
 0x131   : > { %1633 = vmatprep.mubr.f32.mxu1 %v10989_v44 }
 0x132   : > { %v7190_v24 = vpop.permute.xlu1 %986  ;;  %v985_v59 = vpop.permute.xlu0 %984 }
 0x133   : > { %v1015_v22 = vsel %vm1006_vm0, %v7092_v54, %v985_v59  ;;  %v1016_v0 = vsel %vm1006_vm0, %v985_v59, %v7190_v24  ;;  %v7207_v54 = vld [vmem:[%s6493_s26 + $0x48] sm:$0x77] }
 0x134   : > { %440 = vrot.lane.b32.xlu1 %v403_v12, %s6432_s7  ;;  %438 = vrot.lane.b32.xlu0 %v402_v28, %s6432_s7  ;;  %v885_v43 = vrot.slane %v7207_v54, 3  ;;  %v480_v39 = vcombine.high %v7207_v54, %v7207_v54  ;;  %v589_v9 = vcombine.low %v7207_v54, %v7207_v54 }
 0x135   : > { %5587 = vmatprep.subr.msk.mxu0 %vm1026_vm1, %v1016_v0 }
 0x136   : > { %5588 = vmatpush1.msk.msra.mxu0 %vm1026_vm1, %v1015_v22  ;;  %v7202_v48 = vpop.permute.xlu1 %424  ;;  %v423_v53 = vpop.permute.xlu0 %422  ;;  %v787_v37 = vrot.slane %v480_v39, 6  ;;  %v500_v16 = vrot.slane %v480_v39, 7 }
 0x137   : > { %v451_v2 = vsel %vm442_vm8, %v7104_v13, %v423_v53  ;;  %v452_v5 = vsel %vm442_vm8, %v423_v53, %v7202_v48  ;;  %v357_v13 = vsel %vm347_vm12, %v6716_v41, %v6727_v46 }
 0x138   : > { %537 = vrot.lane.b32.xlu1 %v499_v4, %s6433_s8  ;;  %535 = vrot.lane.b32.xlu0 %v498_v15, %s6433_s8  ;;  %v1036_v0 = vsel %vm1026_vm1, %v6542_v17, %v357_v13  ;;  %v6412_v15 = vld [vmem:[%s6493_s26 + $0x20] sm:$0x77] }
 0x139   : > { %v1056_v4 = vsel %vm1046_vm14, %v1036_v0, %v452_v5  ;;  %v1167_v17 = vld [vmem:[%s10900_s2] sm:$0x3f]  ;;  %v6413_v0 = vld [vmem:[%s6493_s26 + $0x28] sm:$0x77] }
 0x13a   : > { %v7211_v36 = vpop.permute.xlu1 %521  ;;  %v520_v3 = vpop.permute.xlu0 %519 }
 0x13b   : > { %v550_v55 = vsel %vm541_vm7, %v7110_v60, %v520_v3  ;;  %v551_v18 = vsel %vm541_vm7, %v520_v3, %v7211_v36 }
 0x13c   : > { %923 = vrot.lane.b32.xlu1 %v885_v43, %s6434_s9  ;;  %921 = vrot.lane.b32.xlu0 %v884_v30, %s6434_s9  ;;  %v1075_v19 = vsel %vm1066_vm10, %v451_v2, %v550_v55  ;;  %v1076_v62 = vsel %vm1066_vm10, %v452_v5, %v551_v18 }
 0x13e   : > { %v7227_v20 = vpop.permute.xlu1 %907  ;;  %v906_v26 = vpop.permute.xlu0 %905 }
 0x13f   : > { %v936_v27 = vsel %vm927_vm5, %v7124_v63, %v906_v26  ;;  %v937_v32 = vsel %vm927_vm5, %v906_v26, %v7227_v20  ;;  %v688_v63 = vrot.slane %v480_v39, 1 }
 0x140   : > { %626 = vrot.lane.b32.xlu1 %v589_v9, %s6435_s10  ;;  %624 = vrot.lane.b32.xlu0 %v7241_v47, %s6435_s10  ;;  %v1156_v60 = vsel %vm1146_vm6, %v1136_v7, %v937_v32  ;;  %v1155_v8 = vsel %vm1146_vm6, %v1135_v6, %v936_v27 }
 0x141   : > { %1524 = vmatprep.subr.mxu0 %v1156_v60 }
 0x142   : > { %v7251_v58 = vpop.permute.xlu1 %610  ;;  %1525 = vmatpush1.msra.mxu0 %v1155_v8  ;;  %v609_v31 = vpop.permute.xlu0 %608 }
 0x143   : > { %v639_v11 = vsel %vm630_vm9, %v7150_v23, %v609_v31  ;;  %v640_v1 = vsel %vm630_vm9, %v609_v31, %v7251_v58  ;;  %v356_v23 = vsel %vm347_vm12, %v6718_v42, %v6716_v41  ;;  %v886_v42 = vrot.slane %v480_v39, 3 }
 0x144   : > { %826 = vrot.lane.b32.xlu1 %v787_v37, %s6430_s29  ;;  %727 = vrot.lane.b32.xlu0 %v688_v63, %s6429_s28  ;;  %v1096_v34 = vsel %vm1086_vm11, %v1076_v62, %v640_v1  ;;  %v1095_v38 = vsel %vm1086_vm11, %v1075_v19, %v639_v11  ;;  %v1035_v41 = vsel %vm1026_vm1, %v6412_v15, %v356_v23 }
 0x145   : > { %v1116_v12 = vsel %vm1106_vm13, %v1096_v34, %v739_v40  ;;  %v1115_v28 = vsel %vm1106_vm13, %v1095_v38, %v738_v57  ;;  %v1055_v53 = vsel %vm1046_vm14, %v1035_v41, %v451_v2 }
 0x146   : > { %v7271_v59 = vpop.permute.xlu1 %713  ;;  %1526 = vmatprep.subr.mxu0 %v1116_v12  ;;  %v712_v22 = vpop.permute.xlu0 %711 }
 0x147   : > { %1527 = vmatpush1.msra.mxu0 %v1115_v28  ;;  %v741_v55 = vsel %vm729_vm3, %v712_v22, %v7271_v59 }
 0x148   : > { %539 = vrot.lane.b32.xlu1 %v500_v16, %s6433_s8  ;;  %1004 = vrot.lane.b32.xlu0 %v480_v39, %s6431_s30 }
 0x149   : > { %1528 = vmatprep.subr.mxu0 %v1056_v4 }
 0x14a   : > { %1529 = vmatpush1.msra.mxu0 %v1055_v53  ;;  %v7281_v43 = vpop.permute.xlu1 %812  ;;  %v811_v30 = vpop.permute.xlu0 %810 }
 0x14b   : > { %5589 = vmatmul.mubr.msk.f32.vlgmr.msra.gmra.mxu0 %vm927_vm5, %v6882_v61  ;;  %v839_v7 = vsel %vm828_vm2, %v7179_v10, %v811_v30  ;;  %v840_v37 = vsel %vm828_vm2, %v811_v30, %v7281_v43 }
 0x14c   : > { %628 = vrot.lane.b32.xlu1 %v7207_v54, %s6435_s10  ;;  %925 = vrot.lane.b32.xlu0 %v886_v42, %s6434_s9  ;;  %v1138_v60 = vsel %vm1126_vm4, %v741_v55, %v840_v37 }
 0x14d   : > { %1704 = vmatprep.mubr.f32.mxu0 %v10989_v44 }
 0x14e   : > { %v991_v3 = vpop.permute.xlu1 %990  ;;  %v989_v39 = vpop.permute.xlu0 %988 }
 0x14f   : > { %v1017_v35 = vsel %vm1006_vm0, %v7190_v24, %v989_v39  ;;  %v1018_v14 = vsel %vm1006_vm0, %v989_v39, %v991_v3  ;;  %v740_v24 = vsel %vm729_vm3, %v7169_v51, %v712_v22 }
 0x150   : > { %5590 = vmatprep.subr.msk.mxu1 %vm1026_vm1, %v1018_v14  ;;  %1170 = vperm.xlu0 %6057, %v1167_v17   ;;  %v1137_v10 = vsel %vm1126_vm4, %v740_v24, %v839_v7 }
 0x151   : > { %5591 = vmatpush1.msk.msra.mxu1 %vm1026_vm1, %v1017_v35 }
 0x152   : > { %v7297_v9 = vpop.permute.xlu1 %428  ;;  %v427_v40 = vpop.permute.xlu0 %426 }
 0x153   : > { %v453_v5 = vsel %vm442_vm8, %v7202_v48, %v427_v40  ;;  %v454_v31 = vsel %vm442_vm8, %v427_v40, %v7297_v9  ;;  %v358_v48 = vsel %vm347_vm12, %v6727_v46, %v6725_v45 }
 0x156   : > { %v7299_v57 = vpop.permute.xlu1 %525  ;;  %v524_v26 = vpop.permute.xlu0 %523 }
 0x157   : > { %v552_v8 = vsel %vm541_vm7, %v7211_v36, %v524_v26  ;;  %v553_v51 = vsel %vm541_vm7, %v524_v26, %v7299_v57 }
 0x158   : > { %v1077_v62 = vsel %vm1066_vm10, %v453_v5, %v552_v8  ;;  %v1078_v11 = vsel %vm1066_vm10, %v454_v31, %v553_v51 }
 0x15a   : > { %v912_v27 = vpop.permute.xlu1 %911  ;;  %v910_v32 = vpop.permute.xlu0 %909 }
 0x15b   : > { %v938_v6 = vsel %vm927_vm5, %v7227_v20, %v910_v32  ;;  %v939_v18 = vsel %vm927_vm5, %v910_v32, %v912_v27  ;;  %v359_v20 = vsel %vm347_vm12, %v6725_v45, %v6735_v50  ;;  %v1037_v45 = vsel %vm1026_vm1, %v6413_v0, %v358_v48 }
 0x15c   : > { %v1158_v63 = vsel %vm1146_vm6, %v1138_v60, %v939_v18  ;;  %v1157_v2 = vsel %vm1146_vm6, %v1137_v10, %v938_v6  ;;  %v1057_v46 = vsel %vm1046_vm14, %v1037_v45, %v453_v5 }
 0x15d   : > { %1595 = vmatprep.subr.mxu1 %v1158_v63 }
 0x15e   : > { %v615_v19 = vpop.permute.xlu1 %614  ;;  %1596 = vmatpush1.msra.mxu1 %v1157_v2  ;;  %v613_v36 = vpop.permute.xlu0 %612 }
 0x15f   : > { %v641_v1 = vsel %vm630_vm9, %v7251_v58, %v613_v36  ;;  %v642_v13 = vsel %vm630_vm9, %v613_v36, %v615_v19  ;;  %v1038_v58 = vsel %vm1026_vm1, %v6553_v21, %v359_v20 }
 0x160   : > { %v1098_v34 = vsel %vm1086_vm11, %v1078_v11, %v642_v13  ;;  %v1097_v38 = vsel %vm1086_vm11, %v1077_v62, %v641_v1  ;;  %v1058_v22 = vsel %vm1046_vm14, %v1038_v58, %v454_v31  ;;  %v360_v31 = vsel %vm347_vm12, %v6735_v50, %v6733_v49 }
 0x161   : > { %v1118_v16 = vsel %vm1106_vm13, %v1098_v34, %v741_v55  ;;  %v1117_v23 = vsel %vm1106_vm13, %v1097_v38, %v740_v24  ;;  %v6414_v34 = vld [vmem:[%s6493_s26 + $0x30] sm:$0x77] }
 0x162   : > { %v7339_v12 = vpop.permute.xlu1 %717  ;;  %1597 = vmatprep.subr.mxu1 %v1118_v16  ;;  %v716_v28 = vpop.permute.xlu0 %715 }
 0x163   : > { %1598 = vmatpush1.msra.mxu1 %v1117_v23  ;;  %v743_v26 = vsel %vm729_vm3, %v716_v28, %v7339_v12 }
 0x164   : > { %1599 = vmatprep.subr.mxu1 %v1058_v22 }
 0x165   : > { %1600 = vmatpush1.msra.mxu1 %v1057_v46 }
 0x166   : > { %v7347_v4 = vpop.permute.xlu1 %816  ;;  %5592 = vmatmul.mubr.msk.f32.vlgmr.msra.gmra.mxu1 %vm927_vm5, %v6882_v61  ;;  %v815_v15 = vpop.permute.xlu0 %814 }
 0x167   : > { %1775 = vmatprep.mubr.f32.mxu1 %v10989_v44  ;;  %v841_v14 = vsel %vm828_vm2, %v7281_v43, %v815_v15  ;;  %v842_v40 = vsel %vm828_vm2, %v815_v15, %v7347_v4 }
 0x168   : > { %v1140_v32 = vsel %vm1126_vm4, %v743_v26, %v842_v40 }
 0x16a   : > { %v995_v41 = vpop.permute.xlu1 %994  ;;  %v993_v21 = vpop.permute.xlu0 %992 }
 0x16b   : > { %v1019_v42 = vsel %vm1006_vm0, %v991_v3, %v993_v21  ;;  %v1020_v53 = vsel %vm1006_vm0, %v993_v21, %v995_v41  ;;  %v742_v3 = vsel %vm729_vm3, %v7271_v59, %v716_v28 }
 0x16c   : > { %5593 = vmatprep.subr.msk.mxu0 %vm1026_vm1, %v1020_v53  ;;  %v1139_v6 = vsel %vm1126_vm4, %v742_v3, %v841_v14 }
 0x16d   : > { %5594 = vmatpush1.msk.msra.mxu0 %vm1026_vm1, %v1019_v42 }
 0x16e   : > { %v7356_v30 = vpop.permute.xlu1 %432  ;;  %v431_v17 = vpop.permute.xlu0 %430 }
 0x16f   : > { %v455_v10 = vsel %vm442_vm8, %v7297_v9, %v431_v17  ;;  %v456_v8 = vsel %vm442_vm8, %v431_v17, %v7356_v30 }
 0x172   : > { %v7358_v39 = vpop.permute.xlu1 %529  ;;  %v528_v35 = vpop.permute.xlu0 %527 }
 0x173   : > { %v554_v43 = vsel %vm541_vm7, %v7299_v57, %v528_v35  ;;  %v555_v18 = vsel %vm541_vm7, %v528_v35, %v7358_v39 }
 0x174   : > { %v1079_v63 = vsel %vm1066_vm10, %v455_v10, %v554_v43  ;;  %v1080_v2 = vsel %vm1066_vm10, %v456_v8, %v555_v18 }
 0x176   : > { %v916_v7 = vpop.permute.xlu1 %915  ;;  %v914_v37 = vpop.permute.xlu0 %913 }
 0x177   : > { %v940_v24 = vsel %vm927_vm5, %v912_v27, %v914_v37  ;;  %v941_v55 = vsel %vm927_vm5, %v914_v37, %v916_v7  ;;  %v361_v27 = vsel %vm347_vm12, %v6733_v49, %v6741_v52  ;;  %v1039_v49 = vsel %vm1026_vm1, %v6414_v34, %v360_v31 }
 0x178   : > { %v1160_v59 = vsel %vm1146_vm6, %v1140_v32, %v941_v55  ;;  %v1159_v60 = vsel %vm1146_vm6, %v1139_v6, %v940_v24  ;;  %v1059_v50 = vsel %vm1046_vm14, %v1039_v49, %v455_v10  ;;  %v10990_v24 = vld [vmem:[#allocation2_spill] sm:$0xff] }
 0x179   : > { %1666 = vmatprep.subr.mxu0 %v1160_v59 }
 0x17a   : > { %v619_v51 = vpop.permute.xlu1 %618  ;;  %1667 = vmatpush1.msra.mxu0 %v1159_v60  ;;  %v617_v57 = vpop.permute.xlu0 %616 }
 0x17b   : > { %v643_v20 = vsel %vm630_vm9, %v615_v19, %v617_v57  ;;  %v644_v5 = vsel %vm630_vm9, %v617_v57, %v619_v51  ;;  %v1040_v19 = vsel %vm1026_vm1, %v6564_v25, %v361_v27 }
 0x17c   : > { %v1100_v9 = vsel %vm1086_vm11, %v1080_v2, %v644_v5  ;;  %v1099_v36 = vsel %vm1086_vm11, %v1079_v63, %v643_v20  ;;  %v1060_v48 = vsel %vm1046_vm14, %v1040_v19, %v456_v8  ;;  %v6415_v5 = vld [vmem:[%s6493_s26 + $0x38] sm:$0x77] }
 0x17d   : > { %v1120_v62 = vsel %vm1106_vm13, %v1100_v9, %v743_v26  ;;  %v1119_v11 = vsel %vm1106_vm13, %v1099_v36, %v742_v3 }
 0x17e   : > { %v7396_v1 = vpop.permute.xlu1 %721  ;;  %1668 = vmatprep.subr.mxu0 %v1120_v62  ;;  %v720_v13 = vpop.permute.xlu0 %719 }
 0x17f   : > { %1669 = vmatpush1.msra.mxu0 %v1119_v11  ;;  %v745_v42 = vsel %vm729_vm3, %v720_v13, %v7396_v1 }
 0x180   : > { %1670 = vmatprep.subr.mxu0 %v1060_v48 }
 0x181   : > { %1671 = vmatpush1.msra.mxu0 %v1059_v50 }
 0x182   : > { %v7404_v38 = vpop.permute.xlu1 %820  ;;  %5595 = vmatmul.mubr.msk.f32.vlgmr.msra.gmra.mxu0 %vm927_vm5, %v6882_v61  ;;  %v819_v16 = vpop.permute.xlu0 %818 }
 0x183   : > { %1846 = vmatprep.mubr.f32.mxu0 %v10989_v44  ;;  %v843_v15 = vsel %vm828_vm2, %v7347_v4, %v819_v16  ;;  %v844_v21 = vsel %vm828_vm2, %v819_v16, %v7404_v38 }
 0x184   : > { %v1142_v40 = vsel %vm1126_vm4, %v745_v42, %v844_v21 }
 0x186   : > { %v999_v23 = vpop.permute.xlu1 %998  ;;  %v997_v25 = vpop.permute.xlu0 %996 }
 0x187   : > { %v1021_v28 = vsel %vm1006_vm0, %v995_v41, %v997_v25  ;;  %v1022_v58 = vsel %vm1006_vm0, %v997_v25, %v999_v23  ;;  %v744_v41 = vsel %vm729_vm3, %v7339_v12, %v720_v13 }
 0x188   : > { %5596 = vmatprep.subr.msk.mxu1 %vm1026_vm1, %v1022_v58  ;;  %v1141_v3 = vsel %vm1126_vm4, %v744_v41, %v843_v15 }
 0x189   : > { %5597 = vmatpush1.msk.msra.mxu1 %vm1026_vm1, %v1021_v28 }
 0x18a   : > { %v7413_v22 = vpop.permute.xlu1 %436  ;;  %v435_v0 = vpop.permute.xlu0 %434 }
 0x18b   : > { %v457_v55 = vsel %vm442_vm8, %v7356_v30, %v435_v0  ;;  %v458_v32 = vsel %vm442_vm8, %v435_v0, %v7413_v22  ;;  %v362_v30 = vsel %vm347_vm12, %v6741_v52, %v10990_v24 }
 0x18c   : > { %v1041_v52 = vsel %vm1026_vm1, %v6415_v5, %v362_v30 }
 0x18d   : > { %v1061_v31 = vsel %vm1046_vm14, %v1041_v52, %v457_v55 }
 0x18e   : > { %v7415_v45 = vpop.permute.xlu1 %533  ;;  %v532_v46 = vpop.permute.xlu0 %531 }
 0x18f   : > { %v556_v4 = vsel %vm541_vm7, %v7358_v39, %v532_v46  ;;  %v557_v26 = vsel %vm541_vm7, %v532_v46, %v7415_v45 }
 0x190   : > { %v1081_v43 = vsel %vm1066_vm10, %v457_v55, %v556_v4  ;;  %v1082_v18 = vsel %vm1066_vm10, %v458_v32, %v557_v26 }
 0x192   : > { %v920_v53 = vpop.permute.xlu1 %919  ;;  %v918_v17 = vpop.permute.xlu0 %917 }
 0x193   : > { %v942_v35 = vsel %vm927_vm5, %v916_v7, %v918_v17  ;;  %v943_v14 = vsel %vm927_vm5, %v918_v17, %v920_v53  ;;  %v363_v7 = vsel %vm347_vm12, %v10990_v24, %v6751_v56  ;;  %v10992_v17 = vld [vmem:[#allocation3_spill] sm:$0xff] }
 0x194   : > { %v1162_v12 = vsel %vm1146_vm6, %v1142_v40, %v943_v14  ;;  %v1161_v37 = vsel %vm1146_vm6, %v1141_v3, %v942_v35 }
 0x195   : > { %1737 = vmatprep.subr.mxu1 %v1162_v12 }
 0x196   : > { %v7442_v6 = vpop.permute.xlu1 %622  ;;  %1738 = vmatpush1.msra.mxu1 %v1161_v37  ;;  %v621_v39 = vpop.permute.xlu0 %620  ;;  %v364_v37 = vsel %vm347_vm12, %v6751_v56, %v10992_v17 }
 0x197   : > { %v645_v59 = vsel %vm630_vm9, %v619_v51, %v621_v39  ;;  %v646_v60 = vsel %vm630_vm9, %v621_v39, %v7442_v6  ;;  %v1042_v51 = vsel %vm1026_vm1, %v6575_v29, %v363_v7  ;;  %v1043_v56 = vsel %vm1026_vm1, %v7241_v47, %v364_v37 }
 0x198   : > { %v1102_v27 = vsel %vm1086_vm11, %v1082_v18, %v646_v60  ;;  %v1101_v10 = vsel %vm1086_vm11, %v1081_v43, %v645_v59  ;;  %v1062_v20 = vsel %vm1046_vm14, %v1042_v51, %v458_v32  ;;  %v6416_v60 = vld [vmem:[%s10899_s1] sm:$0x3f] }
 0x199   : > { %v1122_v8 = vsel %vm1106_vm13, %v1102_v27, %v745_v42  ;;  %v1121_v57 = vsel %vm1106_vm13, %v1101_v10, %v744_v41  ;;  %v10991_v42 = vld [vmem:[#allocation4_spill] sm:$0xff] }
 0x19a   : > { %v7456_v63 = vpop.permute.xlu1 %725  ;;  %1739 = vmatprep.subr.mxu1 %v1122_v8  ;;  %v724_v2 = vpop.permute.xlu0 %723 }
 0x19b   : > { %1740 = vmatpush1.msra.mxu1 %v1121_v57  ;;  %v746_v16 = vsel %vm729_vm3, %v7396_v1, %v724_v2 }
 0x19c   : > { %1741 = vmatprep.subr.mxu1 %v1062_v20 }
 0x19d   : > { %1742 = vmatpush1.msra.mxu1 %v1061_v31 }
 0x19e   : > { %v7464_v9 = vpop.permute.xlu1 %824  ;;  %5598 = vmatmul.mubr.msk.f32.vlgmr.msra.gmra.mxu1 %vm927_vm5, %v6882_v61  ;;  %v823_v36 = vpop.permute.xlu0 %822  ;;  %5997 = vmatprep.subr.mxu1 %v10989_v44 }
 0x19f   : > { %6005 = vmatprep.mubr.msk.f32.mxu1 %vm6438_vm15, %v10989_v44  ;;  %v845_v49 = vsel %vm828_vm2, %v7404_v38, %v823_v36  ;;  %v846_v50 = vsel %vm828_vm2, %v823_v36, %v7464_v9 }
 0x1a0   : > { %v1143_v15 = vsel %vm1126_vm4, %v746_v16, %v845_v49 }
 0x1a2   : > { %v1003_v29 = vpop.permute.xlu1 %1002  ;;  %v1001_v62 = vpop.permute.xlu0 %1000 }
 0x1a3   : > { %v1023_v11 = vsel %vm1006_vm0, %v999_v23, %v1001_v62  ;;  %v1024_v13 = vsel %vm1006_vm0, %v1001_v62, %v1003_v29  ;;  %v747_v23 = vsel %vm729_vm3, %v724_v2, %v7456_v63 }
 0x1a4   : > { %5599 = vmatprep.subr.msk.mxu0 %vm1026_vm1, %v1024_v13  ;;  %v1144_v46 = vsel %vm1126_vm4, %v747_v23, %v846_v50 }
 0x1a5   : > { %5600 = vmatpush1.msk.msra.mxu0 %vm1026_vm1, %v1023_v11 }
 0x1a6   : > { %v7475_v19 = vpop.permute.xlu1 %440  ;;  %v439_v61 = vpop.permute.xlu0 %438 }
 0x1a7   : > { %v459_v35 = vsel %vm442_vm8, %v7413_v22, %v439_v61  ;;  %v460_v14 = vsel %vm442_vm8, %v439_v61, %v7475_v19 }
 0x1a8   : > { %v1063_v18 = vsel %vm1046_vm14, %v1043_v56, %v459_v35 }
 0x1aa   : > { %v538_v48 = vpop.permute.xlu1 %537  ;;  %v536_v34 = vpop.permute.xlu0 %535 }
 0x1ab   : > { %v558_v38 = vsel %vm541_vm7, %v7415_v45, %v536_v34  ;;  %v559_v21 = vsel %vm541_vm7, %v536_v34, %v538_v48 }
 0x1ac   : > { %v1083_v3 = vsel %vm1066_vm10, %v459_v35, %v558_v38  ;;  %v1084_v4 = vsel %vm1066_vm10, %v460_v14, %v559_v21 }
 0x1ae   : > { %v924_v25 = vpop.permute.xlu1 %923  ;;  %v922_v28 = vpop.permute.xlu0 %921 }
 0x1af   : > { %v944_v58 = vsel %vm927_vm5, %v920_v53, %v922_v28  ;;  %v945_v0 = vsel %vm927_vm5, %v922_v28, %v924_v25  ;;  %v365_v53 = vsel %vm347_vm12, %v10992_v17, %v10991_v42 }
 0x1b0   : > { %v1164_v1 = vsel %vm1146_vm6, %v1144_v46, %v945_v0  ;;  %v1163_v41 = vsel %vm1146_vm6, %v1143_v15, %v944_v58 }
 0x1b1   : > { %1808 = vmatprep.subr.mxu0 %v1164_v1 }
 0x1b2   : > { %v627_v40 = vpop.permute.xlu1 %626  ;;  %1809 = vmatpush1.msra.mxu0 %v1163_v41  ;;  %v625_v45 = vpop.permute.xlu0 %624 }
 0x1b3   : > { %v647_v26 = vsel %vm630_vm9, %v7442_v6, %v625_v45  ;;  %v648_v12 = vsel %vm630_vm9, %v625_v45, %v627_v40  ;;  %v1044_v6 = vsel %vm1026_vm1, %v6586_v33, %v365_v53 }
 0x1b4   : > { %v1104_v22 = vsel %vm1086_vm11, %v1084_v4, %v648_v12  ;;  %v1103_v24 = vsel %vm1086_vm11, %v1083_v3, %v647_v26  ;;  %v1064_v43 = vsel %vm1046_vm14, %v1044_v6, %v460_v14 }
 0x1b5   : > { %v1124_v7 = vsel %vm1106_vm13, %v1104_v22, %v747_v23  ;;  %v1123_v55 = vsel %vm1106_vm13, %v1103_v24, %v746_v16 }
 0x1b6   : > { %v827_v32 = vpop.permute.xlu1 %826  ;;  %1810 = vmatprep.subr.mxu0 %v1124_v7  ;;  %v728_v39 = vpop.permute.xlu0 %727 }
 0x1b7   : > { %1811 = vmatpush1.msra.mxu0 %v1123_v55  ;;  %v847_v27 = vsel %vm828_vm2, %v7464_v9, %v827_v32  ;;  %v748_v47 = vsel %vm729_vm3, %v7456_v63, %v728_v39  ;;  %v1045_v9 = vsel %vm1026_vm1, %v7207_v54, %v10991_v42  ;;  %vm2771_vm3 = vcmask 441344  }
 0x1b8   : > { %1812 = vmatprep.subr.mxu0 %v1064_v43  ;;  %v1145_v2 = vsel %vm1126_vm4, %v748_v47, %v847_v27  ;;  %v1065_v36 = vsel %vm1046_vm14, %v1045_v9, %v7475_v19 }
 0x1b9   : > { %1813 = vmatpush1.msra.mxu0 %v1063_v18 }
 0x1ba   : > { %v540_v59 = vpop.permute.xlu1 %539  ;;  %5601 = vmatmul.mubr.msk.f32.vlgmr.msra.gmra.mxu0 %vm927_vm5, %v6416_v60  ;;  %v1005_v30 = vpop.permute.xlu0 %1004 }
 0x1bb   : > { %v1025_v33 = vsel %vm1006_vm0, %v1003_v29, %v1005_v30  ;;  %3090 = vmatprep.mubr.f32.mxu0 %v10989_v44  ;;  %v560_v10 = vsel %vm541_vm7, %v538_v48, %v540_v59  ;;  %v1280_v29 = vpop.f32.mrf.mxu1 }
 0x1bc   : > { %5998 = vmatpush3.msk.msra.mxu1 %vm1026_vm1, %v1025_v33  ;;  %v1085_v51 = vsel %vm1066_vm10, %v7475_v19, %v560_v10  ;;  %vm2842_vm1 = vcmask 424960  }
 0x1bd   : > { %5999 = vmatprep.subr.mxu1 %v10989_v44  ;;  %v1282_v54 = vpop.f32.mrf.mxu1 }
 0x1be   : > { %v629_v8 = vpop.permute.xlu1 %628  ;;  %v926_v57 = vpop.permute.xlu0 %925 }
 0x1bf   : > { %v649_v20 = vsel %vm630_vm9, %v627_v40, %v629_v8  ;;  %v946_v5 = vsel %vm927_vm5, %v924_v25, %v926_v57  ;;  %v1351_v34 = vpop.f32.mrf.mxu1 }
 0x1c0   : > { %v1105_v52 = vsel %vm1086_vm11, %v1085_v51, %v649_v20  ;;  %v1165_v63 = vsel %vm1146_vm6, %v1145_v2, %v946_v5  ;;  %vm2625_vm6 = vcmask 195584  }
 0x1c1   : > { %6000 = vmatpush3.msra.mxu1 %v1165_v63  ;;  %v1125_v31 = vsel %vm1106_vm13, %v1105_v52, %v748_v47  ;;  %v1353_v25 = vpop.f32.mrf.mxu1  ;;  %vm2395_vm13 = vcmask 1014784  }
 0x1c2   : > { %6001 = vmatprep.subr.mxu1 %v10989_v44 }
 0x1c3   : > { %6002 = vmatpush3.msra.mxu1 %v1125_v31 }
 0x1c4   : > { %6003 = vmatprep.subr.mxu1 %v10989_v44 }
 0x1c5   : > { %6004 = vmatpush3.msra.mxu1 %v1065_v36 }
 0x1c6   : > { %6006 = vmatmul.mubr.msk.f32.vlgmr.msra.gmra.mxu1 %vm927_vm5, %v6416_v60  ;;  %vm2699_vm5 = vcmask 457728  }
 0x1c7   : > { %3173 = vmatprep.mubr.f32.mxu1 %v10989_v44 }
 0x1cb   : > { %v7549_v62 = vpop.permute.xlu0 %1170 }
 0x1cc   : > { %v1281_v11 = vadd.f32 %v1280_v29, %v7549_v62  ;;  %v1283_v19 = vadd.f32 %v1282_v54, %v7549_v62  ;;  %v1352_v16 = vadd.f32 %v1351_v34, %v7549_v62  ;;  %v1354_v28 = vadd.f32 %v1353_v25, %v7549_v62 }
 0x1ce   : > { %v7552_v13 = vmax.f32 %v1281_v11, 0.0  ;;  %v7560_v50 = vmax.f32 %v1283_v19, 0.0  ;;  %v7567_v23 = vmax.f32 %v1352_v16, 0.0  ;;  %v7582_v58 = vmax.f32 %v1354_v28, 0.0 }
 0x1d0   : > { %1961 = vrot.lane.b32.xlu1 %v7552_v13, %s6428_s27 }
 0x1d3   : > { %v1422_v61 = vpop.f32.mrf.mxu0 }
 0x1d4   : > { %v1423_v48 = vadd.f32 %v1422_v61, %v7549_v62 }
 0x1d5   : > { %v1424_v0 = vpop.f32.mrf.mxu0 }
 0x1d6   : > { %v7558_v49 = vmax.f32 %v1423_v48, 0.0  ;;  %v1425_v46 = vadd.f32 %v1424_v0, %v7549_v62 }
 0x1d8   : > { %1969 = vrot.lane.b32.xlu0 %v7558_v49, %s6428_s27  ;;  %2157 = vrot.lane.b32.xlu1 %v7558_v49, %s6435_s10  ;;  %v7598_v1 = vmax.f32 %v1425_v46, 0.0 }
 0x1dc   : > { %2063 = vrot.lane.b32.xlu0 %v7558_v49, %s6433_s8  ;;  %1963 = vrot.lane.b32.xlu1 %v7560_v50, %s6428_s27 }
 0x1e0   : > { %2057 = vrot.lane.b32.xlu0 %v7560_v50, %s6433_s8  ;;  %1965 = vrot.lane.b32.xlu1 %v7567_v23, %s6428_s27 }
 0x1e4   : > { %2059 = vrot.lane.b32.xlu0 %v7567_v23, %s6433_s8  ;;  %2153 = vrot.lane.b32.xlu1 %v7567_v23, %s6435_s10 }
 0x1e8   : > { %2155 = vrot.lane.b32.xlu0 %v7582_v58, %s6435_s10  ;;  %1967 = vrot.lane.b32.xlu1 %v7582_v58, %s6428_s27 }
 0x1ec   : > { %2055 = vrot.lane.b32.xlu0 %v7552_v13, %s6433_s8  ;;  %2061 = vrot.lane.b32.xlu1 %v7582_v58, %s6433_s8 }
 0x1ef   : > { %v1493_v15 = vpop.f32.mrf.mxu1 }
 0x1f0   : > { %v1494_v38 = vadd.f32 %v1493_v15, %v7549_v62  ;;  %2149 = vrot.lane.b32.xlu0 %v7552_v13, %s6435_s10  ;;  %2151 = vrot.lane.b32.xlu1 %v7560_v50, %s6435_s10 }
 0x1f1   : > { %v1495_v21 = vpop.f32.mrf.mxu1 }
 0x1f2   : > { %v7600_v41 = vmax.f32 %v1494_v38, 0.0  ;;  %v1496_v42 = vadd.f32 %v1495_v21, %v7549_v62 }
 0x1f4   : > { %1973 = vrot.lane.b32.xlu0 %v7600_v41, %s6428_s27  ;;  %1971 = vrot.lane.b32.xlu1 %v7598_v1, %s6428_s27  ;;  %v7607_v17 = vmax.f32 %v1496_v42, 0.0 }
 0x1f8   : > { %1975 = vrot.lane.b32.xlu1 %v7607_v17, %s6428_s27 }
 0x1fc   : > { %2065 = vrot.lane.b32.xlu1 %v7598_v1, %s6433_s8 }
 0x200   : > { %2069 = vrot.lane.b32.xlu1 %v7607_v17, %s6433_s8 }
 0x204   : > { %2159 = vrot.lane.b32.xlu1 %v7598_v1, %s6435_s10 }
 0x208   : > { %2163 = vrot.lane.b32.xlu1 %v7607_v17, %s6435_s10 }
 0x20b   : > { %v1564_v53 = vpop.f32.mrf.mxu0 }
 0x20c   : > { %v1565_v35 = vadd.f32 %v1564_v53, %v7549_v62 }
 0x20d   : > { %v1566_v14 = vpop.f32.mrf.mxu0 }
 0x20e   : > { %v7620_v40 = vmax.f32 %v1565_v35, 0.0  ;;  %v1567_v45 = vadd.f32 %v1566_v14, %v7549_v62 }
 0x210   : > { %v7623_v3 = vmax.f32 %v1567_v45, 0.0  ;;  %1977 = vrot.lane.b32.xlu0 %v7620_v40, %s6428_s27 }
 0x212   : > { %1979 = vrot.lane.b32.xlu1 %v7623_v3, %s6428_s27 }
 0x214   : > { %2067 = vrot.lane.b32.xlu0 %v7600_v41, %s6433_s8 }
 0x218   : > { %2071 = vrot.lane.b32.xlu0 %v7620_v40, %s6433_s8 }
 0x21c   : > { %2161 = vrot.lane.b32.xlu0 %v7600_v41, %s6435_s10 }
 0x220   : > { %2165 = vrot.lane.b32.xlu0 %v7620_v40, %s6435_s10 }
 0x226   : > { %v1635_v4 = vpop.f32.mrf.mxu1 }
 0x227   : > { %v1636_v26 = vadd.f32 %v1635_v4, %v7549_v62 }
 0x228   : > { %v1637_v12 = vpop.f32.mrf.mxu1 }
 0x229   : > { %v7638_v37 = vmax.f32 %v1636_v26, 0.0  ;;  %v1638_v22 = vadd.f32 %v1637_v12, %v7549_v62 }
 0x22b   : > { %v7641_v24 = vmax.f32 %v1638_v22, 0.0  ;;  %1981 = vrot.lane.b32.xlu0 %v7638_v37, %s6428_s27 }
 0x22d   : > { %1983 = vrot.lane.b32.xlu1 %v7641_v24, %s6428_s27 }
 0x231   : > { %2073 = vrot.lane.b32.xlu1 %v7623_v3, %s6433_s8 }
 0x235   : > { %2077 = vrot.lane.b32.xlu1 %v7641_v24, %s6433_s8 }
 0x239   : > { %2167 = vrot.lane.b32.xlu1 %v7623_v3, %s6435_s10 }
 0x23d   : > { %2171 = vrot.lane.b32.xlu1 %v7641_v24, %s6435_s10 }
 0x242   : > { %v1706_v7 = vpop.f32.mrf.mxu0  ;;  %v1962_v32 = vpop.permute.xlu1 %1961 }
 0x243   : > { %v1707_v55 = vadd.f32 %v1706_v7, %v7549_v62 }
 0x244   : > { %v1708_v59 = vpop.f32.mrf.mxu0 }
 0x245   : > { %v7656_v39 = vmax.f32 %v1707_v55, 0.0  ;;  %v1709_v33 = vadd.f32 %v1708_v59, %v7549_v62 }
 0x247   : > { %1985 = vrot.lane.b32.xlu0 %v7656_v39, %s6428_s27  ;;  %v7681_v10 = vmax.f32 %v1709_v33, 0.0 }
 0x24a   : > { %v7660_v6 = vpop.permute.xlu0 %1969  ;;  %v7662_v43 = vpop.permute.xlu1 %2157 }
 0x24b   : > { %2075 = vrot.lane.b32.xlu0 %v7638_v37, %s6433_s8 }
 0x24e   : > { %v7666_v56 = vpop.permute.xlu0 %2063  ;;  %v1964_v18 = vpop.permute.xlu1 %1963 }
 0x24f   : > { %2079 = vrot.lane.b32.xlu0 %v7656_v39, %s6433_s8  ;;  %v1999_v11 = vsel %vm347_vm12, %v1962_v32, %v1964_v18 }
 0x250   : > { %v2036_v48 = vmax.f32 %v7552_v13, %v1999_v11 }
 0x252   : > { %v2058_v60 = vpop.permute.xlu0 %2057  ;;  %v7670_v30 = vpop.permute.xlu1 %1965 }
 0x253   : > { %2169 = vrot.lane.b32.xlu0 %v7638_v37, %s6435_s10  ;;  %v2000_v26 = vsel %vm347_vm12, %v1964_v18, %v7670_v30 }
 0x254   : > { %v2037_v22 = vmax.f32 %v7560_v50, %v2000_v26 }
 0x256   : > { %v7675_v27 = vpop.permute.xlu0 %2059  ;;  %v7677_v47 = vpop.permute.xlu1 %2153 }
 0x257   : > { %2173 = vrot.lane.b32.xlu0 %v7656_v39, %s6435_s10  ;;  %v2094_v12 = vsel %vm541_vm7, %v2058_v60, %v7675_v27 }
 0x258   : > { %v2131_v18 = vmax.f32 %v2037_v22, %v2094_v12 }
 0x25a   : > { %v1968_v8 = vpop.permute.xlu1 %1967  ;;  %v7685_v57 = vpop.permute.xlu0 %2155 }
 0x25b   : > { %1987 = vrot.lane.b32.xlu0 %v7681_v10, %s6428_s27  ;;  %v2002_v50 = vsel %vm347_vm12, %v1968_v8, %v7660_v6 }
 0x25e   : > { %v7687_v2 = vpop.permute.xlu1 %2061  ;;  %v1777_v51 = vpop.f32.mrf.mxu1 }
 0x25f   : > { %v1778_v20 = vadd.f32 %v1777_v51, %v7549_v62  ;;  %v2056_v52 = vpop.permute.xlu0 %2055 }
 0x260   : > { %v1779_v5 = vpop.f32.mrf.mxu1  ;;  %v2093_v61 = vsel %vm541_vm7, %v2056_v52, %v2058_v60  ;;  %v2001_v60 = vsel %vm347_vm12, %v7670_v30, %v1968_v8  ;;  %v2096_v30 = vsel %vm541_vm7, %v7687_v2, %v7666_v56 }
 0x261   : > { %v7690_v63 = vmax.f32 %v1778_v20, 0.0  ;;  %v1780_v31 = vadd.f32 %v1779_v5, %v7549_v62  ;;  %v2130_v16 = vmax.f32 %v2036_v48, %v2093_v61  ;;  %v2095_v20 = vsel %vm541_vm7, %v7675_v27, %v7687_v2 }
 0x262   : > { %v2152_v9 = vpop.permute.xlu1 %2151  ;;  %v2038_v52 = vmax.f32 %v7567_v23, %v2001_v60  ;;  %v2189_v23 = vsel %vm630_vm9, %v7677_v47, %v7685_v57 }
 0x263   : > { %1989 = vrot.lane.b32.xlu1 %v7690_v63, %s6428_s27  ;;  %v7695_v36 = vmax.f32 %v1780_v31, 0.0  ;;  %v2150_v54 = vpop.permute.xlu0 %2149  ;;  %v2188_v55 = vsel %vm630_vm9, %v2152_v9, %v7677_v47 }
 0x264   : > { %v2187_v34 = vsel %vm630_vm9, %v2150_v54, %v2152_v9  ;;  %v7765_v33 = vmax.f32 %v2131_v18, %v2188_v55  ;;  %v2132_v8 = vmax.f32 %v2038_v52, %v2095_v20 }
 0x265   : > { %v7709_v25 = vmax.f32 %v2130_v16, %v2187_v34 }
 0x266   : > { %v7697_v29 = vpop.permute.xlu1 %1971  ;;  %v7788_v27 = vmax.f32 %v2132_v8, %v2189_v23  ;;  %v2431_v2 = vrot.slane %v7765_v33, 6  ;;  %v2345_v47 = vrot.slane %v7765_v33, 4 }
 0x267   : > { %1991 = vrot.lane.b32.xlu1 %v7695_v36, %s6428_s27  ;;  %v2003_v0 = vsel %vm347_vm12, %v7660_v6, %v7697_v29  ;;  %v2430_v45 = vrot.slane %v7709_v25, 6  ;;  %v2260_v32 = vrot.slane %v7709_v25, 2  ;;  %v2344_v5 = vrot.slane %v7709_v25, 4  ;;  %v1974_v9 = vpop.permute.xlu0 %1973 }
 0x268   : > { %v2040_v15 = vmax.f32 %v7558_v49, %v2003_v0  ;;  %v2039_v6 = vmax.f32 %v7582_v58, %v2002_v50  ;;  %v2432_v11 = vrot.slane %v7788_v27, 6  ;;  %v2262_v61 = vrot.slane %v7788_v27, 2 }
 0x26a   : > { %v7704_v19 = vpop.permute.xlu1 %1975  ;;  %v2133_v31 = vmax.f32 %v2039_v6, %v2096_v30 }
 0x26b   : > { %2081 = vrot.lane.b32.xlu1 %v7681_v10, %s6433_s8  ;;  %v2005_v0 = vsel %vm347_vm12, %v1974_v9, %v7704_v19 }
 0x26e   : > { %v7711_v28 = vpop.permute.xlu1 %2065 }
 0x26f   : > { %2518 = vrot.lane.b32.xlu1 %v7709_v25, %s6431_s30  ;;  %v2097_v46 = vsel %vm541_vm7, %v7666_v56, %v7711_v28  ;;  %v2190_v56 = vsel %vm630_vm9, %v7685_v57, %v7662_v43  ;;  %v2261_v57 = vrot.slane %v7765_v33, 2 }
 0x270   : > { %v2134_v38 = vmax.f32 %v2040_v15, %v2097_v46  ;;  %v7790_v58 = vmax.f32 %v2133_v31, %v2190_v56  ;;  %v2004_v15 = vsel %vm347_vm12, %v7697_v29, %v1974_v9 }
 0x271   : > { %v2041_v26 = vmax.f32 %v7598_v1, %v2004_v15 }
 0x272   : > { %v7718_v13 = vpop.permute.xlu1 %2069  ;;  %v2347_v16 = vrot.slane %v7790_v58, 4  ;;  %v2433_v46 = vrot.slane %v7790_v58, 6 }
 0x276   : > { %v7724_v21 = vpop.permute.xlu1 %2159 }
 0x277   : > { %v2191_v42 = vsel %vm630_vm9, %v7662_v43, %v7724_v21  ;;  %v2346_v43 = vrot.slane %v7788_v27, 4 }
 0x278   : > { %v7729_v53 = vmax.f32 %v2134_v38, %v2191_v42 }
 0x27a   : > { %2812 = vrot.lane.b32.xlu1 %v7729_v53, %s6439_s17  ;;  %v1848_v35 = vpop.f32.mrf.mxu0  ;;  %v2348_v49 = vrot.slane %v7729_v53, 4  ;;  %v2434_v7 = vrot.slane %v7729_v53, 6  ;;  %v2164_v38 = vpop.permute.xlu1 %2163  ;;  %v2264_v56 = vrot.slane %v7729_v53, 2 }
 0x27b   : > { %v1849_v14 = vadd.f32 %v1848_v35, %v7549_v62 }
 0x27d   : > { %v7735_v4 = vmax.f32 %v1849_v14, 0.0  ;;  %v2042_v14 = vmax.f32 %v7600_v41, %v2005_v0 }
 0x27e   : > { %2448 = vrot.lane.b32.xlu1 %v2430_v45, %s6430_s29 }
 0x27f   : > { %1993 = vrot.lane.b32.xlu0 %v7735_v4, %s6428_s27 }
 0x282   : > { %2669 = vrot.lane.b32.xlu1 %v2348_v49, %s6440_s18  ;;  %v7808_v54 = vpop.permute.xlu0 %1977 }
 0x283   : > { %2083 = vrot.lane.b32.xlu0 %v7690_v63, %s6433_s8  ;;  %v2006_v20 = vsel %vm347_vm12, %v7704_v19, %v7808_v54 }
 0x284   : > { %v7837_v29 = vpop.permute.xlu1 %1979  ;;  %v2043_v6 = vmax.f32 %v7607_v17, %v2006_v20 }
 0x286   : > { %2741 = vrot.lane.b32.xlu1 %v2434_v7, %s6441_s19  ;;  %v7758_v59 = vpop.f32.mrf.mxu1  ;;  %v2068_v48 = vpop.permute.xlu0 %2067 }
 0x287   : > { %2589 = vrot.lane.b32.xlu0 %v2260_v32, %s6442_s20  ;;  %v2099_v35 = vsel %vm541_vm7, %v2068_v48, %v7718_v13  ;;  %v2098_v45 = vsel %vm541_vm7, %v7711_v28, %v2068_v48 }
 0x288   : > { %v6007_v51 = vpop.f32.mrf.mxu1  ;;  %v2136_v22 = vmax.f32 %v2042_v14, %v2099_v35  ;;  %v1850_v35 = vpop.f32.mrf.mxu0 }
 0x289   : > { %v1851_v14 = vadd.f32 %v1850_v35, %v7549_v62 }
 0x28a   : > { %2806 = vrot.lane.b32.xlu1 %v7765_v33, %s6439_s17  ;;  %v7817_v34 = vpop.permute.xlu0 %2071 }
 0x28b   : > { %2361 = vrot.lane.b32.xlu0 %v2344_v5, %s6443_s23  ;;  %v2100_v52 = vsel %vm541_vm7, %v7718_v13, %v7817_v34 }
 0x28c   : > { %v2137_v19 = vmax.f32 %v2043_v6, %v2100_v52  ;;  %v1920_v52 = vadd.f32 %v7758_v59, %v7549_v62 }
 0x28e   : > { %2520 = vrot.lane.b32.xlu1 %v7765_v33, %s6431_s30  ;;  %v2162_v42 = vpop.permute.xlu0 %2161 }
 0x28f   : > { %2277 = vrot.lane.b32.xlu0 %v2260_v32, %s6432_s7  ;;  %v2193_v12 = vsel %vm630_vm9, %v2162_v42, %v2164_v38  ;;  %v2192_v55 = vsel %vm630_vm9, %v7724_v21, %v2162_v42  ;;  %v2135_v32 = vmax.f32 %v2041_v26, %v2098_v45  ;;  %v2263_v21 = vrot.slane %v7790_v58, 2 }
 0x290   : > { %v7845_v41 = vmax.f32 %v2136_v22, %v2193_v12  ;;  %v2007_v22 = vsel %vm347_vm12, %v7808_v54, %v7837_v29 }
 0x291   : > { %v7847_v28 = vmax.f32 %v2135_v32, %v2192_v55  ;;  %v2044_v32 = vmax.f32 %v7620_v40, %v2007_v22 }
 0x292   : > { %2808 = vrot.lane.b32.xlu1 %v7788_v27, %s6439_s17  ;;  %v2350_v50 = vrot.slane %v7845_v41, 4  ;;  %v2166_v5 = vpop.permute.xlu0 %2165  ;;  %v2436_v30 = vrot.slane %v7845_v41, 6  ;;  %v2266_v15 = vrot.slane %v7845_v41, 2 }
 0x293   : > { %2810 = vrot.lane.b32.xlu0 %v7790_v58, %s6439_s17  ;;  %v2349_v18 = vrot.slane %v7847_v28, 4  ;;  %v2435_v51 = vrot.slane %v7847_v28, 6  ;;  %v2194_v8 = vsel %vm630_vm9, %v2164_v38, %v2166_v5 }
 0x294   : > { %v7883_v23 = vmax.f32 %v2137_v19, %v2194_v8  ;;  %v8000_v19 = vmax.f32 %v1920_v52, 0.0 }
 0x296   : > { %2735 = vrot.lane.b32.xlu1 %v2431_v2, %s6441_s19 }
 0x297   : > { %2663 = vrot.lane.b32.xlu0 %v2345_v47, %s6440_s18 }
 0x29a   : > { %2665 = vrot.lane.b32.xlu1 %v2346_v43, %s6440_s18 }
 0x29b   : > { %2591 = vrot.lane.b32.xlu0 %v2261_v57, %s6442_s20 }
 0x29d   : > { %v7887_v13 = vpop.permute.xlu0 %1981 }
 0x29e   : > { %2737 = vrot.lane.b32.xlu1 %v2432_v11, %s6441_s19  ;;  %v2008_v62 = vsel %vm347_vm12, %v7837_v29, %v7887_v13 }
 0x29f   : > { %2522 = vrot.lane.b32.xlu0 %v7788_v27, %s6431_s30  ;;  %v7849_v1 = vpop.permute.xlu1 %1983 }
 0x2a2   : > { %2593 = vrot.lane.b32.xlu1 %v2262_v61, %s6442_s20 }
 0x2a3   : > { %2363 = vrot.lane.b32.xlu0 %v2345_v47, %s6443_s23  ;;  %v7859_v60 = vpop.permute.xlu1 %2073  ;;  %v2265_v47 = vrot.slane %v7847_v28, 2 }
 0x2a4   : > { %v2101_v55 = vsel %vm541_vm7, %v7817_v34, %v7859_v60 }
 0x2a5   : > { %v2138_v54 = vmax.f32 %v2044_v32, %v2101_v55 }
 0x2a6   : > { %2365 = vrot.lane.b32.xlu1 %v2346_v43, %s6443_s23  ;;  %v2351_v43 = vrot.slane %v7883_v23, 4 }
 0x2a7   : > { %2450 = vrot.lane.b32.xlu0 %v2431_v2, %s6430_s29  ;;  %v7876_v31 = vpop.permute.xlu1 %2077 }
 0x2aa   : > { %2452 = vrot.lane.b32.xlu1 %v2432_v11, %s6430_s29  ;;  %v2437_v11 = vrot.slane %v7883_v23, 6 }
 0x2ab   : > { %2279 = vrot.lane.b32.xlu0 %v2261_v57, %s6432_s7  ;;  %v7891_v17 = vpop.permute.xlu1 %2167 }
 0x2ae   : > { %2281 = vrot.lane.b32.xlu1 %v2262_v61, %s6432_s7 }
 0x2af   : > { %2667 = vrot.lane.b32.xlu0 %v2347_v16, %s6440_s18  ;;  %v7901_v57 = vpop.permute.xlu1 %2171 }
 0x2b2   : > { %2085 = vrot.lane.b32.xlu1 %v7695_v36, %s6433_s8 }
 0x2b3   : > { %2739 = vrot.lane.b32.xlu0 %v2433_v46, %s6441_s19 }
 0x2b6   : > { %2175 = vrot.lane.b32.xlu1 %v7681_v10, %s6435_s10 }
 0x2b7   : > { %2087 = vrot.lane.b32.xlu0 %v7735_v4, %s6433_s8 }
 0x2b9   : > { %v7896_v2 = vpop.permute.xlu0 %1985 }
 0x2ba   : > { %2816 = vrot.lane.b32.xlu1 %v7845_v41, %s6439_s17 }
 0x2bb   : > { %2814 = vrot.lane.b32.xlu0 %v7847_v28, %s6439_s17 }
 0x2bd   : > { %v7907_v9 = vpop.permute.xlu0 %2075 }
 0x2be   : > { %2595 = vrot.lane.b32.xlu1 %v2263_v21, %s6442_s20  ;;  %v2103_v59 = vsel %vm541_vm7, %v7907_v9, %v7876_v31 }
 0x2bf   : > { %2671 = vrot.lane.b32.xlu0 %v2349_v18, %s6440_s18 }
 0x2c1   : > { %v7917_v48 = vpop.permute.xlu0 %2079 }
 0x2c2   : > { %2673 = vrot.lane.b32.xlu1 %v2350_v50, %s6440_s18 }
 0x2c3   : > { %2743 = vrot.lane.b32.xlu0 %v2435_v51, %s6441_s19 }
 0x2c6   : > { %2745 = vrot.lane.b32.xlu1 %v2436_v30, %s6441_s19 }
 0x2c7   : > { %2177 = vrot.lane.b32.xlu0 %v7690_v63, %s6435_s10 }
 0x2ca   : > { %2179 = vrot.lane.b32.xlu1 %v7695_v36, %s6435_s10 }
 0x2cb   : > { %2818 = vrot.lane.b32.xlu0 %v7883_v23, %s6439_s17 }
 0x2ce   : > { %2524 = vrot.lane.b32.xlu1 %v7790_v58, %s6431_s30 }
 0x2cf   : > { %2597 = vrot.lane.b32.xlu0 %v2264_v56, %s6442_s20 }
 0x2d2   : > { %2599 = vrot.lane.b32.xlu1 %v2265_v47, %s6442_s20 }
 0x2d3   : > { %2675 = vrot.lane.b32.xlu0 %v2351_v43, %s6440_s18 }
 0x2d5   : > { %v7911_v61 = vpop.permute.xlu1 %1989 }
 0x2d6   : > { %2367 = vrot.lane.b32.xlu1 %v2347_v16, %s6443_s23  ;;  %v2170_v16 = vpop.permute.xlu0 %2169 }
 0x2d7   : > { %2747 = vrot.lane.b32.xlu0 %v2437_v11, %s6441_s19  ;;  %v2196_v32 = vsel %vm630_vm9, %v7891_v17, %v2170_v16 }
 0x2d9   : > { %v7921_v0 = vpop.permute.xlu1 %1991 }
 0x2da   : > { %2454 = vrot.lane.b32.xlu1 %v2433_v46, %s6430_s29  ;;  %v7933_v46 = vpop.permute.xlu0 %2173 }
 0x2db   : > { %2181 = vrot.lane.b32.xlu0 %v7735_v4, %s6435_s10 }
 0x2dd   : > { %v7928_v38 = vpop.permute.xlu1 %2081 }
 0x2de   : > { %2528 = vrot.lane.b32.xlu1 %v7847_v28, %s6431_s30  ;;  %v7947_v26 = vpop.permute.xlu0 %1987 }
 0x2df   : > { %2526 = vrot.lane.b32.xlu0 %v7729_v53, %s6431_s30 }
 0x2e1   : > { %v7938_v42 = vpop.permute.xlu1 %2518 }
 0x2e2   : > { %2283 = vrot.lane.b32.xlu1 %v2263_v21, %s6432_s7 }
 0x2e3   : > { %2601 = vrot.lane.b32.xlu0 %v2266_v15, %s6442_s20 }
 0x2e6   : > { %2371 = vrot.lane.b32.xlu1 %v2349_v18, %s6443_s23  ;;  %v2195_v18 = vsel %vm630_vm9, %v2166_v5, %v7891_v17 }
 0x2e7   : > { %2369 = vrot.lane.b32.xlu0 %v2348_v49, %s6443_s23  ;;  %v7952_v49 = vmax.f32 %v1851_v14, 0.0  ;;  %v7979_v34 = vmax.f32 %v2138_v54, %v2195_v18  ;;  %v2197_v14 = vsel %vm630_vm9, %v2170_v16, %v7901_v57 }
 0x2e9   : > { %v10917_v8 = vrot.slane %v7979_v34, 4  ;;  %v10914_v29 = vrot.slane %v7979_v34, 6 }
 0x2ea   : > { %2458 = vrot.lane.b32.xlu1 %v2435_v51, %s6430_s29 }
 0x2eb   : > { %2456 = vrot.lane.b32.xlu0 %v2434_v7, %s6430_s29 }
 0x2ec   : > { %v7945_v45 = vpop.permute.xlu1 %2812 }
 0x2ee   : > { %2287 = vrot.lane.b32.xlu1 %v2265_v47, %s6432_s7 }
 0x2ef   : > { %2530 = vrot.lane.b32.xlu0 %v7845_v41, %s6431_s30 }
 0x2f0   : > { %v7954_v12 = vpop.permute.xlu1 %2448 }
 0x2f1   : > { %v7959_v7 = vpop.permute.xlu0 %1993 }
 0x2f2   : > { %1995 = vrot.lane.b32.xlu1 %v7952_v49, %s6428_s27 }
 0x2f3   : > { %2285 = vrot.lane.b32.xlu0 %v2264_v56, %s6432_s7 }
 0x2f4   : > { %v7968_v21 = vpop.permute.xlu1 %2669 }
 0x2f5   : > { %v7972_v51 = vpop.permute.xlu0 %2083 }
 0x2f6   : > { %2089 = vrot.lane.b32.xlu1 %v7952_v49, %s6433_s8 }
 0x2f7   : > { %2373 = vrot.lane.b32.xlu0 %v2350_v50, %s6443_s23 }
 0x2f8   : > { %v7981_v20 = vpop.permute.xlu1 %2741 }
 0x2f9   : > { %v7983_v40 = vpop.permute.xlu0 %2589 }
 0x2fa   : > { %2820 = vrot.lane.b32.xlu1 %v7979_v34, %s6439_s17 }
 0x2fb   : > { %2460 = vrot.lane.b32.xlu0 %v2436_v30, %s6430_s29  ;;  %v2009_v30 = vsel %vm347_vm12, %v7887_v13, %v7849_v1  ;;  %v2045_v13 = vmax.f32 %v7623_v3, %v2008_v62 }
 0x2fc   : > { %v2807_v5 = vpop.permute.xlu1 %2806  ;;  %v2046_v47 = vmax.f32 %v7638_v37, %v2009_v30 }
 0x2fd   : > { %v7992_v6 = vpop.permute.xlu0 %2361 }
 0x2fe   : > { %2183 = vrot.lane.b32.xlu1 %v7952_v49, %s6435_s10  ;;  %v2140_v55 = vmax.f32 %v2046_v47, %v2103_v59 }
 0x2ff   : > { %2289 = vrot.lane.b32.xlu0 %v2266_v15, %s6432_s7  ;;  %v2102_v15 = vsel %vm541_vm7, %v7859_v60, %v7907_v9 }
 0x300   : > { %v7997_v50 = vpop.permute.xlu1 %2520  ;;  %v2139_v60 = vmax.f32 %v2045_v13, %v2102_v15  ;;  %v8039_v3 = vmax.f32 %v2140_v55, %v2197_v14  ;;  %v2010_v15 = vsel %vm347_vm12, %v7849_v1, %v7896_v2 }
 0x301   : > { %v8005_v56 = vpop.permute.xlu0 %2277  ;;  %v2047_v55 = vmax.f32 %v7641_v24, %v2010_v15 }
 0x302   : > { %2677 = vrot.lane.b32.xlu1 %v10917_v8, %s6440_s18  ;;  %v8042_v17 = vmax.f32 %v2139_v60, %v2196_v32  ;;  %v10911_v62 = vrot.slane %v8039_v3, 4  ;;  %v10910_v14 = vrot.slane %v8039_v3, 6 }
 0x303   : > { %1997 = vrot.lane.b32.xlu0 %v8000_v19, %s6428_s27 }
 0x304   : > { %v2809_v35 = vpop.permute.xlu1 %2808  ;;  %v10918_v47 = vrot.slane %v8042_v17, 4  ;;  %v10915_v1 = vrot.slane %v8042_v17, 6  ;;  %v10913_v15 = vrot.slane %v8042_v17, 2 }
 0x305   : > { %v8026_v22 = vpop.permute.xlu0 %2810  ;;  %v2843_v9 = vsel %vm2842_vm1, %v2807_v5, %v2809_v35  ;;  %v10919_v5 = vrot.slane %v7883_v23, 2 }
 0x306   : > { %2749 = vrot.lane.b32.xlu1 %v10914_v29, %s6441_s19  ;;  %v2844_v37 = vsel %vm2842_vm1, %v2809_v35, %v8026_v22  ;;  %v2104_v35 = vsel %vm541_vm7, %v7876_v31, %v7917_v48 }
 0x307   : > { %2091 = vrot.lane.b32.xlu0 %v8000_v19, %s6433_s8  ;;  %5604 = vmatprep.subr.msk.mxu0 %vm1046_vm14, %v2844_v37  ;;  %v2198_v37 = vsel %vm630_vm9, %v7901_v57, %v7933_v46  ;;  %v2141_v60 = vmax.f32 %v2047_v55, %v2104_v35  ;;  %v10912_v55 = vrot.slane %v7979_v34, 2 }
 0x308   : > { %v2736_v18 = vpop.permute.xlu1 %2735  ;;  %5605 = vmatpush1.msk.msra.mxu0 %vm1046_vm14, %v2843_v9 }
 0x309   : > { %v2664_v16 = vpop.permute.xlu0 %2663  ;;  %v8086_v9 = vmax.f32 %v2141_v60, %v2198_v37 }
 0x30a   : > { %2824 = vrot.lane.b32.xlu1 %v8039_v3, %s6439_s17 }
 0x30b   : > { %2822 = vrot.lane.b32.xlu0 %v8042_v17, %s6439_s17  ;;  %v2441_v29 = vrot.slane %v8086_v9, 6 }
 0x30c   : > { %v2666_v54 = vpop.permute.xlu1 %2665 }
 0x30d   : > { %v2592_v52 = vpop.permute.xlu0 %2591 }
 0x30e   : > { %2603 = vrot.lane.b32.xlu1 %v10919_v5, %s6442_s20  ;;  %v2626_v8 = vsel %vm2625_vm6, %v7983_v40, %v2592_v52 }
 0x30f   : > { %2185 = vrot.lane.b32.xlu0 %v8000_v19, %s6435_s10 }
 0x310   : > { %v2738_v30 = vpop.permute.xlu1 %2737 }
 0x311   : > { %v8055_v59 = vpop.permute.xlu0 %2522 }
 0x312   : > { %2681 = vrot.lane.b32.xlu1 %v10911_v62, %s6440_s18  ;;  %v2555_v40 = vsel %vm1006_vm0, %v7997_v50, %v8055_v59 }
 0x313   : > { %2679 = vrot.lane.b32.xlu0 %v10918_v47, %s6440_s18 }
 0x314   : > { %v8070_v13 = vpop.permute.xlu1 %2593 }
 0x315   : > { %v2364_v32 = vpop.permute.xlu0 %2363  ;;  %v2627_v47 = vsel %vm2625_vm6, %v2592_v52, %v8070_v13 }
 0x316   : > { %2753 = vrot.lane.b32.xlu1 %v10910_v14, %s6441_s19  ;;  %v10916_v14 = vrot.slane %v8086_v9, 4 }
 0x317   : > { %2751 = vrot.lane.b32.xlu0 %v10915_v1, %s6441_s19 }
 0x318   : > { %v8084_v31 = vpop.permute.xlu1 %2365 }
 0x319   : > { %v2451_v24 = vpop.permute.xlu0 %2450 }
 0x31a   : > { %2532 = vrot.lane.b32.xlu1 %v7883_v23, %s6431_s30 }
 0x31b   : > { %2826 = vrot.lane.b32.xlu0 %v8086_v9, %s6439_s17 }
 0x31c   : > { %v8092_v57 = vpop.permute.xlu1 %2452 }
 0x31d   : > { %v2280_v35 = vpop.permute.xlu0 %2279 }
 0x31e   : > { %2607 = vrot.lane.b32.xlu1 %v10913_v15, %s6442_s20 }
 0x31f   : > { %2605 = vrot.lane.b32.xlu0 %v10912_v55, %s6442_s20  ;;  %v2772_v55 = vsel %vm2771_vm3, %v2736_v18, %v2738_v30 }
 0x320   : > { %v8102_v37 = vpop.permute.xlu1 %2281 }
 0x321   : > { %v8104_v60 = vpop.permute.xlu0 %2667 }
 0x322   : > { %2375 = vrot.lane.b32.xlu1 %v2351_v43, %s6443_s23  ;;  %v2701_v1 = vsel %vm2699_vm5, %v2666_v54, %v8104_v60 }
 0x323   : > { %2683 = vrot.lane.b32.xlu0 %v10916_v14, %s6440_s18  ;;  %v2700_v14 = vsel %vm2699_vm5, %v2664_v16, %v2666_v54  ;;  %v2929_v16 = vsel %vm1086_vm11, %v2627_v47, %v2701_v1  ;;  %v2485_v54 = vsel %vm828_vm2, %v2451_v24, %v8092_v57 }
 0x324   : > { %v8113_v62 = vpop.permute.xlu1 %2085  ;;  %v2928_v52 = vsel %vm1086_vm11, %v2626_v8, %v2700_v14 }
 0x325   : > { %v8116_v15 = vpop.permute.xlu0 %2739 }
 0x326   : > { %v2773_v43 = vsel %vm2771_vm3, %v2738_v30, %v8116_v15  ;;  %2462 = vrot.lane.b32.xlu1 %v2437_v11, %s6430_s29  ;;  %v2945_v30 = vsel %vm1126_vm4, %v2700_v14, %v2772_v55  ;;  %v2554_v55 = vsel %vm1006_vm0, %v7938_v42, %v7997_v50  ;;  %v2311_v50 = vsel %vm442_vm8, %v8005_v56, %v2280_v35 }
 0x327   : > { %2755 = vrot.lane.b32.xlu0 %v2441_v29, %s6441_s19  ;;  %v2946_v18 = vsel %vm1126_vm4, %v2701_v1, %v2773_v43  ;;  %v2484_v1 = vsel %vm828_vm2, %v7954_v12, %v2451_v24  ;;  %v2912_v43 = vsel %vm1046_vm14, %v2555_v40, %v2627_v47  ;;  %v2911_v42 = vsel %vm1046_vm14, %v2554_v55, %v2626_v8 }
 0x328   : > { %v8135_v5 = vpop.permute.xlu1 %2175  ;;  %3046 = vmatprep.subr.mxu0 %v2946_v18  ;;  %v2397_v18 = vsel %vm2395_vm13, %v2364_v32, %v8084_v31  ;;  %v2396_v12 = vsel %vm2395_vm13, %v7992_v6, %v2364_v32  ;;  %v10993_v40 = vrot.slane %v7883_v23, 2  ;;  %v2845_v56 = vsel %vm2842_vm1, %v8026_v22, %v7945_v45 }
 0x329   : > { %v8138_v11 = vpop.permute.xlu0 %2087  ;;  %3047 = vmatpush1.msra.mxu0 %v2945_v30  ;;  %v2312_v30 = vsel %vm442_vm8, %v2280_v35, %v8102_v37  ;;  %v2895_v47 = vsel %vm1126_vm4, %v2397_v18, %v2485_v54  ;;  %v2877_v35 = vsel %vm1086_vm11, %v2311_v50, %v2396_v12  ;;  %v2860_v22 = vsel %vm1046_vm14, %v7709_v25, %v2311_v50  ;;  %v8217_v25 = vld [vmem:[%s10901_s3 + $0x8] sm:$0xff] }
 0x32a   : > { %2536 = vrot.lane.b32.xlu1 %v8042_v17, %s6431_s30  ;;  %3048 = vmatprep.subr.mxu0 %v2929_v16  ;;  %v2270_v16 = vrot.slane %v8039_v3, 2  ;;  %v2878_v6 = vsel %vm1086_vm11, %v2312_v30, %v2397_v18  ;;  %v2861_v55 = vsel %vm1046_vm14, %v7765_v33, %v2312_v30  ;;  %v2011_v33 = vsel %vm347_vm12, %v7896_v2, %v7947_v26 }
 0x32b   : > { %2534 = vrot.lane.b32.xlu0 %v7979_v34, %s6431_s30  ;;  %3049 = vmatpush1.msra.mxu0 %v2928_v52  ;;  %v2894_v52 = vsel %vm1126_vm4, %v2396_v12, %v2484_v1  ;;  %v8193_v1 = vld [vmem:[%s10901_s3] sm:$0xff]  ;;  %v2774_v30 = vsel %vm2771_vm3, %v8116_v15, %v7981_v20  ;;  %v10996_v2 = vrot.slane %v8042_v17, 6  ;;  %v2105_v15 = vsel %vm541_vm7, %v7917_v48, %v7928_v38 }
 0x32c   : > { %v8161_v14 = vpop.permute.xlu1 %2816  ;;  %3050 = vmatprep.subr.mxu0 %v2912_v43  ;;  %v10995_v43 = vrot.slane %v7979_v34, 4  ;;  %v2199_v48 = vsel %vm630_vm9, %v7933_v46, %v8135_v5 }
 0x32d   : > { %v2815_v24 = vpop.permute.xlu0 %2814  ;;  %3051 = vmatpush1.msra.mxu0 %v2911_v42 }
 0x32e   : > { %2291 = vrot.lane.b32.xlu1 %v10993_v40, %s6432_s7  ;;  %3052 = vmatprep.subr.mxu0 %v2895_v47  ;;  %v2846_v8 = vsel %vm2842_vm1, %v7945_v45, %v2815_v24  ;;  %v10994_v45 = vrot.slane %v8042_v17, 4  ;;  %v2702_v47 = vsel %vm2699_vm5, %v8104_v60, %v7968_v21  ;;  %v10997_v40 = vrot.slane %v7979_v34, 6  ;;  %v8248_v60 = vld [vmem:[%s10901_s3 + $0x10] sm:$0xff] }
 0x32f   : > { %2609 = vrot.lane.b32.xlu0 %v2270_v16, %s6442_s20  ;;  %3053 = vmatpush1.msra.mxu0 %v2894_v52 }
 0x330   : > { %5609 = vmatprep.subr.msk.mxu1 %vm1046_vm14, %v2846_v8  ;;  %v2596_v32 = vpop.permute.xlu1 %2595  ;;  %3054 = vmatprep.subr.mxu0 %v2878_v6  ;;  %v2947_v6 = vsel %vm1126_vm4, %v2702_v47, %v2774_v30 }
 0x331   : > { %5610 = vmatpush1.msk.msra.mxu1 %vm1046_vm14, %v2845_v56  ;;  %v8186_v54 = vpop.permute.xlu0 %2671  ;;  %3055 = vmatpush1.msra.mxu0 %v2877_v35  ;;  %v10998_v56 = vrot.slane %v8042_v17, 2 }
 0x332   : > { %2379 = vrot.lane.b32.xlu1 %v10994_v45, %s6443_s23  ;;  %3056 = vmatprep.subr.mxu0 %v2861_v55  ;;  %v2703_v12 = vsel %vm2699_vm5, %v7968_v21, %v8186_v54 }
 0x333   : > { %2377 = vrot.lane.b32.xlu0 %v10995_v43, %s6443_s23  ;;  %3057 = vmatpush1.msra.mxu0 %v2860_v22  ;;  %v2847_v22 = vsel %vm2842_vm1, %v2815_v24, %v8161_v14  ;;  %v10999_v43 = vrot.slane %v7979_v34, 2  ;;  %v2107_v24 = vsel %vm541_vm7, %v7972_v51, %v8113_v62 }
 0x334   : > { %v8203_v18 = vpop.permute.xlu1 %2673  ;;  %5606 = vmatmul.mubr.msk.f32.vlgmr.msra.gmra.mxu0 %vm2771_vm3, %v8193_v1 }
 0x335   : > { %v2744_v42 = vpop.permute.xlu0 %2743  ;;  %3096 = vmatprep.mubr.f32.mxu0 %v10989_v44 }
 0x336   : > { %v2775_v50 = vsel %vm2771_vm3, %v7981_v20, %v2744_v42  ;;  %2466 = vrot.lane.b32.xlu1 %v10996_v2, %s6430_s29  ;;  %v2048_v20 = vmax.f32 %v7656_v39, %v2011_v33  ;;  %v2628_v2 = vsel %vm2625_vm6, %v8070_v13, %v2596_v32 }
 0x337   : > { %2464 = vrot.lane.b32.xlu0 %v10997_v40, %s6430_s29  ;;  %v2948_v52 = vsel %vm1126_vm4, %v2703_v12, %v2775_v50  ;;  %v2013_v50 = vsel %vm347_vm12, %v7911_v61, %v7921_v0  ;;  %v11000_v40 = vrot.slane %v8039_v3, 4 }
 0x338   : > { %v2746_v8 = vpop.permute.xlu1 %2745  ;;  %3129 = vmatprep.subr.mxu1 %v2948_v52  ;;  %5607 = vmatmul.mubr.msk.f32.gmra.mxu0 %vm2771_vm3, %v8217_v25  ;;  %v2142_v39 = vmax.f32 %v2048_v20, %v2105_v15  ;;  %v2050_v20 = vmax.f32 %v7690_v63, %v2013_v50  ;;  %v11001_v63 = vrot.slane %v8039_v3, 6 }
 0x339   : > { %v2178_v21 = vpop.permute.xlu0 %2177  ;;  %3130 = vmatpush1.msra.mxu1 %v2947_v6  ;;  %3102 = vmatprep.mubr.f32.mxu0 %v10989_v44  ;;  %v2930_v6 = vsel %vm1086_vm11, %v2628_v2, %v2702_v47 }
 0x33a   : > { %2295 = vrot.lane.b32.xlu1 %v10998_v56, %s6432_s7  ;;  %v8255_v35 = vmax.f32 %v2142_v39, %v2199_v48  ;;  %v2012_v56 = vsel %vm347_vm12, %v7947_v26, %v7911_v61  ;;  %v2776_v61 = vsel %vm2771_vm3, %v2744_v42, %v2746_v8  ;;  %v2200_v50 = vsel %vm630_vm9, %v8135_v5, %v2178_v21 }
 0x33b   : > { %2538 = vrot.lane.b32.xlu0 %v8039_v3, %s6431_s30 }
 0x33c   : > { %v8257_v46 = vpop.permute.xlu1 %2179  ;;  %5608 = vmatmul.mubr.msk.f32.gmra.mxu0 %vm2771_vm3, %v8248_v60  ;;  %v2356_v30 = vrot.slane %v8255_v35, 4 }
 0x33d   : > { %v8261_v55 = vpop.permute.xlu0 %2818  ;;  %3256 = vmatprep.mubr.f32.mxu0 %v10989_v44  ;;  %v2201_v48 = vsel %vm630_vm9, %v2178_v21, %v8257_v46 }
 0x33e   : > { %2828 = vrot.lane.b32.xlu1 %v8255_v35, %s6439_s17  ;;  %v2848_v45 = vsel %vm2842_vm1, %v8161_v14, %v8261_v55 }
 0x33f   : > { %2293 = vrot.lane.b32.xlu0 %v10999_v43, %s6432_s7  ;;  %5614 = vmatprep.subr.msk.mxu0 %vm1046_vm14, %v2848_v45  ;;  %v2144_v45 = vmax.f32 %v2050_v20, %v2107_v24  ;;  %v2049_v43 = vmax.f32 %v7681_v10, %v2012_v56  ;;  %v2704_v10 = vsel %vm2699_vm5, %v8186_v54, %v8203_v18 }
 0x340   : > { %v2525_v33 = vpop.permute.xlu1 %2524  ;;  %5615 = vmatpush1.msk.msra.mxu0 %vm1046_vm14, %v2847_v22  ;;  %v2949_v21 = vsel %vm1126_vm4, %v2704_v10, %v2776_v61 }
 0x341   : > { %v2598_v15 = vpop.permute.xlu0 %2597  ;;  %v8312_v47 = vmax.f32 %v2144_v45, %v2201_v48  ;;  %v2014_v48 = vsel %vm347_vm12, %v7921_v0, %v7959_v7 }
 0x342   : > { %v2629_v14 = vsel %vm2625_vm6, %v2596_v32, %v2598_v15  ;;  %2685 = vrot.lane.b32.xlu1 %v2356_v30, %s6440_s18  ;;  %v2442_v32 = vrot.slane %v8255_v35, 6 }
 0x343   : > { %2381 = vrot.lane.b32.xlu0 %v11000_v40, %s6443_s23  ;;  %v2931_v52 = vsel %vm1086_vm11, %v2629_v14, %v2703_v12  ;;  %v2106_v12 = vsel %vm541_vm7, %v7928_v38, %v7972_v51  ;;  %v2358_v54 = vrot.slane %v8312_v47, 4  ;;  %v2444_v0 = vrot.slane %v8312_v47, 6 }
 0x344   : > { %v2600_v13 = vpop.permute.xlu1 %2599  ;;  %3131 = vmatprep.subr.mxu1 %v2931_v52  ;;  %v2143_v51 = vmax.f32 %v2049_v43, %v2106_v12  ;;  %v2051_v12 = vmax.f32 %v7695_v36, %v2014_v48 }
 0x345   : > { %v8298_v39 = vpop.permute.xlu0 %2675  ;;  %3132 = vmatpush1.msra.mxu1 %v2930_v6  ;;  %v2630_v43 = vsel %vm2625_vm6, %v2598_v15, %v2600_v13 }
 0x346   : > { %2757 = vrot.lane.b32.xlu1 %v2442_v32, %s6441_s19  ;;  %v2705_v24 = vsel %vm2699_vm5, %v8203_v18, %v8298_v39  ;;  %v8338_v40 = vmax.f32 %v2143_v51, %v2200_v50  ;;  %v2556_v18 = vsel %vm1006_vm0, %v8055_v59, %v2525_v33  ;;  %v2108_v59 = vsel %vm541_vm7, %v8113_v62, %v8138_v11 }
 0x347   : > { %2468 = vrot.lane.b32.xlu0 %v11001_v63, %s6430_s29 }
 0x348   : > { %v8314_v22 = vpop.permute.xlu1 %2367  ;;  %v2357_v6 = vrot.slane %v8338_v40, 4  ;;  %v2443_v50 = vrot.slane %v8338_v40, 6 }
 0x349   : > { %v8318_v26 = vpop.permute.xlu0 %2747 }
 0x34a   : > { %v2777_v38 = vsel %vm2771_vm3, %v2746_v8, %v8318_v26  ;;  %2832 = vrot.lane.b32.xlu1 %v8312_v47, %s6439_s17  ;;  %v2271_v8 = vrot.slane %v8086_v9, 2 }
 0x34b   : > { %2297 = vrot.lane.b32.xlu0 %v2270_v16, %s6432_s7  ;;  %v2950_v5 = vsel %vm1126_vm4, %v2705_v24, %v2777_v38  ;;  %v2932_v38 = vsel %vm1086_vm11, %v2630_v43, %v2704_v10 }
 0x34c   : > { %v2455_v42 = vpop.permute.xlu1 %2454  ;;  %3212 = vmatprep.subr.mxu0 %v2950_v5  ;;  %v2273_v5 = vrot.slane %v8338_v40, 2 }
 0x34d   : > { %v8340_v52 = vpop.permute.xlu0 %2181  ;;  %3213 = vmatpush1.msra.mxu0 %v2949_v21 }
 0x34e   : > { %2611 = vrot.lane.b32.xlu1 %v2271_v8, %s6442_s20 }
 0x34f   : > { %2830 = vrot.lane.b32.xlu0 %v8338_v40, %s6439_s17 }
 0x350   : > { %v2529_v16 = vpop.permute.xlu1 %2528 }
 0x351   : > { %v2527_v20 = vpop.permute.xlu0 %2526 }
 0x352   : > { %v2557_v56 = vsel %vm1006_vm0, %v2525_v33, %v2527_v20  ;;  %2689 = vrot.lane.b32.xlu1 %v2358_v54, %s6440_s18  ;;  %v2913_v33 = vsel %vm1046_vm14, %v2556_v18, %v2628_v2  ;;  %v2145_v2 = vmax.f32 %v2051_v12, %v2108_v59  ;;  %v2272_v18 = vrot.slane %v8255_v35, 2 }
 0x353   : > { %2687 = vrot.lane.b32.xlu0 %v2357_v6, %s6440_s18  ;;  %v2914_v45 = vsel %vm1046_vm14, %v2557_v56, %v2629_v14  ;;  %v2202_v14 = vsel %vm630_vm9, %v8257_v46, %v8340_v52  ;;  %v2398_v56 = vsel %vm2395_vm13, %v8084_v31, %v8314_v22 }
 0x354   : > { %v2284_v63 = vpop.permute.xlu1 %2283  ;;  %3133 = vmatprep.subr.mxu1 %v2914_v45  ;;  %v8385_v51 = vmax.f32 %v2145_v2, %v2202_v14 }
 0x355   : > { %v8369_v61 = vpop.permute.xlu0 %2601  ;;  %3134 = vmatpush1.msra.mxu1 %v2913_v33 }
 0x356   : > { %v2631_v62 = vsel %vm2625_vm6, %v2600_v13, %v8369_v61  ;;  %2761 = vrot.lane.b32.xlu1 %v2444_v0, %s6441_s19  ;;  %v2359_v12 = vrot.slane %v8385_v51, 4 }
 0x357   : > { %2759 = vrot.lane.b32.xlu0 %v2443_v50, %s6441_s19  ;;  %v2933_v36 = vsel %vm1086_vm11, %v2631_v62, %v2705_v24  ;;  %v2486_v24 = vsel %vm828_vm2, %v8092_v57, %v2455_v42 }
 0x358   : > { %v2372_v15 = vpop.permute.xlu1 %2371  ;;  %3214 = vmatprep.subr.mxu0 %v2933_v36  ;;  %v2896_v59 = vsel %vm1126_vm4, %v2398_v56, %v2486_v24  ;;  %v2313_v36 = vsel %vm442_vm8, %v8102_v37, %v2284_v63 }
 0x359   : > { %v2370_v46 = vpop.permute.xlu0 %2369  ;;  %3215 = vmatpush1.msra.mxu0 %v2932_v38  ;;  %v2879_v37 = vsel %vm1086_vm11, %v2313_v36, %v2398_v56 }
 0x35a   : > { %2540 = vrot.lane.b32.xlu1 %v8086_v9, %s6431_s30  ;;  %v2399_v10 = vsel %vm2395_vm13, %v8314_v22, %v2370_v46  ;;  %v11002_v22 = vrot.slane %v8086_v9, 4 }
 0x35b   : > { %2834 = vrot.lane.b32.xlu0 %v8385_v51, %s6439_s17 }
 0x35c   : > { %v2459_v13 = vpop.permute.xlu1 %2458 }
 0x35d   : > { %v2457_v21 = vpop.permute.xlu0 %2456 }
 0x35e   : > { %v2487_v48 = vsel %vm828_vm2, %v2455_v42, %v2457_v21  ;;  %2615 = vrot.lane.b32.xlu1 %v2273_v5, %s6442_s20  ;;  %v2558_v42 = vsel %vm1006_vm0, %v2527_v20, %v2529_v16  ;;  %v2488_v56 = vsel %vm828_vm2, %v2457_v21, %v2459_v13 }
 0x35f   : > { %2613 = vrot.lane.b32.xlu0 %v2272_v18, %s6442_s20  ;;  %v2897_v57 = vsel %vm1126_vm4, %v2399_v10, %v2487_v48  ;;  %v2915_v20 = vsel %vm1046_vm14, %v2558_v42, %v2630_v43  ;;  %v2400_v42 = vsel %vm2395_vm13, %v2370_v46, %v2372_v15 }
 0x360   : > { %v2288_v45 = vpop.permute.xlu1 %2287  ;;  %3135 = vmatprep.subr.mxu1 %v2897_v57 }
 0x361   : > { %v8410_v33 = vpop.permute.xlu0 %2530  ;;  %3136 = vmatpush1.msra.mxu1 %v2896_v59 }
 0x362   : > { %v2559_v31 = vsel %vm1006_vm0, %v2529_v16, %v8410_v33  ;;  %2383 = vrot.lane.b32.xlu1 %v11002_v22, %s6443_s23  ;;  %v2445_v16 = vrot.slane %v8385_v51, 6  ;;  %v2898_v22 = vsel %vm1126_vm4, %v2400_v42, %v2488_v56 }
 0x363   : > { %2691 = vrot.lane.b32.xlu0 %v2359_v12, %s6440_s18  ;;  %v2916_v14 = vsel %vm1046_vm14, %v2559_v31, %v2631_v62 }
 0x364   : > { %v8422_v2 = vpop.permute.xlu1 %1995  ;;  %3216 = vmatprep.subr.mxu0 %v2916_v14 }
 0x365   : > { %v2286_v38 = vpop.permute.xlu0 %2285  ;;  %3217 = vmatpush1.msra.mxu0 %v2915_v20 }
 0x366   : > { %v2314_v24 = vsel %vm442_vm8, %v2284_v63, %v2286_v38  ;;  %2470 = vrot.lane.b32.xlu1 %v2441_v29, %s6430_s29  ;;  %v2862_v29 = vsel %vm1046_vm14, %v7788_v27, %v2313_v36 }
 0x367   : > { %2763 = vrot.lane.b32.xlu0 %v2445_v16, %s6441_s19  ;;  %v2880_v62 = vsel %vm1086_vm11, %v2314_v24, %v2399_v10  ;;  %v2863_v63 = vsel %vm1046_vm14, %v7790_v58, %v2314_v24  ;;  %v2274_v58 = vrot.slane %v8312_v47, 2 }
 0x368   : > { %v8436_v43 = vpop.permute.xlu1 %2089  ;;  %3137 = vmatprep.subr.mxu1 %v2880_v62 }
 0x369   : > { %v8439_v48 = vpop.permute.xlu0 %2373  ;;  %3138 = vmatpush1.msra.mxu1 %v2879_v37 }
 0x36a   : > { %2544 = vrot.lane.b32.xlu1 %v8338_v40, %s6431_s30  ;;  %3139 = vmatprep.subr.mxu1 %v2863_v63  ;;  %v2401_v59 = vsel %vm2395_vm13, %v2372_v15, %v8439_v48 }
 0x36b   : > { %2542 = vrot.lane.b32.xlu0 %v8255_v35, %s6431_s30  ;;  %3140 = vmatpush1.msra.mxu1 %v2862_v29 }
 0x36c   : > { %v2821_v10 = vpop.permute.xlu1 %2820  ;;  %5611 = vmatmul.mubr.msk.f32.vlgmr.msra.gmra.mxu1 %vm2771_vm3, %v8193_v1 }
 0x36d   : > { %v8452_v57 = vpop.permute.xlu0 %2460  ;;  %3179 = vmatprep.mubr.f32.mxu1 %v10989_v44 }
 0x36e   : > { %v2489_v27 = vsel %vm828_vm2, %v2459_v13, %v8452_v57  ;;  %2299 = vrot.lane.b32.xlu1 %v2271_v8, %s6432_s7  ;;  %v2315_v13 = vsel %vm442_vm8, %v2286_v38, %v2288_v45 }
 0x36f   : > { %2617 = vrot.lane.b32.xlu0 %v2274_v58, %s6442_s20  ;;  %v2899_v21 = vsel %vm1126_vm4, %v2401_v59, %v2489_v27  ;;  %v2881_v20 = vsel %vm1086_vm11, %v2315_v13, %v2400_v42 }
 0x370   : > { %v8468_v31 = vpop.permute.xlu1 %2183  ;;  %3218 = vmatprep.subr.mxu0 %v2899_v21  ;;  %5612 = vmatmul.mubr.msk.f32.gmra.mxu1 %vm2771_vm3, %v8217_v25 }
 0x371   : > { %v8474_v14 = vpop.permute.xlu0 %2289  ;;  %3219 = vmatpush1.msra.mxu0 %v2898_v22  ;;  %3185 = vmatprep.mubr.f32.mxu1 %v10989_v44 }
 0x372   : > { %v2316_v8 = vsel %vm442_vm8, %v2288_v45, %v8474_v14  ;;  %2387 = vrot.lane.b32.xlu1 %v2357_v6, %s6443_s23  ;;  %v2015_v45 = vsel %vm347_vm12, %v7959_v7, %v8422_v2  ;;  %v2109_v7 = vsel %vm541_vm7, %v8138_v11, %v8436_v43 }
 0x373   : > { %2385 = vrot.lane.b32.xlu0 %v2356_v30, %s6443_s23  ;;  %v2882_v15 = vsel %vm1086_vm11, %v2316_v8, %v2401_v59  ;;  %v2865_v6 = vsel %vm1046_vm14, %v7847_v28, %v2316_v8  ;;  %v2864_v30 = vsel %vm1046_vm14, %v7729_v53, %v2315_v13  ;;  %v2052_v28 = vmax.f32 %v7735_v4, %v2015_v45 }
 0x374   : > { %v2678_v46 = vpop.permute.xlu1 %2677  ;;  %3220 = vmatprep.subr.mxu0 %v2882_v15  ;;  %5613 = vmatmul.mubr.msk.f32.gmra.mxu1 %vm2771_vm3, %v8248_v60  ;;  %v2275_v59 = vrot.slane %v8385_v51, 2 }
 0x375   : > { %v8492_v36 = vpop.permute.xlu0 %1997  ;;  %3221 = vmatpush1.msra.mxu0 %v2881_v20  ;;  %3339 = vmatprep.mubr.f32.mxu1 %v10989_v44  ;;  %v2146_v24 = vmax.f32 %v2052_v28, %v2109_v7 }
 0x376   : > { %2474 = vrot.lane.b32.xlu1 %v2443_v50, %s6430_s29  ;;  %3222 = vmatprep.subr.mxu0 %v2865_v6  ;;  %v2203_v50 = vsel %vm630_vm9, %v8340_v52, %v8468_v31 }
 0x377   : > { %2472 = vrot.lane.b32.xlu0 %v2442_v32, %s6430_s29  ;;  %3223 = vmatpush1.msra.mxu0 %v2864_v30  ;;  %v8520_v4 = vmax.f32 %v2146_v24, %v2203_v50 }
 0x378   : > { %v2750_v38 = vpop.permute.xlu1 %2749  ;;  %5616 = vmatmul.mubr.msk.f32.vlgmr.msra.gmra.mxu0 %vm2771_vm3, %v8193_v1 }
 0x379   : > { %v2092_v53 = vpop.permute.xlu0 %2091  ;;  %3262 = vmatprep.mubr.f32.mxu0 %v10989_v44  ;;  %v2360_v37 = vrot.slane %v8520_v4, 4  ;;  %v2778_v42 = vsel %vm2771_vm3, %v8318_v26, %v2750_v38  ;;  %v2054_v26 = vmax.f32 %v8000_v19, %v8492_v36 }
 0x37a   : > { %2303 = vrot.lane.b32.xlu1 %v2273_v5, %s6432_s7  ;;  %v2849_v5 = vsel %vm2842_vm1, %v8261_v55, %v2821_v10  ;;  %v2110_v56 = vsel %vm541_vm7, %v8436_v43, %v2092_v53 }
 0x37b   : > { %2546 = vrot.lane.b32.xlu0 %v8312_v47, %s6431_s30 }
 0x37c   : > { %v2825_v11 = vpop.permute.xlu1 %2824  ;;  %5617 = vmatmul.mubr.msk.f32.gmra.mxu0 %vm2771_vm3, %v8217_v25 }
 0x37d   : > { %v2823_v32 = vpop.permute.xlu0 %2822  ;;  %3268 = vmatprep.mubr.f32.mxu0 %v10989_v44 }
 0x37e   : > { %2836 = vrot.lane.b32.xlu1 %v8520_v4, %s6439_s17  ;;  %v2850_v52 = vsel %vm2842_vm1, %v2821_v10, %v2823_v32  ;;  %v2016_v10 = vsel %vm347_vm12, %v8422_v2, %v8492_v36 }
 0x37f   : > { %2301 = vrot.lane.b32.xlu0 %v2272_v18, %s6432_s7  ;;  %5619 = vmatprep.subr.msk.mxu1 %vm1046_vm14, %v2850_v52  ;;  %v2446_v18 = vrot.slane %v8520_v4, 6  ;;  %v2053_v27 = vmax.f32 %v7952_v49, %v2016_v10 }
 0x380   : > { %v2604_v62 = vpop.permute.xlu1 %2603  ;;  %5620 = vmatpush1.msk.msra.mxu1 %vm1046_vm14, %v2849_v5  ;;  %5618 = vmatmul.mubr.msk.f32.gmra.mxu0 %vm2771_vm3, %v8248_v60  ;;  %v2276_v5 = vrot.slane %v8520_v4, 2 }
 0x381   : > { %v2186_v63 = vpop.permute.xlu0 %2185  ;;  %3422 = vmatprep.mubr.f32.mxu0 %v10989_v44  ;;  %v2147_v43 = vmax.f32 %v2053_v27, %v2110_v56  ;;  %v2632_v36 = vsel %vm2625_vm6, %v8369_v61, %v2604_v62 }
 0x382   : > { %2693 = vrot.lane.b32.xlu1 %v2360_v37, %s6440_s18  ;;  %v2204_v21 = vsel %vm630_vm9, %v8468_v31, %v2186_v63 }
 0x383   : > { %2389 = vrot.lane.b32.xlu0 %v2358_v54, %s6443_s23  ;;  %v8577_v15 = vmax.f32 %v2147_v43, %v2204_v21 }
 0x384   : > { %v2682_v55 = vpop.permute.xlu1 %2681 }
 0x385   : > { %v2680_v29 = vpop.permute.xlu0 %2679  ;;  %v2661_v30 = vrot.slane %v8577_v15, 4  ;;  %v2447_v61 = vrot.slane %v8577_v15, 6 }
 0x386   : > { %2765 = vrot.lane.b32.xlu1 %v2446_v18, %s6441_s19  ;;  %v2707_v22 = vsel %vm2699_vm5, %v2678_v46, %v2680_v29  ;;  %v2708_v10 = vsel %vm2699_vm5, %v2680_v29, %v2682_v55 }
 0x387   : > { %2476 = vrot.lane.b32.xlu0 %v2444_v0, %s6430_s29  ;;  %v2706_v0 = vsel %vm2699_vm5, %v8298_v39, %v2678_v46  ;;  %v2148_v39 = vmax.f32 %v2054_v26, %v2092_v53  ;;  %v2851_v46 = vsel %vm2842_vm1, %v2823_v32, %v2825_v11 }
 0x388   : > { %v2754_v54 = vpop.permute.xlu1 %2753  ;;  %v2951_v8 = vsel %vm1126_vm4, %v2706_v0, %v2778_v42  ;;  %v2934_v53 = vsel %vm1086_vm11, %v2632_v36, %v2706_v0 }
 0x389   : > { %v2752_v2 = vpop.permute.xlu0 %2751  ;;  %v2242_v19 = vmax.f32 %v2148_v39, %v2186_v63 }
 0x38a   : > { %v2779_v13 = vsel %vm2771_vm3, %v2750_v38, %v2752_v2  ;;  %2619 = vrot.lane.b32.xlu1 %v2275_v59, %s6442_s20  ;;  %v2780_v32 = vsel %vm2771_vm3, %v2752_v2, %v2754_v54 }
 0x38b   : > { %2305 = vrot.lane.b32.xlu0 %v2274_v58, %s6432_s7  ;;  %v2952_v49 = vsel %vm1126_vm4, %v2707_v22, %v2779_v13  ;;  %v2734_v50 = vrot.slane %v2242_v19, 6  ;;  %v2953_v42 = vsel %vm1126_vm4, %v2708_v10, %v2780_v32  ;;  %v2662_v13 = vrot.slane %v2242_v19, 4 }
 0x38c   : > { %v2533_v31 = vpop.permute.xlu1 %2532  ;;  %3295 = vmatprep.subr.mxu1 %v2952_v49 }
 0x38d   : > { %v8579_v20 = vpop.permute.xlu0 %2826  ;;  %3296 = vmatpush1.msra.mxu1 %v2951_v8  ;;  %v2560_v2 = vsel %vm1006_vm0, %v8410_v33, %v2533_v31 }
 0x38e   : > { %2548 = vrot.lane.b32.xlu1 %v8385_v51, %s6431_s30  ;;  %v2852_v58 = vsel %vm2842_vm1, %v2825_v11, %v8579_v20  ;;  %v2917_v29 = vsel %vm1046_vm14, %v2560_v2, %v2632_v36 }
 0x38f   : > { %2838 = vrot.lane.b32.xlu0 %v8577_v15, %s6439_s17  ;;  %5624 = vmatprep.subr.msk.mxu0 %vm1046_vm14, %v2852_v58 }
 0x390   : > { %v2608_v45 = vpop.permute.xlu1 %2607  ;;  %5625 = vmatpush1.msk.msra.mxu0 %vm1046_vm14, %v2851_v46 }
 0x391   : > { %v2606_v6 = vpop.permute.xlu0 %2605 }
 0x392   : > { %v2633_v7 = vsel %vm2625_vm6, %v2604_v62, %v2606_v6  ;;  %2840 = vrot.lane.b32.xlu1 %v2242_v19, %s6439_s17 }
 0x393   : > { %2695 = vrot.lane.b32.xlu0 %v2661_v30, %s6440_s18  ;;  %v2935_v28 = vsel %vm1086_vm11, %v2633_v7, %v2707_v22  ;;  %v2634_v22 = vsel %vm2625_vm6, %v2606_v6, %v2608_v45 }
 0x394   : > { %v2376_v38 = vpop.permute.xlu1 %2375  ;;  %3297 = vmatprep.subr.mxu1 %v2935_v28  ;;  %v2936_v49 = vsel %vm1086_vm11, %v2634_v22, %v2708_v10 }
 0x395   : > { %v8598_v24 = vpop.permute.xlu0 %2683  ;;  %3298 = vmatpush1.msra.mxu1 %v2934_v53  ;;  %v2402_v19 = vsel %vm2395_vm13, %v8439_v48, %v2376_v38  ;;  %v2588_v48 = vrot.slane %v8577_v15, 2 }
 0x396   : > { %2769 = vrot.lane.b32.xlu1 %v2734_v50, %s6441_s19  ;;  %v2709_v62 = vsel %vm2699_vm5, %v2682_v55, %v8598_v24 }
 0x397   : > { %2767 = vrot.lane.b32.xlu0 %v2447_v61, %s6441_s19 }
 0x398   : > { %v2463_v11 = vpop.permute.xlu1 %2462 }
 0x399   : > { %v8606_v52 = vpop.permute.xlu0 %2755  ;;  %v2490_v8 = vsel %vm828_vm2, %v8452_v57, %v2463_v11 }
 0x39a   : > { %v2781_v63 = vsel %vm2771_vm3, %v2754_v54, %v8606_v52  ;;  %2393 = vrot.lane.b32.xlu1 %v2360_v37, %s6443_s23  ;;  %v2900_v36 = vsel %vm1126_vm4, %v2402_v19, %v2490_v8 }
 0x39b   : > { %2621 = vrot.lane.b32.xlu0 %v2276_v5, %s6442_s20  ;;  %v2954_v56 = vsel %vm1126_vm4, %v2709_v62, %v2781_v63 }
 0x39c   : > { %v2537_v27 = vpop.permute.xlu1 %2536  ;;  %3378 = vmatprep.subr.mxu0 %v2954_v56 }
 0x39d   : > { %v2535_v54 = vpop.permute.xlu0 %2534  ;;  %3379 = vmatpush1.msra.mxu0 %v2953_v42 }
 0x39e   : > { %v2561_v21 = vsel %vm1006_vm0, %v2533_v31, %v2535_v54  ;;  %2480 = vrot.lane.b32.xlu1 %v2446_v18, %s6430_s29  ;;  %v2562_v6 = vsel %vm1006_vm0, %v2535_v54, %v2537_v27 }
 0x39f   : > { %2550 = vrot.lane.b32.xlu0 %v8520_v4, %s6431_s30  ;;  %v2918_v37 = vsel %vm1046_vm14, %v2561_v21, %v2633_v7 }
 0x3a0   : > { %v2292_v55 = vpop.permute.xlu1 %2291  ;;  %3299 = vmatprep.subr.mxu1 %v2918_v37 }
 0x3a1   : > { %v8633_v33 = vpop.permute.xlu0 %2609  ;;  %3300 = vmatpush1.msra.mxu1 %v2917_v29  ;;  %v2317_v50 = vsel %vm442_vm8, %v8474_v14, %v2292_v55 }
 0x3a2   : > { %v2635_v0 = vsel %vm2625_vm6, %v2608_v45, %v8633_v33  ;;  %2307 = vrot.lane.b32.xlu1 %v2275_v59, %s6432_s7  ;;  %v2965_v59 = vld [vmem:[%s10902_s4] sm:$0xff]  ;;  %v2967_v45 = vld [vmem:[%s10902_s4 + $0x10] sm:$0xff]  ;;  %v2883_v63 = vsel %vm1086_vm11, %v2317_v50, %v2402_v19  ;;  %v2866_v56 = vsel %vm1046_vm14, %v7845_v41, %v2317_v50 }
 0x3a3   : > { %2697 = vrot.lane.b32.xlu0 %v2662_v13, %s6440_s18  ;;  %v2937_v18 = vsel %vm1086_vm11, %v2635_v0, %v2709_v62 }
 0x3a4   : > { %v2380_v43 = vpop.permute.xlu1 %2379  ;;  %3380 = vmatprep.subr.mxu0 %v2937_v18 }
 0x3a5   : > { %v2378_v26 = vpop.permute.xlu0 %2377  ;;  %3381 = vmatpush1.msra.mxu0 %v2936_v49 }
 0x3a6   : > { %2552 = vrot.lane.b32.xlu1 %v8577_v15, %s6431_s30  ;;  %v2403_v58 = vsel %vm2395_vm13, %v2376_v38, %v2378_v26  ;;  %v2919_v38 = vsel %vm1046_vm14, %v2562_v6, %v2634_v22 }
 0x3a7   : > { %2391 = vrot.lane.b32.xlu0 %v2359_v12, %s6443_s23 }
 0x3a8   : > { %v2467_v31 = vpop.permute.xlu1 %2466 }
 0x3a9   : > { %v2465_v39 = vpop.permute.xlu0 %2464 }
 0x3aa   : > { %v2491_v46 = vsel %vm828_vm2, %v2463_v11, %v2465_v39  ;;  %2970 = vperm.xlu1 %6058, %v2965_v59   ;;  %v2492_v42 = vsel %vm828_vm2, %v2465_v39, %v2467_v31 }
 0x3ab   : > { %2478 = vrot.lane.b32.xlu0 %v2445_v16, %s6430_s29  ;;  %v2901_v12 = vsel %vm1126_vm4, %v2403_v58, %v2491_v46 }
 0x3ac   : > { %v2296_v57 = vpop.permute.xlu1 %2295  ;;  %3301 = vmatprep.subr.mxu1 %v2901_v12 }
 0x3ad   : > { %v8666_v30 = vpop.permute.xlu0 %2538  ;;  %3302 = vmatpush1.msra.mxu1 %v2900_v36 }
 0x3ae   : > { %v2563_v16 = vsel %vm1006_vm0, %v2537_v27, %v8666_v30  ;;  %2980 = vperm.xlu1 %6058, %v2967_v45   ;;  %v2966_v27 = vld [vmem:[%s10902_s4 + $0x8] sm:$0xff] }
 0x3af   : > { %2623 = vrot.lane.b32.xlu0 %v2588_v48, %s6442_s20  ;;  %v2920_v7 = vsel %vm1046_vm14, %v2563_v16, %v2635_v0 }
 0x3b0   : > { %v2829_v28 = vpop.permute.xlu1 %2828  ;;  %3382 = vmatprep.subr.mxu0 %v2920_v7 }
 0x3b1   : > { %v2294_v53 = vpop.permute.xlu0 %2293  ;;  %3383 = vmatpush1.msra.mxu0 %v2919_v38  ;;  %v2853_v59 = vsel %vm2842_vm1, %v8579_v20, %v2829_v28 }
 0x3b2   : > { %v2318_v11 = vsel %vm442_vm8, %v2292_v55, %v2294_v53  ;;  %v2319_v37 = vsel %vm442_vm8, %v2294_v53, %v2296_v57 }
 0x3b3   : > { %2309 = vrot.lane.b32.xlu0 %v2276_v5, %s6432_s7  ;;  %v2884_v32 = vsel %vm1086_vm11, %v2318_v11, %v2403_v58  ;;  %v2867_v14 = vsel %vm1046_vm14, %v7883_v23, %v2318_v11  ;;  %v2868_v49 = vsel %vm1046_vm14, %v7979_v34, %v2319_v37 }
 0x3b4   : > { %v2686_v62 = vpop.permute.xlu1 %2685  ;;  %3303 = vmatprep.subr.mxu1 %v2884_v32 }
 0x3b5   : > { %v8682_v10 = vpop.permute.xlu0 %2381  ;;  %3304 = vmatpush1.msra.mxu1 %v2883_v63  ;;  %v2710_v46 = vsel %vm2699_vm5, %v8598_v24, %v2686_v62 }
 0x3b6   : > { %3305 = vmatprep.subr.mxu1 %v2867_v14  ;;  %v2405_v41 = vsel %vm2395_vm13, %v2380_v43, %v8682_v10 }
 0x3b7   : > { %2482 = vrot.lane.b32.xlu0 %v2447_v61, %s6430_s29  ;;  %3306 = vmatpush1.msra.mxu1 %v2866_v56  ;;  %v2404_v61 = vsel %vm2395_vm13, %v2378_v26, %v2380_v43 }
 0x3b8   : > { %v2758_v5 = vpop.permute.xlu1 %2757  ;;  %5621 = vmatmul.mubr.msk.f32.vlgmr.msra.gmra.mxu1 %vm2771_vm3, %v8193_v1  ;;  %v2902_v21 = vsel %vm1126_vm4, %v2404_v61, %v2492_v42  ;;  %v2885_v0 = vsel %vm1086_vm11, %v2319_v37, %v2404_v61 }
 0x3b9   : > { %v8697_v23 = vpop.permute.xlu0 %2468  ;;  %3345 = vmatprep.mubr.f32.mxu1 %v10989_v44  ;;  %v2782_v34 = vsel %vm2771_vm3, %v8606_v52, %v2758_v5 }
 0x3ba   : > { %v2493_v15 = vsel %vm828_vm2, %v2467_v31, %v8697_v23  ;;  %v2955_v45 = vsel %vm1126_vm4, %v2710_v46, %v2782_v34 }
 0x3bb   : > { %2975 = vperm.xlu0 %6057, %v2966_v27   ;;  %v2903_v2 = vsel %vm1126_vm4, %v2405_v41, %v2493_v15 }
 0x3bc   : > { %v2833_v54 = vpop.permute.xlu1 %2832  ;;  %5622 = vmatmul.mubr.msk.f32.gmra.mxu1 %vm2771_vm3, %v8217_v25  ;;  %3384 = vmatprep.subr.mxu0 %v2903_v2 }
 0x3bd   : > { %v8710_v55 = vpop.permute.xlu0 %2297  ;;  %3385 = vmatpush1.msra.mxu0 %v2902_v21  ;;  %3351 = vmatprep.mubr.f32.mxu1 %v10989_v44 }
 0x3be   : > { %v2320_v29 = vsel %vm442_vm8, %v2296_v57, %v8710_v55 }
 0x3bf   : > { %v2886_v22 = vsel %vm1086_vm11, %v2320_v29, %v2405_v41  ;;  %v2869_v43 = vsel %vm1046_vm14, %v8042_v17, %v2320_v29 }
 0x3c0   : > { %v2612_v13 = vpop.permute.xlu1 %2611  ;;  %5623 = vmatmul.mubr.msk.f32.gmra.mxu1 %vm2771_vm3, %v8248_v60  ;;  %3386 = vmatprep.subr.mxu0 %v2886_v22 }
 0x3c1   : > { %v2831_v18 = vpop.permute.xlu0 %2830  ;;  %3387 = vmatpush1.msra.mxu0 %v2885_v0  ;;  %3505 = vmatprep.mubr.f32.mxu1 %v10989_v44  ;;  %v2636_v6 = vsel %vm2625_vm6, %v8633_v33, %v2612_v13 }
 0x3c2   : > { %3388 = vmatprep.subr.mxu0 %v2869_v43  ;;  %v2854_v26 = vsel %vm2842_vm1, %v2829_v28, %v2831_v18  ;;  %v2855_v36 = vsel %vm2842_vm1, %v2831_v18, %v2833_v54  ;;  %v2938_v38 = vsel %vm1086_vm11, %v2636_v6, %v2710_v46 }
 0x3c3   : > { %3389 = vmatpush1.msra.mxu0 %v2868_v49  ;;  %5629 = vmatprep.subr.msk.mxu1 %vm1046_vm14, %v2854_v26 }
 0x3c4   : > { %v2690_v31 = vpop.permute.xlu1 %2689  ;;  %5626 = vmatmul.mubr.msk.f32.vlgmr.msra.gmra.mxu0 %vm2771_vm3, %v8193_v1  ;;  %5630 = vmatpush1.msk.msra.mxu1 %vm1046_vm14, %v2853_v59 }
 0x3c5   : > { %v2688_v17 = vpop.permute.xlu0 %2687  ;;  %3428 = vmatprep.mubr.f32.mxu0 %v10989_v44 }
 0x3c6   : > { %v2711_v39 = vsel %vm2699_vm5, %v2686_v62, %v2688_v17  ;;  %v2712_v63 = vsel %vm2699_vm5, %v2688_v17, %v2690_v31 }
 0x3c8   : > { %v2762_v8 = vpop.permute.xlu1 %2761  ;;  %5627 = vmatmul.mubr.msk.f32.gmra.mxu0 %vm2771_vm3, %v8217_v25 }
 0x3c9   : > { %v2760_v20 = vpop.permute.xlu0 %2759  ;;  %3434 = vmatprep.mubr.f32.mxu0 %v10989_v44 }
 0x3ca   : > { %v2783_v58 = vsel %vm2771_vm3, %v2758_v5, %v2760_v20  ;;  %v2784_v11 = vsel %vm2771_vm3, %v2760_v20, %v2762_v8 }
 0x3cb   : > { %v2956_v19 = vsel %vm1126_vm4, %v2711_v39, %v2783_v58  ;;  %v2957_v5 = vsel %vm1126_vm4, %v2712_v63, %v2784_v11 }
 0x3cc   : > { %v2541_v12 = vpop.permute.xlu1 %2540  ;;  %5628 = vmatmul.mubr.msk.f32.gmra.mxu0 %vm2771_vm3, %v8248_v60  ;;  %3461 = vmatprep.subr.mxu1 %v2956_v19 }
 0x3cd   : > { %v8745_v52 = vpop.permute.xlu0 %2834  ;;  %3462 = vmatpush1.msra.mxu1 %v2955_v45  ;;  %3588 = vmatprep.mubr.f32.mxu0 %v10989_v44  ;;  %v2564_v27 = vsel %vm1006_vm0, %v8666_v30, %v2541_v12 }
 0x3ce   : > { %v2856_v57 = vsel %vm2842_vm1, %v2833_v54, %v8745_v52  ;;  %v2921_v2 = vsel %vm1046_vm14, %v2564_v27, %v2636_v6 }
 0x3cf   : > { %5634 = vmatprep.subr.msk.mxu0 %vm1046_vm14, %v2856_v57 }
 0x3d0   : > { %v2616_v24 = vpop.permute.xlu1 %2615  ;;  %5635 = vmatpush1.msk.msra.mxu0 %vm1046_vm14, %v2855_v36 }
 0x3d1   : > { %v2614_v48 = vpop.permute.xlu0 %2613 }
 0x3d2   : > { %v2637_v16 = vsel %vm2625_vm6, %v2612_v13, %v2614_v48  ;;  %v2638_v54 = vsel %vm2625_vm6, %v2614_v48, %v2616_v24 }
 0x3d3   : > { %v2939_v7 = vsel %vm1086_vm11, %v2637_v16, %v2711_v39  ;;  %v2940_v22 = vsel %vm1086_vm11, %v2638_v54, %v2712_v63 }
 0x3d4   : > { %v2384_v28 = vpop.permute.xlu1 %2383  ;;  %3463 = vmatprep.subr.mxu1 %v2939_v7 }
 0x3d5   : > { %v8758_v50 = vpop.permute.xlu0 %2691  ;;  %3464 = vmatpush1.msra.mxu1 %v2938_v38  ;;  %v2406_v59 = vsel %vm2395_vm13, %v8682_v10, %v2384_v28 }
 0x3d6   : > { %v2713_v33 = vsel %vm2699_vm5, %v2690_v31, %v8758_v50 }
 0x3d8   : > { %v2471_v53 = vpop.permute.xlu1 %2470 }
 0x3d9   : > { %v8761_v32 = vpop.permute.xlu0 %2763  ;;  %v2494_v18 = vsel %vm828_vm2, %v8697_v23, %v2471_v53 }
 0x3da   : > { %v2785_v62 = vsel %vm2771_vm3, %v2762_v8, %v8761_v32  ;;  %v2904_v8 = vsel %vm1126_vm4, %v2406_v59, %v2494_v18 }
 0x3db   : > { %v2958_v14 = vsel %vm1126_vm4, %v2713_v33, %v2785_v62 }
 0x3dc   : > { %v2545_v56 = vpop.permute.xlu1 %2544  ;;  %3544 = vmatprep.subr.mxu0 %v2958_v14 }
 0x3dd   : > { %v2543_v42 = vpop.permute.xlu0 %2542  ;;  %3545 = vmatpush1.msra.mxu0 %v2957_v5 }
 0x3de   : > { %v2565_v41 = vsel %vm1006_vm0, %v2541_v12, %v2543_v42  ;;  %v2566_v34 = vsel %vm1006_vm0, %v2543_v42, %v2545_v56 }
 0x3df   : > { %v2922_v15 = vsel %vm1046_vm14, %v2565_v41, %v2637_v16  ;;  %v2923_v10 = vsel %vm1046_vm14, %v2566_v34, %v2638_v54 }
 0x3e0   : > { %v2300_v61 = vpop.permute.xlu1 %2299  ;;  %3465 = vmatprep.subr.mxu1 %v2922_v15  ;;  %v8845_v15 = vld [vmem:[%s10901_s3] sm:$0xff] }
 0x3e1   : > { %v8776_v21 = vpop.permute.xlu0 %2617  ;;  %3466 = vmatpush1.msra.mxu1 %v2921_v2  ;;  %v2321_v46 = vsel %vm442_vm8, %v8710_v55, %v2300_v61 }
 0x3e2   : > { %v2639_v37 = vsel %vm2625_vm6, %v2616_v24, %v8776_v21  ;;  %v2887_v36 = vsel %vm1086_vm11, %v2321_v46, %v2406_v59  ;;  %v2870_v55 = vsel %vm1046_vm14, %v8039_v3, %v2321_v46 }
 0x3e3   : > { %v2941_v30 = vsel %vm1086_vm11, %v2639_v37, %v2713_v33 }
 0x3e4   : > { %v2388_v29 = vpop.permute.xlu1 %2387  ;;  %3546 = vmatprep.subr.mxu0 %v2941_v30 }
 0x3e5   : > { %v2386_v13 = vpop.permute.xlu0 %2385  ;;  %3547 = vmatpush1.msra.mxu0 %v2940_v22 }
 0x3e6   : > { %v2407_v49 = vsel %vm2395_vm13, %v2384_v28, %v2386_v13  ;;  %v2408_v38 = vsel %vm2395_vm13, %v2386_v13, %v2388_v29  ;;  %v8873_v13 = vld [vmem:[%s10901_s3 + $0x10] sm:$0xff] }
 0x3e8   : > { %v2475_v0 = vpop.permute.xlu1 %2474 }
 0x3e9   : > { %v2473_v43 = vpop.permute.xlu0 %2472 }
 0x3ea   : > { %v2495_v26 = vsel %vm828_vm2, %v2471_v53, %v2473_v43  ;;  %v2496_v16 = vsel %vm828_vm2, %v2473_v43, %v2475_v0 }
 0x3eb   : > { %v2905_v31 = vsel %vm1126_vm4, %v2407_v49, %v2495_v26 }
 0x3ec   : > { %v2304_v17 = vpop.permute.xlu1 %2303  ;;  %3467 = vmatprep.subr.mxu1 %v2905_v31 }
 0x3ed   : > { %v8791_v20 = vpop.permute.xlu0 %2546  ;;  %3468 = vmatpush1.msra.mxu1 %v2904_v8 }
 0x3ee   : > { %v2567_v23 = vsel %vm1006_vm0, %v2545_v56, %v8791_v20 }
 0x3ef   : > { %v2924_v39 = vsel %vm1046_vm14, %v2567_v23, %v2639_v37 }
 0x3f0   : > { %v2837_v58 = vpop.permute.xlu1 %2836  ;;  %3548 = vmatprep.subr.mxu0 %v2924_v39 }
 0x3f1   : > { %v2302_v19 = vpop.permute.xlu0 %2301  ;;  %3549 = vmatpush1.msra.mxu0 %v2923_v10  ;;  %v2857_v41 = vsel %vm2842_vm1, %v8745_v52, %v2837_v58  ;;  %v8858_v52 = vld [vmem:[%s10901_s3 + $0x8] sm:$0xff] }
 0x3f2   : > { %v2322_v12 = vsel %vm442_vm8, %v2300_v61, %v2302_v19  ;;  %v2323_v11 = vsel %vm442_vm8, %v2302_v19, %v2304_v17 }
 0x3f3   : > { %v2888_v45 = vsel %vm1086_vm11, %v2322_v12, %v2407_v49  ;;  %v2871_v6 = vsel %vm1046_vm14, %v8086_v9, %v2322_v12  ;;  %v2872_v27 = vsel %vm1046_vm14, %v8255_v35, %v2323_v11 }
 0x3f4   : > { %v2694_v57 = vpop.permute.xlu1 %2693  ;;  %3469 = vmatprep.subr.mxu1 %v2888_v45 }
 0x3f5   : > { %v8802_v24 = vpop.permute.xlu0 %2389  ;;  %3470 = vmatpush1.msra.mxu1 %v2887_v36 }
 0x3f6   : > { %3471 = vmatprep.subr.mxu1 %v2871_v6  ;;  %v2409_v28 = vsel %vm2395_vm13, %v2388_v29, %v8802_v24  ;;  %v2714_v29 = vsel %vm2699_vm5, %v8758_v50, %v2694_v57 }
 0x3f7   : > { %3472 = vmatpush1.msra.mxu1 %v2870_v55 }
 0x3f8   : > { %v2766_v48 = vpop.permute.xlu1 %2765  ;;  %5631 = vmatmul.mubr.msk.f32.vlgmr.msra.gmra.mxu1 %vm2771_vm3, %v8193_v1  ;;  %v2906_v1 = vsel %vm1126_vm4, %v2408_v38, %v2496_v16 }
 0x3f9   : > { %v8811_v7 = vpop.permute.xlu0 %2476  ;;  %3511 = vmatprep.mubr.f32.mxu1 %v10989_v44  ;;  %v2786_v61 = vsel %vm2771_vm3, %v8761_v32, %v2766_v48 }
 0x3fa   : > { %v2497_v9 = vsel %vm828_vm2, %v2475_v0, %v8811_v7  ;;  %v2959_v32 = vsel %vm1126_vm4, %v2714_v29, %v2786_v61 }
 0x3fb   : > { %v2907_v3 = vsel %vm1126_vm4, %v2409_v28, %v2497_v9  ;;  %v3092_v9 = vpop.f32.mrf.mxu0 }
 0x3fc   : > { %v2620_v53 = vpop.permute.xlu1 %2619  ;;  %5632 = vmatmul.mubr.msk.f32.gmra.mxu1 %vm2771_vm3, %v8217_v25  ;;  %3550 = vmatprep.subr.mxu0 %v2907_v3  ;;  %v2889_v25 = vsel %vm1086_vm11, %v2323_v11, %v2408_v38 }
 0x3fd   : > { %v8824_v33 = vpop.permute.xlu0 %2305  ;;  %3551 = vmatpush1.msra.mxu0 %v2906_v1  ;;  %3517 = vmatprep.mubr.f32.mxu1 %v10989_v44  ;;  %v2640_v0 = vsel %vm2625_vm6, %v8776_v21, %v2620_v53  ;;  %v3094_v1 = vpop.f32.mrf.mxu0 }
 0x3fe   : > { %v2324_v62 = vsel %vm442_vm8, %v2304_v17, %v8824_v33  ;;  %v2942_v26 = vsel %vm1086_vm11, %v2640_v0, %v2714_v29 }
 0x3ff   : > { %v2890_v63 = vsel %vm1086_vm11, %v2324_v62, %v2409_v28  ;;  %v2873_v5 = vsel %vm1046_vm14, %v8338_v40, %v2324_v62 }
 0x400   : > { %v2549_v14 = vpop.permute.xlu1 %2548  ;;  %5633 = vmatmul.mubr.msk.f32.gmra.mxu1 %vm2771_vm3, %v8248_v60  ;;  %3552 = vmatprep.subr.mxu0 %v2890_v63 }
 0x401   : > { %v2839_v56 = vpop.permute.xlu0 %2838  ;;  %3553 = vmatpush1.msra.mxu0 %v2889_v25  ;;  %3671 = vmatprep.mubr.f32.mxu1 %v10989_v44  ;;  %v2568_v59 = vsel %vm1006_vm0, %v8791_v20, %v2549_v14  ;;  %v3098_v25 = vpop.f32.mrf.mxu0 }
 0x402   : > { %3554 = vmatprep.subr.mxu0 %v2873_v5  ;;  %v2858_v42 = vsel %vm2842_vm1, %v2837_v58, %v2839_v56  ;;  %v2925_v8 = vsel %vm1046_vm14, %v2568_v59, %v2640_v0  ;;  %v4631_v0 = vld [vmem:[%s10903_s5 + $0xf0] sm:$0xff] }
 0x403   : > { %3555 = vmatpush1.msra.mxu0 %v2872_v27  ;;  %5639 = vmatprep.subr.msk.mxu1 %vm1046_vm14, %v2858_v42 }
 0x404   : > { %v2841_v60 = vpop.permute.xlu1 %2840  ;;  %5636 = vmatmul.mubr.msk.f32.vlgmr.msra.gmra.mxu0 %vm2771_vm3, %v8845_v15  ;;  %5640 = vmatpush1.msk.msra.mxu1 %vm1046_vm14, %v2857_v41 }
 0x405   : > { %v2859_v35 = vsel %vm2842_vm1, %v2839_v56, %v2841_v60  ;;  %6008 = vmatprep.subr.mxu0 %v10989_v44  ;;  %v2696_v40 = vpop.permute.xlu0 %2695  ;;  %3594 = vmatprep.mubr.f32.mxu0 %v10989_v44 }
 0x406   : > { %6009 = vmatpush3.msk.msra.mxu0 %vm1046_vm14, %v2859_v35  ;;  %v2715_v37 = vsel %vm2699_vm5, %v2694_v57, %v2696_v40 }
 0x407   : > { %6010 = vmatprep.subr.mxu0 %v10989_v44 }
 0x408   : > { %5637 = vmatmul.mubr.msk.f32.gmra.mxu0 %vm2771_vm3, %v8858_v52  ;;  %v2770_v2 = vpop.permute.xlu1 %2769 }
 0x409   : > { %v2768_v54 = vpop.permute.xlu0 %2767  ;;  %3600 = vmatprep.mubr.f32.mxu0 %v10989_v44 }
 0x40a   : > { %v2787_v30 = vsel %vm2771_vm3, %v2766_v48, %v2768_v54  ;;  %v2788_v39 = vsel %vm2771_vm3, %v2768_v54, %v2770_v2 }
 0x40b   : > { %v2960_v22 = vsel %vm1126_vm4, %v2715_v37, %v2787_v30 }
 0x40c   : > { %5638 = vmatmul.mubr.msk.f32.gmra.mxu0 %vm2771_vm3, %v8873_v13  ;;  %3627 = vmatprep.subr.mxu1 %v2960_v22  ;;  %v8883_v43 = vpop.permute.xlu1 %2393 }
 0x40d   : > { %v2622_v18 = vpop.permute.xlu0 %2621  ;;  %3628 = vmatpush1.msra.mxu1 %v2959_v32  ;;  %6022 = vmatprep.mubr.msk.f32.mxu0 %vm6438_vm15, %v10989_v44 }
 0x40e   : > { %v2641_v50 = vsel %vm2625_vm6, %v2620_v53, %v2622_v18 }
 0x40f   : > { %v2943_v49 = vsel %vm1086_vm11, %v2641_v50, %v2715_v37 }
 0x410   : > { %3629 = vmatprep.subr.mxu1 %v2943_v49  ;;  %v2481_v34 = vpop.permute.xlu1 %2480  ;;  %v4615_v49 = vld [vmem:[%s10903_s5 + $0x70] sm:$0xff] }
 0x411   : > { %v2551_v31 = vpop.permute.xlu0 %2550  ;;  %3630 = vmatpush1.msra.mxu1 %v2942_v26  ;;  %v4630_v26 = vld [vmem:[%s10903_s5 + $0xe8] sm:$0xff] }
 0x412   : > { %v2569_v21 = vsel %vm1006_vm0, %v2549_v14, %v2551_v31 }
 0x413   : > { %v2926_v17 = vsel %vm1046_vm14, %v2569_v21, %v2641_v50  ;;  %v4648_v21 = vld [vmem:[%s10903_s5 + $0x178] sm:$0xff] }
 0x414   : > { %3631 = vmatprep.subr.mxu1 %v2926_v17  ;;  %v2308_v46 = vpop.permute.xlu1 %2307 }
 0x415   : > { %v2698_v23 = vpop.permute.xlu0 %2697  ;;  %3632 = vmatpush1.msra.mxu1 %v2925_v8  ;;  %v2325_v62 = vsel %vm442_vm8, %v8824_v33, %v2308_v46 }
 0x416   : > { %v2716_v58 = vsel %vm2699_vm5, %v2696_v40, %v2698_v23  ;;  %v2874_v33 = vsel %vm1046_vm14, %v8312_v47, %v2325_v62  ;;  %v8936_v40 = vpop.f32.mrf.mxu0  ;;  %v4616_v47 = vld [vmem:[%s10903_s5 + $0x78] sm:$0xff] }
 0x417   : > { %v2961_v10 = vsel %vm1126_vm4, %v2716_v58, %v2788_v39  ;;  %v4613_v39 = vld [vmem:[%s10903_s5 + $0x60] sm:$0xff] }
 0x418   : > { %6011 = vmatpush3.msra.mxu0 %v2961_v10  ;;  %v2553_v48 = vpop.permute.xlu1 %2552 }
 0x419   : > { %v2392_v20 = vpop.permute.xlu0 %2391  ;;  %6012 = vmatprep.subr.mxu0 %v10989_v44  ;;  %v2570_v38 = vsel %vm1006_vm0, %v2551_v31, %v2553_v48  ;;  %v4614_v31 = vld [vmem:[%s10903_s5 + $0x68] sm:$0xff] }
 0x41a   : > { %v2410_v12 = vsel %vm2395_vm13, %v8802_v24, %v2392_v20  ;;  %v2411_v45 = vsel %vm2395_vm13, %v2392_v20, %v8883_v43 }
 0x41b   : > { %v2891_v14 = vsel %vm1086_vm11, %v2325_v62, %v2410_v12 }
 0x41d   : > { %v2479_v19 = vpop.permute.xlu0 %2478 }
 0x41e   : > { %v2498_v57 = vsel %vm828_vm2, %v8811_v7, %v2479_v19  ;;  %v2499_v36 = vsel %vm828_vm2, %v2479_v19, %v2481_v34  ;;  %v4628_v19 = vld [vmem:[%s10903_s5 + $0xd8] sm:$0xff] }
 0x41f   : > { %v2909_v6 = vsel %vm1126_vm4, %v2411_v45, %v2499_v36  ;;  %v2908_v55 = vsel %vm1126_vm4, %v2410_v12, %v2498_v57  ;;  %v4647_v12 = vld [vmem:[%s10903_s5 + $0x170] sm:$0xff]  ;;  %v4662_v57 = vld [vmem:[%s10903_s5 + $0x1e8] sm:$0xff] }
 0x420   : > { %3633 = vmatprep.subr.mxu1 %v2909_v6  ;;  %v4627_v6 = vld [vmem:[%s10903_s5 + $0xd0] sm:$0xff] }
 0x421   : > { %v2624_v16 = vpop.permute.xlu0 %2623  ;;  %3634 = vmatpush1.msra.mxu1 %v2908_v55  ;;  %v4646_v55 = vld [vmem:[%s10903_s5 + $0x168] sm:$0xff] }
 0x422   : > { %v2642_v28 = vsel %vm2625_vm6, %v2622_v18, %v2624_v16  ;;  %v8962_v18 = vpop.f32.mrf.mxu0 }
 0x423   : > { %v2944_v24 = vsel %vm1086_vm11, %v2642_v28, %v2716_v58  ;;  %v2927_v7 = vsel %vm1046_vm14, %v2570_v38, %v2642_v28  ;;  %v4661_v38 = vld [vmem:[%s10903_s5 + $0x1e0] sm:$0xff] }
 0x424   : > { %6013 = vmatpush3.msra.mxu0 %v2944_v24  ;;  %v3106_v59 = vpop.f32.mrf.mxu0  ;;  %v4611_v24 = vld [vmem:[%s10903_s5 + $0x50] sm:$0xff] }
 0x425   : > { %v2310_v3 = vpop.permute.xlu0 %2309  ;;  %6014 = vmatprep.subr.mxu0 %v10989_v44  ;;  %v8911_v11 = vpop.permute.xlu1 %2970 }
 0x426   : > { %v2326_v53 = vsel %vm442_vm8, %v2308_v46, %v2310_v3  ;;  %6015 = vmatpush3.msra.mxu0 %v2927_v7  ;;  %v8921_v27 = vadd.f32 %v3094_v1, %v8911_v11  ;;  %v8929_v60 = vadd.f32 %v3092_v9, %v8911_v11  ;;  %v2893_v61 = vsel %vm1086_vm11, %v2310_v3, %v8883_v43  ;;  %v4645_v7 = vld [vmem:[%s10903_s5 + $0x160] sm:$0xff] }
 0x427   : > { %v2892_v63 = vsel %vm1086_vm11, %v2326_v53, %v2411_v45  ;;  %6016 = vmatprep.subr.mxu0 %v10989_v44  ;;  %v2875_v5 = vsel %vm1046_vm14, %v8385_v51, %v2326_v53  ;;  %v4632_v51 = vld [vmem:[%s10903_s5 + $0xf8] sm:$0xff]  ;;  %v2876_v29 = vsel %vm1046_vm14, %v8520_v4, %v2310_v3  ;;  %v4626_v3 = vld [vmem:[%s10903_s5 + $0xc8] sm:$0xff] }
 0x428   : > { %3635 = vmatprep.subr.mxu1 %v2892_v63  ;;  %v3771_v54 = vmax.f32 %v8921_v27, 0.0  ;;  %v3770_v32 = vmax.f32 %v8929_v60, 0.0  ;;  %v4610_v63 = vld [vmem:[%s10903_s5 + $0x48] sm:$0xff] }
 0x429   : > { %v2483_v56 = vpop.permute.xlu0 %2482  ;;  %3636 = vmatpush1.msra.mxu1 %v2891_v14  ;;  %v9053_v16 = vpop.permute.xlu1 %2980  ;;  %v4660_v14 = vld [vmem:[%s10903_s5 + $0x1d8] sm:$0xff] }
 0x42a   : > { %v2500_v42 = vsel %vm828_vm2, %v2481_v34, %v2483_v56  ;;  %3637 = vmatprep.subr.mxu1 %v2875_v5  ;;  %v9076_v1 = vadd.f32 %v3106_v59, %v9053_v16  ;;  %v4625_v5 = vld [vmem:[%s10903_s5 + $0xc0] sm:$0xff] }
 0x42b   : > { %3638 = vmatpush1.msra.mxu1 %v2874_v33  ;;  %v2910_v41 = vsel %vm1126_vm4, %v8883_v43, %v2500_v42  ;;  %v4664_v43 = vld [vmem:[%s10903_s5 + $0x1f8] sm:$0xff]  ;;  %vm4857_vm4 = vcmask 990208  }
 0x42c   : > { %v3175_v35 = vpop.f32.mrf.mxu1  ;;  %5641 = vmatmul.mubr.msk.f32.vlgmr.msra.gmra.mxu1 %vm2771_vm3, %v8845_v15  ;;  %6017 = vmatpush3.msra.mxu0 %v2910_v41  ;;  %v4644_v42 = vld [vmem:[%s10903_s5 + $0x158] sm:$0xff]  ;;  %v4609_v41 = vld [vmem:[%s10903_s5 + $0x40] sm:$0xff] }
 0x42d   : > { %6018 = vmatprep.subr.mxu0 %v10989_v44  ;;  %3677 = vmatprep.mubr.f32.mxu1 %v10989_v44  ;;  %v8946_v2 = vadd.f32 %v3175_v35, %v8911_v11 }
 0x42e   : > { %6019 = vmatpush3.msra.mxu0 %v2893_v61  ;;  %v3177_v37 = vpop.f32.mrf.mxu1  ;;  %5669 = vmatprep.subr.mxu1 %v4632_v51  ;;  %v4659_v51 = vld [vmem:[%s10903_s5 + $0x1d0] sm:$0xff]  ;;  %v9112_v61 = vadd.f32 %v8962_v18, %v9053_v16  ;;  %v4658_v18 = vld [vmem:[%s10903_s5 + $0x1c8] sm:$0xff] }
 0x42f   : > { %6020 = vmatprep.subr.mxu0 %v10989_v44  ;;  %v8951_v30 = vadd.f32 %v3177_v37, %v8911_v11  ;;  %v3772_v22 = vmax.f32 %v8946_v2, 0.0  ;;  %5670 = vmatpush3.msra.mxu1 %v4616_v47  ;;  %v4624_v37 = vld [vmem:[%s10903_s5 + $0xb8] sm:$0xff] }
 0x430   : > { %5642 = vmatmul.mubr.msk.f32.gmra.mxu1 %vm2771_vm3, %v8858_v52  ;;  %6021 = vmatpush3.msra.mxu0 %v2876_v29  ;;  %v3181_v17 = vpop.f32.mrf.mxu1  ;;  %v4643_v29 = vld [vmem:[%s10903_s5 + $0x150] sm:$0xff]  ;;  %v10942_v59 = vmax.f32 %v9112_v61, 0.0 }
 0x431   : > { %v3773_v50 = vmax.f32 %v8951_v30, 0.0  ;;  %6023 = vmatmul.mubr.msk.f32.vlgmr.msra.gmra.mxu0 %vm2771_vm3, %v8845_v15  ;;  %3683 = vmatprep.mubr.f32.mxu1 %v10989_v44  ;;  %v6064_v4 = vpack.i.bf16 %v3772_v22, %v3771_v54 }
 0x432   : > { %6025 = vmatprep.mubr.msk.f32.mxu0 %vm6438_vm15, %v10989_v44  ;;  %5671 = vmatprep.subr.mxu1 %v4631_v0  ;;  %v9033_v45 = vpop.f32.mrf.mxu1  ;;  %v4608_v0 = vld [vmem:[%s10903_s5 + $0x38] sm:$0xff] }
 0x433   : > { %6065 = vrot.lane.b32.xlu1 %v6064_v4, %s6430_s29  ;;  %6060 = vrot.lane.b32.xlu0 %v6064_v4, %s6432_s7  ;;  %v6074_v15 = vpack.i.bf16 %v3773_v50, %v3770_v32 }
 0x434   : > { %5643 = vmatmul.mubr.msk.f32.gmra.mxu1 %vm2771_vm3, %v8873_v13  ;;  %5710 = vmatprep.subr.mxu0 %v4664_v43  ;;  %v3187_v48 = vpop.f32.mrf.mxu1  ;;  %v4623_v43 = vld [vmem:[%s10903_s5 + $0xb0] sm:$0xff] }
 0x435   : > { %6026 = vmatmul.mubr.msk.f32.gmra.mxu0 %vm2771_vm3, %v8858_v52  ;;  %5672 = vmatpush3.msra.mxu1 %v4615_v49  ;;  %v4629_v52 = vld [vmem:[%s10903_s5 + $0xe0] sm:$0xff]  ;;  %v9079_v62 = vadd.f32 %v3187_v48, %v9053_v16  ;;  %v4642_v49 = vld [vmem:[%s10903_s5 + $0x148] sm:$0xff] }
 0x436   : > { %v8999_v8 = vpop.permute.xlu0 %2975  ;;  %6028 = vmatprep.mubr.msk.f32.mxu0 %vm6438_vm15, %v10989_v44  ;;  %5673 = vmatprep.subr.mxu1 %v4630_v26  ;;  %v4663_v44 = vld [vmem:[%s10903_s5 + $0x1f0] sm:$0xff] }
 0x437   : > { %6070 = vrot.lane.b32.xlu0 %v6064_v4, %s6431_s30  ;;  %6075 = vrot.lane.b32.xlu1 %v6074_v15, %s6432_s7  ;;  %v9009_v34 = vadd.f32 %v3098_v25, %v8999_v8  ;;  %v9012_v23 = vadd.f32 %v3181_v17, %v8999_v8  ;;  %v9045_v36 = vadd.f32 %v8936_v40, %v8999_v8  ;;  %v3189_v25 = vpop.f32.mrf.mxu1  ;;  %v10945_v40 = vmax.f32 %v9076_v1, 0.0 }
 0x438   : > { %v3258_v58 = vpop.f32.mrf.mxu0  ;;  %5674 = vmatpush3.msra.mxu1 %v4614_v31  ;;  %5711 = vmatpush3.msra.mxu0 %v4648_v21  ;;  %v9106_v35 = vadd.f32 %v3189_v25, %v9053_v16  ;;  %v10935_v47 = vmax.f32 %v9079_v62, 0.0  ;;  %v4607_v31 = vld [vmem:[%s10903_s5 + $0x30] sm:$0xff]  ;;  %v4657_v21 = vld [vmem:[%s10903_s5 + $0x1c0] sm:$0xff]  ;;  %v4654_v25 = vld [vmem:[%s10903_s5 + $0x1a8] sm:$0xff] }
 0x439   : > { %v9021_v10 = vadd.f32 %v3258_v58, %v8911_v11  ;;  %6029 = vmatmul.mubr.msk.f32.gmra.mxu0 %vm2771_vm3, %v8873_v13  ;;  %v10946_v20 = vmax.f32 %v9009_v34, 0.0  ;;  %v10939_v46 = vmax.f32 %v9012_v23, 0.0  ;;  %5675 = vmatprep.subr.mxu1 %v4629_v52  ;;  %v4612_v13 = vld [vmem:[%s10903_s5 + $0x58] sm:$0xff]  ;;  %v3788_v53 = vmax.f32 %v9045_v36, 0.0  ;;  %v4622_v52 = vld [vmem:[%s10903_s5 + $0xa8] sm:$0xff] }
 0x43a   : > { %5676 = vmatpush3.msra.mxu1 %v4613_v39  ;;  %5712 = vmatprep.subr.mxu0 %v4663_v44  ;;  %v3260_v33 = vpop.f32.mrf.mxu0  ;;  %v6124_v26 = vpack.i.bf16 %v10935_v47, %v10945_v40  ;;  %v4641_v39 = vld [vmem:[%s10903_s5 + $0x140] sm:$0xff]  ;;  %v4606_v58 = vld [vmem:[%s10903_s5 + $0x28] sm:$0xff]  ;;  %v4680_v47 = vld [vmem:[%s10903_s5 + $0x278] sm:$0xff] }
 0x43b   : > { %6080 = vrot.lane.b32.xlu0 %v6074_v15, %s6430_s29  ;;  %6085 = vrot.lane.b32.xlu1 %v6074_v15, %s6431_s30  ;;  %v10937_v28 = vmax.f32 %v9021_v10, 0.0  ;;  %v6099_v9 = vpack.i.bf16 %v10946_v20, %v10939_v46  ;;  %v10936_v15 = vmax.f32 %v9106_v35, 0.0 }
 0x43c   : > { %5677 = vmatprep.subr.mxu1 %v4628_v19  ;;  %5713 = vmatpush3.msra.mxu0 %v4647_v12  ;;  %v3264_v4 = vpop.f32.mrf.mxu0  ;;  %v4656_v19 = vld [vmem:[%s10903_s5 + $0x1b8] sm:$0xff] }
 0x43d   : > { %5678 = vmatpush3.msra.mxu1 %v4612_v13  ;;  %5714 = vmatprep.subr.mxu0 %v4662_v57  ;;  %v6104_v56 = vpack.i.bf16 %v3788_v53, %v10937_v28  ;;  %v9147_v17 = vadd.f32 %v3264_v4, %v8999_v8  ;;  %v6134_v12 = vpack.i.bf16 %v10936_v15, %v10942_v59  ;;  %v4621_v57 = vld [vmem:[%s10903_s5 + $0xa0] sm:$0xff]  ;;  %v4652_v4 = vld [vmem:[%s10903_s5 + $0x198] sm:$0xff] }
 0x43e   : > { %5679 = vmatprep.subr.mxu1 %v4627_v6  ;;  %5715 = vmatpush3.msra.mxu0 %v4646_v55  ;;  %v9155_v44 = vpop.f32.mrf.mxu0  ;;  %v9171_v13 = vadd.f32 %v9033_v45, %v8999_v8  ;;  %v4640_v6 = vld [vmem:[%s10903_s5 + $0x138] sm:$0xff]  ;;  %v4655_v45 = vld [vmem:[%s10903_s5 + $0x1b0] sm:$0xff] }
 0x43f   : > { %6100 = vrot.lane.b32.xlu0 %v6099_v9, %s6431_s30  ;;  %6090 = vrot.lane.b32.xlu1 %v6099_v9, %s6432_s7  ;;  %v10931_v48 = vmax.f32 %v9147_v17, 0.0 }
 0x440   : > { %5680 = vmatpush3.msra.mxu1 %v4611_v24  ;;  %5716 = vmatprep.subr.mxu0 %v4661_v38  ;;  %v3270_v55 = vpop.f32.mrf.mxu0  ;;  %v4620_v24 = vld [vmem:[%s10903_s5 + $0x98] sm:$0xff]  ;;  %v4639_v38 = vld [vmem:[%s10903_s5 + $0x130] sm:$0xff] }
 0x441   : > { %5681 = vmatprep.subr.mxu1 %v4626_v3  ;;  %5717 = vmatpush3.msra.mxu0 %v4645_v7  ;;  %v9193_v3 = vadd.f32 %v3260_v33, %v8911_v11  ;;  %v10938_v7 = vmax.f32 %v9171_v13, 0.0  ;;  %v4603_v33 = vld [vmem:[%s10903_s5 + $0x10] sm:$0xff] }
 0x442   : > { %5682 = vmatpush3.msra.mxu1 %v4610_v63  ;;  %5718 = vmatprep.subr.mxu0 %v4660_v14  ;;  %v9199_v63 = vadd.f32 %v3270_v55, %v9053_v16  ;;  %v4604_v14 = vld [vmem:[%s10903_s5 + $0x18] sm:$0xff] }
 0x443   : > { %6105 = vrot.lane.b32.xlu0 %v6104_v56, %s6432_s7  ;;  %6095 = vrot.lane.b32.xlu1 %v6099_v9, %s6430_s29  ;;  %v4605_v9 = vld [vmem:[%s10903_s5 + $0x20] sm:$0xff] }
 0x444   : > { %5683 = vmatprep.subr.mxu1 %v4625_v5  ;;  %5719 = vmatpush3.msra.mxu0 %v4644_v42  ;;  %v4619_v5 = vld [vmem:[%s10903_s5 + $0x90] sm:$0xff]  ;;  %v4638_v42 = vld [vmem:[%s10903_s5 + $0x128] sm:$0xff] }
 0x445   : > { %5684 = vmatpush3.msra.mxu1 %v4609_v41  ;;  %5720 = vmatprep.subr.mxu0 %v4659_v51  ;;  %v4653_v41 = vld [vmem:[%s10903_s5 + $0x1a0] sm:$0xff]  ;;  %v10934_v51 = vmax.f32 %v9193_v3, 0.0 }
 0x446   : > { %5685 = vmatprep.subr.mxu1 %v4624_v37  ;;  %5721 = vmatpush3.msra.mxu0 %v4643_v29  ;;  %v10926_v37 = vmax.f32 %v9199_v63, 0.0  ;;  %v4618_v29 = vld [vmem:[%s10903_s5 + $0x88] sm:$0xff] }
 0x447   : > { %6115 = vrot.lane.b32.xlu0 %v6104_v56, %s6431_s30  ;;  %6110 = vrot.lane.b32.xlu1 %v6104_v56, %s6430_s29  ;;  %v6149_v56 = vpack.i.bf16 %v10931_v48, %v10938_v7 }
 0x448   : > { %5686 = vmatpush3.msra.mxu1 %v4608_v0  ;;  %5722 = vmatprep.subr.mxu0 %v4658_v18  ;;  %v4637_v0 = vld [vmem:[%s10903_s5 + $0x120] sm:$0xff]  ;;  %v4602_v18 = vld [vmem:[%s10903_s5 + $0x8] sm:$0xff] }
 0x449   : > { %5687 = vmatprep.subr.mxu1 %v4623_v43  ;;  %5723 = vmatpush3.msra.mxu0 %v4642_v49  ;;  %v4617_v43 = vld [vmem:[%s10903_s5 + $0x80] sm:$0xff]  ;;  %v4636_v49 = vld [vmem:[%s10903_s5 + $0x118] sm:$0xff] }
 0x44a   : > { %5688 = vmatpush3.msra.mxu1 %v4607_v31  ;;  %5724 = vmatprep.subr.mxu0 %v4657_v21  ;;  %v4601_v31 = vld [vmem:[%s10903_s5] sm:$0xff]  ;;  %v4651_v21 = vld [vmem:[%s10903_s5 + $0x190] sm:$0xff] }
 0x44b   : > { %6125 = vrot.lane.b32.xlu1 %v6124_v26, %s6430_s29  ;;  %6120 = vrot.lane.b32.xlu0 %v6124_v26, %s6432_s7 }
 0x44c   : > { %5689 = vmatprep.subr.mxu1 %v4622_v52  ;;  %5725 = vmatpush3.msra.mxu0 %v4641_v39  ;;  %v4635_v52 = vld [vmem:[%s10903_s5 + $0x110] sm:$0xff]  ;;  %v4650_v39 = vld [vmem:[%s10903_s5 + $0x188] sm:$0xff] }
 0x44d   : > { %5690 = vmatpush3.msra.mxu1 %v4606_v58  ;;  %5726 = vmatprep.subr.mxu0 %v4656_v19  ;;  %v4634_v58 = vld [vmem:[%s10903_s5 + $0x108] sm:$0xff]  ;;  %v4649_v19 = vld [vmem:[%s10903_s5 + $0x180] sm:$0xff] }
 0x44e   : > { %5691 = vmatprep.subr.mxu1 %v4621_v57  ;;  %5727 = vmatpush3.msra.mxu0 %v4640_v6  ;;  %v4696_v57 = vld [vmem:[%s10903_s5 + $0x2f8] sm:$0xff] }
 0x44f   : > { %6130 = vrot.lane.b32.xlu0 %v6124_v26, %s6431_s30  ;;  %6135 = vrot.lane.b32.xlu1 %v6134_v12, %s6432_s7  ;;  %v6164_v26 = vpack.i.bf16 %v10934_v51, %v10926_v37  ;;  %v4728_v6 = vld [vmem:[%s10903_s5 + $0x3f8] sm:$0xff] }
 0x450   : > { %5692 = vmatpush3.msra.mxu1 %v4605_v9  ;;  %5728 = vmatprep.subr.mxu0 %v4655_v45 }
 0x451   : > { %5693 = vmatprep.subr.mxu1 %v4620_v24  ;;  %5729 = vmatpush3.msra.mxu0 %v4639_v38 }
 0x452   : > { %5694 = vmatpush3.msra.mxu1 %v4604_v14  ;;  %5730 = vmatprep.subr.mxu0 %v4654_v25 }
 0x453   : > { %6150 = vrot.lane.b32.xlu0 %v6149_v56, %s6432_s7  ;;  %6140 = vrot.lane.b32.xlu1 %v6134_v12, %s6430_s29 }
 0x454   : > { %5695 = vmatprep.subr.mxu1 %v4619_v5  ;;  %5731 = vmatpush3.msra.mxu0 %v4638_v42 }
 0x455   : > { %5696 = vmatpush3.msra.mxu1 %v4603_v33  ;;  %5732 = vmatprep.subr.mxu0 %v4653_v41 }
 0x456   : > { %5697 = vmatprep.subr.mxu1 %v4618_v29  ;;  %5733 = vmatpush3.msra.mxu0 %v4637_v0  ;;  %v3272_v0 = vpop.f32.mrf.mxu0 }
 0x457   : > { %6160 = vrot.lane.b32.xlu0 %v6149_v56, %s6431_s30  ;;  %6145 = vrot.lane.b32.xlu1 %v6134_v12, %s6431_s30  ;;  %v4633_v12 = vld [vmem:[%s10903_s5 + $0x100] sm:$0xff] }
 0x458   : > { %5698 = vmatpush3.msra.mxu1 %v4602_v18  ;;  %5734 = vmatprep.subr.mxu0 %v4652_v4  ;;  %v9305_v4 = vadd.f32 %v9155_v44, %v8999_v8 }
 0x459   : > { %5699 = vmatprep.subr.mxu1 %v4617_v43  ;;  %5735 = vmatpush3.msra.mxu0 %v4636_v49 }
 0x45a   : > { %5700 = vmatpush3.msra.mxu1 %v4601_v31  ;;  %5736 = vmatprep.subr.mxu0 %v4651_v21 }
 0x45b   : > { %6165 = vrot.lane.b32.xlu0 %v6164_v26, %s6432_s7  ;;  %6155 = vrot.lane.b32.xlu1 %v6149_v56, %s6430_s29 }
 0x45c   : > { %5737 = vmatpush3.msra.mxu0 %v4635_v52  ;;  %5751 = vmatprep.subr.mxu1 %v4696_v57  ;;  %v10930_v52 = vmax.f32 %v9305_v4, 0.0 }
 0x45d   : > { %5738 = vmatprep.subr.mxu0 %v4650_v39 }
 0x45e   : > { %5739 = vmatpush3.msra.mxu0 %v4634_v58 }
 0x45f   : > { %6175 = vrot.lane.b32.xlu1 %v6164_v26, %s6430_s29  ;;  %5740 = vmatprep.subr.mxu0 %v4649_v19 }
 0x460   : > { %5741 = vmatpush3.msra.mxu0 %v4633_v12 }
 0x461   : > { %5792 = vmatprep.subr.mxu0 %v4728_v6 }
 0x478   : > { %v3341_v55 = vpop.f32.mrf.mxu1 }
 0x479   : > { %v9282_v9 = vadd.f32 %v3341_v55, %v8911_v11 }
 0x47a   : > { %v3343_v45 = vpop.f32.mrf.mxu1 }
 0x47b   : > { %v9285_v24 = vadd.f32 %v3343_v45, %v8911_v11  ;;  %v10933_v14 = vmax.f32 %v9282_v9, 0.0 }
 0x47c   : > { %v3347_v38 = vpop.f32.mrf.mxu1 }
 0x47d   : > { %v10932_v25 = vmax.f32 %v9285_v24, 0.0  ;;  %v9290_v56 = vadd.f32 %v3347_v38, %v8999_v8  ;;  %v9340_v38 = vadd.f32 %v3272_v0, %v9053_v16 }
 0x47e   : > { %v3349_v5 = vpop.f32.mrf.mxu1 }
 0x47f   : > { %v9293_v42 = vadd.f32 %v3349_v5, %v8999_v8  ;;  %v6169_v33 = vpack.i.bf16 %v10932_v25, %v10933_v14  ;;  %v10929_v41 = vmax.f32 %v9290_v56, 0.0 }
 0x480   : > { %v3353_v18 = vpop.f32.mrf.mxu1 }
 0x481   : > { %v10925_v29 = vmax.f32 %v9293_v42, 0.0  ;;  %6170 = vrot.lane.b32.xlu0 %v6169_v33, %s6432_s7  ;;  %6180 = vrot.lane.b32.xlu1 %v6169_v33, %s6430_s29 }
 0x482   : > { %v3355_v21 = vpop.f32.mrf.mxu1 }
 0x483   : > { %v6204_v43 = vpack.i.bf16 %v10925_v29, %v10929_v41  ;;  %v9319_v58 = vadd.f32 %v3355_v21, %v9053_v16 }
 0x484   : > { %v3424_v49 = vpop.f32.mrf.mxu0 }
 0x485   : > { %v9312_v31 = vadd.f32 %v3424_v49, %v8911_v11  ;;  %6185 = vrot.lane.b32.xlu0 %v6164_v26, %s6431_s30  ;;  %6205 = vrot.lane.b32.xlu1 %v6204_v43, %s6431_s30  ;;  %v9327_v26 = vadd.f32 %v3353_v18, %v9053_v16  ;;  %v10923_v57 = vmax.f32 %v9319_v58, 0.0  ;;  %v10924_v49 = vmax.f32 %v9340_v38, 0.0 }
 0x486   : > { %v3426_v44 = vpop.f32.mrf.mxu0 }
 0x487   : > { %v10921_v39 = vmax.f32 %v9312_v31, 0.0  ;;  %v10922_v6 = vmax.f32 %v9327_v26, 0.0 }
 0x488   : > { %v3430_v12 = vpop.f32.mrf.mxu0 }
 0x489   : > { %6190 = vrot.lane.b32.xlu0 %v6169_v33, %s6431_s30  ;;  %v6214_v19 = vpack.i.bf16 %v10930_v52, %v10921_v39  ;;  %v9334_v55 = vadd.f32 %v3430_v12, %v8999_v8  ;;  %v6224_v5 = vpack.i.bf16 %v10923_v57, %v10922_v6 }
 0x48a   : > { %v9337_v45 = vpop.f32.mrf.mxu0 }
 0x48b   : > { %6215 = vrot.lane.b32.xlu1 %v6214_v19, %s6430_s29  ;;  %11003 = vst [vmem:[#allocation2_spill] sm:$0xff] %v9334_v55  ;;  %v10920_v33 = vmax.f32 %v9334_v55, 0.0  ;;  %v11015_v55 = vmax.f32 %v9112_v61, 0.0  ;;  %v4686_v61 = vld [vmem:[%s10903_s5 + $0x2a8] sm:$0xff] }
 0x48c   : > { %v3436_v18 = vpop.f32.mrf.mxu0 }
 0x48d   : > { %6195 = vrot.lane.b32.xlu0 %v6204_v43, %s6432_s7  ;;  %v9352_v21 = vadd.f32 %v3436_v18, %v9053_v16  ;;  %v6244_v0 = vpack.i.bf16 %v10924_v49, %v10920_v33 }
 0x48f   : > { %6220 = vrot.lane.b32.xlu1 %v6214_v19, %s6431_s30  ;;  %11004 = vst [vmem:[#allocation4_spill] sm:$0xff] %v9352_v21  ;;  %v10927_v12 = vmax.f32 %v9352_v21, 0.0 }
 0x491   : > { %6200 = vrot.lane.b32.xlu0 %v6204_v43, %s6430_s29  ;;  %v9360_v43 = vadd.f32 %v3426_v44, %v8911_v11 }
 0x493   : > { %6225 = vrot.lane.b32.xlu1 %v6224_v5, %s6432_s7 }
 0x495   : > { %6210 = vrot.lane.b32.xlu0 %v6214_v19, %s6432_s7  ;;  %v10928_v19 = vmax.f32 %v9360_v43, 0.0 }
 0x497   : > { %6230 = vrot.lane.b32.xlu1 %v6224_v5, %s6430_s29  ;;  %v6254_v18 = vpack.i.bf16 %v10928_v19, %v10927_v12 }
 0x499   : > { %6245 = vrot.lane.b32.xlu0 %v6244_v0, %s6430_s29 }
 0x49b   : > { %6235 = vrot.lane.b32.xlu1 %v6224_v5, %s6431_s30 }
 0x49d   : > { %6250 = vrot.lane.b32.xlu0 %v6244_v0, %s6431_s30 }
 0x49f   : > { %6240 = vrot.lane.b32.xlu1 %v6244_v0, %s6432_s7 }
 0x4a1   : > { %6255 = vrot.lane.b32.xlu0 %v6254_v18, %s6432_s7 }
 0x4a5   : > { %v6061_v44 = vpop.permute.xlu0 %6060  ;;  %6265 = vrot.lane.b32.xlu0 %v6254_v18, %s6430_s29  ;;  %v6066_v33 = vpop.permute.xlu1 %6065 }
 0x4a6   : > { %v6063_v39 = vunpack.i.h.bf16 %v6061_v44  ;;  %v6062_v6 = vunpack.i.l.bf16 %v6061_v44  ;;  %v6068_v5 = vunpack.i.h.bf16 %v6066_v33  ;;  %v6067_v57 = vunpack.i.l.bf16 %v6066_v33 }
 0x4a8   : > { %v3966_v49 = vsel %vm442_vm8, %v6062_v6, %v6063_v39  ;;  %v4212_v29 = vsel %vm828_vm2, %v6067_v57, %v6068_v5 }
 0x4a9   : > { %v4059_v0 = vmax.f32 %v3771_v54, %v3966_v49  ;;  %v6071_v37 = vpop.permute.xlu0 %6070  ;;  %6275 = vrot.lane.b32.xlu0 %v6254_v18, %s6431_s30  ;;  %v6076_v12 = vpop.permute.xlu1 %6075 }
 0x4aa   : > { %v6073_v19 = vunpack.i.h.bf16 %v6071_v37  ;;  %v6072_v41 = vunpack.i.l.bf16 %v6071_v37  ;;  %v6077_v52 = vunpack.i.l.bf16 %v6076_v12  ;;  %v6078_v37 = vunpack.i.h.bf16 %v6076_v12 }
 0x4ab   : > { %v4308_v48 = vmax.f32 %v4059_v0, %v4212_v29 }
 0x4ac   : > { %v3965_v25 = vsel %vm442_vm8, %v6077_v52, %v6062_v6  ;;  %v4458_v44 = vsel %vm1006_vm0, %v6072_v41, %v6073_v19  ;;  %v3967_v60 = vsel %vm442_vm8, %v6063_v39, %v6078_v37 }
 0x4ad   : > { %v9381_v33 = vpop.permute.xlu0 %6080  ;;  %v9383_v14 = vpop.permute.xlu1 %6085  ;;  %v4554_v51 = vmax.f32 %v4308_v48, %v4458_v44  ;;  %v4058_v49 = vmax.f32 %v3770_v32, %v3965_v25 }
 0x4ae   : > { %v6082_v27 = vunpack.i.l.bf16 %v9381_v33  ;;  %v6087_v54 = vunpack.i.l.bf16 %v9383_v14  ;;  %v6083_v48 = vunpack.i.h.bf16 %v9381_v33  ;;  %v10947_v32 = vunpack.i.h.bf16 %v9383_v14 }
 0x4af   : > { %4934 = vmatprep.mubr.f32.mxu1 %v4554_v51  ;;  %v4695_v51 = vld [vmem:[%s10903_s5 + $0x2f0] sm:$0xff] }
 0x4b0   : > { %v4211_v29 = vsel %vm828_vm2, %v6082_v27, %v6067_v57  ;;  %v4457_v52 = vsel %vm1006_vm0, %v6087_v54, %v6072_v41  ;;  %v4679_v57 = vld [vmem:[%s10903_s5 + $0x270] sm:$0xff]  ;;  %v9412_v12 = vsel %vm828_vm2, %v6068_v5, %v6083_v48  ;;  %v4694_v54 = vld [vmem:[%s10903_s5 + $0x2e8] sm:$0xff] }
 0x4b1   : > { %v4307_v6 = vmax.f32 %v4058_v49, %v4211_v29  ;;  %v9391_v18 = vpop.permute.xlu0 %6100  ;;  %v9393_v0 = vpop.permute.xlu1 %6090  ;;  %v9422_v49 = vmax.f32 %v3772_v22, %v3967_v60  ;;  %v4678_v5 = vld [vmem:[%s10903_s5 + $0x268] sm:$0xff]  ;;  %v9430_v29 = vsel %vm1006_vm0, %v6073_v19, %v10947_v32 }
 0x4b2   : > { %v10941_v39 = vunpack.i.l.bf16 %v9393_v0 }
 0x4b3   : > { %v4553_v44 = vmax.f32 %v4307_v6, %v4457_v52  ;;  %v4693_v6 = vld [vmem:[%s10903_s5 + $0x2e0] sm:$0xff]  ;;  %v4309_v19 = vmax.f32 %v9422_v49, %v9412_v12 }
 0x4b5   : > { %v9404_v25 = vpop.permute.xlu0 %6105  ;;  %v9406_v41 = vpop.permute.xlu1 %6095  ;;  %4935 = vmatmul.mubr.f32.vlgmr.msra.gmra.mxu1 %v4553_v44  ;;  %v10950_v44 = vunpack.i.l.bf16 %v9391_v18 }
 0x4b6   : > { %v6108_v33 = vunpack.i.h.bf16 %v9404_v25  ;;  %v10940_v27 = vunpack.i.l.bf16 %v9404_v25  ;;  %5752 = vmatpush3.msra.mxu1 %v4680_v47  ;;  %v6093_v47 = vunpack.i.h.bf16 %v9393_v0  ;;  %v6098_v60 = vunpack.i.h.bf16 %v9406_v41 }
 0x4b7   : > { %5753 = vmatprep.subr.mxu1 %v4695_v51  ;;  %v10944_v12 = vunpack.i.l.bf16 %v9406_v41 }
 0x4b8   : > { %v3968_v52 = vsel %vm442_vm8, %v6078_v37, %v10940_v27  ;;  %v3981_v2 = vsel %vm442_vm8, %v6108_v33, %v10941_v39  ;;  %v3507_v22 = vpop.f32.mrf.mxu1  ;;  %5754 = vmatpush3.msra.mxu1 %v4679_v57  ;;  %v4677_v57 = vld [vmem:[%s10903_s5 + $0x260] sm:$0xff]  ;;  %v3980_v28 = vsel %vm442_vm8, %v6093_v47, %v6108_v33 }
 0x4b9   : > { %v9447_v51 = vadd.f32 %v3507_v22, %v8911_v11  ;;  %v9449_v37 = vpop.permute.xlu0 %6115  ;;  %v9451_v15 = vpop.permute.xlu1 %6110  ;;  %5755 = vmatprep.subr.mxu1 %v4694_v54  ;;  %v4692_v22 = vld [vmem:[%s10903_s5 + $0x2d8] sm:$0xff]  ;;  %v4061_v54 = vmax.f32 %v3773_v50, %v3968_v52  ;;  %v4075_v27 = vmax.f32 %v3788_v53, %v3981_v2 }
 0x4ba   : > { %v6113_v49 = vunpack.i.h.bf16 %v9451_v15  ;;  %v10943_v7 = vunpack.i.l.bf16 %v9451_v15  ;;  %v3509_v46 = vpop.f32.mrf.mxu1  ;;  %5756 = vmatpush3.msra.mxu1 %v4678_v5  ;;  %v6118_v33 = vunpack.i.h.bf16 %v9449_v37  ;;  %v4676_v5 = vld [vmem:[%s10903_s5 + $0x258] sm:$0xff] }
 0x4bb   : > { %11005 = vst [vmem:[#allocation3_spill] sm:$0xff] %v9447_v51  ;;  %v9469_v47 = vadd.f32 %v3509_v46, %v8911_v11  ;;  %5757 = vmatprep.subr.mxu1 %v4693_v6  ;;  %v10949_v39 = vmax.f32 %v9447_v51, 0.0  ;;  %v4691_v46 = vld [vmem:[%s10903_s5 + $0x2d0] sm:$0xff] }
 0x4bc   : > { %v4214_v30 = vsel %vm828_vm2, %v6083_v48, %v10943_v7  ;;  %v4228_v50 = vsel %vm828_vm2, %v6113_v49, %v10944_v12  ;;  %v3513_v36 = vpop.f32.mrf.mxu1  ;;  %5758 = vmatpush3.msra.mxu1 %v4677_v57  ;;  %v4675_v57 = vld [vmem:[%s10903_s5 + $0x250] sm:$0xff] }
 0x4bd   : > { %11006 = vst [vmem:[#allocation5_spill] sm:$0xff] %v9469_v47  ;;  %v10948_v53 = vmax.f32 %v9469_v47, 0.0  ;;  %v9487_v52 = vadd.f32 %v3513_v36, %v8999_v8  ;;  %v9489_v2 = vpop.permute.xlu0 %6120  ;;  %v9491_v6 = vpop.permute.xlu1 %6125  ;;  %v4324_v48 = vmax.f32 %v4075_v27, %v4228_v50  ;;  %v4310_v7 = vmax.f32 %v4061_v54, %v4214_v30  ;;  %5759 = vmatprep.subr.mxu1 %v4692_v22  ;;  %v4690_v54 = vld [vmem:[%s10903_s5 + $0x2c8] sm:$0xff] }
 0x4be   : > { %v10951_v12 = vunpack.i.h.bf16 %v9489_v2  ;;  %v10952_v40 = vunpack.i.l.bf16 %v9489_v2  ;;  %v10953_v20 = vunpack.i.h.bf16 %v9491_v6  ;;  %v10954_v36 = vunpack.i.l.bf16 %v9491_v6  ;;  %v3515_v32 = vpop.f32.mrf.mxu1  ;;  %5760 = vmatpush3.msra.mxu1 %v4676_v5 }
 0x4bf   : > { %11007 = vst [vmem:[#allocation6_spill] sm:$0xff] %v9487_v52  ;;  %v9501_v59 = vadd.f32 %v3515_v32, %v8999_v8  ;;  %v6279_v27 = vpack.i.bf16 %v10948_v53, %v10949_v39  ;;  %v4474_v22 = vsel %vm1006_vm0, %v6118_v33, %v10950_v44  ;;  %5761 = vmatprep.subr.mxu1 %v4691_v46  ;;  %v11009_v50 = vunpack.i.l.bf16 %v9449_v37  ;;  %v4674_v46 = vld [vmem:[%s10903_s5 + $0x248] sm:$0xff] }
 0x4c0   : > { %v4227_v30 = vsel %vm828_vm2, %v6098_v60, %v6113_v49  ;;  %v3996_v32 = vsel %vm442_vm8, %v10952_v40, %v10951_v12  ;;  %v4570_v5 = vmax.f32 %v4324_v48, %v4474_v22  ;;  %v11010_v53 = vunpack.i.h.bf16 %v9383_v14  ;;  %5762 = vmatpush3.msra.mxu1 %v4675_v57 }
 0x4c1   : > { %11008 = vst [vmem:[#allocation7_spill] sm:$0xff] %v9501_v59  ;;  %v11011_v60 = vmax.f32 %v9009_v34, 0.0  ;;  %v10955_v44 = vmax.f32 %v9501_v59, 0.0  ;;  %6280 = vrot.lane.b32.xlu0 %v6279_v27, %s6431_s30  ;;  %v9531_v12 = vpop.permute.xlu0 %6130  ;;  %6260 = vrot.lane.b32.xlu1 %v6279_v27, %s6432_s7  ;;  %v9534_v48 = vpop.permute.xlu1 %6135  ;;  %v4555_v57 = vmax.f32 %v4309_v19, %v9430_v29  ;;  %v6103_v22 = vunpack.i.h.bf16 %v9391_v18 }
 0x4c2   : > { %v4460_v39 = vsel %vm1006_vm0, %v11010_v53, %v11009_v50  ;;  %v3438_v53 = vpop.f32.mrf.mxu0  ;;  %v10956_v50 = vmax.f32 %v9487_v52, 0.0  ;;  %v4244_v34 = vsel %vm828_vm2, %v10954_v36, %v10953_v20  ;;  %4939 = vmatprep.mubr.f32.mxu1 %v4570_v5  ;;  %5763 = vmatprep.subr.mxu1 %v4690_v54  ;;  %v10957_v19 = vunpack.i.h.bf16 %v9531_v12  ;;  %v9554_v5 = vpop.f32.mrf.mxu1 }
 0x4c3   : > { %v4074_v49 = vmax.f32 %v11011_v60, %v3980_v28  ;;  %v4556_v14 = vmax.f32 %v4310_v7, %v4460_v39  ;;  %v4689_v28 = vld [vmem:[%s10903_s5 + $0x2c0] sm:$0xff]  ;;  %v4712_v7 = vld [vmem:[%s10903_s5 + $0x378] sm:$0xff]  ;;  %v11012_v39 = vmax.f32 %v9076_v1, 0.0  ;;  %v10958_v60 = vunpack.i.l.bf16 %v9531_v12  ;;  %5764 = vmatpush3.msra.mxu1 %v4674_v46 }
 0x4c4   : > { %v6137_v54 = vunpack.i.l.bf16 %v9534_v48  ;;  %v4473_v20 = vsel %vm1006_vm0, %v6103_v22, %v6118_v33  ;;  %v3590_v36 = vpop.f32.mrf.mxu0  ;;  %v6284_v1 = vpack.i.bf16 %v10955_v44, %v10956_v50  ;;  %5765 = vmatprep.subr.mxu1 %v4689_v28  ;;  %v4673_v33 = vld [vmem:[%s10903_s5 + $0x240] sm:$0xff]  ;;  %v4726_v22 = vld [vmem:[%s10903_s5 + $0x3e8] sm:$0xff]  ;;  %v3521_v44 = vpop.f32.mrf.mxu1  ;;  %v11014_v59 = vunpack.i.l.bf16 %v9491_v6 }
 0x4c5   : > { %v4091_v29 = vmax.f32 %v11012_v39, %v3996_v32  ;;  %5014 = vmatprep.mubr.f32.mxu0 %v4556_v14  ;;  %v4323_v40 = vmax.f32 %v4074_v49, %v4227_v30  ;;  %v4727_v32 = vld [vmem:[%s10903_s5 + $0x3f0] sm:$0xff]  ;;  %v9565_v30 = vpop.permute.xlu0 %6150  ;;  %v9567_v46 = vpop.permute.xlu1 %6140  ;;  %6270 = vrot.lane.b32.xlu1 %v6279_v27, %s6430_s29  ;;  %v4672_v27 = vld [vmem:[%s10903_s5 + $0x238] sm:$0xff]  ;;  %v4710_v39 = vld [vmem:[%s10903_s5 + $0x368] sm:$0xff] }
 0x4c6   : > { %5015 = vmatmul.mubr.f32.vlgmr.msra.gmra.mxu0 %v4555_v57  ;;  %v4711_v49 = vld [vmem:[%s10903_s5 + $0x370] sm:$0xff]  ;;  %v9576_v57 = vadd.f32 %v3590_v36, %v8911_v11  ;;  %6285 = vrot.lane.b32.xlu0 %v6284_v1, %s6432_s7  ;;  %v6142_v28 = vunpack.i.l.bf16 %v9567_v46  ;;  %v4490_v36 = vsel %vm1006_vm0, %v10958_v60, %v10957_v19  ;;  %v9627_v60 = vadd.f32 %v3438_v53, %v9053_v16 }
 0x4c7   : > { %v4569_v14 = vmax.f32 %v4323_v40, %v4473_v20  ;;  %5793 = vmatpush3.msra.mxu0 %v4712_v7  ;;  %v9580_v20 = vpop.f32.mrf.mxu0  ;;  %v4688_v40 = vld [vmem:[%s10903_s5 + $0x2b8] sm:$0xff]  ;;  %v4340_v7 = vmax.f32 %v4091_v29, %v4244_v34  ;;  %v11013_v34 = vunpack.i.l.bf16 %v9489_v2  ;;  %5766 = vmatpush3.msra.mxu1 %v4673_v33  ;;  %v4687_v19 = vld [vmem:[%s10903_s5 + $0x2b0] sm:$0xff] }
 0x4c8   : > { %5794 = vmatprep.subr.mxu0 %v4727_v32  ;;  %v4725_v32 = vld [vmem:[%s10903_s5 + $0x3e0] sm:$0xff]  ;;  %5767 = vmatprep.subr.mxu1 %v4688_v40  ;;  %v4671_v40 = vld [vmem:[%s10903_s5 + $0x230] sm:$0xff] }
 0x4c9   : > { %4940 = vmatmul.mubr.f32.gmra.mxu1 %v4569_v14  ;;  %v9602_v14 = vadd.f32 %v9337_v45, %v8999_v8  ;;  %v3995_v29 = vsel %vm442_vm8, %v6137_v54, %v11013_v34  ;;  %v3596_v50 = vpop.f32.mrf.mxu0  ;;  %5795 = vmatpush3.msra.mxu0 %v4711_v49  ;;  %v6152_v45 = vunpack.i.l.bf16 %v9565_v30  ;;  %v4243_v54 = vsel %vm828_vm2, %v6142_v28, %v11014_v59  ;;  %v9618_v34 = vpop.permute.xlu0 %6160 }
 0x4ca   : > { %v9620_v33 = vpop.permute.xlu1 %6145  ;;  %5796 = vmatprep.subr.mxu0 %v4726_v22  ;;  %v10965_v49 = vmax.f32 %v9576_v57, 0.0  ;;  %v4586_v21 = vmax.f32 %v4340_v7, %v4490_v36  ;;  %v9624_v52 = vadd.f32 %v3596_v50, %v8999_v8  ;;  %5768 = vmatpush3.msra.mxu1 %v4672_v27  ;;  %v4090_v59 = vmax.f32 %v11015_v55, %v3995_v29  ;;  %v4709_v50 = vld [vmem:[%s10903_s5 + $0x360] sm:$0xff]  ;;  %v4724_v55 = vld [vmem:[%s10903_s5 + $0x3d8] sm:$0xff] }
 0x4cb   : > { %5797 = vmatpush3.msra.mxu0 %v4710_v39  ;;  %v6147_v28 = vunpack.i.l.bf16 %v9620_v33  ;;  %v9632_v47 = vpop.f32.mrf.mxu0  ;;  %5769 = vmatprep.subr.mxu1 %v4687_v19  ;;  %v9642_v22 = vadd.f32 %v3521_v44, %v9053_v16  ;;  %v11016_v19 = vunpack.i.l.bf16 %v9393_v0  ;;  %v11017_v36 = vunpack.i.h.bf16 %v9565_v30 }
 0x4cc   : > { %5798 = vmatprep.subr.mxu0 %v4725_v32  ;;  %4944 = vmatprep.mubr.f32.mxu1 %v4586_v21  ;;  %v4339_v39 = vmax.f32 %v4090_v59, %v4243_v54  ;;  %v11018_v29 = vunpack.i.l.bf16 %v9531_v12  ;;  %v10968_v53 = vmax.f32 %v9624_v52, 0.0  ;;  %v11019_v0 = vmax.f32 %v9602_v14, 0.0 }
 0x4cd   : > { %6290 = vrot.lane.b32.xlu0 %v6284_v1, %s6430_s29  ;;  %v3982_v7 = vsel %vm442_vm8, %v11016_v19, %v6152_v45  ;;  %v3983_v44 = vsel %vm442_vm8, %v6152_v45, %v11017_v36  ;;  %6295 = vrot.lane.b32.xlu1 %v6284_v1, %s6431_s30  ;;  %v9658_v21 = vpop.permute.xlu0 %6165  ;;  %v3602_v54 = vpop.f32.mrf.mxu0 }
 0x4ce   : > { %v9660_v27 = vpop.permute.xlu1 %6155  ;;  %v4489_v32 = vsel %vm1006_vm0, %v6147_v28, %v11018_v29  ;;  %v6299_v19 = vpack.i.bf16 %v11019_v0, %v10965_v49  ;;  %v10966_v45 = vunpack.i.h.bf16 %v9658_v21  ;;  %5770 = vmatpush3.msra.mxu1 %v4671_v40  ;;  %5799 = vmatpush3.msra.mxu0 %v4709_v50  ;;  %v4708_v28 = vld [vmem:[%s10903_s5 + $0x358] sm:$0xff]  ;;  %v9679_v29 = vadd.f32 %v9554_v5, %v9053_v16 }
 0x4cf   : > { %v10975_v1 = vunpack.i.h.bf16 %v9660_v27  ;;  %v6157_v59 = vunpack.i.l.bf16 %v9660_v27  ;;  %v4585_v51 = vmax.f32 %v4339_v39, %v4489_v32  ;;  %5771 = vmatprep.subr.mxu1 %v4686_v61  ;;  %5800 = vmatprep.subr.mxu0 %v4724_v55  ;;  %v6162_v40 = vunpack.i.l.bf16 %v9618_v34  ;;  %v4670_v55 = vld [vmem:[%s10903_s5 + $0x228] sm:$0xff] }
 0x4d0   : > { %v11020_v50 = vunpack.i.l.bf16 %v9404_v25  ;;  %v11021_v39 = vmax.f32 %v9012_v23, 0.0  ;;  %v11022_v32 = vmax.f32 %v9171_v13, 0.0  ;;  %v11023_v0 = vunpack.i.l.bf16 %v9406_v41  ;;  %5801 = vmatpush3.msra.mxu0 %v4708_v28  ;;  %5772 = vmatpush3.msra.mxu1 %v4670_v55 }
 0x4d1   : > { %6300 = vrot.lane.b32.xlu0 %v6299_v19, %s6432_s7  ;;  %6305 = vrot.lane.b32.xlu1 %v6299_v19, %s6430_s29  ;;  %v4230_v25 = vsel %vm828_vm2, %v6157_v59, %v10975_v1  ;;  %v9707_v23 = vadd.f32 %v3602_v54, %v9053_v16  ;;  %v11025_v13 = vmax.f32 %v9627_v60, 0.0  ;;  %v4723_v54 = vld [vmem:[%s10903_s5 + $0x3d0] sm:$0xff] }
 0x4d2   : > { %v3969_v61 = vsel %vm442_vm8, %v11020_v50, %v10966_v45  ;;  %v4076_v5 = vmax.f32 %v11021_v39, %v3982_v7  ;;  %v4077_v49 = vmax.f32 %v11022_v32, %v3983_v44  ;;  %v4229_v36 = vsel %vm828_vm2, %v11023_v0, %v6157_v59  ;;  %v9703_v50 = vpop.permute.xlu1 %6175  ;;  %4945 = vmatmul.mubr.f32.gmra.mxu1 %v4585_v51  ;;  %v4685_v51 = vld [vmem:[%s10903_s5 + $0x2a0] sm:$0xff] }
 0x4d3   : > { %v10973_v45 = vmax.f32 %v9642_v22, 0.0  ;;  %11024 = vst [vmem:[#allocation8_spill] sm:$0xff] %v9707_v23  ;;  %v9713_v7 = vpack.i.bf16 %v11025_v13, %v10968_v53  ;;  %v10976_v41 = vunpack.i.h.bf16 %v9703_v50  ;;  %v11026_v44 = vmax.f32 %v9021_v10, 0.0  ;;  %5773 = vmatprep.subr.mxu1 %v4685_v51  ;;  %5802 = vmatprep.subr.mxu0 %v4723_v54  ;;  %v4683_v51 = vld [vmem:[%s10903_s5 + $0x290] sm:$0xff]  ;;  %v4722_v54 = vld [vmem:[%s10903_s5 + $0x3c8] sm:$0xff] }
 0x4d4   : > { %v4326_v0 = vmax.f32 %v4077_v49, %v4230_v25  ;;  %v4325_v39 = vmax.f32 %v4076_v5, %v4229_v36  ;;  %v9728_v32 = vadd.f32 %v9580_v20, %v8911_v11  ;;  %v11027_v10 = vunpack.i.l.bf16 %v9451_v15  ;;  %v4669_v20 = vld [vmem:[%s10903_s5 + $0x220] sm:$0xff] }
 0x4d5   : > { %v9718_v59 = vmax.f32 %v11026_v44, %v3969_v61  ;;  %6335 = vrot.lane.b32.xlu0 %v9713_v7, %s6430_s29  ;;  %v11028_v36 = vunpack.i.h.bf16 %v9618_v34  ;;  %v11029_v61 = vunpack.i.l.bf16 %v9391_v18  ;;  %v10972_v5 = vmax.f32 %v9679_v29, 0.0  ;;  %6310 = vrot.lane.b32.xlu1 %v6299_v19, %s6431_s30  ;;  %v4684_v18 = vld [vmem:[%s10903_s5 + $0x298] sm:$0xff] }
 0x4d6   : > { %v9737_v49 = vsel %vm828_vm2, %v11027_v10, %v10976_v41  ;;  %v10967_v44 = vmax.f32 %v9707_v23, 0.0  ;;  %5774 = vmatpush3.msra.mxu1 %v4669_v20  ;;  %v4668_v19 = vld [vmem:[%s10903_s5 + $0x218] sm:$0xff]  ;;  %v4667_v10 = vld [vmem:[%s10903_s5 + $0x210] sm:$0xff]  ;;  %v4681_v20 = vld [vmem:[%s10903_s5 + $0x280] sm:$0xff]  ;;  %v11035_v41 = vmax.f32 %v9106_v35, 0.0  ;;  %v11037_v35 = vmax.f32 %v9079_v62, 0.0 }
 0x4d7   : > { %v4476_v28 = vsel %vm1006_vm0, %v6162_v40, %v11028_v36  ;;  %v4475_v55 = vsel %vm1006_vm0, %v11029_v61, %v6162_v40  ;;  %v6314_v40 = vpack.i.bf16 %v10973_v45, %v10972_v5  ;;  %5775 = vmatprep.subr.mxu1 %v4684_v18  ;;  %v4666_v61 = vld [vmem:[%s10903_s5 + $0x208] sm:$0xff]  ;;  %v4705_v18 = vld [vmem:[%s10903_s5 + $0x340] sm:$0xff] }
 0x4d8   : > { %v4572_v25 = vmax.f32 %v4326_v0, %v4476_v28  ;;  %v4571_v13 = vmax.f32 %v4325_v39, %v4475_v55  ;;  %v4707_v0 = vld [vmem:[%s10903_s5 + $0x350] sm:$0xff]  ;;  %v10969_v39 = vmax.f32 %v9728_v32, 0.0  ;;  %5776 = vmatpush3.msra.mxu1 %v4668_v19  ;;  %v4682_v28 = vld [vmem:[%s10903_s5 + $0x288] sm:$0xff]  ;;  %v4720_v19 = vld [vmem:[%s10903_s5 + $0x3b8] sm:$0xff] }
 0x4d9   : > { %6340 = vrot.lane.b32.xlu0 %v9713_v7, %s6431_s30  ;;  %6315 = vrot.lane.b32.xlu1 %v6314_v40, %s6432_s7  ;;  %v4706_v55 = vld [vmem:[%s10903_s5 + $0x348] sm:$0xff] }
 0x4da   : > { %5019 = vmatprep.mubr.f32.mxu0 %v4572_v25  ;;  %v9783_v36 = vpack.i.bf16 %v10969_v39, %v10967_v44  ;;  %5803 = vmatpush3.msra.mxu0 %v4707_v0  ;;  %v4721_v25 = vld [vmem:[%s10903_s5 + $0x3c0] sm:$0xff]  ;;  %v4760_v0 = vld [vmem:[%s10903_s5 + $0x4f8] sm:$0xff] }
 0x4db   : > { %5020 = vmatmul.mubr.f32.gmra.mxu0 %v4571_v13  ;;  %5777 = vmatprep.subr.mxu1 %v4683_v51  ;;  %v4665_v13 = vld [vmem:[%s10903_s5 + $0x200] sm:$0xff]  ;;  %v4704_v51 = vld [vmem:[%s10903_s5 + $0x338] sm:$0xff] }
 0x4dc   : > { %5804 = vmatprep.subr.mxu0 %v4722_v54  ;;  %5778 = vmatpush3.msra.mxu1 %v4667_v10  ;;  %v4719_v54 = vld [vmem:[%s10903_s5 + $0x3b0] sm:$0xff] }
 0x4dd   : > { %6350 = vrot.lane.b32.xlu0 %v9783_v36, %s6432_s7  ;;  %6320 = vrot.lane.b32.xlu1 %v6314_v40, %s6430_s29  ;;  %v4703_v10 = vld [vmem:[%s10903_s5 + $0x330] sm:$0xff] }
 0x4de   : > { %5779 = vmatprep.subr.mxu1 %v4682_v28  ;;  %5805 = vmatpush3.msra.mxu0 %v4706_v55  ;;  %v4718_v28 = vld [vmem:[%s10903_s5 + $0x3a8] sm:$0xff]  ;;  %v4701_v55 = vld [vmem:[%s10903_s5 + $0x320] sm:$0xff] }
 0x4df   : > { %5780 = vmatpush3.msra.mxu1 %v4666_v61  ;;  %5806 = vmatprep.subr.mxu0 %v4721_v25  ;;  %v4717_v61 = vld [vmem:[%s10903_s5 + $0x3a0] sm:$0xff]  ;;  %v4715_v25 = vld [vmem:[%s10903_s5 + $0x390] sm:$0xff] }
 0x4e0   : > { %5781 = vmatprep.subr.mxu1 %v4681_v20  ;;  %5807 = vmatpush3.msra.mxu0 %v4705_v18  ;;  %v4716_v20 = vld [vmem:[%s10903_s5 + $0x398] sm:$0xff]  ;;  %v9855_v18 = vadd.f32 %v9632_v47, %v8999_v8  ;;  %v4713_v47 = vld [vmem:[%s10903_s5 + $0x380] sm:$0xff] }
 0x4e1   : > { %6355 = vrot.lane.b32.xlu0 %v9783_v36, %s6430_s29  ;;  %5782 = vmatpush3.msra.mxu1 %v4665_v13  ;;  %v4699_v13 = vld [vmem:[%s10903_s5 + $0x310] sm:$0xff] }
 0x4e2   : > { %6325 = vrot.lane.b32.xlu1 %v6314_v40, %s6431_s30  ;;  %5808 = vmatprep.subr.mxu0 %v4720_v19  ;;  %v4702_v40 = vld [vmem:[%s10903_s5 + $0x328] sm:$0xff]  ;;  %11030 = vst [vmem:[#allocation9_spill] sm:$0xff] %v9855_v18 }
 0x4e3   : > { %5833 = vmatprep.subr.mxu1 %v4760_v0  ;;  %5809 = vmatpush3.msra.mxu0 %v4704_v51  ;;  %v4714_v19 = vld [vmem:[%s10903_s5 + $0x388] sm:$0xff] }
 0x4e4   : > { %5810 = vmatprep.subr.mxu0 %v4719_v54  ;;  %v4698_v51 = vld [vmem:[%s10903_s5 + $0x308] sm:$0xff] }
 0x4e5   : > { %5811 = vmatpush3.msra.mxu0 %v4703_v10 }
 0x4e6   : > { %6330 = vrot.lane.b32.xlu1 %v9713_v7, %s6432_s7  ;;  %5812 = vmatprep.subr.mxu0 %v4718_v28  ;;  %v4700_v7 = vld [vmem:[%s10903_s5 + $0x318] sm:$0xff]  ;;  %v4697_v28 = vld [vmem:[%s10903_s5 + $0x300] sm:$0xff] }
 0x4e7   : > { %5813 = vmatpush3.msra.mxu0 %v4702_v40  ;;  %v10970_v40 = vmax.f32 %v9855_v18, 0.0  ;;  %v11039_v18 = vunpack.i.l.bf16 %v9449_v37 }
 0x4e8   : > { %5814 = vmatprep.subr.mxu0 %v4717_v61  ;;  %v3604_v61 = vpop.f32.mrf.mxu0 }
 0x4e9   : > { %5815 = vmatpush3.msra.mxu0 %v4701_v55 }
 0x4ea   : > { %5816 = vmatprep.subr.mxu0 %v4716_v20  ;;  %v4792_v20 = vld [vmem:[%s10903_s5 + $0x5f8] sm:$0xff] }
 0x4eb   : > { %5817 = vmatpush3.msra.mxu0 %v4700_v7  ;;  %v10974_v7 = vunpack.i.l.bf16 %v9658_v21 }
 0x4ec   : > { %v3673_v0 = vpop.f32.mrf.mxu1  ;;  %5818 = vmatprep.subr.mxu0 %v4715_v25 }
 0x4ed   : > { %v9864_v54 = vadd.f32 %v3673_v0, %v8911_v11  ;;  %5819 = vmatpush3.msra.mxu0 %v4699_v13  ;;  %v6138_v13 = vunpack.i.h.bf16 %v9534_v48  ;;  %v6143_v48 = vunpack.i.h.bf16 %v9567_v46 }
 0x4ee   : > { %v3675_v10 = vpop.f32.mrf.mxu1  ;;  %5820 = vmatprep.subr.mxu0 %v4714_v19 }
 0x4ef   : > { %v10971_v55 = vmax.f32 %v9864_v54, 0.0  ;;  %5821 = vmatpush3.msra.mxu0 %v4698_v51  ;;  %v3676_v19 = vadd.f32 %v3675_v10, %v8911_v11  ;;  %v10977_v51 = vunpack.i.l.bf16 %v9703_v50  ;;  %v3998_v10 = vsel %vm442_vm8, %v6138_v13, %v10974_v7 }
 0x4f0   : > { %v3679_v25 = vpop.f32.mrf.mxu1  ;;  %5822 = vmatprep.subr.mxu0 %v4713_v47  ;;  %v11034_v7 = vunpack.i.h.bf16 %v9658_v21 }
 0x4f1   : > { %v3756_v0 = vpop.f32.mrf.mxu0  ;;  %v6359_v44 = vpack.i.bf16 %v10970_v40, %v10971_v55  ;;  %5823 = vmatpush3.msra.mxu0 %v4697_v28  ;;  %v9886_v53 = vadd.f32 %v3679_v25, %v8999_v8  ;;  %v9897_v28 = vadd.f32 %v3604_v61, %v9053_v16  ;;  %v6148_v55 = vunpack.i.h.bf16 %v9620_v33 }
 0x4f2   : > { %5874 = vmatprep.subr.mxu0 %v4792_v20  ;;  %v9906_v5 = vmax.f32 %v3676_v19, 0.0  ;;  %v4246_v45 = vsel %vm828_vm2, %v6143_v48, %v10977_v51  ;;  %v3681_v23 = vpop.f32.mrf.mxu1 }
 0x4f3   : > { %11031 = vst [vmem:[#allocation10_spill] sm:$0xff] %v9886_v53  ;;  %v6024_v39 = vpop.f32.mrf.mxu0  ;;  %6360 = vrot.lane.b32.xlu0 %v6359_v44, %s6430_s29  ;;  %v9889_v47 = vpop.permute.xlu0 %6170  ;;  %6345 = vrot.lane.b32.xlu1 %v6359_v44, %s6432_s7  ;;  %11032 = vst [vmem:[#allocation11_spill] sm:$0xff] %v9897_v28  ;;  %v11040_v62 = vmax.f32 %v9886_v53, 0.0 }
 0x4f4   : > { %v6172_v25 = vunpack.i.l.bf16 %v9889_v47  ;;  %v9900_v40 = vpop.permute.xlu1 %6180  ;;  %v11033_v39 = vunpack.i.h.bf16 %v9489_v2  ;;  %v4093_v2 = vmax.f32 %v11035_v41, %v3998_v10 }
 0x4f5   : > { %v3761_v46 = vpop.f32.mrf.mxu0  ;;  %v6182_v51 = vunpack.i.l.bf16 %v9900_v40 }
 0x4f6   : > { %v3997_v20 = vsel %vm442_vm8, %v11033_v39, %v6138_v13  ;;  %v3970_v1 = vsel %vm442_vm8, %v11034_v7, %v6172_v25  ;;  %v11036_v13 = vunpack.i.h.bf16 %v9491_v6  ;;  %v9937_v39 = vadd.f32 %v3756_v0, %v8911_v11 }
 0x4f7   : > { %v6027_v15 = vpop.f32.mrf.mxu0  ;;  %3899 = vrot.lane.b32.xlu0 %v9906_v5, %s6432_s7  ;;  %v9919_v33 = vpop.permute.xlu0 %6185  ;;  %6365 = vrot.lane.b32.xlu1 %v9783_v36, %s6431_s30  ;;  %v4092_v41 = vmax.f32 %v11037_v35, %v3997_v20  ;;  %v11041_v20 = vmax.f32 %v9897_v28, 0.0 }
 0x4f8   : > { %v4245_v19 = vsel %vm828_vm2, %v11036_v13, %v6143_v48  ;;  %v6188_v61 = vunpack.i.h.bf16 %v9919_v33  ;;  %v11038_v15 = vmax.f32 %v9193_v3, 0.0  ;;  %v10980_v10 = vunpack.i.l.bf16 %v9919_v33  ;;  %v9934_v6 = vpop.permute.xlu1 %6205 }
 0x4f9   : > { %v3766_v48 = vpop.f32.mrf.mxu0  ;;  %v4342_v13 = vmax.f32 %v4093_v2, %v4246_v45  ;;  %v9946_v3 = vpack.i.bf16 %v11041_v20, %v11040_v62  ;;  %v11043_v45 = vmax.f32 %v9718_v59, %v9737_v49  ;;  %v4341_v0 = vmax.f32 %v4092_v41, %v4245_v19  ;;  %v3685_v41 = vpop.f32.mrf.mxu1 }
 0x4fa   : > { %v4063_v7 = vmax.f32 %v11038_v15, %v3970_v1  ;;  %v4461_v36 = vsel %vm1006_vm0, %v11039_v18, %v6188_v61  ;;  %v11042_v1 = vunpack.i.h.bf16 %v9531_v12  ;;  %v4492_v18 = vsel %vm1006_vm0, %v6148_v55, %v10980_v10  ;;  %v4755_v10 = vld [vmem:[%s10903_s5 + $0x4d0] sm:$0xff] }
 0x4fb   : > { %v4557_v11 = vmax.f32 %v11043_v45, %v4461_v36  ;;  %4139 = vrot.lane.b32.xlu0 %v9906_v5, %s6430_s29  ;;  %v9956_v37 = vpop.permute.xlu0 %6190  ;;  %v6030_v2 = vpop.f32.mrf.mxu0  ;;  %v6173_v15 = vunpack.i.h.bf16 %v9889_v47  ;;  %v11044_v12 = vunpack.i.h.bf16 %v9703_v50  ;;  %6370 = vrot.lane.b32.xlu1 %v9946_v3, %s6432_s7  ;;  %v4588_v49 = vmax.f32 %v4342_v13, %v4492_v18 }
 0x4fc   : > { %v4491_v35 = vsel %vm1006_vm0, %v11042_v1, %v6148_v55  ;;  %v10981_v59 = vunpack.i.l.bf16 %v9956_v37  ;;  %v3786_v55 = vmax.f32 %v9937_v39, 0.0  ;;  %v4744_v39 = vld [vmem:[%s10903_s5 + $0x478] sm:$0xff]  ;;  %v3686_v18 = vadd.f32 %v3685_v41, %v9053_v16 }
 0x4fd   : > { %v4216_v62 = vsel %vm828_vm2, %v11044_v12, %v6182_v51  ;;  %v9968_v36 = vpop.permute.xlu1 %6215  ;;  %v4587_v20 = vmax.f32 %v4341_v0, %v4491_v35  ;;  %5024 = vmatprep.mubr.f32.mxu0 %v4588_v49  ;;  %v3971_v13 = vsel %vm442_vm8, %v6172_v25, %v6173_v15  ;;  %v6183_v35 = vunpack.i.h.bf16 %v9900_v40  ;;  %v4743_v0 = vld [vmem:[%s10903_s5 + $0x470] sm:$0xff] }
 0x4fe   : > { %v4312_v1 = vmax.f32 %v4063_v7, %v4216_v62  ;;  %v4462_v19 = vsel %vm1006_vm0, %v6188_v61, %v10981_v59  ;;  %v3682_v7 = vadd.f32 %v3681_v23, %v8999_v8  ;;  %v9993_v25 = vadd.f32 %v3761_v46, %v8999_v8  ;;  %v3687_v62 = vpop.f32.mrf.mxu1  ;;  %v4758_v8 = vld [vmem:[%s10903_s5 + $0x4e8] sm:$0xff] }
 0x4ff   : > { %5025 = vmatmul.mubr.f32.gmra.mxu0 %v4587_v20  ;;  %6375 = vrot.lane.b32.xlu0 %v6359_v44, %s6431_s30  ;;  %v9975_v45 = vpop.permute.xlu0 %6195  ;;  %v4759_v44 = vld [vmem:[%s10903_s5 + $0x4f0] sm:$0xff]  ;;  %v11045_v23 = vmax.f32 %v9282_v9, 0.0  ;;  %v4742_v9 = vld [vmem:[%s10903_s5 + $0x468] sm:$0xff]  ;;  %v10022_v20 = vsel %vm828_vm2, %v6182_v51, %v6183_v35  ;;  %v3688_v41 = vadd.f32 %v3687_v62, %v9053_v16  ;;  %v6218_v51 = vunpack.i.h.bf16 %v9968_v36 }
 0x500   : > { %v4558_v2 = vmax.f32 %v4312_v1, %v4462_v19  ;;  %4141 = vrot.lane.b32.xlu1 %v3786_v55, %s6430_s29  ;;  %v10014_v40 = vmax.f32 %v3682_v7, 0.0  ;;  %v10024_v1 = vmax.f32 %v3686_v18, 0.0  ;;  %v4756_v18 = vld [vmem:[%s10903_s5 + $0x4d8] sm:$0xff]  ;;  %v6193_v62 = vunpack.i.h.bf16 %v9956_v37 }
 0x501   : > { %v9985_v61 = vpop.permute.xlu1 %6220  ;;  %v10000_v12 = vmax.f32 %v11045_v23, %v3971_v13  ;;  %v11046_v19 = vunpack.i.h.bf16 %v9565_v30  ;;  %v10985_v7 = vunpack.i.l.bf16 %v9934_v6  ;;  %v11048_v47 = vmax.f32 %v9147_v17, 0.0 }
 0x502   : > { %5094 = vmatprep.mubr.f32.mxu1 %v4558_v2  ;;  %v4741_v2 = vld [vmem:[%s10903_s5 + $0x460] sm:$0xff]  ;;  %v11051_v17 = vunpack.i.h.bf16 %v9660_v27 }
 0x503   : > { %5095 = vmatmul.mubr.f32.vlgmr.msra.gmra.mxu1 %v4557_v11  ;;  %4385 = vrot.lane.b32.xlu0 %v9906_v5, %s6431_s30  ;;  %v10004_v49 = vpop.permute.xlu0 %6200  ;;  %v4757_v11 = vld [vmem:[%s10903_s5 + $0x4e0] sm:$0xff]  ;;  %v4313_v13 = vmax.f32 %v10000_v12, %v10022_v20  ;;  %v4740_v12 = vld [vmem:[%s10903_s5 + $0x458] sm:$0xff] }
 0x504   : > { %5834 = vmatpush3.msra.mxu1 %v4744_v39  ;;  %6380 = vrot.lane.b32.xlu1 %v9946_v3, %s6430_s29  ;;  %v10034_v39 = vadd.f32 %v3766_v48, %v9053_v16  ;;  %v6202_v23 = vunpack.i.l.bf16 %v10004_v49 }
 0x505   : > { %5835 = vmatprep.subr.mxu1 %v4759_v44  ;;  %v10016_v46 = vpop.permute.xlu1 %6225 }
 0x506   : > { %5836 = vmatpush3.msra.mxu1 %v4743_v0  ;;  %v6197_v0 = vunpack.i.l.bf16 %v9975_v45 }
 0x507   : > { %5837 = vmatprep.subr.mxu1 %v4758_v8  ;;  %3931 = vrot.lane.b32.xlu0 %v10014_v40, %s6432_s7  ;;  %v10040_v44 = vpop.permute.xlu0 %6210 }
 0x508   : > { %5838 = vmatpush3.msra.mxu1 %v4742_v9  ;;  %v6213_v16 = vunpack.i.h.bf16 %v10040_v44  ;;  %v10984_v48 = vunpack.i.l.bf16 %v10040_v44  ;;  %4387 = vrot.lane.b32.xlu1 %v3786_v55, %s6431_s30  ;;  %v6223_v9 = vunpack.i.h.bf16 %v9985_v61  ;;  %v11047_v55 = vmax.f32 %v9285_v24, 0.0 }
 0x509   : > { %5839 = vmatprep.subr.mxu1 %v4757_v11  ;;  %v10056_v20 = vpop.permute.xlu1 %6230 }
 0x50a   : > { %5840 = vmatpush3.msra.mxu1 %v4741_v2  ;;  %v3972_v11 = vsel %vm442_vm8, %v6173_v15, %v10984_v48  ;;  %v3984_v8 = vsel %vm442_vm8, %v11046_v19, %v6213_v16  ;;  %v3985_v59 = vsel %vm442_vm8, %v6213_v16, %v6197_v0  ;;  %v4739_v2 = vld [vmem:[%s10903_s5 + $0x450] sm:$0xff]  ;;  %v11049_v15 = vmax.f32 %v9305_v4, 0.0 }
 0x50b   : > { %5841 = vmatprep.subr.mxu1 %v4756_v18  ;;  %v4065_v28 = vmax.f32 %v11047_v55, %v3972_v11  ;;  %v4078_v53 = vmax.f32 %v11048_v47, %v3984_v8  ;;  %4173 = vrot.lane.b32.xlu0 %v10014_v40, %s6430_s29  ;;  %v10083_v19 = vpop.permute.xlu0 %6245  ;;  %v4754_v18 = vld [vmem:[%s10903_s5 + $0x4c8] sm:$0xff]  ;;  %v11050_v16 = vunpack.i.l.bf16 %v9968_v36  ;;  %v4231_v8 = vsel %vm828_vm2, %v11051_v17, %v6218_v51 }
 0x50c   : > { %v4079_v30 = vmax.f32 %v11049_v15, %v3985_v59  ;;  %5842 = vmatpush3.msra.mxu1 %v4740_v12  ;;  %v6203_v4 = vunpack.i.h.bf16 %v10004_v49  ;;  %v4232_v59 = vsel %vm828_vm2, %v6218_v51, %v6202_v23  ;;  %3961 = vrot.lane.b32.xlu1 %v10024_v1, %s6432_s7  ;;  %v4738_v12 = vld [vmem:[%s10903_s5 + $0x448] sm:$0xff]  ;;  %v11052_v55 = vunpack.i.l.bf16 %v9956_v37  ;;  %v4753_v51 = vld [vmem:[%s10903_s5 + $0x4c0] sm:$0xff] }
 0x50d   : > { %v4218_v24 = vsel %vm828_vm2, %v6183_v35, %v11050_v16  ;;  %5843 = vmatprep.subr.mxu1 %v4755_v10  ;;  %v10104_v11 = vpop.permute.xlu1 %6235  ;;  %v4327_v15 = vmax.f32 %v4078_v53, %v4231_v8  ;;  %v11053_v10 = vunpack.i.h.bf16 %v9975_v45  ;;  %v4478_v37 = vsel %vm1006_vm0, %v6223_v9, %v10985_v7 }
 0x50e   : > { %v4463_v35 = vsel %vm1006_vm0, %v11052_v55, %v6193_v62  ;;  %v4328_v27 = vmax.f32 %v4079_v30, %v4232_v59  ;;  %v4314_v47 = vmax.f32 %v4065_v28, %v4218_v24  ;;  %5844 = vmatpush3.msra.mxu1 %v4739_v2  ;;  %v11054_v17 = vunpack.i.l.bf16 %v9985_v61 }
 0x50f   : > { %v3986_v16 = vsel %vm442_vm8, %v6197_v0, %v11053_v10  ;;  %v11055_v28 = vunpack.i.h.bf16 %v9618_v34  ;;  %5845 = vmatprep.subr.mxu1 %v4754_v18  ;;  %6385 = vrot.lane.b32.xlu0 %v9946_v3, %s6431_s30  ;;  %v10123_v2 = vpop.permute.xlu0 %6250  ;;  %v10125_v8 = vmax.f32 %v3688_v41, 0.0  ;;  %v6208_v59 = vunpack.i.h.bf16 %v9934_v6  ;;  %v4776_v3 = vld [vmem:[%s10903_s5 + $0x578] sm:$0xff] }
 0x510   : > { %v4464_v55 = vsel %vm1006_vm0, %v6193_v62, %v11054_v17  ;;  %v4574_v30 = vmax.f32 %v4328_v27, %v4478_v37  ;;  %5846 = vmatpush3.msra.mxu1 %v4738_v12  ;;  %v4559_v10 = vmax.f32 %v4313_v13, %v4463_v35  ;;  %v10131_v34 = vsel %vm828_vm2, %v6202_v23, %v6203_v4  ;;  %v4791_v35 = vld [vmem:[%s10903_s5 + $0x5f0] sm:$0xff] }
 0x511   : > { %v4477_v53 = vsel %vm1006_vm0, %v11055_v28, %v6223_v9  ;;  %v4560_v0 = vmax.f32 %v4314_v47, %v4464_v55  ;;  %v11056_v62 = vmax.f32 %v9993_v25, 0.0  ;;  %5847 = vmatprep.subr.mxu1 %v4753_v51  ;;  %v11057_v9 = vmax.f32 %v9290_v56, 0.0  ;;  %v10146_v12 = vpop.permute.xlu1 %6240  ;;  %v4737_v51 = vld [vmem:[%s10903_s5 + $0x440] sm:$0xff] }
 0x512   : > { %v4573_v24 = vmax.f32 %v4327_v15, %v4477_v53  ;;  %v6228_v13 = vunpack.i.h.bf16 %v10016_v46  ;;  %v6227_v23 = vunpack.i.l.bf16 %v10016_v46  ;;  %5099 = vmatprep.mubr.f32.mxu1 %v4574_v30  ;;  %v6248_v27 = vunpack.i.h.bf16 %v10083_v19  ;;  %v4775_v46 = vld [vmem:[%s10903_s5 + $0x570] sm:$0xff]  ;;  %v4790_v53 = vld [vmem:[%s10903_s5 + $0x5e8] sm:$0xff]  ;;  %v4752_v30 = vld [vmem:[%s10903_s5 + $0x4b8] sm:$0xff]  ;;  %5848 = vmatpush3.msra.mxu1 %v4737_v51 }
 0x513   : > { %4175 = vrot.lane.b32.xlu1 %v11056_v62, %s6430_s29  ;;  %v10142_v18 = vmax.f32 %v11057_v9, %v3986_v16  ;;  %5174 = vmatprep.mubr.f32.mxu0 %v4560_v0  ;;  %v6247_v47 = vunpack.i.l.bf16 %v10083_v19  ;;  %v6243_v56 = vunpack.i.h.bf16 %v10146_v12  ;;  %v6242_v15 = vunpack.i.l.bf16 %v10146_v12  ;;  %v10166_v55 = vpop.permute.xlu0 %6255 }
 0x514   : > { %5100 = vmatmul.mubr.f32.gmra.mxu1 %v4573_v24  ;;  %5175 = vmatmul.mubr.f32.vlgmr.msra.gmra.mxu0 %v4559_v10  ;;  %v6232_v16 = vunpack.i.l.bf16 %v10056_v20  ;;  %v6237_v37 = vunpack.i.l.bf16 %v10104_v11  ;;  %v6253_v17 = vunpack.i.h.bf16 %v10123_v2  ;;  %v6252_v0 = vunpack.i.l.bf16 %v10123_v2  ;;  %v4818_v2 = vld [vmem:[%s10903_s5 + $0x6c8] sm:$0xff] }
 0x515   : > { %4419 = vrot.lane.b32.xlu0 %v10014_v40, %s6431_s30  ;;  %v4329_v28 = vmax.f32 %v10142_v18, %v10131_v34  ;;  %5875 = vmatpush3.msra.mxu0 %v4776_v3  ;;  %v11058_v24 = vunpack.i.l.bf16 %v9658_v21  ;;  %v11059_v62 = vunpack.i.h.bf16 %v9975_v45  ;;  %v4000_v3 = vsel %vm442_vm8, %v6243_v56, %v6227_v23  ;;  %v4774_v45 = vld [vmem:[%s10903_s5 + $0x568] sm:$0xff] }
 0x516   : > { %5876 = vmatprep.subr.mxu0 %v4791_v35  ;;  %v11060_v9 = vmax.f32 %v9199_v63, 0.0  ;;  %v11061_v48 = vmax.f32 %v9293_v42, 0.0  ;;  %v6257_v7 = vunpack.i.l.bf16 %v10166_v55  ;;  %v6233_v35 = vunpack.i.h.bf16 %v10056_v20  ;;  %5849 = vmatprep.subr.mxu1 %v4752_v30 }
 0x517   : > { %v3999_v10 = vsel %vm442_vm8, %v11058_v24, %v6243_v56  ;;  %v3987_v34 = vsel %vm442_vm8, %v11059_v62, %v6242_v15  ;;  %4205 = vrot.lane.b32.xlu1 %v10024_v1, %s6430_s29  ;;  %v11062_v24 = vmax.f32 %v9340_v38, 0.0  ;;  %5877 = vmatpush3.msra.mxu0 %v4775_v46  ;;  %v4001_v56 = vsel %vm442_vm8, %v6227_v23, %v6228_v13  ;;  %v4789_v38 = vld [vmem:[%s10903_s5 + $0x5e0] sm:$0xff]  ;;  %v10217_v49 = vpop.permute.xlu0 %6265 }
 0x518   : > { %v4094_v18 = vmax.f32 %v11060_v9, %v3999_v10  ;;  %v4081_v21 = vmax.f32 %v11061_v48, %v3987_v34  ;;  %v4234_v63 = vsel %vm828_vm2, %v6203_v4, %v6247_v47  ;;  %v4248_v42 = vsel %vm828_vm2, %v6248_v27, %v6232_v16  ;;  %5878 = vmatprep.subr.mxu0 %v4790_v53  ;;  %v4736_v48 = vld [vmem:[%s10903_s5 + $0x438] sm:$0xff]  ;;  %v4773_v53 = vld [vmem:[%s10903_s5 + $0x560] sm:$0xff] }
 0x519   : > { %v4095_v41 = vmax.f32 %v11062_v24, %v4000_v3  ;;  %v11063_v20 = vunpack.i.l.bf16 %v9703_v50  ;;  %3963 = vrot.lane.b32.xlu0 %v10125_v8, %s6432_s7  ;;  %v4494_v46 = vsel %vm1006_vm0, %v6253_v17, %v6237_v37  ;;  %v4751_v50 = vld [vmem:[%s10903_s5 + $0x4b0] sm:$0xff]  ;;  %v6267_v30 = vunpack.i.l.bf16 %v10217_v49  ;;  %5879 = vmatpush3.msra.mxu0 %v4774_v45 }
 0x51a   : > { %v4330_v51 = vmax.f32 %v4081_v21, %v4234_v63  ;;  %v4480_v10 = vsel %vm1006_vm0, %v6208_v59, %v6252_v0  ;;  %v6238_v34 = vunpack.i.h.bf16 %v10104_v11  ;;  %5880 = vmatprep.subr.mxu0 %v4789_v38  ;;  %5850 = vmatpush3.msra.mxu1 %v4736_v48  ;;  %v4249_v63 = vsel %vm828_vm2, %v6232_v16, %v6233_v35 }
 0x51b   : > { %v4247_v23 = vsel %vm828_vm2, %v11063_v20, %v6248_v27  ;;  %v4344_v4 = vmax.f32 %v4095_v41, %v4248_v42  ;;  %v4002_v27 = vsel %vm442_vm8, %v6228_v13, %v6257_v7  ;;  %v11064_v41 = vmax.f32 %v9993_v25, 0.0  ;;  %5881 = vmatpush3.msra.mxu0 %v4773_v53  ;;  %5851 = vmatprep.subr.mxu1 %v4751_v50  ;;  %v10258_v38 = vpop.permute.xlu0 %6275  ;;  %v4771_v53 = vld [vmem:[%s10903_s5 + $0x550] sm:$0xff]  ;;  %v4749_v50 = vld [vmem:[%s10903_s5 + $0x4a0] sm:$0xff] }
 0x51c   : > { %v4343_v62 = vmax.f32 %v4094_v18, %v4247_v23  ;;  %v4576_v9 = vmax.f32 %v4330_v51, %v4480_v10  ;;  %v11065_v13 = vunpack.i.l.bf16 %v9919_v33  ;;  %v4250_v25 = vsel %vm828_vm2, %v6233_v35, %v6267_v30  ;;  %v4770_v10 = vld [vmem:[%s10903_s5 + $0x548] sm:$0xff] }
 0x51d   : > { %4421 = vrot.lane.b32.xlu1 %v11064_v41, %s6431_s30  ;;  %v4590_v3 = vmax.f32 %v4344_v4, %v4494_v46  ;;  %v11066_v18 = vunpack.i.l.bf16 %v9934_v6  ;;  %v11067_v33 = vmax.f32 %v9319_v58, 0.0  ;;  %v11068_v42 = vmax.f32 %v10034_v39, 0.0  ;;  %v4788_v6 = vld [vmem:[%s10903_s5 + $0x5d8] sm:$0xff]  ;;  %v4787_v46 = vld [vmem:[%s10903_s5 + $0x5d0] sm:$0xff]  ;;  %v4733_v41 = vld [vmem:[%s10903_s5 + $0x420] sm:$0xff] }
 0x51e   : > { %v4493_v21 = vsel %vm1006_vm0, %v11065_v13, %v6253_v17  ;;  %v11069_v16 = vmax.f32 %v9327_v26, 0.0  ;;  %v6277_v35 = vunpack.i.l.bf16 %v10258_v38  ;;  %5179 = vmatprep.mubr.f32.mxu0 %v4576_v9  ;;  %v4495_v23 = vsel %vm1006_vm0, %v6237_v37, %v6238_v34  ;;  %v4750_v26 = vld [vmem:[%s10903_s5 + $0x4a8] sm:$0xff]  ;;  %5882 = vmatprep.subr.mxu0 %v4788_v6  ;;  %v4732_v9 = vld [vmem:[%s10903_s5 + $0x418] sm:$0xff]  ;;  %v4769_v13 = vld [vmem:[%s10903_s5 + $0x540] sm:$0xff] }
 0x51f   : > { %v4589_v24 = vmax.f32 %v4343_v62, %v4493_v21  ;;  %v4479_v45 = vsel %vm1006_vm0, %v11066_v18, %v6208_v59  ;;  %v4097_v17 = vmax.f32 %v11067_v33, %v4002_v27  ;;  %4209 = vrot.lane.b32.xlu0 %v11068_v42, %s6430_s29  ;;  %5104 = vmatprep.mubr.f32.mxu1 %v4590_v3  ;;  %v4735_v59 = vld [vmem:[%s10903_s5 + $0x430] sm:$0xff]  ;;  %v4734_v37 = vld [vmem:[%s10903_s5 + $0x428] sm:$0xff]  ;;  %v4748_v62 = vld [vmem:[%s10903_s5 + $0x498] sm:$0xff]  ;;  %v11082_v12 = vmax.f32 %v9602_v14, 0.0 }
 0x520   : > { %v4575_v48 = vmax.f32 %v4329_v28, %v4479_v45  ;;  %v4096_v58 = vmax.f32 %v11069_v16, %v4001_v56  ;;  %v4772_v28 = vld [vmem:[%s10903_s5 + $0x558] sm:$0xff]  ;;  %v4496_v56 = vsel %vm1006_vm0, %v6238_v34, %v6277_v35  ;;  %5852 = vmatpush3.msra.mxu1 %v4735_v59  ;;  %v4786_v27 = vld [vmem:[%s10903_s5 + $0x5c8] sm:$0xff]  ;;  %v4785_v34 = vld [vmem:[%s10903_s5 + $0x5c0] sm:$0xff]  ;;  %v11070_v3 = vmov %v11068_v42 }
 0x521   : > { %4207 = vrot.lane.b32.xlu1 %v10125_v8, %s6430_s29  ;;  %5105 = vmatmul.mubr.f32.gmra.mxu1 %v4589_v24  ;;  %v4346_v20 = vmax.f32 %v4097_v17, %v4250_v25  ;;  %v4747_v21 = vld [vmem:[%s10903_s5 + $0x490] sm:$0xff]  ;;  %v4784_v39 = vld [vmem:[%s10903_s5 + $0x5b8] sm:$0xff]  ;;  %v4746_v18 = vld [vmem:[%s10903_s5 + $0x488] sm:$0xff]  ;;  %s10885_s29 = scalar_lea.vmem %s10904_s6, %s6032_s12 }
 0x522   : > { %5180 = vmatmul.mubr.f32.gmra.mxu0 %v4575_v48  ;;  %v4345_v4 = vmax.f32 %v4096_v58, %v4249_v63  ;;  %5853 = vmatprep.subr.mxu1 %v4750_v26  ;;  %v4731_v25 = vld [vmem:[%s10903_s5 + $0x410] sm:$0xff]  ;;  %v4768_v24 = vld [vmem:[%s10903_s5 + $0x538] sm:$0xff]  ;;  %v4730_v63 = vld [vmem:[%s10903_s5 + $0x408] sm:$0xff] }
 0x523   : > { %4453 = vrot.lane.b32.xlu0 %v10125_v8, %s6431_s30  ;;  %v4592_v11 = vmax.f32 %v4346_v20, %v4496_v56  ;;  %5883 = vmatpush3.msra.mxu0 %v4772_v28  ;;  %v4783_v45 = vld [vmem:[%s10903_s5 + $0x5b0] sm:$0xff]  ;;  %v4745_v17 = vld [vmem:[%s10903_s5 + $0x480] sm:$0xff]  ;;  %v4782_v42 = vld [vmem:[%s10903_s5 + $0x5a8] sm:$0xff] }
 0x524   : > { %v4591_v51 = vmax.f32 %v4345_v4, %v4495_v23  ;;  %5884 = vmatprep.subr.mxu0 %v4787_v46  ;;  %5854 = vmatpush3.msra.mxu1 %v4734_v37  ;;  %v4767_v33 = vld [vmem:[%s10903_s5 + $0x530] sm:$0xff]  ;;  %v4729_v48 = vld [vmem:[%s10903_s5 + $0x400] sm:$0xff]  ;;  %v4766_v6 = vld [vmem:[%s10903_s5 + $0x528] sm:$0xff] }
 0x525   : > { %4451 = vrot.lane.b32.xlu1 %v10024_v1, %s6431_s30  ;;  %5184 = vmatprep.mubr.f32.mxu0 %v4592_v11  ;;  %v4781_v59 = vld [vmem:[%s10903_s5 + $0x5a0] sm:$0xff]  ;;  %v4824_v16 = vld [vmem:[%s10903_s5 + $0x6f8] sm:$0xff]  ;;  %v4779_v23 = vld [vmem:[%s10903_s5 + $0x590] sm:$0xff] }
 0x526   : > { %5185 = vmatmul.mubr.f32.gmra.mxu0 %v4591_v51  ;;  %5855 = vmatprep.subr.mxu1 %v4749_v50  ;;  %v4765_v58 = vld [vmem:[%s10903_s5 + $0x520] sm:$0xff]  ;;  %v4780_v28 = vld [vmem:[%s10903_s5 + $0x598] sm:$0xff]  ;;  %v4763_v26 = vld [vmem:[%s10903_s5 + $0x510] sm:$0xff]  ;;  %v6258_v51 = vunpack.i.h.bf16 %v10166_v55 }
 0x527   : > { %5885 = vmatpush3.msra.mxu0 %v4771_v53  ;;  %5856 = vmatpush3.msra.mxu1 %v4733_v41  ;;  %v4764_v20 = vld [vmem:[%s10903_s5 + $0x518] sm:$0xff]  ;;  %v4778_v56 = vld [vmem:[%s10903_s5 + $0x588] sm:$0xff]  ;;  %v4777_v37 = vld [vmem:[%s10903_s5 + $0x580] sm:$0xff]  ;;  %v6268_v41 = vunpack.i.h.bf16 %v10217_v49 }
 0x528   : > { %5886 = vmatprep.subr.mxu0 %v4786_v27  ;;  %5857 = vmatprep.subr.mxu1 %v4748_v62  ;;  %v4762_v4 = vld [vmem:[%s10903_s5 + $0x508] sm:$0xff]  ;;  %v4761_v50 = vld [vmem:[%s10903_s5 + $0x500] sm:$0xff]  ;;  %v4856_v27 = vld [vmem:[%s10903_s5 + $0x7f8] sm:$0x1]  ;;  %v11071_v62 = vunpack.i.l.bf16 %v10040_v44  ;;  %v11074_v44 = vmax.f32 %v9312_v31, 0.0 }
 0x529   : > { %4455 = vrot.lane.b32.xlu1 %v11070_v3, %s6431_s30  ;;  %5887 = vmatpush3.msra.mxu0 %v4770_v10  ;;  %v6278_v3 = vunpack.i.h.bf16 %v10258_v38  ;;  %v4796_v55 = vld [vmem:[%s10903_s5 + $0x618] sm:$0xff]  ;;  %v4847_v49 = vld [vmem:[%s10903_s5 + $0x7b0] sm:$0xff]  ;;  %v4794_v38 = vld [vmem:[%s10903_s5 + $0x608] sm:$0xff] }
 0x52a   : > { %5888 = vmatprep.subr.mxu0 %v4785_v34  ;;  %5858 = vmatpush3.msra.mxu1 %v4732_v9  ;;  %v3973_v34 = vsel %vm442_vm8, %v11071_v62, %v6258_v51 }
 0x52b   : > { %5889 = vmatpush3.msra.mxu0 %v4769_v13  ;;  %5859 = vmatprep.subr.mxu1 %v4747_v21 }
 0x52c   : > { %5890 = vmatprep.subr.mxu0 %v4784_v39  ;;  %5860 = vmatpush3.msra.mxu1 %v4731_v25  ;;  %v11072_v25 = vunpack.i.l.bf16 %v9968_v36 }
 0x52d   : > { %5891 = vmatpush3.msra.mxu0 %v4768_v24  ;;  %5861 = vmatprep.subr.mxu1 %v4746_v18  ;;  %v11073_v18 = vmax.f32 %v9360_v43, 0.0 }
 0x52e   : > { %5892 = vmatprep.subr.mxu0 %v4783_v45  ;;  %5862 = vmatpush3.msra.mxu1 %v4730_v63  ;;  %v4219_v24 = vsel %vm828_vm2, %v11072_v25, %v6268_v41  ;;  %v4066_v63 = vmax.f32 %v11074_v44, %v3973_v34  ;;  %v4805_v44 = vld [vmem:[%s10903_s5 + $0x660] sm:$0xff] }
 0x52f   : > { %5893 = vmatpush3.msra.mxu0 %v4767_v33  ;;  %5863 = vmatprep.subr.mxu1 %v4745_v17  ;;  %v11075_v17 = vunpack.i.l.bf16 %v9985_v61  ;;  %v4808_v61 = vld [vmem:[%s10903_s5 + $0x678] sm:$0xff] }
 0x530   : > { %5894 = vmatprep.subr.mxu0 %v4782_v42  ;;  %5864 = vmatpush3.msra.mxu1 %v4729_v48 }
 0x531   : > { %5895 = vmatpush3.msra.mxu0 %v4766_v6  ;;  %5915 = vmatprep.subr.mxu1 %v4824_v16  ;;  %v4465_v42 = vsel %vm1006_vm0, %v11075_v17, %v6278_v3  ;;  %v4315_v6 = vmax.f32 %v4066_v63, %v4219_v24 }
 0x532   : > { %5896 = vmatprep.subr.mxu0 %v4781_v59 }
 0x533   : > { %5897 = vmatpush3.msra.mxu0 %v4765_v58  ;;  %v10386_v46 = vpop.permute.xlu0 %6280  ;;  %v6261_v11 = vpop.permute.xlu1 %6260  ;;  %v4561_v58 = vmax.f32 %v4315_v6, %v4465_v42 }
 0x534   : > { %5898 = vmatprep.subr.mxu0 %v4780_v28  ;;  %v6262_v53 = vunpack.i.l.bf16 %v6261_v11  ;;  %v6282_v21 = vunpack.i.l.bf16 %v10386_v46  ;;  %v6263_v59 = vunpack.i.h.bf16 %v6261_v11 }
 0x535   : > { %5899 = vmatpush3.msra.mxu0 %v4764_v20  ;;  %v4823_v20 = vld [vmem:[%s10903_s5 + $0x6f0] sm:$0xff] }
 0x536   : > { %5900 = vmatprep.subr.mxu0 %v4779_v23  ;;  %v3974_v10 = vsel %vm442_vm8, %v6258_v51, %v6262_v53  ;;  %v4466_v36 = vsel %vm1006_vm0, %v6278_v3, %v6282_v21  ;;  %v3975_v23 = vsel %vm442_vm8, %v6262_v53, %v6263_v59 }
 0x537   : > { %5901 = vmatpush3.msra.mxu0 %v4763_v26  ;;  %v6271_v13 = vpop.permute.xlu1 %6270  ;;  %v4067_v45 = vmax.f32 %v11073_v18, %v3974_v10  ;;  %v4807_v26 = vld [vmem:[%s10903_s5 + $0x670] sm:$0xff]  ;;  %v11076_v10 = vld [vmem:[#allocation3_spill] sm:$0xff] }
 0x538   : > { %5902 = vmatprep.subr.mxu0 %v4778_v56  ;;  %v10404_v9 = vpop.permute.xlu0 %6285  ;;  %v6272_v39 = vunpack.i.l.bf16 %v6271_v13  ;;  %v6273_v28 = vunpack.i.h.bf16 %v6271_v13  ;;  %v11077_v62 = vmax.f32 %v11076_v10, 0.0 }
 0x539   : > { %5903 = vmatpush3.msra.mxu0 %v4762_v4  ;;  %v4822_v4 = vld [vmem:[%s10903_s5 + $0x6e8] sm:$0xff]  ;;  %v6287_v11 = vunpack.i.l.bf16 %v10404_v9 }
 0x53a   : > { %5904 = vmatprep.subr.mxu0 %v4777_v37  ;;  %v4220_v33 = vsel %vm828_vm2, %v6268_v41, %v6272_v39  ;;  %v4221_v37 = vsel %vm828_vm2, %v6272_v39, %v6273_v28  ;;  %v6283_v41 = vunpack.i.h.bf16 %v10386_v46  ;;  %v4068_v34 = vmax.f32 %v11077_v62, %v3975_v23  ;;  %v4821_v39 = vld [vmem:[%s10903_s5 + $0x6e0] sm:$0xff]  ;;  %v4804_v23 = vld [vmem:[%s10903_s5 + $0x658] sm:$0xff]  ;;  %v4802_v46 = vld [vmem:[%s10903_s5 + $0x648] sm:$0xff] }
 0x53b   : > { %5905 = vmatpush3.msra.mxu0 %v4761_v50  ;;  %v4316_v48 = vmax.f32 %v4067_v45, %v4220_v33  ;;  %v11078_v33 = vld [vmem:[#allocation5_spill] sm:$0xff] }
 0x53c   : > { %5956 = vmatprep.subr.msk.mxu0 %vm1066_vm10, %v4856_v27  ;;  %v4806_v27 = vld [vmem:[%s10903_s5 + $0x668] sm:$0xff]  ;;  %v4317_v63 = vmax.f32 %v4068_v34, %v4221_v37  ;;  %v11079_v17 = vmax.f32 %v11078_v33, 0.0  ;;  %v4819_v37 = vld [vmem:[%s10903_s5 + $0x6d0] sm:$0xff]  ;;  %v4467_v34 = vsel %vm1006_vm0, %v6282_v21, %v6283_v41 }
 0x53d   : > { %v4562_v43 = vmax.f32 %v4316_v48, %v4466_v36  ;;  %v11080_v48 = vld [vmem:[#allocation2_spill] sm:$0xff]  ;;  %v4839_v21 = vld [vmem:[%s10903_s5 + $0x770] sm:$0xff] }
 0x53e   : > { %v11081_v6 = vmax.f32 %v11080_v48, 0.0  ;;  %v4838_v48 = vld [vmem:[%s10903_s5 + $0x768] sm:$0xff] }
 0x53f   : > { %v10422_v16 = vpop.permute.xlu0 %6290  ;;  %v10424_v31 = vpop.permute.xlu1 %6295  ;;  %5254 = vmatprep.mubr.f32.mxu1 %v4562_v43 }
 0x540   : > { %5255 = vmatmul.mubr.f32.vlgmr.msra.gmra.mxu1 %v4561_v58  ;;  %v6292_v25 = vunpack.i.l.bf16 %v10422_v16  ;;  %v6297_v43 = vunpack.i.l.bf16 %v10424_v31 }
 0x541   : > { %5916 = vmatpush3.msra.mxu1 %v4808_v61 }
 0x542   : > { %5917 = vmatprep.subr.mxu1 %v4823_v20 }
 0x543   : > { %v10436_v56 = vpop.permute.xlu0 %6300  ;;  %v10445_v50 = vpop.permute.xlu1 %6305  ;;  %5918 = vmatpush3.msra.mxu1 %v4807_v26 }
 0x544   : > { %v6303_v51 = vunpack.i.h.bf16 %v10436_v56  ;;  %v6302_v53 = vunpack.i.l.bf16 %v10436_v56  ;;  %v6308_v3 = vunpack.i.h.bf16 %v10445_v50  ;;  %v6307_v13 = vunpack.i.l.bf16 %v10445_v50  ;;  %5919 = vmatprep.subr.mxu1 %v4822_v4 }
 0x545   : > { %5920 = vmatpush3.msra.mxu1 %v4806_v27 }
 0x546   : > { %v3976_v24 = vsel %vm442_vm8, %v6263_v59, %v6302_v53  ;;  %v3988_v18 = vsel %vm442_vm8, %v6242_v15, %v6303_v51  ;;  %v3989_v45 = vsel %vm442_vm8, %v6303_v51, %v6287_v11  ;;  %v4820_v15 = vld [vmem:[%s10903_s5 + $0x6d8] sm:$0xff]  ;;  %v4235_v58 = vsel %vm828_vm2, %v6247_v47, %v6308_v3  ;;  %5921 = vmatprep.subr.mxu1 %v4821_v39 }
 0x547   : > { %v4069_v42 = vmax.f32 %v11079_v17, %v3976_v24  ;;  %v4082_v59 = vmax.f32 %v11081_v6, %v3988_v18  ;;  %v4083_v36 = vmax.f32 %v11082_v12, %v3989_v45  ;;  %v4236_v61 = vsel %vm828_vm2, %v6308_v3, %v6292_v25  ;;  %v10490_v20 = vpop.permute.xlu1 %6310  ;;  %5922 = vmatpush3.msra.mxu1 %v4805_v44  ;;  %v4840_v44 = vld [vmem:[%s10903_s5 + $0x778] sm:$0xff]  ;;  %v4854_v17 = vld [vmem:[%s10903_s5 + $0x7e8] sm:$0xff]  ;;  %v4801_v6 = vld [vmem:[%s10903_s5 + $0x640] sm:$0xff] }
 0x548   : > { %v4222_v14 = vsel %vm828_vm2, %v6273_v28, %v6307_v13  ;;  %v6313_v26 = vunpack.i.h.bf16 %v10490_v20  ;;  %v6312_v19 = vunpack.i.l.bf16 %v10490_v20  ;;  %5923 = vmatprep.subr.mxu1 %v4820_v15  ;;  %v4803_v28 = vld [vmem:[%s10903_s5 + $0x650] sm:$0xff]  ;;  %v4563_v18 = vmax.f32 %v4317_v63, %v4467_v34  ;;  %v10535_v63 = vpop.permute.xlu0 %6335  ;;  %v4816_v12 = vld [vmem:[%s10903_s5 + $0x6b8] sm:$0xff]  ;;  %v4837_v15 = vld [vmem:[%s10903_s5 + $0x760] sm:$0xff] }
 0x549   : > { %v4332_v47 = vmax.f32 %v4083_v36, %v4236_v61  ;;  %v4318_v4 = vmax.f32 %v4069_v42, %v4222_v14  ;;  %v4331_v51 = vmax.f32 %v4082_v59, %v4235_v58  ;;  %5924 = vmatpush3.msra.mxu1 %v4804_v23  ;;  %v6288_v42 = vunpack.i.h.bf16 %v10404_v9  ;;  %v4853_v59 = vld [vmem:[%s10903_s5 + $0x7e0] sm:$0xff]  ;;  %v4800_v58 = vld [vmem:[%s10903_s5 + $0x638] sm:$0xff]  ;;  %v4815_v23 = vld [vmem:[%s10903_s5 + $0x6b0] sm:$0xff] }
 0x54a   : > { %v4482_v27 = vsel %vm1006_vm0, %v6313_v26, %v6297_v43  ;;  %v4468_v10 = vsel %vm1006_vm0, %v6283_v41, %v6312_v19  ;;  %v4481_v62 = vsel %vm1006_vm0, %v6252_v0, %v6313_v26  ;;  %5925 = vmatprep.subr.mxu1 %v4819_v37  ;;  %v4855_v0 = vld [vmem:[%s10903_s5 + $0x7f0] sm:$0xff]  ;;  %v4817_v41 = vld [vmem:[%s10903_s5 + $0x6c0] sm:$0xff]  ;;  %v6293_v36 = vunpack.i.h.bf16 %v10422_v16  ;;  %v4852_v14 = vld [vmem:[%s10903_s5 + $0x7d8] sm:$0xff] }
 0x54b   : > { %v10515_v3 = vpop.permute.xlu1 %6315  ;;  %v4578_v39 = vmax.f32 %v4332_v47, %v4482_v27  ;;  %v4564_v24 = vmax.f32 %v4318_v4, %v4468_v10  ;;  %v4577_v45 = vmax.f32 %v4331_v51, %v4481_v62  ;;  %5926 = vmatpush3.msra.mxu1 %v4803_v28  ;;  %v3990_v26 = vsel %vm442_vm8, %v6287_v11, %v6288_v42  ;;  %v4836_v47 = vld [vmem:[%s10903_s5 + $0x758] sm:$0xff]  ;;  %v4799_v4 = vld [vmem:[%s10903_s5 + $0x630] sm:$0xff]  ;;  %v4814_v11 = vld [vmem:[%s10903_s5 + $0x6a8] sm:$0xff] }
 0x54c   : > { %5927 = vmatprep.subr.mxu1 %v4818_v2  ;;  %v6298_v37 = vunpack.i.h.bf16 %v10424_v31  ;;  %v10580_v51 = vpop.permute.xlu0 %6340  ;;  %v4851_v9 = vld [vmem:[%s10903_s5 + $0x7d0] sm:$0xff]  ;;  %v10593_v28 = vsel %vm828_vm2, %v6292_v25, %v6293_v36  ;;  %v4798_v10 = vld [vmem:[%s10903_s5 + $0x628] sm:$0xff]  ;;  %v11083_v62 = vld [vmem:[#allocation6_spill] sm:$0xff]  ;;  %v6317_v2 = vunpack.i.l.bf16 %v10515_v3 }
 0x54d   : > { %5259 = vmatprep.mubr.f32.mxu1 %v4578_v39  ;;  %5334 = vmatprep.mubr.f32.mxu0 %v4564_v24  ;;  %v4835_v27 = vld [vmem:[%s10903_s5 + $0x750] sm:$0xff]  ;;  %v11084_v34 = vmax.f32 %v11083_v62, 0.0  ;;  %v6338_v24 = vunpack.i.h.bf16 %v10535_v63 }
 0x54e   : > { %5260 = vmatmul.mubr.f32.gmra.mxu1 %v4577_v45  ;;  %5335 = vmatmul.mubr.f32.vlgmr.msra.gmra.mxu0 %v4563_v18  ;;  %v6337_v18 = vunpack.i.l.bf16 %v10535_v63  ;;  %v4850_v45 = vld [vmem:[%s10903_s5 + $0x7c8] sm:$0xff]  ;;  %v4795_v16 = vld [vmem:[%s10903_s5 + $0x610] sm:$0xff] }
 0x54f   : > { %v10537_v33 = vpop.permute.xlu1 %6320  ;;  %5957 = vmatpush3.msra.mxu0 %v4840_v44  ;;  %5928 = vmatpush3.msra.mxu1 %v4802_v46  ;;  %v10603_v39 = vmax.f32 %v11084_v34, %v3990_v26  ;;  %v4813_v44 = vld [vmem:[%s10903_s5 + $0x6a0] sm:$0xff]  ;;  %v4848_v34 = vld [vmem:[%s10903_s5 + $0x7b8] sm:$0xff] }
 0x550   : > { %5958 = vmatprep.subr.mxu0 %v4855_v0  ;;  %5929 = vmatprep.subr.mxu1 %v4817_v41  ;;  %v6322_v0 = vunpack.i.l.bf16 %v10537_v33  ;;  %v4834_v41 = vld [vmem:[%s10903_s5 + $0x748] sm:$0xff] }
 0x551   : > { %5959 = vmatpush3.msra.mxu0 %v4839_v21  ;;  %5930 = vmatpush3.msra.mxu1 %v4801_v6  ;;  %v6342_v6 = vunpack.i.l.bf16 %v10580_v51 }
 0x552   : > { %5960 = vmatprep.subr.mxu0 %v4854_v17  ;;  %5931 = vmatprep.subr.mxu1 %v4816_v12  ;;  %v4797_v17 = vld [vmem:[%s10903_s5 + $0x620] sm:$0xff]  ;;  %v4483_v12 = vsel %vm1006_vm0, %v6297_v43, %v6298_v37 }
 0x553   : > { %5961 = vmatpush3.msra.mxu0 %v4838_v48  ;;  %5932 = vmatpush3.msra.mxu1 %v4800_v58  ;;  %v6343_v48 = vunpack.i.h.bf16 %v10580_v51  ;;  %v4812_v58 = vld [vmem:[%s10903_s5 + $0x698] sm:$0xff]  ;;  %v11098_v51 = vld [vmem:[#allocation10_spill] sm:$0xff] }
 0x554   : > { %v10562_v61 = vpop.permute.xlu1 %6325  ;;  %5962 = vmatprep.subr.mxu0 %v4853_v59  ;;  %5933 = vmatprep.subr.mxu1 %v4815_v23  ;;  %v4333_v59 = vmax.f32 %v10603_v39, %v10593_v28  ;;  %v4811_v39 = vld [vmem:[%s10903_s5 + $0x690] sm:$0xff] }
 0x555   : > { %5963 = vmatpush3.msra.mxu0 %v4837_v15  ;;  %5934 = vmatpush3.msra.mxu1 %v4799_v4  ;;  %v4849_v15 = vld [vmem:[%s10903_s5 + $0x7c0] sm:$0xff]  ;;  %v10656_v4 = vpop.permute.xlu0 %6350 }
 0x556   : > { %5964 = vmatprep.subr.mxu0 %v4852_v14  ;;  %5935 = vmatprep.subr.mxu1 %v4814_v11  ;;  %v6327_v14 = vunpack.i.l.bf16 %v10562_v61 }
 0x557   : > { %5965 = vmatpush3.msra.mxu0 %v4836_v47  ;;  %5936 = vmatpush3.msra.mxu1 %v4798_v10  ;;  %v4833_v47 = vld [vmem:[%s10903_s5 + $0x740] sm:$0xff]  ;;  %v11089_v10 = vmax.f32 %v9627_v60, 0.0  ;;  %v4251_v60 = vsel %vm828_vm2, %v6267_v30, %v6338_v24  ;;  %v4810_v30 = vld [vmem:[%s10903_s5 + $0x688] sm:$0xff] }
 0x558   : > { %v10607_v25 = vpop.permute.xlu1 %6330  ;;  %5966 = vmatprep.subr.mxu0 %v4851_v9  ;;  %5937 = vmatprep.subr.mxu1 %v4813_v44  ;;  %v4252_v44 = vsel %vm828_vm2, %v6338_v24, %v6322_v0  ;;  %v4498_v24 = vsel %vm1006_vm0, %v6343_v48, %v6327_v14 }
 0x559   : > { %v6333_v46 = vunpack.i.h.bf16 %v10607_v25  ;;  %v6332_v21 = vunpack.i.l.bf16 %v10607_v25  ;;  %5967 = vmatpush3.msra.mxu0 %v4835_v27  ;;  %5938 = vmatpush3.msra.mxu1 %v4797_v17  ;;  %v10710_v31 = vpop.permute.xlu0 %6355 }
 0x55a   : > { %5968 = vmatprep.subr.mxu0 %v4850_v45  ;;  %v4238_v45 = vsel %vm828_vm2, %v6293_v36, %v6337_v18  ;;  %5939 = vmatprep.subr.mxu1 %v4812_v58  ;;  %v4497_v58 = vsel %vm1006_vm0, %v6277_v35, %v6343_v48  ;;  %v4846_v35 = vld [vmem:[%s10903_s5 + $0x7a8] sm:$0xff] }
 0x55b   : > { %v4003_v23 = vsel %vm442_vm8, %v6257_v7, %v6333_v46  ;;  %v3991_v43 = vsel %vm442_vm8, %v6288_v42, %v6332_v21  ;;  %v4004_v26 = vsel %vm442_vm8, %v6333_v46, %v6317_v2  ;;  %v11085_v7 = vld [vmem:[#allocation4_spill] sm:$0xff]  ;;  %v11087_v42 = vld [vmem:[#allocation7_spill] sm:$0xff]  ;;  %5969 = vmatpush3.msra.mxu0 %v4834_v41  ;;  %v4832_v46 = vld [vmem:[%s10903_s5 + $0x738] sm:$0xff]  ;;  %5940 = vmatpush3.msra.mxu1 %v4796_v55 }
 0x55c   : > { %v11086_v9 = vmax.f32 %v11085_v7, 0.0  ;;  %v11088_v28 = vmax.f32 %v11087_v42, 0.0  ;;  %v4099_v62 = vmax.f32 %v11089_v10, %v4004_v26  ;;  %5970 = vmatprep.subr.mxu0 %v4849_v15  ;;  %v4484_v15 = vsel %vm1006_vm0, %v6298_v37, %v6342_v6  ;;  %5941 = vmatprep.subr.mxu1 %v4811_v39  ;;  %v4831_v55 = vld [vmem:[%s10903_s5 + $0x730] sm:$0xff]  ;;  %v4809_v37 = vld [vmem:[%s10903_s5 + $0x680] sm:$0xff]  ;;  %v4830_v48 = vld [vmem:[%s10903_s5 + $0x728] sm:$0xff] }
 0x55d   : > { %5971 = vmatpush3.msra.mxu0 %v4833_v47  ;;  %5942 = vmatpush3.msra.mxu1 %v4795_v16  ;;  %v4579_v47 = vmax.f32 %v4333_v59, %v4483_v12  ;;  %v4793_v59 = vld [vmem:[%s10903_s5 + $0x600] sm:$0xff]  ;;  %v6352_v12 = vunpack.i.l.bf16 %v10656_v4  ;;  %v6357_v42 = vunpack.i.l.bf16 %v10710_v31  ;;  %v4844_v10 = vld [vmem:[%s10903_s5 + $0x798] sm:$0xff]  ;;  %v4827_v16 = vld [vmem:[%s10903_s5 + $0x710] sm:$0xff] }
 0x55e   : > { %v4098_v11 = vmax.f32 %v11086_v9, %v4003_v23  ;;  %v4085_v27 = vmax.f32 %v11088_v28, %v3991_v43  ;;  %v4348_v41 = vmax.f32 %v4099_v62, %v4252_v44  ;;  %5972 = vmatprep.subr.mxu0 %v4848_v34  ;;  %5943 = vmatprep.subr.mxu1 %v4810_v30  ;;  %v4845_v7 = vld [vmem:[%s10903_s5 + $0x7a0] sm:$0xff]  ;;  %v6318_v9 = vunpack.i.h.bf16 %v10515_v3  ;;  %v4828_v34 = vld [vmem:[%s10903_s5 + $0x718] sm:$0xff]  ;;  %v4842_v3 = vld [vmem:[%s10903_s5 + $0x788] sm:$0xff] }
 0x55f   : > { %5973 = vmatpush3.msra.mxu0 %v4832_v46  ;;  %5944 = vmatpush3.msra.mxu1 %v4794_v38  ;;  %v6323_v62 = vunpack.i.h.bf16 %v10537_v33  ;;  %v6328_v44 = vunpack.i.h.bf16 %v10562_v61 }
 0x560   : > { %v4334_v36 = vmax.f32 %v4085_v27, %v4238_v45  ;;  %v4347_v17 = vmax.f32 %v4098_v11, %v4251_v60  ;;  %v4594_v23 = vmax.f32 %v4348_v41, %v4498_v24  ;;  %5974 = vmatprep.subr.mxu0 %v4847_v49  ;;  %v4829_v11 = vld [vmem:[%s10903_s5 + $0x720] sm:$0xff]  ;;  %5945 = vmatprep.subr.mxu1 %v4809_v37  ;;  %v4843_v45 = vld [vmem:[%s10903_s5 + $0x790] sm:$0xff] }
 0x561   : > { %5975 = vmatpush3.msra.mxu0 %v4831_v55  ;;  %5946 = vmatpush3.msra.mxu1 %v4793_v59  ;;  %v4006_v39 = vsel %vm442_vm8, %v6318_v9, %v6352_v12  ;;  %v4005_v60 = vsel %vm442_vm8, %v6317_v2, %v6318_v9  ;;  %v4254_v41 = vsel %vm828_vm2, %v6323_v62, %v6357_v42  ;;  %v6353_v2 = vunpack.i.h.bf16 %v10656_v4 }
 0x562   : > { %v4580_v43 = vmax.f32 %v4334_v36, %v4484_v15  ;;  %v4593_v26 = vmax.f32 %v4347_v17, %v4497_v58  ;;  %5264 = vmatprep.mubr.f32.mxu1 %v4594_v23  ;;  %5976 = vmatprep.subr.mxu0 %v4846_v35  ;;  %v11090_v17 = vmax.f32 %v9642_v22, 0.0  ;;  %v4253_v30 = vsel %vm828_vm2, %v6322_v0, %v6323_v62  ;;  %v4826_v15 = vld [vmem:[%s10903_s5 + $0x708] sm:$0xff]  ;;  %v4841_v22 = vld [vmem:[%s10903_s5 + $0x780] sm:$0xff] }
 0x563   : > { %5977 = vmatpush3.msra.mxu0 %v4830_v48  ;;  %v11091_v58 = vmax.f32 %v9679_v29, 0.0  ;;  %v4825_v29 = vld [vmem:[%s10903_s5 + $0x700] sm:$0xff]  ;;  %v11092_v59 = vmax.f32 %v9728_v32, 0.0 }
 0x564   : > { %5339 = vmatprep.mubr.f32.mxu0 %v4580_v43  ;;  %5265 = vmatmul.mubr.f32.gmra.mxu1 %v4593_v26  ;;  %v4101_v49 = vmax.f32 %v11090_v17, %v4006_v39  ;;  %v4499_v26 = vsel %vm1006_vm0, %v6327_v14, %v6328_v44  ;;  %v3977_v14 = vsel %vm442_vm8, %v6302_v53, %v6353_v2 }
 0x565   : > { %5340 = vmatmul.mubr.f32.gmra.mxu0 %v4579_v47  ;;  %v10733_v28 = vpop.permute.xlu0 %6360  ;;  %v10735_v27 = vpop.permute.xlu1 %6345  ;;  %5978 = vmatprep.subr.mxu0 %v4845_v7  ;;  %v4100_v23 = vmax.f32 %v11091_v58, %v4005_v60  ;;  %v6358_v47 = vunpack.i.h.bf16 %v10710_v31 }
 0x566   : > { %5979 = vmatpush3.msra.mxu0 %v4829_v11  ;;  %v6347_v46 = vunpack.i.l.bf16 %v10735_v27  ;;  %v4350_v0 = vmax.f32 %v4101_v49, %v4254_v41  ;;  %v6362_v37 = vunpack.i.l.bf16 %v10733_v28  ;;  %v11094_v49 = vmax.f32 %v9864_v54, 0.0 }
 0x567   : > { %5980 = vmatprep.subr.mxu0 %v4844_v10  ;;  %v4349_v35 = vmax.f32 %v4100_v23, %v4253_v30  ;;  %v4223_v10 = vsel %vm828_vm2, %v6307_v13, %v6358_v47 }
 0x568   : > { %5981 = vmatpush3.msra.mxu0 %v4828_v34  ;;  %v3978_v33 = vsel %vm442_vm8, %v6353_v2, %v6347_v46  ;;  %v11093_v34 = vmax.f32 %v9576_v57, 0.0  ;;  %v4224_v56 = vsel %vm828_vm2, %v6358_v47, %v6362_v37 }
 0x569   : > { %v3900_v36 = vpop.permute.xlu0 %3899  ;;  %v10770_v24 = vpop.permute.xlu1 %6365  ;;  %5982 = vmatprep.subr.mxu0 %v4843_v45  ;;  %v4071_v7 = vmax.f32 %v11092_v59, %v3978_v33  ;;  %v4595_v11 = vmax.f32 %v4349_v35, %v4499_v26  ;;  %v11095_v35 = vmax.f32 %v9624_v52, 0.0 }
 0x56a   : > { %v6367_v43 = vunpack.i.l.bf16 %v10770_v24  ;;  %5983 = vmatpush3.msra.mxu0 %v4827_v16  ;;  %v6368_v9 = vunpack.i.h.bf16 %v10770_v24  ;;  %v4070_v39 = vmax.f32 %v11093_v34, %v3977_v14  ;;  %v3979_v13 = vsel %vm442_vm8, %v6347_v46, %v3900_v36  ;;  %v11096_v14 = vld [vmem:[#allocation9_spill] sm:$0xff] }
 0x56b   : > { %5984 = vmatprep.subr.mxu0 %v4842_v3  ;;  %v4320_v60 = vmax.f32 %v4071_v7, %v4224_v56  ;;  %v4073_v17 = vmax.f32 %v9906_v5, %v3900_v36  ;;  %v4072_v30 = vmax.f32 %v11094_v49, %v3979_v13  ;;  %v11097_v25 = vmax.f32 %v11096_v14, 0.0 }
 0x56c   : > { %v4500_v38 = vsel %vm1006_vm0, %v6328_v44, %v6367_v43  ;;  %5985 = vmatpush3.msra.mxu0 %v4826_v15  ;;  %v4469_v32 = vsel %vm1006_vm0, %v6312_v19, %v6368_v9  ;;  %v4319_v44 = vmax.f32 %v4070_v39, %v4223_v10  ;;  %v6348_v19 = vunpack.i.h.bf16 %v10735_v27 }
 0x56d   : > { %v4140_v55 = vpop.permute.xlu0 %4139  ;;  %v10793_v48 = vpop.permute.xlu1 %6370  ;;  %v4596_v61 = vmax.f32 %v4350_v0, %v4500_v38  ;;  %5986 = vmatprep.subr.mxu0 %v4841_v22 }
 0x56e   : > { %5987 = vmatpush3.msra.mxu0 %v4825_v29  ;;  %v4565_v3 = vmax.f32 %v4319_v44, %v4469_v32  ;;  %v4225_v20 = vsel %vm828_vm2, %v6362_v37, %v4140_v55  ;;  %v6372_v58 = vunpack.i.l.bf16 %v10793_v48  ;;  %v3992_v27 = vsel %vm442_vm8, %v6332_v21, %v6348_v19 }
 0x56f   : > { %5344 = vmatprep.mubr.f32.mxu0 %v4596_v61  ;;  %v4321_v33 = vmax.f32 %v4072_v30, %v4225_v20  ;;  %v6363_v29 = vunpack.i.h.bf16 %v10733_v28  ;;  %v4086_v37 = vmax.f32 %v11095_v35, %v3992_v27 }
 0x570   : > { %5345 = vmatmul.mubr.f32.gmra.mxu0 %v4595_v11  ;;  %v3993_v47 = vsel %vm442_vm8, %v6348_v19, %v6372_v58 }
 0x571   : > { %v6376_v62 = vpop.permute.xlu0 %6375  ;;  %v4087_v59 = vmax.f32 %v11097_v25, %v3993_v47  ;;  %v4239_v28 = vsel %vm828_vm2, %v6337_v18, %v6363_v29 }
 0x572   : > { %v6377_v53 = vunpack.i.l.bf16 %v6376_v62  ;;  %v4142_v45 = vpop.permute.xlu1 %4141  ;;  %v6378_v38 = vunpack.i.h.bf16 %v6376_v62  ;;  %v4335_v62 = vmax.f32 %v4086_v37, %v4239_v28 }
 0x573   : > { %v4226_v57 = vsel %vm828_vm2, %v4140_v55, %v4142_v45 }
 0x574   : > { %v4470_v16 = vsel %vm1006_vm0, %v6368_v9, %v6377_v53  ;;  %v4322_v46 = vmax.f32 %v4073_v17, %v4226_v57  ;;  %v4485_v10 = vsel %vm1006_vm0, %v6342_v6, %v6378_v38 }
 0x575   : > { %v4386_v50 = vpop.permute.xlu0 %4385  ;;  %v4566_v41 = vmax.f32 %v4320_v60, %v4470_v16  ;;  %v4581_v45 = vmax.f32 %v4335_v62, %v4485_v10  ;;  %v11099_v60 = vmax.f32 %v11098_v51, 0.0  ;;  %v6373_v16 = vunpack.i.h.bf16 %v10793_v48 }
 0x576   : > { %v10812_v2 = vpop.permute.xlu1 %6380  ;;  %v4471_v23 = vsel %vm1006_vm0, %v6377_v53, %v4386_v50 }
 0x577   : > { %5414 = vmatprep.mubr.f32.mxu1 %v4566_v41  ;;  %v6382_v5 = vunpack.i.l.bf16 %v10812_v2  ;;  %v4567_v54 = vmax.f32 %v4321_v33, %v4471_v23  ;;  %v6383_v17 = vunpack.i.h.bf16 %v10812_v2  ;;  %v4007_v30 = vsel %vm442_vm8, %v6352_v12, %v6373_v16  ;;  %v11102_v33 = vld [vmem:[#allocation8_spill] sm:$0xff] }
 0x578   : > { %5415 = vmatmul.mubr.f32.vlgmr.msra.gmra.mxu1 %v4565_v3 }
 0x579   : > { %v3932_v15 = vpop.permute.xlu0 %3931  ;;  %v4240_v61 = vsel %vm828_vm2, %v6363_v29, %v6382_v5  ;;  %v4255_v2 = vsel %vm828_vm2, %v6357_v42, %v6383_v17 }
 0x57a   : > { %v4388_v22 = vpop.permute.xlu1 %4387  ;;  %v4336_v11 = vmax.f32 %v4087_v59, %v4240_v61  ;;  %v3994_v56 = vsel %vm442_vm8, %v6372_v58, %v3932_v15  ;;  %v4089_v63 = vmax.f32 %v10014_v40, %v3932_v15 }
 0x57b   : > { %v4472_v0 = vsel %vm1006_vm0, %v4386_v50, %v4388_v22  ;;  %v4088_v6 = vmax.f32 %v11099_v60, %v3994_v56 }
 0x57c   : > { %v4568_v36 = vmax.f32 %v4322_v46, %v4472_v0  ;;  %v11100_v46 = vld [vmem:[#allocation11_spill] sm:$0xff]  ;;  %v11103_v0 = vmax.f32 %v11102_v33, 0.0 }
 0x57d   : > { %v4174_v26 = vpop.permute.xlu0 %4173  ;;  %v11101_v23 = vmax.f32 %v11100_v46, 0.0 }
 0x57e   : > { %v3962_v55 = vpop.permute.xlu1 %3961  ;;  %5649 = vmatprep.mubr.msk.f32.mxu0 %vm4857_vm4, %v4568_v36  ;;  %v4241_v18 = vsel %vm828_vm2, %v6382_v5, %v4174_v26  ;;  %v4102_v5 = vmax.f32 %v11103_v0, %v4007_v30 }
 0x57f   : > { %5495 = vmatmul.mubr.f32.vlgmr.msra.gmra.mxu0 %v4567_v54  ;;  %v4337_v3 = vmax.f32 %v4088_v6, %v4241_v18  ;;  %v4008_v40 = vsel %vm442_vm8, %v6373_v16, %v3962_v55 }
 0x580   : > { %v4103_v22 = vmax.f32 %v11101_v23, %v4008_v40  ;;  %v4351_v42 = vmax.f32 %v4102_v5, %v4255_v2 }
 0x581   : > { %v6386_v21 = vpop.permute.xlu0 %6385 }
 0x582   : > { %v6387_v7 = vunpack.i.l.bf16 %v6386_v21  ;;  %v6388_v15 = vunpack.i.h.bf16 %v6386_v21 }
 0x584   : > { %v4486_v52 = vsel %vm1006_vm0, %v6378_v38, %v6387_v7  ;;  %v4501_v27 = vsel %vm1006_vm0, %v6367_v43, %v6388_v15 }
 0x585   : > { %v4176_v9 = vpop.permute.xlu1 %4175  ;;  %v4582_v39 = vmax.f32 %v4336_v11, %v4486_v52  ;;  %v4597_v37 = vmax.f32 %v4351_v42, %v4501_v27 }
 0x586   : > { %v4242_v32 = vsel %vm828_vm2, %v4174_v26, %v4176_v9  ;;  %v5742_v9 = vpop.f32.mrf.mxu0 }
 0x587   : > { %v4420_v34 = vpop.permute.xlu0 %4419  ;;  %5419 = vmatprep.mubr.f32.mxu1 %v4582_v39  ;;  %v4338_v50 = vmax.f32 %v4089_v63, %v4242_v32 }
 0x588   : > { %5420 = vmatmul.mubr.f32.gmra.mxu1 %v4581_v45  ;;  %v4487_v41 = vsel %vm1006_vm0, %v6387_v7, %v4420_v34  ;;  %v5743_v28 = vpop.f32.mrf.mxu0 }
 0x589   : > { %v4206_v53 = vpop.permute.xlu1 %4205  ;;  %v4583_v19 = vmax.f32 %v4337_v3, %v4487_v41 }
 0x58a   : > { %v4256_v58 = vsel %vm828_vm2, %v6383_v17, %v4206_v53 }
 0x58b   : > { %v3964_v44 = vpop.permute.xlu0 %3963  ;;  %v4352_v4 = vmax.f32 %v4103_v22, %v4256_v58 }
 0x58c   : > { %v4009_v12 = vsel %vm442_vm8, %v3962_v55, %v3964_v44  ;;  %v4105_v29 = vmax.f32 %v10125_v8, %v3964_v44  ;;  %v5701_v8 = vpop.f32.mrf.mxu1 }
 0x58d   : > { %v4104_v35 = vmax.f32 %v10024_v1, %v4009_v12 }
 0x58e   : > { %v5702_v21 = vpop.f32.mrf.mxu1 }
 0x58f   : > { %v4422_v13 = vpop.permute.xlu1 %4421  ;;  %v5703_v30 = vadd.f32 %v5702_v21, %v5701_v8 }
 0x590   : > { %v4488_v57 = vsel %vm1006_vm0, %v4420_v34, %v4422_v13  ;;  %v5704_v7 = vpop.f32.mrf.mxu1 }
 0x591   : > { %v4584_v20 = vmax.f32 %v4338_v50, %v4488_v57  ;;  %v4210_v49 = vpop.permute.xlu0 %4209 }
 0x592   : > { %v5705_v1 = vpop.f32.mrf.mxu1 }
 0x593   : > { %v4208_v48 = vpop.permute.xlu1 %4207  ;;  %5650 = vmatprep.mubr.msk.f32.mxu0 %vm4857_vm4, %v4584_v20 }
 0x594   : > { %5500 = vmatmul.mubr.f32.gmra.mxu0 %v4583_v19  ;;  %v4258_v54 = vsel %vm828_vm2, %v4208_v48, %v4210_v49  ;;  %v4257_v47 = vsel %vm828_vm2, %v4206_v53, %v4208_v48  ;;  %v10877_v11 = vpop.f32.mrf.mxu1  ;;  %v5744_v49 = vadd.f32 %v5743_v28, %v5742_v9 }
 0x595   : > { %v4454_v26 = vpop.permute.xlu0 %4453  ;;  %v4354_v55 = vmax.f32 %v4105_v29, %v4258_v54  ;;  %v4353_v43 = vmax.f32 %v4104_v35, %v4257_v47 }
 0x596   : > { %v10879_v52 = vpop.f32.mrf.mxu1  ;;  %v5017_v2 = vadd.f32 %v5744_v49, %v5703_v30 }
 0x597   : > { %v4452_v36 = vpop.permute.xlu1 %4451 }
 0x598   : > { %v4502_v31 = vsel %vm1006_vm0, %v6388_v15, %v4452_v36  ;;  %v4503_v61 = vsel %vm1006_vm0, %v4452_v36, %v4454_v26 }
 0x599   : > { %v4598_v38 = vmax.f32 %v4352_v4, %v4502_v31  ;;  %v4599_v59 = vmax.f32 %v4353_v43, %v4503_v61 }
 0x59b   : > { %v4456_v24 = vpop.permute.xlu1 %4455  ;;  %5424 = vmatprep.mubr.f32.mxu1 %v4598_v38  ;;  %v5745_v10 = vpop.f32.mrf.mxu0 }
 0x59c   : > { %v4504_v14 = vsel %vm1006_vm0, %v4454_v26, %v4456_v24  ;;  %5425 = vmatmul.mubr.f32.gmra.mxu1 %v4597_v37  ;;  %v5706_v37 = vadd.f32 %v5705_v1, %v5704_v7  ;;  %v5709_v7 = vadd.f32 %v10879_v52, %v10877_v11 }
 0x59d   : > { %v4600_v25 = vmax.f32 %v4354_v55, %v4504_v14  ;;  %v5746_v62 = vpop.f32.mrf.mxu0 }
 0x59e   : > { %v5747_v38 = vadd.f32 %v5746_v62, %v5745_v10 }
 0x59f   : > { %5651 = vmatprep.mubr.msk.f32.mxu0 %vm4857_vm4, %v4600_v25 }
 0x5a0   : > { %5505 = vmatmul.mubr.f32.gmra.mxu0 %v4599_v59  ;;  %v5022_v61 = vadd.f32 %v5747_v38, %v5706_v37 }
 0x5bf   : > { %v5748_v39 = vpop.f32.mrf.mxu0 }
 0x5c1   : > { %v5749_v53 = vpop.f32.mrf.mxu0 }
 0x5c3   : > { %v5783_v34 = vpop.f32.mrf.mxu1 }
 0x5c5   : > { %v5784_v56 = vpop.f32.mrf.mxu1 }
 0x5c6   : > { %v5785_v15 = vadd.f32 %v5784_v56, %v5783_v34  ;;  %v5750_v56 = vadd.f32 %v5749_v53, %v5748_v39 }
 0x5c8   : > { %v5097_v33 = vadd.f32 %v5785_v15, %v5017_v2 }
 0x5d4   : > { %v5786_v45 = vpop.f32.mrf.mxu1  ;;  %v5824_v32 = vpop.f32.mrf.mxu0 }
 0x5d6   : > { %v5787_v63 = vpop.f32.mrf.mxu1  ;;  %v5825_v18 = vpop.f32.mrf.mxu0 }
 0x5d7   : > { %v5826_v46 = vadd.f32 %v5825_v18, %v5824_v32  ;;  %v5788_v55 = vadd.f32 %v5787_v63, %v5786_v45  ;;  %v5027_v63 = vadd.f32 %v5750_v56, %v5709_v7 }
 0x5d9   : > { %v5177_v4 = vadd.f32 %v5826_v46, %v5097_v33  ;;  %v5102_v14 = vadd.f32 %v5788_v55, %v5022_v61 }
 0x5e1   : > { %v5789_v51 = vpop.f32.mrf.mxu1 }
 0x5e2   : > { %v5827_v60 = vpop.f32.mrf.mxu0 }
 0x5e3   : > { %v5790_v6 = vpop.f32.mrf.mxu1 }
 0x5e4   : > { %v5828_v44 = vpop.f32.mrf.mxu0  ;;  %v5791_v1 = vadd.f32 %v5790_v6, %v5789_v51 }
 0x5e5   : > { %v5829_v24 = vadd.f32 %v5828_v44, %v5827_v60 }
 0x5e6   : > { %v5830_v50 = vpop.f32.mrf.mxu0  ;;  %v5107_v44 = vadd.f32 %v5791_v1, %v5027_v63 }
 0x5e7   : > { %v5182_v8 = vadd.f32 %v5829_v24, %v5102_v14 }
 0x5e8   : > { %v5831_v13 = vpop.f32.mrf.mxu0 }
 0x5e9   : > { %v5832_v18 = vadd.f32 %v5831_v13, %v5830_v50 }
 0x600   : > { %v5865_v16 = vpop.f32.mrf.mxu1 }
 0x602   : > { %v5866_v41 = vpop.f32.mrf.mxu1 }
 0x603   : > { %v5867_v0 = vadd.f32 %v5866_v41, %v5865_v16 }
 0x605   : > { %v5257_v27 = vadd.f32 %v5867_v0, %v5177_v4 }
 0x60e   : > { %v5868_v3 = vpop.f32.mrf.mxu1  ;;  %v5906_v57 = vpop.f32.mrf.mxu0 }
 0x610   : > { %v5869_v17 = vpop.f32.mrf.mxu1  ;;  %v5907_v20 = vpop.f32.mrf.mxu0 }
 0x611   : > { %v5908_v12 = vadd.f32 %v5907_v20, %v5906_v57  ;;  %v5870_v25 = vadd.f32 %v5869_v17, %v5868_v3  ;;  %v5187_v3 = vadd.f32 %v5832_v18, %v5107_v44 }
 0x613   : > { %v5337_v31 = vadd.f32 %v5908_v12, %v5257_v27  ;;  %v5262_v9 = vadd.f32 %v5870_v25, %v5182_v8 }
 0x624   : > { %v5871_v40 = vpop.f32.mrf.mxu1 }
 0x625   : > { %v5909_v19 = vpop.f32.mrf.mxu0 }
 0x626   : > { %v5872_v48 = vpop.f32.mrf.mxu1 }
 0x627   : > { %v5910_v58 = vpop.f32.mrf.mxu0  ;;  %v5873_v16 = vadd.f32 %v5872_v48, %v5871_v40 }
 0x628   : > { %v5911_v21 = vadd.f32 %v5910_v58, %v5909_v19 }
 0x629   : > { %v5267_v53 = vadd.f32 %v5873_v16, %v5187_v3 }
 0x62a   : > { %v5342_v32 = vadd.f32 %v5911_v21, %v5262_v9 }
 0x630   : > { %v5912_v22 = vpop.f32.mrf.mxu0 }
 0x632   : > { %v5913_v36 = vpop.f32.mrf.mxu0 }
 0x633   : > { %v5914_v57 = vadd.f32 %v5913_v36, %v5912_v22 }
 0x635   : > { %v5347_v19 = vadd.f32 %v5914_v57, %v5267_v53 }
 0x638   : > { %v5947_v23 = vpop.f32.mrf.mxu1 }
 0x63a   : > { %v5948_v5 = vpop.f32.mrf.mxu1 }
 0x63b   : > { %v5949_v54 = vadd.f32 %v5948_v5, %v5947_v23 }
 0x63d   : > { %v5417_v29 = vadd.f32 %v5949_v54, %v5337_v31 }
 0x63f   : > { %v5988_v26 = vpop.f32.mrf.mxu0 }
 0x641   : > { %v5989_v42 = vpop.f32.mrf.mxu0 }
 0x642   : > { %v5990_v47 = vadd.f32 %v5989_v42, %v5988_v26 }
 0x644   : > { %v5497_v35 = vadd.f32 %v5990_v47, %v5417_v29 }
 0x646   : > { %5510 = vst.msk [vmem:[%s10885_s29] sm:$0xff] %vm4857_vm4, %v5497_v35 }
 0x648   : > { %v5950_v43 = vpop.f32.mrf.mxu1 }
 0x64a   : > { %v5951_v59 = vpop.f32.mrf.mxu1 }
 0x64b   : > { %v5952_v28 = vadd.f32 %v5951_v59, %v5950_v43 }
 0x64d   : > { %v5422_v62 = vadd.f32 %v5952_v28, %v5342_v32 }
 0x654   : > { %v5991_v34 = vpop.f32.mrf.mxu0 }
 0x656   : > { %v5992_v10 = vpop.f32.mrf.mxu0 }
 0x657   : > { %v5993_v45 = vadd.f32 %v5992_v10, %v5991_v34 }
 0x659   : > { %v5502_v60 = vadd.f32 %v5993_v45, %v5422_v62 }
 0x65b   : > { %5511 = vst.msk [vmem:[%s10885_s29 + $0x8] sm:$0xff] %vm4857_vm4, %v5502_v60 }
 0x65c   : > { %v5953_v41 = vpop.f32.mrf.mxu1 }
 0x65e   : > { %v5954_v39 = vpop.f32.mrf.mxu1 }
 0x65f   : > { %v5955_v17 = vadd.f32 %v5954_v39, %v5953_v41 }
 0x660   : > { %v5994_v20 = vpop.f32.mrf.mxu0 }
 0x661   : > { %v5427_v52 = vadd.f32 %v5955_v17, %v5347_v19 }
 0x662   : > { %v5995_v11 = vpop.f32.mrf.mxu0 }
 0x663   : > { %v5996_v51 = vadd.f32 %v5995_v11, %v5994_v20 }
 0x665   : > { %v5507_v6 = vadd.f32 %v5996_v51, %v5427_v52 }
 0x667   : > { %5512 = vst.msk [vmem:[%s10885_s29 + $0x10] sm:$0xff] %vm4857_vm4, %v5507_v6 }
 0x668 PF: > { %s16_s21 = sadd.s32 1, %s6426_s21  }
 0x669   : > { %p13_p4 = scmp.ge.s32.totalorder %s16_s21, 8  }
 0x66b   :  { %15 = sbr.rel (!%p13_p4) target bundleno = 1 (0x1), region = 74 }

</bundles_post_ra>
